<compile_context>
chip_gen: v7x
topology: tpu7x:2x2x1
jax: 0.10.0
libtpu: 0.0.40
codegen_flags: <defaults>
</compile_context>

<pallas_src>
import functools

import jax
import jax.numpy as jnp
from jax import lax
from jax.experimental import pallas as pl
from jax.experimental.pallas import tpu as pltpu

# ---------------- model / env sizes ----------------
D = 128      # state feature dim (lane axis)
H = 128      # MLP hidden dim
A = 8        # number of discrete actions
T = 4        # fixed trajectory length (replaces the data-dependent while loop)
B = 512      # total batch of trajectories
BM = 128     # trajectories per grid block (MXU sublane tile)


def _tb_block_kernel(s_ref, wcat_ref, b1f_ref, w2f_ref, b2f_ref,
                     w1b_ref, b1b_ref, w2b_ref, b2b_ref,
                     emb_ref, wr_ref, logz_ref, o_ref, *, T, H, A):
    """Per-block TB residual: writes sum_b (sum_t(logPf-logPb) + logZ - logR)^2."""
    s = s_ref[...].astype(jnp.float32)                       # [BM, D]
    bm = s.shape[0]

    # ---- hoist all weight/bias loads out of the unrolled T loop ----
    wcat = wcat_ref[...]                                     # bf16 [D, H+D]  (= [w1f | wenv])
    w2f = w2f_ref[...]                                       # bf16 [H, A]
    w1b = w1b_ref[...]                                       # bf16 [D, H]
    w2b = w2b_ref[...]                                       # bf16 [H, A]
    emb = emb_ref[...]                                       # bf16 [A, D]
    wr = wr_ref[...]                                         # bf16 [D, 1]
    b1f = b1f_ref[...]                                       # f32  [1, H]
    b2f = b2f_ref[...]                                       # f32  [1, A]
    b1b = b1b_ref[...]                                       # f32  [1, H]
    b2b = b2b_ref[...]                                       # f32  [1, A]
    logz = logz_ref[...]                                     # f32  [1, 1]

    col = lax.broadcasted_iota(jnp.int32, (bm, A), 1)        # action-index lanes
    acc = jnp.zeros((bm, 1), jnp.float32)                    # TB accumulator

    for _ in range(T):  # static unroll; mask==True every step (fixed length)
        s_bf = s.astype(jnp.bfloat16)

        # fused forward-policy-hidden + env-transition matmul (shared input s)
        fused = jnp.dot(s_bf, wcat, preferred_element_type=jnp.float32)   # [BM, H+D]
        h = jnp.maximum(fused[:, :H] + b1f, 0.0)                          # [BM, H]
        env_pre = fused[:, H:]                                            # [BM, D]

        # ---- forward policy logits + log-softmax stats ----
        logits_f = jnp.dot(h.astype(jnp.bfloat16), w2f,
                           preferred_element_type=jnp.float32) + b2f      # [BM, A]
        max_f = jnp.max(logits_f, axis=-1, keepdims=True)
        lse_f = max_f + jnp.log(jnp.sum(jnp.exp(logits_f - max_f),
                                        axis=-1, keepdims=True))
        flp = max_f - lse_f                                               # log Pf(argmax)

        # first-max one-hot via iota + lane min-reduce (no serialized cumsum)
        idx = jnp.min(jnp.where(logits_f >= max_f, col, A),
                      axis=-1, keepdims=True)
        onehot = (col == idx).astype(jnp.float32)                         # [BM, A]

        # ---- apply action: deterministic state transition ----
        s = jnp.tanh(env_pre + jnp.dot(onehot.astype(jnp.bfloat16), emb,
                                       preferred_element_type=jnp.float32))

        # ---- backward policy: log Pb(taken action | new state) ----
        hb = jnp.maximum(jnp.dot(s.astype(jnp.bfloat16), w1b,
                                 preferred_element_type=jnp.float32) + b1b, 0.0)
        logits_b = jnp.dot(hb.astype(jnp.bfloat16), w2b,
                           preferred_element_type=jnp.float32) + b2b
        max_b = jnp.max(logits_b, axis=-1, keepdims=True)
        lse_b = max_b + jnp.log(jnp.sum(jnp.exp(logits_b - max_b),
                                        axis=-1, keepdims=True))
        blp = jnp.sum(onehot * (logits_b - lse_b), axis=-1, keepdims=True)

        acc = acc + (flp - blp)

    # ---- terminal log-reward and TB residual ----
    log_reward = jnp.dot(s.astype(jnp.bfloat16), wr,
                         preferred_element_type=jnp.float32)              # [BM, 1]
    diff = acc + logz - log_reward                                        # [BM, 1]
    block_sum = jnp.sum(diff * diff)

    # write the partial sum into element [0,0] of an aligned (8,128) tile
    row = lax.broadcasted_iota(jnp.int32, (8, 128), 0)
    lane = lax.broadcasted_iota(jnp.int32, (8, 128), 1)
    o_ref[...] = jnp.where((row == 0) & (lane == 0), block_sum, 0.0)


def gflownet_tb_loss(state, params):
    (w1f, b1f, w2f, b2f, w1b, b1b, w2b, b2b, emb, wenv, wr, logz) = params
    assert state.shape[0] % BM == 0
    nb = state.shape[0] // BM

    # fuse the two matmuls that share input s and cast MXU operands to bf16
    wcat = jnp.concatenate([w1f, wenv], axis=1).astype(jnp.bfloat16)      # [D, H+D]
    kparams = (wcat, b1f, w2f.astype(jnp.bfloat16), b2f,
               w1b.astype(jnp.bfloat16), b1b, w2b.astype(jnp.bfloat16), b2b,
               emb.astype(jnp.bfloat16), wr.astype(jnp.bfloat16), logz)

    const = lambda i: (0, 0)   # weights stay resident in VMEM across grid steps

    flops = int(state.shape[0]) * (
        T * (2 * D * (H + D) + 2 * H * A + 2 * A * D + 2 * D * H + 2 * H * A) + 2 * D)
    trans = int(state.shape[0]) * T * (2 * A + 2 + D)
    bytes_acc = int(state.size) * 4 + sum(
        int(p.size) * p.dtype.itemsize for p in kparams) + nb * 8 * 128 * 4

    out = pl.pallas_call(
        functools.partial(_tb_block_kernel, T=T, H=H, A=A),
        out_shape=jax.ShapeDtypeStruct((8, nb * 128), jnp.float32),
        grid=(nb,),
        in_specs=[
            pl.BlockSpec((BM, D), lambda i: (i, 0)),   # state block (streams)
            pl.BlockSpec((D, H + D), const),           # wcat  = [w1f | wenv]
            pl.BlockSpec((1, H), const),               # b1f
            pl.BlockSpec((H, A), const),               # w2f
            pl.BlockSpec((1, A), const),               # b2f
            pl.BlockSpec((D, H), const),               # w1b
            pl.BlockSpec((1, H), const),               # b1b
            pl.BlockSpec((H, A), const),               # w2b
            pl.BlockSpec((1, A), const),               # b2b
            pl.BlockSpec((A, D), const),               # emb
            pl.BlockSpec((D, 1), const),               # wr
            pl.BlockSpec((1, 1), const),               # logZ scalar
        ],
        out_specs=pl.BlockSpec((8, 128), lambda i: (0, i)),
        compiler_params=pltpu.CompilerParams(
            dimension_semantics=("parallel",),
            vmem_limit_bytes=32 * 1024 * 1024),
        cost_estimate=pl.CostEstimate(flops=flops, transcendentals=trans,
                                      bytes_accessed=bytes_acc),
    )(state, *kparams)

    # global mean over the full batch (not one block)
    return jnp.sum(out) / state.shape[0]


def _ref_tb_loss(state, params):
    """Pure-JAX reference mirroring the kernel math (incl. bf16 MXU operands)."""
    (w1f, b1f, w2f, b2f, w1b, b1b, w2b, b2b, emb, wenv, wr, logz) = params
    wcat = jnp.concatenate([w1f, wenv], axis=1).astype(jnp.bfloat16)
    w2f_b = w2f.astype(jnp.bfloat16)
    w1b_b = w1b.astype(jnp.bfloat16)
    w2b_b = w2b.astype(jnp.bfloat16)
    emb_b = emb.astype(jnp.bfloat16)
    wr_b = wr.astype(jnp.bfloat16)

    s = state.astype(jnp.float32)
    acc = jnp.zeros((s.shape[0], 1), jnp.float32)
    col = jnp.arange(A, dtype=jnp.int32)[None, :]
    for _ in range(T):
        fused = jnp.dot(s.astype(jnp.bfloat16), wcat,
                        preferred_element_type=jnp.float32)
        h = jnp.maximum(fused[:, :H] + b1f, 0.0)
        env_pre = fused[:, H:]
        logits_f = jnp.dot(h.astype(jnp.bfloat16), w2f_b,
                           preferred_element_type=jnp.float32) + b2f
        max_f = jnp.max(logits_f, axis=-1, keepdims=True)
        lse_f = max_f + jnp.log(jnp.sum(jnp.exp(logits_f - max_f),
                                        axis=-1, keepdims=True))
        flp = max_f - lse_f
        idx = jnp.min(jnp.where(logits_f >= max_f, col, A),
                      axis=-1, keepdims=True)
        onehot = (col == idx).astype(jnp.float32)
        s = jnp.tanh(env_pre + jnp.dot(onehot.astype(jnp.bfloat16), emb_b,
                                       preferred_element_type=jnp.float32))
        hb = jnp.maximum(jnp.dot(s.astype(jnp.bfloat16), w1b_b,
                                 preferred_element_type=jnp.float32) + b1b, 0.0)
        logits_b = jnp.dot(hb.astype(jnp.bfloat16), w2b_b,
                           preferred_element_type=jnp.float32) + b2b
        max_b = jnp.max(logits_b, axis=-1, keepdims=True)
        lse_b = max_b + jnp.log(jnp.sum(jnp.exp(logits_b - max_b),
                                        axis=-1, keepdims=True))
        blp = jnp.sum(onehot * (logits_b - lse_b), axis=-1, keepdims=True)
        acc = acc + (flp - blp)
    log_reward = jnp.dot(s.astype(jnp.bfloat16), wr_b,
                         preferred_element_type=jnp.float32)
    diff = acc + logz[0, 0] - log_reward
    return jnp.mean(diff * diff)


def make_params(key):
    ks = jax.random.split(key, 12)
    scale = 0.1
    w1f = scale * jax.random.normal(ks[0], (D, H), jnp.float32)
    b1f = scale * jax.random.normal(ks[1], (1, H), jnp.float32)
    w2f = scale * jax.random.normal(ks[2], (H, A), jnp.float32)
    b2f = scale * jax.random.normal(ks[3], (1, A), jnp.float32)
    w1b = scale * jax.random.normal(ks[4], (D, H), jnp.float32)
    b1b = scale * jax.random.normal(ks[5], (1, H), jnp.float32)
    w2b = scale * jax.random.normal(ks[6], (H, A), jnp.float32)
    b2b = scale * jax.random.normal(ks[7], (1, A), jnp.float32)
    emb = scale * jax.random.normal(ks[8], (A, D), jnp.float32)
    wenv = scale * jax.random.normal(ks[9], (D, D), jnp.float32)
    wr = scale * jax.random.normal(ks[10], (D, 1), jnp.float32)
    # nn.Parameter(torch.randn((1,)).squeeze())  -> scalar log-partition param
    logz = jax.random.normal(ks[11], (1, 1), jnp.float32)
    return (w1f, b1f, w2f, b2f, w1b, b1b, w2b, b2b, emb, wenv, wr, logz)


if __name__ == "__main__":
    key = jax.random.PRNGKey(0)
    k_state, k_params = jax.random.split(key)
    state = jax.random.normal(k_state, (B, D), jnp.float32)   # batch_state features
    params = make_params(k_params)

    loss = jax.block_until_ready(gflownet_tb_loss(state, params))
    ref = jax.block_until_ready(_ref_tb_loss(state, params))

    assert jnp.isfinite(loss), "kernel produced non-finite loss"
    assert jnp.allclose(loss, ref, rtol=2e-2, atol=2e-2), (loss, ref)
    print("KERNEL_OK")
</pallas_src>

<mosaic_0001>
module attributes {stable_mosaic.version = 11 : i64} {
  func.func @_tb_block_kernel(%arg0: i32, %arg1: memref<128x128xf32, #tpu.memory_space<vmem>>, %arg2: memref<128x256xbf16, #tpu.memory_space<vmem>>, %arg3: memref<1x128xf32, #tpu.memory_space<vmem>>, %arg4: memref<128x8xbf16, #tpu.memory_space<vmem>>, %arg5: memref<1x8xf32, #tpu.memory_space<vmem>>, %arg6: memref<128x128xbf16, #tpu.memory_space<vmem>>, %arg7: memref<1x128xf32, #tpu.memory_space<vmem>>, %arg8: memref<128x8xbf16, #tpu.memory_space<vmem>>, %arg9: memref<1x8xf32, #tpu.memory_space<vmem>>, %arg10: memref<8x128xbf16, #tpu.memory_space<vmem>>, %arg11: memref<128x1xbf16, #tpu.memory_space<vmem>>, %arg12: memref<1x1xf32, #tpu.memory_space<vmem>>, %arg13: memref<8x128xf32, #tpu.memory_space<vmem>>) attributes {dimension_semantics = [#tpu.dimension_semantics<parallel>], iteration_bounds = array<i64: 4>, scalar_prefetch = 0 : i64, scratch_operands = 0 : i64, tpu.core_type = #tpu.core_type<tc>, window_params = [{transform_indices = @transform_0, window_bounds = array<i64: 128, 128>}, {pipeline_mode = #tpu.pipeline_mode<synchronous>, transform_indices = @transform_1, window_bounds = array<i64: 128, 256>}, {pipeline_mode = #tpu.pipeline_mode<synchronous>, transform_indices = @transform_2, window_bounds = array<i64: 1, 128>}, {pipeline_mode = #tpu.pipeline_mode<synchronous>, transform_indices = @transform_3, window_bounds = array<i64: 128, 8>}, {pipeline_mode = #tpu.pipeline_mode<synchronous>, transform_indices = @transform_4, window_bounds = array<i64: 1, 8>}, {pipeline_mode = #tpu.pipeline_mode<synchronous>, transform_indices = @transform_5, window_bounds = array<i64: 128, 128>}, {pipeline_mode = #tpu.pipeline_mode<synchronous>, transform_indices = @transform_6, window_bounds = array<i64: 1, 128>}, {pipeline_mode = #tpu.pipeline_mode<synchronous>, transform_indices = @transform_7, window_bounds = array<i64: 128, 8>}, {pipeline_mode = #tpu.pipeline_mode<synchronous>, transform_indices = @transform_8, window_bounds = array<i64: 1, 8>}, {pipeline_mode = #tpu.pipeline_mode<synchronous>, transform_indices = @transform_9, window_bounds = array<i64: 8, 128>}, {pipeline_mode = #tpu.pipeline_mode<synchronous>, transform_indices = @transform_10, window_bounds = array<i64: 128, 1>}, {pipeline_mode = #tpu.pipeline_mode<synchronous>, transform_indices = @transform_11, window_bounds = array<i64: 1, 1>}, {transform_indices = @transform_12, window_bounds = array<i64: 8, 128>}]} {
    %c0 = arith.constant 0 : index
    %c0_0 = arith.constant 0 : index
    %0 = vector.load %arg1[%c0, %c0_0] : memref<128x128xf32, #tpu.memory_space<vmem>>, vector<128x128xf32>
    %c0_1 = arith.constant 0 : index
    %c0_2 = arith.constant 0 : index
    %1 = vector.load %arg2[%c0_1, %c0_2] : memref<128x256xbf16, #tpu.memory_space<vmem>>, vector<128x256xbf16>
    %c0_3 = arith.constant 0 : index
    %c0_4 = arith.constant 0 : index
    %2 = vector.load %arg4[%c0_3, %c0_4] : memref<128x8xbf16, #tpu.memory_space<vmem>>, vector<128x8xbf16>
    %c0_5 = arith.constant 0 : index
    %c0_6 = arith.constant 0 : index
    %3 = vector.load %arg6[%c0_5, %c0_6] : memref<128x128xbf16, #tpu.memory_space<vmem>>, vector<128x128xbf16>
    %c0_7 = arith.constant 0 : index
    %c0_8 = arith.constant 0 : index
    %4 = vector.load %arg8[%c0_7, %c0_8] : memref<128x8xbf16, #tpu.memory_space<vmem>>, vector<128x8xbf16>
    %c0_9 = arith.constant 0 : index
    %c0_10 = arith.constant 0 : index
    %5 = vector.load %arg10[%c0_9, %c0_10] : memref<8x128xbf16, #tpu.memory_space<vmem>>, vector<8x128xbf16>
    %c0_11 = arith.constant 0 : index
    %c0_12 = arith.constant 0 : index
    %6 = vector.load %arg11[%c0_11, %c0_12] : memref<128x1xbf16, #tpu.memory_space<vmem>>, vector<128x1xbf16>
    %c0_13 = arith.constant 0 : index
    %c0_14 = arith.constant 0 : index
    %7 = vector.load %arg3[%c0_13, %c0_14] : memref<1x128xf32, #tpu.memory_space<vmem>>, vector<1x128xf32>
    %c0_15 = arith.constant 0 : index
    %c0_16 = arith.constant 0 : index
    %8 = vector.load %arg5[%c0_15, %c0_16] : memref<1x8xf32, #tpu.memory_space<vmem>>, vector<1x8xf32>
    %c0_17 = arith.constant 0 : index
    %c0_18 = arith.constant 0 : index
    %9 = vector.load %arg7[%c0_17, %c0_18] : memref<1x128xf32, #tpu.memory_space<vmem>>, vector<1x128xf32>
    %c0_19 = arith.constant 0 : index
    %c0_20 = arith.constant 0 : index
    %10 = vector.load %arg9[%c0_19, %c0_20] : memref<1x8xf32, #tpu.memory_space<vmem>>, vector<1x8xf32>
    %c0_21 = arith.constant 0 : index
    %c0_22 = arith.constant 0 : index
    %11 = vector.load %arg12[%c0_21, %c0_22] : memref<1x1xf32, #tpu.memory_space<vmem>>, vector<1x1xf32>
    %12 = tpu.iota {dimensions = array<i32: 1>} : vector<128x8xi32>
    %cst = arith.constant 0.000000e+00 : f32
    %13 = vector.broadcast %cst : f32 to vector<128x1xf32>
    %14 = arith.truncf %0 : vector<128x128xf32> to vector<128x128xbf16>
    %cst_23 = arith.constant dense<0.000000e+00> : vector<128x256xf32>
    %15 = tpu.matmul %14, %1, %cst_23 {dimension_numbers = #tpu.dot_dimension_numbers<[1], [0], [0], [1], [0, 0, 1, 1], [], []>} : vector<128x128xbf16>, vector<128x256xbf16>, vector<128x256xf32> -> vector<128x256xf32>
    %16 = vector.extract_strided_slice %15 {offsets = [0, 0], sizes = [128, 128], strides = [1, 1]} : vector<128x256xf32> to vector<128x128xf32>
    %17 = vector.broadcast %7 : vector<1x128xf32> to vector<128x128xf32>
    %18 = arith.addf %16, %17 : vector<128x128xf32>
    %cst_24 = arith.constant 0.000000e+00 : f32
    %19 = vector.broadcast %cst_24 : f32 to vector<128x128xf32>
    %20 = arith.maximumf %18, %19 : vector<128x128xf32>
    %21 = vector.extract_strided_slice %15 {offsets = [0, 128], sizes = [128, 128], strides = [1, 1]} : vector<128x256xf32> to vector<128x128xf32>
    %22 = arith.truncf %20 : vector<128x128xf32> to vector<128x128xbf16>
    %cst_25 = arith.constant dense<0.000000e+00> : vector<128x8xf32>
    %23 = tpu.matmul %22, %2, %cst_25 {dimension_numbers = #tpu.dot_dimension_numbers<[1], [0], [0], [1], [0, 0, 1, 1], [], []>} : vector<128x128xbf16>, vector<128x8xbf16>, vector<128x8xf32> -> vector<128x8xf32>
    %24 = vector.broadcast %8 : vector<1x8xf32> to vector<128x8xf32>
    %25 = arith.addf %23, %24 : vector<128x8xf32>
    %cst_26 = arith.constant dense<0xFF800000> : vector<128xf32>
    %26 = vector.multi_reduction <maximumf>, %25, %cst_26 [1] : vector<128x8xf32> to vector<128xf32>
    %27 = vector.shape_cast %26 : vector<128xf32> to vector<128x1xf32>
    %28 = vector.broadcast %27 : vector<128x1xf32> to vector<128x8xf32>
    %29 = arith.subf %25, %28 : vector<128x8xf32>
    %30 = math.exp %29 : vector<128x8xf32>
    %cst_27 = arith.constant dense<0.000000e+00> : vector<128xf32>
    %31 = vector.multi_reduction <add>, %30, %cst_27 [1] : vector<128x8xf32> to vector<128xf32>
    %32 = vector.shape_cast %31 : vector<128xf32> to vector<128x1xf32>
    %33 = math.log %32 : vector<128x1xf32>
    %34 = arith.addf %27, %33 : vector<128x1xf32>
    %35 = arith.subf %27, %34 : vector<128x1xf32>
    %36 = vector.broadcast %27 : vector<128x1xf32> to vector<128x8xf32>
    %37 = arith.cmpf oge, %25, %36 : vector<128x8xf32>
    %c8_i32 = arith.constant 8 : i32
    %38 = vector.broadcast %c8_i32 : i32 to vector<128x8xi32>
    %39 = arith.select %37, %12, %38 : vector<128x8xi1>, vector<128x8xi32>
    %cst_28 = arith.constant dense<2147483647> : vector<128xi32>
    %40 = vector.multi_reduction <minsi>, %39, %cst_28 [1] : vector<128x8xi32> to vector<128xi32>
    %41 = vector.shape_cast %40 : vector<128xi32> to vector<128x1xi32>
    %42 = vector.broadcast %41 : vector<128x1xi32> to vector<128x8xi32>
    %43 = arith.cmpi eq, %12, %42 : vector<128x8xi32>
    %44 = arith.extui %43 : vector<128x8xi1> to vector<128x8xi32>
    %45 = arith.sitofp %44 : vector<128x8xi32> to vector<128x8xf32>
    %46 = arith.truncf %45 : vector<128x8xf32> to vector<128x8xbf16>
    %cst_29 = arith.constant dense<0.000000e+00> : vector<128x128xf32>
    %47 = tpu.matmul %46, %5, %cst_29 {dimension_numbers = #tpu.dot_dimension_numbers<[1], [0], [0], [1], [0, 0, 1, 1], [], []>} : vector<128x8xbf16>, vector<8x128xbf16>, vector<128x128xf32> -> vector<128x128xf32>
    %48 = arith.addf %21, %47 : vector<128x128xf32>
    %49 = math.tanh %48 : vector<128x128xf32>
    %50 = arith.truncf %49 : vector<128x128xf32> to vector<128x128xbf16>
    %cst_30 = arith.constant dense<0.000000e+00> : vector<128x128xf32>
    %51 = tpu.matmul %50, %3, %cst_30 {dimension_numbers = #tpu.dot_dimension_numbers<[1], [0], [0], [1], [0, 0, 1, 1], [], []>} : vector<128x128xbf16>, vector<128x128xbf16>, vector<128x128xf32> -> vector<128x128xf32>
    %52 = vector.broadcast %9 : vector<1x128xf32> to vector<128x128xf32>
    %53 = arith.addf %51, %52 : vector<128x128xf32>
    %cst_31 = arith.constant 0.000000e+00 : f32
    %54 = vector.broadcast %cst_31 : f32 to vector<128x128xf32>
    %55 = arith.maximumf %53, %54 : vector<128x128xf32>
    %56 = arith.truncf %55 : vector<128x128xf32> to vector<128x128xbf16>
    %cst_32 = arith.constant dense<0.000000e+00> : vector<128x8xf32>
    %57 = tpu.matmul %56, %4, %cst_32 {dimension_numbers = #tpu.dot_dimension_numbers<[1], [0], [0], [1], [0, 0, 1, 1], [], []>} : vector<128x128xbf16>, vector<128x8xbf16>, vector<128x8xf32> -> vector<128x8xf32>
    %58 = vector.broadcast %10 : vector<1x8xf32> to vector<128x8xf32>
    %59 = arith.addf %57, %58 : vector<128x8xf32>
    %cst_33 = arith.constant dense<0xFF800000> : vector<128xf32>
    %60 = vector.multi_reduction <maximumf>, %59, %cst_33 [1] : vector<128x8xf32> to vector<128xf32>
    %61 = vector.shape_cast %60 : vector<128xf32> to vector<128x1xf32>
    %62 = vector.broadcast %61 : vector<128x1xf32> to vector<128x8xf32>
    %63 = arith.subf %59, %62 : vector<128x8xf32>
    %64 = math.exp %63 : vector<128x8xf32>
    %cst_34 = arith.constant dense<0.000000e+00> : vector<128xf32>
    %65 = vector.multi_reduction <add>, %64, %cst_34 [1] : vector<128x8xf32> to vector<128xf32>
    %66 = vector.shape_cast %65 : vector<128xf32> to vector<128x1xf32>
    %67 = math.log %66 : vector<128x1xf32>
    %68 = arith.addf %61, %67 : vector<128x1xf32>
    %69 = vector.broadcast %68 : vector<128x1xf32> to vector<128x8xf32>
    %70 = arith.subf %59, %69 : vector<128x8xf32>
    %71 = arith.mulf %45, %70 : vector<128x8xf32>
    %cst_35 = arith.constant dense<0.000000e+00> : vector<128xf32>
    %72 = vector.multi_reduction <add>, %71, %cst_35 [1] : vector<128x8xf32> to vector<128xf32>
    %73 = vector.shape_cast %72 : vector<128xf32> to vector<128x1xf32>
    %74 = arith.subf %35, %73 : vector<128x1xf32>
    %75 = arith.addf %13, %74 : vector<128x1xf32>
    %76 = arith.truncf %49 : vector<128x128xf32> to vector<128x128xbf16>
    %cst_36 = arith.constant dense<0.000000e+00> : vector<128x256xf32>
    %77 = tpu.matmul %76, %1, %cst_36 {dimension_numbers = #tpu.dot_dimension_numbers<[1], [0], [0], [1], [0, 0, 1, 1], [], []>} : vector<128x128xbf16>, vector<128x256xbf16>, vector<128x256xf32> -> vector<128x256xf32>
    %78 = vector.extract_strided_slice %77 {offsets = [0, 0], sizes = [128, 128], strides = [1, 1]} : vector<128x256xf32> to vector<128x128xf32>
    %79 = vector.broadcast %7 : vector<1x128xf32> to vector<128x128xf32>
    %80 = arith.addf %78, %79 : vector<128x128xf32>
    %cst_37 = arith.constant 0.000000e+00 : f32
    %81 = vector.broadcast %cst_37 : f32 to vector<128x128xf32>
    %82 = arith.maximumf %80, %81 : vector<128x128xf32>
    %83 = vector.extract_strided_slice %77 {offsets = [0, 128], sizes = [128, 128], strides = [1, 1]} : vector<128x256xf32> to vector<128x128xf32>
    %84 = arith.truncf %82 : vector<128x128xf32> to vector<128x128xbf16>
    %cst_38 = arith.constant dense<0.000000e+00> : vector<128x8xf32>
    %85 = tpu.matmul %84, %2, %cst_38 {dimension_numbers = #tpu.dot_dimension_numbers<[1], [0], [0], [1], [0, 0, 1, 1], [], []>} : vector<128x128xbf16>, vector<128x8xbf16>, vector<128x8xf32> -> vector<128x8xf32>
    %86 = vector.broadcast %8 : vector<1x8xf32> to vector<128x8xf32>
    %87 = arith.addf %85, %86 : vector<128x8xf32>
    %cst_39 = arith.constant dense<0xFF800000> : vector<128xf32>
    %88 = vector.multi_reduction <maximumf>, %87, %cst_39 [1] : vector<128x8xf32> to vector<128xf32>
    %89 = vector.shape_cast %88 : vector<128xf32> to vector<128x1xf32>
    %90 = vector.broadcast %89 : vector<128x1xf32> to vector<128x8xf32>
    %91 = arith.subf %87, %90 : vector<128x8xf32>
    %92 = math.exp %91 : vector<128x8xf32>
    %cst_40 = arith.constant dense<0.000000e+00> : vector<128xf32>
    %93 = vector.multi_reduction <add>, %92, %cst_40 [1] : vector<128x8xf32> to vector<128xf32>
    %94 = vector.shape_cast %93 : vector<128xf32> to vector<128x1xf32>
    %95 = math.log %94 : vector<128x1xf32>
    %96 = arith.addf %89, %95 : vector<128x1xf32>
    %97 = arith.subf %89, %96 : vector<128x1xf32>
    %98 = vector.broadcast %89 : vector<128x1xf32> to vector<128x8xf32>
    %99 = arith.cmpf oge, %87, %98 : vector<128x8xf32>
    %c8_i32_41 = arith.constant 8 : i32
    %100 = vector.broadcast %c8_i32_41 : i32 to vector<128x8xi32>
    %101 = arith.select %99, %12, %100 : vector<128x8xi1>, vector<128x8xi32>
    %cst_42 = arith.constant dense<2147483647> : vector<128xi32>
    %102 = vector.multi_reduction <minsi>, %101, %cst_42 [1] : vector<128x8xi32> to vector<128xi32>
    %103 = vector.shape_cast %102 : vector<128xi32> to vector<128x1xi32>
    %104 = vector.broadcast %103 : vector<128x1xi32> to vector<128x8xi32>
    %105 = arith.cmpi eq, %12, %104 : vector<128x8xi32>
    %106 = arith.extui %105 : vector<128x8xi1> to vector<128x8xi32>
    %107 = arith.sitofp %106 : vector<128x8xi32> to vector<128x8xf32>
    %108 = arith.truncf %107 : vector<128x8xf32> to vector<128x8xbf16>
    %cst_43 = arith.constant dense<0.000000e+00> : vector<128x128xf32>
    %109 = tpu.matmul %108, %5, %cst_43 {dimension_numbers = #tpu.dot_dimension_numbers<[1], [0], [0], [1], [0, 0, 1, 1], [], []>} : vector<128x8xbf16>, vector<8x128xbf16>, vector<128x128xf32> -> vector<128x128xf32>
    %110 = arith.addf %83, %109 : vector<128x128xf32>
    %111 = math.tanh %110 : vector<128x128xf32>
    %112 = arith.truncf %111 : vector<128x128xf32> to vector<128x128xbf16>
    %cst_44 = arith.constant dense<0.000000e+00> : vector<128x128xf32>
    %113 = tpu.matmul %112, %3, %cst_44 {dimension_numbers = #tpu.dot_dimension_numbers<[1], [0], [0], [1], [0, 0, 1, 1], [], []>} : vector<128x128xbf16>, vector<128x128xbf16>, vector<128x128xf32> -> vector<128x128xf32>
    %114 = vector.broadcast %9 : vector<1x128xf32> to vector<128x128xf32>
    %115 = arith.addf %113, %114 : vector<128x128xf32>
    %cst_45 = arith.constant 0.000000e+00 : f32
    %116 = vector.broadcast %cst_45 : f32 to vector<128x128xf32>
    %117 = arith.maximumf %115, %116 : vector<128x128xf32>
    %118 = arith.truncf %117 : vector<128x128xf32> to vector<128x128xbf16>
    %cst_46 = arith.constant dense<0.000000e+00> : vector<128x8xf32>
    %119 = tpu.matmul %118, %4, %cst_46 {dimension_numbers = #tpu.dot_dimension_numbers<[1], [0], [0], [1], [0, 0, 1, 1], [], []>} : vector<128x128xbf16>, vector<128x8xbf16>, vector<128x8xf32> -> vector<128x8xf32>
    %120 = vector.broadcast %10 : vector<1x8xf32> to vector<128x8xf32>
    %121 = arith.addf %119, %120 : vector<128x8xf32>
    %cst_47 = arith.constant dense<0xFF800000> : vector<128xf32>
    %122 = vector.multi_reduction <maximumf>, %121, %cst_47 [1] : vector<128x8xf32> to vector<128xf32>
    %123 = vector.shape_cast %122 : vector<128xf32> to vector<128x1xf32>
    %124 = vector.broadcast %123 : vector<128x1xf32> to vector<128x8xf32>
    %125 = arith.subf %121, %124 : vector<128x8xf32>
    %126 = math.exp %125 : vector<128x8xf32>
    %cst_48 = arith.constant dense<0.000000e+00> : vector<128xf32>
    %127 = vector.multi_reduction <add>, %126, %cst_48 [1] : vector<128x8xf32> to vector<128xf32>
    %128 = vector.shape_cast %127 : vector<128xf32> to vector<128x1xf32>
    %129 = math.log %128 : vector<128x1xf32>
    %130 = arith.addf %123, %129 : vector<128x1xf32>
    %131 = vector.broadcast %130 : vector<128x1xf32> to vector<128x8xf32>
    %132 = arith.subf %121, %131 : vector<128x8xf32>
    %133 = arith.mulf %107, %132 : vector<128x8xf32>
    %cst_49 = arith.constant dense<0.000000e+00> : vector<128xf32>
    %134 = vector.multi_reduction <add>, %133, %cst_49 [1] : vector<128x8xf32> to vector<128xf32>
    %135 = vector.shape_cast %134 : vector<128xf32> to vector<128x1xf32>
    %136 = arith.subf %97, %135 : vector<128x1xf32>
    %137 = arith.addf %75, %136 : vector<128x1xf32>
    %138 = arith.truncf %111 : vector<128x128xf32> to vector<128x128xbf16>
    %cst_50 = arith.constant dense<0.000000e+00> : vector<128x256xf32>
    %139 = tpu.matmul %138, %1, %cst_50 {dimension_numbers = #tpu.dot_dimension_numbers<[1], [0], [0], [1], [0, 0, 1, 1], [], []>} : vector<128x128xbf16>, vector<128x256xbf16>, vector<128x256xf32> -> vector<128x256xf32>
    %140 = vector.extract_strided_slice %139 {offsets = [0, 0], sizes = [128, 128], strides = [1, 1]} : vector<128x256xf32> to vector<128x128xf32>
    %141 = vector.broadcast %7 : vector<1x128xf32> to vector<128x128xf32>
    %142 = arith.addf %140, %141 : vector<128x128xf32>
    %cst_51 = arith.constant 0.000000e+00 : f32
    %143 = vector.broadcast %cst_51 : f32 to vector<128x128xf32>
    %144 = arith.maximumf %142, %143 : vector<128x128xf32>
    %145 = vector.extract_strided_slice %139 {offsets = [0, 128], sizes = [128, 128], strides = [1, 1]} : vector<128x256xf32> to vector<128x128xf32>
    %146 = arith.truncf %144 : vector<128x128xf32> to vector<128x128xbf16>
    %cst_52 = arith.constant dense<0.000000e+00> : vector<128x8xf32>
    %147 = tpu.matmul %146, %2, %cst_52 {dimension_numbers = #tpu.dot_dimension_numbers<[1], [0], [0], [1], [0, 0, 1, 1], [], []>} : vector<128x128xbf16>, vector<128x8xbf16>, vector<128x8xf32> -> vector<128x8xf32>
    %148 = vector.broadcast %8 : vector<1x8xf32> to vector<128x8xf32>
    %149 = arith.addf %147, %148 : vector<128x8xf32>
    %cst_53 = arith.constant dense<0xFF800000> : vector<128xf32>
    %150 = vector.multi_reduction <maximumf>, %149, %cst_53 [1] : vector<128x8xf32> to vector<128xf32>
    %151 = vector.shape_cast %150 : vector<128xf32> to vector<128x1xf32>
    %152 = vector.broadcast %151 : vector<128x1xf32> to vector<128x8xf32>
    %153 = arith.subf %149, %152 : vector<128x8xf32>
    %154 = math.exp %153 : vector<128x8xf32>
    %cst_54 = arith.constant dense<0.000000e+00> : vector<128xf32>
    %155 = vector.multi_reduction <add>, %154, %cst_54 [1] : vector<128x8xf32> to vector<128xf32>
    %156 = vector.shape_cast %155 : vector<128xf32> to vector<128x1xf32>
    %157 = math.log %156 : vector<128x1xf32>
    %158 = arith.addf %151, %157 : vector<128x1xf32>
    %159 = arith.subf %151, %158 : vector<128x1xf32>
    %160 = vector.broadcast %151 : vector<128x1xf32> to vector<128x8xf32>
    %161 = arith.cmpf oge, %149, %160 : vector<128x8xf32>
    %c8_i32_55 = arith.constant 8 : i32
    %162 = vector.broadcast %c8_i32_55 : i32 to vector<128x8xi32>
    %163 = arith.select %161, %12, %162 : vector<128x8xi1>, vector<128x8xi32>
    %cst_56 = arith.constant dense<2147483647> : vector<128xi32>
    %164 = vector.multi_reduction <minsi>, %163, %cst_56 [1] : vector<128x8xi32> to vector<128xi32>
    %165 = vector.shape_cast %164 : vector<128xi32> to vector<128x1xi32>
    %166 = vector.broadcast %165 : vector<128x1xi32> to vector<128x8xi32>
    %167 = arith.cmpi eq, %12, %166 : vector<128x8xi32>
    %168 = arith.extui %167 : vector<128x8xi1> to vector<128x8xi32>
    %169 = arith.sitofp %168 : vector<128x8xi32> to vector<128x8xf32>
    %170 = arith.truncf %169 : vector<128x8xf32> to vector<128x8xbf16>
    %cst_57 = arith.constant dense<0.000000e+00> : vector<128x128xf32>
    %171 = tpu.matmul %170, %5, %cst_57 {dimension_numbers = #tpu.dot_dimension_numbers<[1], [0], [0], [1], [0, 0, 1, 1], [], []>} : vector<128x8xbf16>, vector<8x128xbf16>, vector<128x128xf32> -> vector<128x128xf32>
    %172 = arith.addf %145, %171 : vector<128x128xf32>
    %173 = math.tanh %172 : vector<128x128xf32>
    %174 = arith.truncf %173 : vector<128x128xf32> to vector<128x128xbf16>
    %cst_58 = arith.constant dense<0.000000e+00> : vector<128x128xf32>
    %175 = tpu.matmul %174, %3, %cst_58 {dimension_numbers = #tpu.dot_dimension_numbers<[1], [0], [0], [1], [0, 0, 1, 1], [], []>} : vector<128x128xbf16>, vector<128x128xbf16>, vector<128x128xf32> -> vector<128x128xf32>
    %176 = vector.broadcast %9 : vector<1x128xf32> to vector<128x128xf32>
    %177 = arith.addf %175, %176 : vector<128x128xf32>
    %cst_59 = arith.constant 0.000000e+00 : f32
    %178 = vector.broadcast %cst_59 : f32 to vector<128x128xf32>
    %179 = arith.maximumf %177, %178 : vector<128x128xf32>
    %180 = arith.truncf %179 : vector<128x128xf32> to vector<128x128xbf16>
    %cst_60 = arith.constant dense<0.000000e+00> : vector<128x8xf32>
    %181 = tpu.matmul %180, %4, %cst_60 {dimension_numbers = #tpu.dot_dimension_numbers<[1], [0], [0], [1], [0, 0, 1, 1], [], []>} : vector<128x128xbf16>, vector<128x8xbf16>, vector<128x8xf32> -> vector<128x8xf32>
    %182 = vector.broadcast %10 : vector<1x8xf32> to vector<128x8xf32>
    %183 = arith.addf %181, %182 : vector<128x8xf32>
    %cst_61 = arith.constant dense<0xFF800000> : vector<128xf32>
    %184 = vector.multi_reduction <maximumf>, %183, %cst_61 [1] : vector<128x8xf32> to vector<128xf32>
    %185 = vector.shape_cast %184 : vector<128xf32> to vector<128x1xf32>
    %186 = vector.broadcast %185 : vector<128x1xf32> to vector<128x8xf32>
    %187 = arith.subf %183, %186 : vector<128x8xf32>
    %188 = math.exp %187 : vector<128x8xf32>
    %cst_62 = arith.constant dense<0.000000e+00> : vector<128xf32>
    %189 = vector.multi_reduction <add>, %188, %cst_62 [1] : vector<128x8xf32> to vector<128xf32>
    %190 = vector.shape_cast %189 : vector<128xf32> to vector<128x1xf32>
    %191 = math.log %190 : vector<128x1xf32>
    %192 = arith.addf %185, %191 : vector<128x1xf32>
    %193 = vector.broadcast %192 : vector<128x1xf32> to vector<128x8xf32>
    %194 = arith.subf %183, %193 : vector<128x8xf32>
    %195 = arith.mulf %169, %194 : vector<128x8xf32>
    %cst_63 = arith.constant dense<0.000000e+00> : vector<128xf32>
    %196 = vector.multi_reduction <add>, %195, %cst_63 [1] : vector<128x8xf32> to vector<128xf32>
    %197 = vector.shape_cast %196 : vector<128xf32> to vector<128x1xf32>
    %198 = arith.subf %159, %197 : vector<128x1xf32>
    %199 = arith.addf %137, %198 : vector<128x1xf32>
    %200 = arith.truncf %173 : vector<128x128xf32> to vector<128x128xbf16>
    %cst_64 = arith.constant dense<0.000000e+00> : vector<128x256xf32>
    %201 = tpu.matmul %200, %1, %cst_64 {dimension_numbers = #tpu.dot_dimension_numbers<[1], [0], [0], [1], [0, 0, 1, 1], [], []>} : vector<128x128xbf16>, vector<128x256xbf16>, vector<128x256xf32> -> vector<128x256xf32>
    %202 = vector.extract_strided_slice %201 {offsets = [0, 0], sizes = [128, 128], strides = [1, 1]} : vector<128x256xf32> to vector<128x128xf32>
    %203 = vector.broadcast %7 : vector<1x128xf32> to vector<128x128xf32>
    %204 = arith.addf %202, %203 : vector<128x128xf32>
    %cst_65 = arith.constant 0.000000e+00 : f32
    %205 = vector.broadcast %cst_65 : f32 to vector<128x128xf32>
    %206 = arith.maximumf %204, %205 : vector<128x128xf32>
    %207 = vector.extract_strided_slice %201 {offsets = [0, 128], sizes = [128, 128], strides = [1, 1]} : vector<128x256xf32> to vector<128x128xf32>
    %208 = arith.truncf %206 : vector<128x128xf32> to vector<128x128xbf16>
    %cst_66 = arith.constant dense<0.000000e+00> : vector<128x8xf32>
    %209 = tpu.matmul %208, %2, %cst_66 {dimension_numbers = #tpu.dot_dimension_numbers<[1], [0], [0], [1], [0, 0, 1, 1], [], []>} : vector<128x128xbf16>, vector<128x8xbf16>, vector<128x8xf32> -> vector<128x8xf32>
    %210 = vector.broadcast %8 : vector<1x8xf32> to vector<128x8xf32>
    %211 = arith.addf %209, %210 : vector<128x8xf32>
    %cst_67 = arith.constant dense<0xFF800000> : vector<128xf32>
    %212 = vector.multi_reduction <maximumf>, %211, %cst_67 [1] : vector<128x8xf32> to vector<128xf32>
    %213 = vector.shape_cast %212 : vector<128xf32> to vector<128x1xf32>
    %214 = vector.broadcast %213 : vector<128x1xf32> to vector<128x8xf32>
    %215 = arith.subf %211, %214 : vector<128x8xf32>
    %216 = math.exp %215 : vector<128x8xf32>
    %cst_68 = arith.constant dense<0.000000e+00> : vector<128xf32>
    %217 = vector.multi_reduction <add>, %216, %cst_68 [1] : vector<128x8xf32> to vector<128xf32>
    %218 = vector.shape_cast %217 : vector<128xf32> to vector<128x1xf32>
    %219 = math.log %218 : vector<128x1xf32>
    %220 = arith.addf %213, %219 : vector<128x1xf32>
    %221 = arith.subf %213, %220 : vector<128x1xf32>
    %222 = vector.broadcast %213 : vector<128x1xf32> to vector<128x8xf32>
    %223 = arith.cmpf oge, %211, %222 : vector<128x8xf32>
    %c8_i32_69 = arith.constant 8 : i32
    %224 = vector.broadcast %c8_i32_69 : i32 to vector<128x8xi32>
    %225 = arith.select %223, %12, %224 : vector<128x8xi1>, vector<128x8xi32>
    %cst_70 = arith.constant dense<2147483647> : vector<128xi32>
    %226 = vector.multi_reduction <minsi>, %225, %cst_70 [1] : vector<128x8xi32> to vector<128xi32>
    %227 = vector.shape_cast %226 : vector<128xi32> to vector<128x1xi32>
    %228 = vector.broadcast %227 : vector<128x1xi32> to vector<128x8xi32>
    %229 = arith.cmpi eq, %12, %228 : vector<128x8xi32>
    %230 = arith.extui %229 : vector<128x8xi1> to vector<128x8xi32>
    %231 = arith.sitofp %230 : vector<128x8xi32> to vector<128x8xf32>
    %232 = arith.truncf %231 : vector<128x8xf32> to vector<128x8xbf16>
    %cst_71 = arith.constant dense<0.000000e+00> : vector<128x128xf32>
    %233 = tpu.matmul %232, %5, %cst_71 {dimension_numbers = #tpu.dot_dimension_numbers<[1], [0], [0], [1], [0, 0, 1, 1], [], []>} : vector<128x8xbf16>, vector<8x128xbf16>, vector<128x128xf32> -> vector<128x128xf32>
    %234 = arith.addf %207, %233 : vector<128x128xf32>
    %235 = math.tanh %234 : vector<128x128xf32>
    %236 = arith.truncf %235 : vector<128x128xf32> to vector<128x128xbf16>
    %cst_72 = arith.constant dense<0.000000e+00> : vector<128x128xf32>
    %237 = tpu.matmul %236, %3, %cst_72 {dimension_numbers = #tpu.dot_dimension_numbers<[1], [0], [0], [1], [0, 0, 1, 1], [], []>} : vector<128x128xbf16>, vector<128x128xbf16>, vector<128x128xf32> -> vector<128x128xf32>
    %238 = vector.broadcast %9 : vector<1x128xf32> to vector<128x128xf32>
    %239 = arith.addf %237, %238 : vector<128x128xf32>
    %cst_73 = arith.constant 0.000000e+00 : f32
    %240 = vector.broadcast %cst_73 : f32 to vector<128x128xf32>
    %241 = arith.maximumf %239, %240 : vector<128x128xf32>
    %242 = arith.truncf %241 : vector<128x128xf32> to vector<128x128xbf16>
    %cst_74 = arith.constant dense<0.000000e+00> : vector<128x8xf32>
    %243 = tpu.matmul %242, %4, %cst_74 {dimension_numbers = #tpu.dot_dimension_numbers<[1], [0], [0], [1], [0, 0, 1, 1], [], []>} : vector<128x128xbf16>, vector<128x8xbf16>, vector<128x8xf32> -> vector<128x8xf32>
    %244 = vector.broadcast %10 : vector<1x8xf32> to vector<128x8xf32>
    %245 = arith.addf %243, %244 : vector<128x8xf32>
    %cst_75 = arith.constant dense<0xFF800000> : vector<128xf32>
    %246 = vector.multi_reduction <maximumf>, %245, %cst_75 [1] : vector<128x8xf32> to vector<128xf32>
    %247 = vector.shape_cast %246 : vector<128xf32> to vector<128x1xf32>
    %248 = vector.broadcast %247 : vector<128x1xf32> to vector<128x8xf32>
    %249 = arith.subf %245, %248 : vector<128x8xf32>
    %250 = math.exp %249 : vector<128x8xf32>
    %cst_76 = arith.constant dense<0.000000e+00> : vector<128xf32>
    %251 = vector.multi_reduction <add>, %250, %cst_76 [1] : vector<128x8xf32> to vector<128xf32>
    %252 = vector.shape_cast %251 : vector<128xf32> to vector<128x1xf32>
    %253 = math.log %252 : vector<128x1xf32>
    %254 = arith.addf %247, %253 : vector<128x1xf32>
    %255 = vector.broadcast %254 : vector<128x1xf32> to vector<128x8xf32>
    %256 = arith.subf %245, %255 : vector<128x8xf32>
    %257 = arith.mulf %231, %256 : vector<128x8xf32>
    %cst_77 = arith.constant dense<0.000000e+00> : vector<128xf32>
    %258 = vector.multi_reduction <add>, %257, %cst_77 [1] : vector<128x8xf32> to vector<128xf32>
    %259 = vector.shape_cast %258 : vector<128xf32> to vector<128x1xf32>
    %260 = arith.subf %221, %259 : vector<128x1xf32>
    %261 = arith.addf %199, %260 : vector<128x1xf32>
    %262 = arith.truncf %235 : vector<128x128xf32> to vector<128x128xbf16>
    %cst_78 = arith.constant dense<0.000000e+00> : vector<128x1xf32>
    %263 = tpu.matmul %262, %6, %cst_78 {dimension_numbers = #tpu.dot_dimension_numbers<[1], [0], [0], [1], [0, 0, 1, 1], [], []>} : vector<128x128xbf16>, vector<128x1xbf16>, vector<128x1xf32> -> vector<128x1xf32>
    %264 = vector.broadcast %11 : vector<1x1xf32> to vector<128x1xf32>
    %265 = arith.addf %261, %264 : vector<128x1xf32>
    %266 = arith.subf %265, %263 : vector<128x1xf32>
    %267 = arith.mulf %266, %266 : vector<128x1xf32>
    %268 = vector.shape_cast %267 : vector<128x1xf32> to vector<1x128x1xf32>
    %cst_79 = arith.constant dense<0.000000e+00> : vector<1xf32>
    %269 = vector.multi_reduction <add>, %268, %cst_79 [1, 2] : vector<1x128x1xf32> to vector<1xf32>
    %270 = vector.shape_cast %269 : vector<1xf32> to vector<1x1x1xf32>
    %271 = vector.extract %270[0, 0, 0] : f32 from vector<1x1x1xf32>
    %272 = tpu.iota {dimensions = array<i32: 0>} : vector<8x128xi32>
    %273 = tpu.iota {dimensions = array<i32: 1>} : vector<8x128xi32>
    %c0_i32 = arith.constant 0 : i32
    %274 = vector.broadcast %c0_i32 : i32 to vector<8x128xi32>
    %275 = arith.cmpi eq, %272, %274 : vector<8x128xi32>
    %c0_i32_80 = arith.constant 0 : i32
    %276 = vector.broadcast %c0_i32_80 : i32 to vector<8x128xi32>
    %277 = arith.cmpi eq, %273, %276 : vector<8x128xi32>
    %278 = arith.andi %275, %277 : vector<8x128xi1>
    %cst_81 = arith.constant 0.000000e+00 : f32
    %279 = vector.broadcast %271 : f32 to vector<8x128xf32>
    %280 = vector.broadcast %cst_81 : f32 to vector<8x128xf32>
    %281 = arith.select %278, %279, %280 : vector<8x128xi1>, vector<8x128xf32>
    %c0_82 = arith.constant 0 : index
    %c0_83 = arith.constant 0 : index
    %282 = vector.load %arg13[%c0_82, %c0_83] : memref<8x128xf32, #tpu.memory_space<vmem>>, vector<8x128xf32>
    tpu.vector_store %arg13[%c0_82, %c0_83], %281 {strides = array<i32>} : memref<8x128xf32, #tpu.memory_space<vmem>>, vector<8x128xf32>,
    return
  }
  func.func @transform_0(%arg0: i32) -> (i32, i32) {
    %c0_i32 = arith.constant 0 : i32
    %c0_i32_0 = arith.constant 0 : i32
    return %arg0, %c0_i32 : i32, i32
  }
  func.func @transform_1(%arg0: i32) -> (i32, i32) {
    %c0_i32 = arith.constant 0 : i32
    %c0_i32_0 = arith.constant 0 : i32
    %c0_i32_1 = arith.constant 0 : i32
    return %c0_i32, %c0_i32_0 : i32, i32
  }
  func.func @transform_2(%arg0: i32) -> (i32, i32) {
    %c0_i32 = arith.constant 0 : i32
    %c0_i32_0 = arith.constant 0 : i32
    %c0_i32_1 = arith.constant 0 : i32
    return %c0_i32, %c0_i32_0 : i32, i32
  }
  func.func @transform_3(%arg0: i32) -> (i32, i32) {
    %c0_i32 = arith.constant 0 : i32
    %c0_i32_0 = arith.constant 0 : i32
    %c0_i32_1 = arith.constant 0 : i32
    return %c0_i32, %c0_i32_0 : i32, i32
  }
  func.func @transform_4(%arg0: i32) -> (i32, i32) {
    %c0_i32 = arith.constant 0 : i32
    %c0_i32_0 = arith.constant 0 : i32
    %c0_i32_1 = arith.constant 0 : i32
    return %c0_i32, %c0_i32_0 : i32, i32
  }
  func.func @transform_5(%arg0: i32) -> (i32, i32) {
    %c0_i32 = arith.constant 0 : i32
    %c0_i32_0 = arith.constant 0 : i32
    %c0_i32_1 = arith.constant 0 : i32
    return %c0_i32, %c0_i32_0 : i32, i32
  }
  func.func @transform_6(%arg0: i32) -> (i32, i32) {
    %c0_i32 = arith.constant 0 : i32
    %c0_i32_0 = arith.constant 0 : i32
    %c0_i32_1 = arith.constant 0 : i32
    return %c0_i32, %c0_i32_0 : i32, i32
  }
  func.func @transform_7(%arg0: i32) -> (i32, i32) {
    %c0_i32 = arith.constant 0 : i32
    %c0_i32_0 = arith.constant 0 : i32
    %c0_i32_1 = arith.constant 0 : i32
    return %c0_i32, %c0_i32_0 : i32, i32
  }
  func.func @transform_8(%arg0: i32) -> (i32, i32) {
    %c0_i32 = arith.constant 0 : i32
    %c0_i32_0 = arith.constant 0 : i32
    %c0_i32_1 = arith.constant 0 : i32
    return %c0_i32, %c0_i32_0 : i32, i32
  }
  func.func @transform_9(%arg0: i32) -> (i32, i32) {
    %c0_i32 = arith.constant 0 : i32
    %c0_i32_0 = arith.constant 0 : i32
    %c0_i32_1 = arith.constant 0 : i32
    return %c0_i32, %c0_i32_0 : i32, i32
  }
  func.func @transform_10(%arg0: i32) -> (i32, i32) {
    %c0_i32 = arith.constant 0 : i32
    %c0_i32_0 = arith.constant 0 : i32
    %c0_i32_1 = arith.constant 0 : i32
    return %c0_i32, %c0_i32_0 : i32, i32
  }
  func.func @transform_11(%arg0: i32) -> (i32, i32) {
    %c0_i32 = arith.constant 0 : i32
    %c0_i32_0 = arith.constant 0 : i32
    %c0_i32_1 = arith.constant 0 : i32
    return %c0_i32, %c0_i32_0 : i32, i32
  }
  func.func @transform_12(%arg0: i32) -> (i32, i32) {
    %c0_i32 = arith.constant 0 : i32
    %c0_i32_0 = arith.constant 0 : i32
    return %c0_i32, %arg0 : i32, i32
  }
}

</mosaic_0001>

<bundles_post_ra>
// kernel: tpu_custom_call.1
= control target key start
LH: loop header
LB: loop body
LE: loop exit
PB: predicated region body
PF: predicated region fallthrough
CT: control target
= control target key end

     0   :  { %s13983_s0 = inlined_call_operand.hbm [shape: f32[512,128], index: 0, kind: input, shape index: {}]   ;;  %s13984_s1 = inlined_call_operand.vmem [shape: bf16[128,256], index: 1, kind: input, shape index: {}]   ;;  %s13985_s2 = inlined_call_operand.vmem [shape: f32[1,128], index: 2, kind: input, shape index: {}]   ;;  %s13986_s3 = inlined_call_operand.vmem [shape: bf16[128,8], index: 3, kind: input, shape index: {}]   ;;  %s13987_s4 = inlined_call_operand.vmem [shape: f32[1,8], index: 4, kind: input, shape index: {}]   ;;  %s13988_s5 = inlined_call_operand.vmem [shape: bf16[128,128], index: 5, kind: input, shape index: {}]   ;;  %s13989_s6 = inlined_call_operand.vmem [shape: f32[1,128], index: 6, kind: input, shape index: {}]   ;;  %s13990_s7 = inlined_call_operand.vmem [shape: bf16[128,8], index: 7, kind: input, shape index: {}]   ;;  %s13991_s8 = inlined_call_operand.vmem [shape: f32[1,8], index: 8, kind: input, shape index: {}]   ;;  %s13992_s9 = inlined_call_operand.vmem [shape: bf16[8,128], index: 9, kind: input, shape index: {}]   ;;  %s13993_s10 = inlined_call_operand.vmem [shape: bf16[128,1], index: 10, kind: input, shape index: {}]   ;;  %s13994_s11 = inlined_call_operand.<no memory space> [shape: f32[1,1], index: 11, kind: input, shape index: {}]   ;;  %s13995_s12 = inlined_call_operand.hbm [shape: f32[8,512], index: 12, kind: output, shape index: {}]  }
   0x1   :  { %v17_v0 = vstv %s13994_s11 }
   0x2   :  { %18 = vst [vmem:[#allocation2] sm:$0x1] %v17_v0 }
   0x3   :  { %19 = vsyncpa [#allocation4], 0 }
   0x4   :  { %21 = vsyncpa [#allocation4 + $0x1], 0 }
   0x5   :  { %22 = vsyncpa [#allocation5], 0 }
   0x6   :  { %24 = vsyncpa [#allocation5 + $0x1], 0  ;;  %s8975_s23 = smov 0   ;;  %s8977_s24 = smov 0  }
   0x7   :  { %s8979_s25 = smov 0   ;;  %s8981_s26 = smov 0  }
   0x8 LB: > { %14359 = sst [smem:[#allocation9_spill]] %s8895_s25  ;;  %s8996_s11 = sadd.s32 4294967295, %s8899_s26   ;;  %s8899_s26 = sphi %s8981_s26, %s15317_s26   ;;  %s8895_s25 = sphi %s8979_s25, %s15314_s25   ;;  %s8891_s24 = sphi %s8977_s24, %s15316_s24   ;;  %s8887_s23 = sphi %s8975_s23, %s15315_s23  }
   0x9   : > { %s7009_s27 = sadd.s32 4294967294, %s8899_s26   ;;  %s9000_s28 = sadd.s32 1, %s8899_s26  }
   0xa   : > { %s37_s29 = sadd.s32 1, %s8895_s25  ;;  %s34_s30 = ssub.s32 %s8899_s26, %s9000_s28 }
   0xb   : > { %p44_p0 = scmp.ne.s32.totalorder %s8895_s25, %s8891_s24  ;;  %p35_p1 = scmp.eq.s32.totalorder %s34_s30, 0 }
   0xc   : > { %p45_p2 = scmp.eq.s32.totalorder %s8899_s26, 0  ;;  %p50_p3 = scmp.ne.s32.totalorder %s8891_s24, %s8887_s23 }
   0xd   : > { %p51_p4 = scmp.eq.s32.totalorder %s8996_s11, 0  ;;  %p305_p7 = scmp.eq.s32.totalorder %s8996_s11, 3 }
   0xe   : > { %s9012_s13 = scalar_select %p35_p1, %s8895_s25, %s37_s29  }
   0xf   : > { %p9014_p5 = por %p45_p2, %p44_p0  ;;  %p9018_p6 = por %p51_p4, %p50_p3 }
  0x10   : > { %14360 = sst [smem:[#allocation10_spill]] %s9012_s13  ;;  %p311_p8 = scmp.eq.s32.totalorder %s7009_s27, 3 }
  0x11   : > { %p7938_p9 = scmp.lt.s32.totalorder %s8899_s26, 4  ;;  %p9024_p10 = por %p305_p7, %p44_p0 }
  0x12   : > { %p9028_p11 = por %p311_p8, %p50_p3  ;;  %s364_s18 = sand.u32 1, %s8895_s25  }
  0x13   : > { %s14363_s16 = scalar_select %p9024_p10, 1, 0 }
  0x14   : > { %s14364_s17 = scalar_select %p9028_p11, 1, 0 }
  0x15   : > { %s7171_s19 = sshll.u32 %s8899_s26, 11  ;;  %s7012_s20 = sshll.u32 %s364_s18, 7 }
  0x16   : > { %s9037_s29 = scalar_lea.hbm %s13983_s0, %s7171_s19  ;;  %s368_s27 = scalar_lea.vmem [#allocation3], %s7012_s20 }
  0x17   : > { %s375_s30 = sshll.u32 %s368_s27, 4  ;;  %p9041_p12 = pnand %p7938_p9, %p9014_p5  ;;  %s9045_s30 = int_to_ptr.vmem [resolvable:$true] %s375_s30 }
  0x18   : > { %s9047_s25 = scalar_lea.sflag [#allocation4], %s364_s18  ;;  %s8803_s21 = scalar_lea.hbm %s9037_s29, 2048 }
  0x19   : > { %p8804_p13 = scmp.ne.s32.totalorder %s9037_s29, %s8803_s21  ;;  %p8805_p0 = pneg %p9041_p12 }
  0x1a   : > { %s8808_s20 = scalar_lea.hbm %s13983_s0, 8192  ;;  %p8809_p3 = scmp.lt.u32.totalorder %s9037_s29, %s13983_s0 }
  0x1b   : > { %p8806_p1 = pnand %p8805_p0, %p8804_p13  ;;  %p8810_p4 = scmp.lt.u32.totalorder %s8808_s20, %s8803_s21 }
  0x1c   : > { %p8812_p7 = scmp.lt.u32.totalorder %s8803_s21, %s9037_s29 }
  0x1d   : > { %p8807_p2 = pneg %p8806_p1  ;;  %p8811_p5 = por %p8810_p4, %p8809_p3 }
  0x1f   : > { %p8813_p8 = por %p8812_p7, %p8811_p5 }
  0x21   : > { %p8814_p9 = pnand %p8813_p8, %p8807_p2 }
  0x23   : > { %8817 = shalt.err (!%p8814_p9)
}
  0x24   : > { %s8818_s18 = scalar_lea.vmem %s9045_s30, 2048  ;;  %s8901_s19 = smov [#allocation3]  }
  0x25   : > { %p8819_p13 = scmp.ne.s32.totalorder %s9045_s30, %s8818_s18  ;;  %s8823_s14 = sshll.u32 %s8901_s19, 4  ;;  %s8824_s14 = int_to_ptr.vmem [resolvable:$false] %s8823_s14 }
  0x26   : > { %s8825_s22 = scalar_lea.vmem %s8824_s14, 4096  ;;  %p8826_p10 = scmp.lt.s32.totalorder %s9045_s30, %s8824_s14 }
  0x27   : > { %p8821_p1 = pnand %p8819_p13, %p8805_p0  ;;  %p8827_p3 = scmp.lt.s32.totalorder %s8825_s22, %s8818_s18 }
  0x29   : > { %p8822_p11 = pneg %p8821_p1  ;;  %p8828_p4 = por %p8827_p3, %p8826_p10 }
  0x2b   : > { %p8829_p5 = pnand %p8828_p4, %p8822_p11 }
  0x2d   : > { %8832 = shalt.err (!%p8829_p5)
}
  0x2e   : > { %s8902_s21 = smov 128   ;;  %s8903_s20 = smov 8  }
  0x2f   : > { %7933 = dma.hbm_to_vmem [thread:$0]  (!%p9041_p12), %s9037_s29, 2048, %s9045_s30, %s9047_s25, %s8902_s21, %s8902_s21, %s8903_s20  }
  0x30   : > { %p7015_p0 = scmp.ge.s32.totalorder %s8899_s26, 1  ;;  %p383_p2 = scmp.lt.s32.totalorder %s8899_s26, 5 }
  0x32   : > { %p384_p7 = pnand %p7015_p0, %p383_p2 }
  0x34   : > { %387 = sbr.rel (%p384_p7) target bundleno = 5981 (0x175d), region = 68 }
  0x3b   : > { %s9078_s27 = sand.u32 1, %s8891_s24  }
  0x3c   : > { %s7016_s18 = sshll.u32 %s9078_s27, 7  ;;  %s390_s19 = scalar_lea.sflag [#allocation4], %s9078_s27 }
  0x3d   : > { %s9082_s14 = scalar_lea.vmem [#allocation3], %s7016_s18 }
  0x3e   : > { %8878 = dma.done.wait (%p9018_p6), %s390_s19, 2048  }
  0x3f   : > { %8880 = vsyncadd (%p9018_p6), %s390_s19, 4294965248  ;;  %v13999_v1 = vmov 0   ;;  %v7976_v2 = vld [vmem:[%s13984_s1 + $0x4] ss:$8 sps:$4 sm:$0xff]   ;;  %v7978_v3 = vld [vmem:[%s13984_s1] ss:$8 sps:$4 sm:$0xff]  }
  0x40   : > { %660 = vmatprep.mubr.bf16.mxu0 %v13999_v1  ;;  %628 = vmatprep.subr.bf16.mxu0 %v7976_v2  ;;  %v7979_v4 = vld [vmem:[%s13984_s1 + $0x14] ss:$8 sps:$4 sm:$0xff]   ;;  %v7981_v5 = vld [vmem:[%s13984_s1 + $0x10] ss:$8 sps:$4 sm:$0xff]   ;;  %v7982_v6 = vld [vmem:[%s13984_s1 + $0x24] ss:$8 sps:$4 sm:$0xff]  }
  0x41   : > { %629 = vmatpush1.bf16.msra.mxu0 %v7978_v3  ;;  %v7984_v7 = vld [vmem:[%s13984_s1 + $0x20] ss:$8 sps:$4 sm:$0xff]   ;;  %v7985_v8 = vld [vmem:[%s13984_s1 + $0x34] ss:$8 sps:$4 sm:$0xff]   ;;  %v7987_v9 = vld [vmem:[%s13984_s1 + $0x30] ss:$8 sps:$4 sm:$0xff]  }
  0x42   : > { %630 = vmatprep.subr.bf16.mxu0 %v7979_v4  ;;  %v7988_v10 = vld [vmem:[%s13984_s1 + $0x44] ss:$8 sps:$4 sm:$0xff]   ;;  %v7990_v11 = vld [vmem:[%s13984_s1 + $0x40] ss:$8 sps:$4 sm:$0xff]   ;;  %v7991_v12 = vld [vmem:[%s13984_s1 + $0x54] ss:$8 sps:$4 sm:$0xff]  }
  0x43   : > { %v8000_v13 = vld [vmem:[%s13986_s3] sm:$0xff]   ;;  %v8001_v14 = vld [vmem:[%s13986_s3 + $0x8] sm:$0xff]   ;;  %v7993_v15 = vld [vmem:[%s13984_s1 + $0x50] ss:$8 sps:$4 sm:$0xff]   ;;  %vm938_vm0 = vcmask 64512   ;;  %s7017_s18 = sshll.u32 %s9078_s27, 3 }
  0x44   : > { %7416 = vmatprep.subr.bf16.mxu1 %v8000_v13  ;;  %v7994_v16 = vld [vmem:[%s13984_s1 + $0x64] ss:$8 sps:$4 sm:$0xff]   ;;  %v8002_v17 = vld [vmem:[%s13986_s3 + $0x10] sm:$0xff]   ;;  %v7996_v18 = vld [vmem:[%s13984_s1 + $0x60] ss:$8 sps:$4 sm:$0xff]   ;;  %s7168_s19 = sshll.u32 %s8996_s11, 7 }
  0x45   : > { %631 = vmatpush1.bf16.msra.mxu0 %v7981_v5  ;;  %7417 = vmatpush3.bf16.msra.mxu1 %v8000_v13  ;;  %v7997_v19 = vld [vmem:[%s13984_s1 + $0x74] ss:$8 sps:$4 sm:$0xff]   ;;  %v7999_v21 = vld [vmem:[%s13984_s1 + $0x70] ss:$8 sps:$4 sm:$0xff]   ;;  %v436_v22 = vld [vmem:[%s9082_s14] sm:$0xff]  ;;  %s433_s25 = scalar_lea.vmem [#allocation6], %s7017_s18  ;;  %s13940_s21 = scalar_lea.hbm %s13995_s12, %s7168_s19 }
  0x46   : > { %632 = vmatprep.subr.bf16.mxu0 %v7982_v6  ;;  %7418 = vmatprep.subr.bf16.mxu1 %v8001_v14  ;;  %v8003_v20 = vld [vmem:[%s13986_s3 + $0x18] sm:$0xff]   ;;  %v437_v23 = vld [vmem:[%s9082_s14 + $0x8] sm:$0xff]  ;;  %v440_v28 = vld [vmem:[%s9082_s14 + $0x20] sm:$0xff]  ;;  %s6939_s13 = sshll.u32 %s433_s25, 4  ;;  %p15311_p10 = scmp.ne.s32.totalorder %s14363_s16, 0  ;;  %s13942_s13 = int_to_ptr.vmem [resolvable:$true] %s6939_s13 }
  0x47   : > { %v540_v24 = vpack.c.bf16 %v437_v23, %v436_v22  ;;  %v438_v25 = vld [vmem:[%s9082_s14 + $0x10] sm:$0xff]  ;;  %v439_v26 = vld [vmem:[%s9082_s14 + $0x18] sm:$0xff]  ;;  %v441_v29 = vld [vmem:[%s9082_s14 + $0x28] sm:$0xff]  ;;  %s8833_s20 = scalar_lea.vmem %s13942_s13, 128  ;;  %s8906_s11 = smov [#allocation6]  }
  0x48   : > { %v541_v27 = vpack.c.bf16 %v439_v26, %v438_v25  ;;  %v542_v30 = vpack.c.bf16 %v441_v29, %v440_v28  ;;  %v442_v31 = vld [vmem:[%s9082_s14 + $0x30] sm:$0xff]  ;;  %v443_v32 = vld [vmem:[%s9082_s14 + $0x38] sm:$0xff]  ;;  %v444_v34 = vld [vmem:[%s9082_s14 + $0x40] sm:$0xff]  ;;  %p8834_p6 = scmp.ne.s32.totalorder %s13942_s13, %s8833_s20  ;;  %s8837_s15 = sshll.u32 %s8906_s11, 4  ;;  %s8838_s15 = int_to_ptr.vmem [resolvable:$false] %s8837_s15 }
  0x49   : > { %633 = vmatpush1.bf16.msra.mxu0 %v7984_v7  ;;  %7419 = vmatpush3.bf16.msra.mxu1 %v8001_v14  ;;  %v543_v33 = vpack.c.bf16 %v443_v32, %v442_v31  ;;  %v445_v35 = vld [vmem:[%s9082_s14 + $0x48] sm:$0xff]  ;;  %v446_v37 = vld [vmem:[%s9082_s14 + $0x50] sm:$0xff]  ;;  %v447_v38 = vld [vmem:[%s9082_s14 + $0x58] sm:$0xff]  ;;  %s8839_s18 = scalar_lea.vmem %s8838_s15, 256  ;;  %p8840_p8 = scmp.lt.s32.totalorder %s13942_s13, %s8838_s15 }
  0x4a   : > { %634 = vmatprep.subr.bf16.mxu0 %v7985_v8  ;;  %7420 = vmatprep.subr.bf16.mxu1 %v8002_v17  ;;  %v544_v36 = vpack.c.bf16 %v445_v35, %v444_v34  ;;  %v545_v39 = vpack.c.bf16 %v447_v38, %v446_v37  ;;  %v448_v40 = vld [vmem:[%s9082_s14 + $0x60] sm:$0xff]  ;;  %v449_v41 = vld [vmem:[%s9082_s14 + $0x68] sm:$0xff]  ;;  %v450_v43 = vld [vmem:[%s9082_s14 + $0x70] sm:$0xff]  ;;  %p8835_p11 = pnand %p8834_p6, %p15311_p10  ;;  %p8841_p9 = scmp.lt.s32.totalorder %s8839_s18, %s8833_s20 }
  0x4b   : > { %v546_v42 = vpack.c.bf16 %v449_v41, %v448_v40  ;;  %v451_v44 = vld [vmem:[%s9082_s14 + $0x78] sm:$0xff]  ;;  %v8005_v47 = vld [vmem:[%s13986_s3 + $0x28] sm:$0xff]   ;;  %v8006_v48 = vld [vmem:[%s13986_s3 + $0x30] sm:$0xff]   ;;  %s6926_s14 = scalar_lea.sflag [#allocation5], %s9078_s27 }
  0x4c   : > { %v547_v45 = vpack.c.bf16 %v451_v44, %v450_v43  ;;  %v8004_v46 = vld [vmem:[%s13986_s3 + $0x20] sm:$0xff]   ;;  %v8007_v49 = vld [vmem:[%s13986_s3 + $0x38] sm:$0xff]   ;;  %p8836_p12 = pneg %p8835_p11  ;;  %p8842_p13 = por %p8841_p9, %p8840_p8 }
  0x4d   : > { %635 = vmatpush1.bf16.msra.mxu0 %v7987_v9  ;;  %7421 = vmatpush3.bf16.msra.mxu1 %v8002_v17  ;;  %v9187_v50 = vld [vmem:[%s13985_s2] ss:$0 sm:$0xff] }
  0x4e   : > { %636 = vmatprep.subr.bf16.mxu0 %v7988_v10  ;;  %7422 = vmatprep.subr.bf16.mxu1 %v8003_v20  ;;  %p8843_p1 = pnand %p8842_p13, %p8836_p12 }
  0x51   : > { %637 = vmatpush1.bf16.msra.mxu0 %v7990_v11  ;;  %7423 = vmatpush3.bf16.msra.mxu1 %v8003_v20 }
  0x52   : > { %638 = vmatprep.subr.bf16.mxu0 %v7991_v12  ;;  %7424 = vmatprep.subr.bf16.mxu1 %v8004_v46 }
  0x55   : > { %639 = vmatpush1.bf16.msra.mxu0 %v7993_v15  ;;  %7425 = vmatpush3.bf16.msra.mxu1 %v8004_v46 }
  0x56   : > { %640 = vmatprep.subr.bf16.mxu0 %v7994_v16  ;;  %7426 = vmatprep.subr.bf16.mxu1 %v8005_v47 }
  0x59   : > { %641 = vmatpush1.bf16.msra.mxu0 %v7996_v18  ;;  %7427 = vmatpush3.bf16.msra.mxu1 %v8005_v47 }
  0x5a   : > { %642 = vmatprep.subr.bf16.mxu0 %v7997_v19  ;;  %7428 = vmatprep.subr.bf16.mxu1 %v8006_v48 }
  0x5d   : > { %643 = vmatpush1.bf16.msra.mxu0 %v7999_v21  ;;  %7429 = vmatpush3.bf16.msra.mxu1 %v8006_v48 }
  0x5e   : > { %7430 = vmatprep.subr.bf16.mxu1 %v8007_v49 }
  0x60   : > { %661 = vmatmul.mubr.bf16.vlgmr.msra.gmra.mrb[0].mxu0 %v540_v24 }
  0x61   : > { %670 = vmatprep.mubr.bf16.mxu0 %v13999_v1  ;;  %7431 = vmatpush3.bf16.msra.mxu1 %v8007_v49 }
  0x68   : > { %671 = vmatmul.mubr.bf16.gmra.mrb[4].mxu0 %v541_v27 }
  0x69   : > { %680 = vmatprep.mubr.bf16.mxu0 %v13999_v1 }
  0x70   : > { %681 = vmatmul.mubr.bf16.gmra.mrb[8].mxu0 %v542_v30 }
  0x71   : > { %690 = vmatprep.mubr.bf16.mxu0 %v13999_v1 }
  0x78   : > { %691 = vmatmul.mubr.bf16.gmra.mrb[12].mxu0 %v543_v33 }
  0x79   : > { %700 = vmatprep.mubr.bf16.mxu0 %v13999_v1 }
  0x80   : > { %701 = vmatmul.mubr.bf16.gmra.mrb[16].mxu0 %v544_v36 }
  0x81   : > { %710 = vmatprep.mubr.bf16.mxu0 %v13999_v1 }
  0x88   : > { %711 = vmatmul.mubr.bf16.gmra.mrb[20].mxu0 %v545_v39 }
  0x89   : > { %720 = vmatprep.mubr.bf16.mxu0 %v13999_v1 }
  0x90   : > { %721 = vmatmul.mubr.bf16.gmra.mrb[24].mxu0 %v546_v42 }
  0x91   : > { %730 = vmatprep.mubr.bf16.mxu0 %v13999_v1 }
  0x98   : > { %731 = vmatmul.mubr.bf16.gmra.mrb[28].mxu0 %v547_v45 }
 0x133   : > { %v662_v51 = vpop.f32.mrb[0].mxu0 }
 0x134   : > { %v747_v52 = vadd.f32 %v9187_v50, %v662_v51  ;;  %v9190_v53 = vpop.f32.mrb[1].mxu0 }
 0x135   : > { %v666_v54 = vpop.f32.mrb[2].mxu0 }
 0x136   : > { %v748_v55 = vadd.f32 %v9187_v50, %v666_v54  ;;  %v9193_v56 = vpop.f32.mrb[3].mxu0  ;;  %v763_v57 = vmax.f32 %v747_v52, 0.0 }
 0x138   : > { %v764_v58 = vmax.f32 %v748_v55, 0.0 }
 0x13a   : > { %v779_v59 = vpack.c.bf16 %v764_v58, %v763_v57 }
 0x13b   : > { %v672_v60 = vpop.f32.mrb[4].mxu0 }
 0x13c   : > { %v749_v61 = vadd.f32 %v9187_v50, %v672_v60  ;;  %v9196_v62 = vpop.f32.mrb[5].mxu0  ;;  %7432 = vmatprep.mubr.bf16.mxu1 %v779_v59 }
 0x13d   : > { %v676_v63 = vpop.f32.mrb[6].mxu0 }
 0x13e   : > { %v750_v0 = vadd.f32 %v9187_v50, %v676_v63  ;;  %v9199_v2 = vpop.f32.mrb[7].mxu0  ;;  %v765_v3 = vmax.f32 %v749_v61, 0.0 }
 0x140   : > { %v766_v4 = vmax.f32 %v750_v0, 0.0  ;;  %v7035_v0 = vld [vmem:[%s13987_s4] ss:$0 sm:$0xff] }
 0x142   : > { %v780_v5 = vpack.c.bf16 %v766_v4, %v765_v3 }
 0x143   : > { %v682_v6 = vpop.f32.mrb[8].mxu0 }
 0x144   : > { %v751_v7 = vadd.f32 %v9187_v50, %v682_v6  ;;  %v9202_v8 = vpop.f32.mrb[9].mxu0  ;;  %7433 = vmatmul.mubr.bf16.vlgmr.msra.gmra.mrb[0].mxu1 %v780_v5 }
 0x145   : > { %v686_v9 = vpop.f32.mrb[10].mxu0 }
 0x146   : > { %v752_v10 = vadd.f32 %v9187_v50, %v686_v9  ;;  %v9205_v11 = vpop.f32.mrb[11].mxu0  ;;  %v767_v12 = vmax.f32 %v751_v7, 0.0 }
 0x148   : > { %v768_v13 = vmax.f32 %v752_v10, 0.0 }
 0x14a   : > { %v781_v14 = vpack.c.bf16 %v768_v13, %v767_v12 }
 0x14b   : > { %v692_v15 = vpop.f32.mrb[12].mxu0 }
 0x14c   : > { %v753_v16 = vadd.f32 %v9187_v50, %v692_v15  ;;  %v9208_v17 = vpop.f32.mrb[13].mxu0  ;;  %7436 = vmatprep.mubr.bf16.mxu1 %v781_v14 }
 0x14d   : > { %v696_v18 = vpop.f32.mrb[14].mxu0 }
 0x14e   : > { %v754_v19 = vadd.f32 %v9187_v50, %v696_v18  ;;  %v9211_v20 = vpop.f32.mrb[15].mxu0  ;;  %v769_v21 = vmax.f32 %v753_v16, 0.0 }
 0x150   : > { %v770_v22 = vmax.f32 %v754_v19, 0.0 }
 0x152   : > { %v782_v23 = vpack.c.bf16 %v770_v22, %v769_v21 }
 0x153   : > { %v702_v24 = vpop.f32.mrb[16].mxu0 }
 0x154   : > { %v755_v25 = vadd.f32 %v9187_v50, %v702_v24  ;;  %v9214_v26 = vpop.f32.mrb[17].mxu0  ;;  %7437 = vmatmul.mubr.bf16.gmra.mrb[4].mxu1 %v782_v23 }
 0x155   : > { %v706_v27 = vpop.f32.mrb[18].mxu0 }
 0x156   : > { %v756_v28 = vadd.f32 %v9187_v50, %v706_v27  ;;  %v9217_v29 = vpop.f32.mrb[19].mxu0  ;;  %v771_v30 = vmax.f32 %v755_v25, 0.0 }
 0x158   : > { %v772_v31 = vmax.f32 %v756_v28, 0.0 }
 0x15a   : > { %v783_v32 = vpack.c.bf16 %v772_v31, %v771_v30 }
 0x15b   : > { %v712_v33 = vpop.f32.mrb[20].mxu0 }
 0x15c   : > { %v757_v34 = vadd.f32 %v9187_v50, %v712_v33  ;;  %v9220_v35 = vpop.f32.mrb[21].mxu0  ;;  %7440 = vmatprep.mubr.bf16.mxu1 %v783_v32 }
 0x15d   : > { %v716_v36 = vpop.f32.mrb[22].mxu0 }
 0x15e   : > { %v758_v37 = vadd.f32 %v9187_v50, %v716_v36  ;;  %v9223_v38 = vpop.f32.mrb[23].mxu0  ;;  %v773_v39 = vmax.f32 %v757_v34, 0.0 }
 0x160   : > { %v774_v40 = vmax.f32 %v758_v37, 0.0 }
 0x162   : > { %v784_v41 = vpack.c.bf16 %v774_v40, %v773_v39 }
 0x163   : > { %v722_v42 = vpop.f32.mrb[24].mxu0 }
 0x164   : > { %v759_v43 = vadd.f32 %v9187_v50, %v722_v42  ;;  %v9226_v44 = vpop.f32.mrb[25].mxu0  ;;  %7441 = vmatmul.mubr.bf16.gmra.mrb[8].mxu1 %v784_v41 }
 0x165   : > { %v726_v45 = vpop.f32.mrb[26].mxu0 }
 0x166   : > { %v760_v46 = vadd.f32 %v9187_v50, %v726_v45  ;;  %v9229_v47 = vpop.f32.mrb[27].mxu0  ;;  %v775_v48 = vmax.f32 %v759_v43, 0.0 }
 0x168   : > { %v776_v49 = vmax.f32 %v760_v46, 0.0 }
 0x16a   : > { %v785_v51 = vpack.c.bf16 %v776_v49, %v775_v48 }
 0x16b   : > { %v732_v52 = vpop.f32.mrb[28].mxu0 }
 0x16c   : > { %v761_v54 = vadd.f32 %v9187_v50, %v732_v52  ;;  %v9232_v55 = vpop.f32.mrb[29].mxu0  ;;  %7444 = vmatprep.mubr.bf16.mxu1 %v785_v51 }
 0x16d   : > { %v736_v57 = vpop.f32.mrb[30].mxu0 }
 0x16e   : > { %v762_v58 = vadd.f32 %v9187_v50, %v736_v57  ;;  %v9235_v59 = vpop.f32.mrb[31].mxu0  ;;  %v777_v60 = vmax.f32 %v761_v54, 0.0 }
 0x170   : > { %v778_v61 = vmax.f32 %v762_v58, 0.0 }
 0x172   : > { %v786_v63 = vpack.c.bf16 %v778_v61, %v777_v60 }
 0x174   : > { %7445 = vmatmul.mubr.bf16.gmra.mrb[12].mxu1 %v786_v63 }
 0x217   : > { %v7434_v3 = vpop.f32.mrb[0].mxu1 }
 0x218   : > { %v9240_v4 = vadd.f32 %v7434_v3, %v7035_v0  ;;  %v875_v5 = vpop.f32.mrb[1].mxu1 }
 0x219   : > { %v9242_v6 = vadd.f32 %v7035_v0, %v875_v5  ;;  %v7435_v7 = vpop.f32.mrb[2].mxu1 }
 0x21a   : > { %14366 = vst [vmem:[#allocation11_spill] sm:$0xff] %v9240_v4  ;;  %v9244_v9 = vadd.f32 %v7435_v7, %v7035_v0  ;;  %v878_v50 = vpop.f32.mrb[3].mxu1  ;;  %v945_v10 = vsel %vm938_vm0, %v9240_v4, -inf  ;;  %v13998_v7 = vlaneseq }
 0x21b   : > { %v9248_v12 = vadd.f32 %v7035_v0, %v878_v50  ;;  %946 = vmax.xlane.f32.xlu1 %v945_v10  ;;  %v939_v13 = vsel %vm938_vm0, %v9242_v6, -inf }
 0x21c   : > { %14367 = vst [vmem:[#allocation12_spill] sm:$0xff] %v9244_v9  ;;  %940 = vmax.xlane.f32.xlu0 %v939_v13  ;;  %v948_v14 = vsel %vm938_vm0, %v9244_v9, -inf  ;;  %v9305_v50 = vand.u32 127, %v13998_v7 }
 0x21d   : > { %14368 = vst [vmem:[#allocation13_spill] sm:$0xff] %v9248_v12  ;;  %v942_v15 = vsel %vm938_vm0, %v9248_v12, -inf }
 0x21e   : > { %14381 = vst [vmem:[#allocation26_spill] sm:$0xff] %v9305_v50 }
 0x21f   : > { %949 = vmax.xlane.f32.xlu1 %v948_v14 }
 0x220   : > { %943 = vmax.xlane.f32.xlu0 %v942_v15 }
 0x227   : > { %v7438_v16 = vpop.f32.mrb[4].mxu1 }
 0x228   : > { %v891_v18 = vpop.f32.mrb[5].mxu1  ;;  %v9258_v23 = vadd.f32 %v7438_v16, %v7035_v0 }
 0x229   : > { %v9256_v19 = vadd.f32 %v7035_v0, %v891_v18  ;;  %v7439_v21 = vpop.f32.mrb[6].mxu1 }
 0x22a   : > { %v894_v22 = vpop.f32.mrb[7].mxu1  ;;  %14370 = vst [vmem:[#allocation15_spill] sm:$0xff] %v9258_v23  ;;  %v9264_v27 = vadd.f32 %v7439_v21, %v7035_v0  ;;  %v957_v30 = vsel %vm938_vm0, %v9258_v23, -inf }
 0x22b   : > { %14369 = vst [vmem:[#allocation14_spill] sm:$0xff] %v9256_v19  ;;  %v9260_v24 = vadd.f32 %v7035_v0, %v894_v22  ;;  %v951_v25 = vsel %vm938_vm0, %v9256_v19, -inf }
 0x22c   : > { %952 = vmax.xlane.f32.xlu0 %v951_v25  ;;  %14372 = vst [vmem:[#allocation17_spill] sm:$0xff] %v9264_v27  ;;  %v960_v31 = vsel %vm938_vm0, %v9264_v27, -inf }
 0x22d   : > { %14371 = vst [vmem:[#allocation16_spill] sm:$0xff] %v9260_v24  ;;  %v954_v28 = vsel %vm938_vm0, %v9260_v24, -inf }
 0x22e   : > { %955 = vmax.xlane.f32.xlu1 %v954_v28 }
 0x230   : > { %958 = vmax.xlane.f32.xlu0 %v957_v30 }
 0x232   : > { %961 = vmax.xlane.f32.xlu1 %v960_v31 }
 0x237   : > { %v7442_v32 = vpop.f32.mrb[8].mxu1 }
 0x238   : > { %v907_v33 = vpop.f32.mrb[9].mxu1  ;;  %v9274_v39 = vadd.f32 %v7442_v32, %v7035_v0 }
 0x239   : > { %v9272_v34 = vadd.f32 %v7035_v0, %v907_v33  ;;  %v7443_v36 = vpop.f32.mrb[10].mxu1 }
 0x23a   : > { %v910_v37 = vpop.f32.mrb[11].mxu1  ;;  %14374 = vst [vmem:[#allocation19_spill] sm:$0xff] %v9274_v39  ;;  %v9280_v42 = vadd.f32 %v7443_v36, %v7035_v0  ;;  %v969_v45 = vsel %vm938_vm0, %v9274_v39, -inf }
 0x23b   : > { %14373 = vst [vmem:[#allocation18_spill] sm:$0xff] %v9272_v34  ;;  %v9276_v40 = vadd.f32 %v7035_v0, %v910_v37  ;;  %v963_v41 = vsel %vm938_vm0, %v9272_v34, -inf }
 0x23c   : > { %964 = vmax.xlane.f32.xlu0 %v963_v41  ;;  %14376 = vst [vmem:[#allocation21_spill] sm:$0xff] %v9280_v42  ;;  %v972_v46 = vsel %vm938_vm0, %v9280_v42, -inf }
 0x23d   : > { %14375 = vst [vmem:[#allocation20_spill] sm:$0xff] %v9276_v40  ;;  %v966_v43 = vsel %vm938_vm0, %v9276_v40, -inf }
 0x23e   : > { %967 = vmax.xlane.f32.xlu1 %v966_v43 }
 0x240   : > { %970 = vmax.xlane.f32.xlu0 %v969_v45 }
 0x242   : > { %973 = vmax.xlane.f32.xlu1 %v972_v46 }
 0x247   : > { %v7446_v48 = vpop.f32.mrb[12].mxu1 }
 0x248   : > { %v923_v49 = vpop.f32.mrb[13].mxu1  ;;  %v9290_v57 = vadd.f32 %v7446_v48, %v7035_v0 }
 0x249   : > { %v9288_v51 = vadd.f32 %v7035_v0, %v923_v49  ;;  %v7447_v52 = vpop.f32.mrb[14].mxu1 }
 0x24a   : > { %v926_v54 = vpop.f32.mrb[15].mxu1  ;;  %14378 = vst [vmem:[#allocation23_spill] sm:$0xff] %v9290_v57  ;;  %v9296_v61 = vadd.f32 %v7447_v52, %v7035_v0  ;;  %v981_v3 = vsel %vm938_vm0, %v9290_v57, -inf }
 0x24b   : > { %14377 = vst [vmem:[#allocation22_spill] sm:$0xff] %v9288_v51  ;;  %v9292_v58 = vadd.f32 %v7035_v0, %v926_v54  ;;  %v975_v60 = vsel %vm938_vm0, %v9288_v51, -inf }
 0x24c   : > { %976 = vmax.xlane.f32.xlu0 %v975_v60  ;;  %14380 = vst [vmem:[#allocation25_spill] sm:$0xff] %v9296_v61  ;;  %v984_v5 = vsel %vm938_vm0, %v9296_v61, -inf }
 0x24d   : > { %14379 = vst [vmem:[#allocation24_spill] sm:$0xff] %v9292_v58  ;;  %v978_v63 = vsel %vm938_vm0, %v9292_v58, -inf }
 0x24e   : > { %979 = vmax.xlane.f32.xlu1 %v978_v63 }
 0x250   : > { %982 = vmax.xlane.f32.xlu0 %v981_v3 }
 0x252   : > { %985 = vmax.xlane.f32.xlu1 %v984_v5 }
 0x2a8   : > { %v9307_v10 = vpop.xlane.xlu1 %946 }
 0x2a9   : > { %14382 = vst [vmem:[#allocation27_spill] sm:$0xff] %v9307_v10  ;;  %v9309_v0 = vpop.xlane.xlu0 %940  ;;  %vm1149_vm1 = vcmp.ge.f32.partialorder %v9240_v4, %v9307_v10 }
 0x2aa   : > { %14383 = vst [vmem:[#allocation28_spill] sm:$0xff] %v9309_v0  ;;  %vm1147_vm2 = vcmp.ge.f32.partialorder %v9242_v6, %v9309_v0  ;;  %v1165_v13 = vsel %vm1149_vm1, %v9305_v50, 8 }
 0x2ab   : > { %v1163_v14 = vsel %vm1147_vm2, %v9305_v50, 8  ;;  %v9323_v18 = vsel %vm938_vm0, %v1165_v13, 2147483647 }
 0x2ac   : > { %v9317_v15 = vpop.xlane.xlu1 %949  ;;  %v9320_v16 = vsel %vm938_vm0, %v1163_v14, 2147483647  ;;  %v1211_v30 = vshra.s32 %v9323_v18, 16 }
 0x2ad   : > { %14384 = vst [vmem:[#allocation29_spill] sm:$0xff] %v9317_v15  ;;  %v9325_v21 = vpop.xlane.xlu0 %943  ;;  %v1181_v22 = vshra.s32 %v9320_v16, 16  ;;  %vm1150_vm3 = vcmp.ge.f32.partialorder %v9244_v9, %v9317_v15 }
 0x2ae   : > { %14385 = vst [vmem:[#allocation30_spill] sm:$0xff] %v9325_v21  ;;  %vm1148_vm4 = vcmp.ge.f32.partialorder %v9248_v12, %v9325_v21  ;;  %v1166_v31 = vsel %vm1150_vm3, %v9305_v50, 8  ;;  %v9347_v41 = vcvt.s32.f32 %v1211_v30 }
 0x2af   : > { %v9332_v25 = vcvt.s32.f32 %v1181_v22  ;;  %v1164_v28 = vsel %vm1148_vm4, %v9305_v50, 8  ;;  %v9341_v33 = vsel %vm938_vm0, %v1166_v31, 2147483647 }
 0x2b0   : > { %v9338_v32 = vsel %vm938_vm0, %v1164_v28, 2147483647  ;;  %v1226_v43 = vshra.s32 %v9341_v33, 16 }
 0x2b1   : > { %1184 = vmin.xlane.f32.xlu0 %v9332_v25  ;;  %v1196_v36 = vshra.s32 %v9338_v32, 16 }
 0x2b2   : > { %v9352_v45 = vcvt.s32.f32 %v1226_v43 }
 0x2b3   : > { %v9345_v37 = vcvt.s32.f32 %v1196_v36 }
 0x2b5   : > { %1199 = vmin.xlane.f32.xlu1 %v9345_v37  ;;  %1214 = vmin.xlane.f32.xlu0 %v9347_v41 }
 0x2b9   : > { %v9354_v46 = vpop.xlane.xlu0 %952  ;;  %1229 = vmin.xlane.f32.xlu1 %v9352_v45 }
 0x2ba   : > { %14386 = vst [vmem:[#allocation31_spill] sm:$0xff] %v9354_v46  ;;  %vm1151_vm5 = vcmp.ge.f32.partialorder %v9256_v19, %v9354_v46  ;;  %v1195_v46 = vand.u32 65535, %v9338_v32 }
 0x2bb   : > { %v9359_v48 = vpop.xlane.xlu1 %955  ;;  %v1167_v49 = vsel %vm1151_vm5, %v9305_v50, 8 }
 0x2bc   : > { %14387 = vst [vmem:[#allocation32_spill] sm:$0xff] %v9359_v48  ;;  %v9363_v52 = vsel %vm938_vm0, %v1167_v49, 2147483647  ;;  %vm1152_vm6 = vcmp.ge.f32.partialorder %v9260_v24, %v9359_v48  ;;  %v1197_v15 = vcvt.s32.f32 %v1195_v46 }
 0x2bd   : > { %v9367_v54 = vpop.xlane.xlu0 %958  ;;  %v1241_v60 = vshra.s32 %v9363_v52, 16  ;;  %v1168_v63 = vsel %vm1152_vm6, %v9305_v50, 8 }
 0x2be   : > { %14388 = vst [vmem:[#allocation33_spill] sm:$0xff] %v9367_v54  ;;  %v9372_v3 = vsel %vm938_vm0, %v1168_v63, 2147483647  ;;  %vm1153_vm7 = vcmp.ge.f32.partialorder %v9258_v23, %v9367_v54 }
 0x2bf   : > { %v9374_v5 = vpop.xlane.xlu1 %961  ;;  %v9376_v13 = vcvt.s32.f32 %v1241_v60  ;;  %v1256_v14 = vshra.s32 %v9372_v3, 16  ;;  %v1169_v22 = vsel %vm1153_vm7, %v9305_v50, 8  ;;  %v1255_v46 = vand.u32 65535, %v9372_v3 }
 0x2c0   : > { %14389 = vst [vmem:[#allocation34_spill] sm:$0xff] %v9374_v5  ;;  %v9386_v30 = vsel %vm938_vm0, %v1169_v22, 2147483647  ;;  %vm1154_vm8 = vcmp.ge.f32.partialorder %v9264_v27, %v9374_v5 }
 0x2c1   : > { %1244 = vmin.xlane.f32.xlu0 %v9376_v13  ;;  %v9383_v28 = vcvt.s32.f32 %v1256_v14  ;;  %v1271_v31 = vshra.s32 %v9386_v30, 16  ;;  %v1170_v36 = vsel %vm1154_vm8, %v9305_v50, 8 }
 0x2c2   : > { %v9394_v43 = vsel %vm938_vm0, %v1170_v36, 2147483647 }
 0x2c3   : > { %1259 = vmin.xlane.f32.xlu1 %v9383_v28  ;;  %v9396_v49 = vcvt.s32.f32 %v1271_v31  ;;  %v1286_v60 = vshra.s32 %v9394_v43, 16 }
 0x2c5   : > { %1274 = vmin.xlane.f32.xlu0 %v9396_v49  ;;  %v9400_v63 = vcvt.s32.f32 %v1286_v60 }
 0x2c7   : > { %1289 = vmin.xlane.f32.xlu1 %v9400_v63 }
 0x2c9   : > { %v9403_v14 = vpop.xlane.xlu0 %964 }
 0x2ca   : > { %14390 = vst [vmem:[#allocation35_spill] sm:$0xff] %v9403_v14  ;;  %vm1155_vm9 = vcmp.ge.f32.partialorder %v9272_v34, %v9403_v14 }
 0x2cb   : > { %v9407_v22 = vpop.xlane.xlu1 %967  ;;  %v1171_v36 = vsel %vm1155_vm9, %v9305_v50, 8 }
 0x2cc   : > { %14391 = vst [vmem:[#allocation36_spill] sm:$0xff] %v9407_v22  ;;  %v9411_v31 = vsel %vm938_vm0, %v1171_v36, 2147483647  ;;  %vm1156_vm10 = vcmp.ge.f32.partialorder %v9276_v40, %v9407_v22 }
 0x2cd   : > { %v9415_v7 = vpop.xlane.xlu0 %970  ;;  %v1301_v60 = vshra.s32 %v9411_v31, 16  ;;  %v1172_v1 = vsel %vm1156_vm10, %v9305_v50, 8  ;;  %vm1499_vm10 = vcmask 1043456  }
 0x2ce   : > { %14392 = vst [vmem:[#allocation37_spill] sm:$0xff] %v9415_v7  ;;  %v9420_v27 = vsel %vm938_vm0, %v1172_v1, 2147483647  ;;  %vm1157_vm11 = vcmp.ge.f32.partialorder %v9274_v39, %v9415_v7 }
 0x2cf   : > { %v9422_v34 = vpop.xlane.xlu1 %973  ;;  %v9424_v14 = vcvt.s32.f32 %v1301_v60  ;;  %v1316_v5 = vshra.s32 %v9420_v27, 16  ;;  %v1173_v36 = vsel %vm1157_vm11, %v9305_v50, 8 }
 0x2d0   : > { %14393 = vst [vmem:[#allocation38_spill] sm:$0xff] %v9422_v34  ;;  %v9434_v22 = vsel %vm938_vm0, %v1173_v36, 2147483647  ;;  %vm1158_vm12 = vcmp.ge.f32.partialorder %v9280_v42, %v9422_v34 }
 0x2d1   : > { %1304 = vmin.xlane.f32.xlu0 %v9424_v14  ;;  %v9431_v40 = vcvt.s32.f32 %v1316_v5  ;;  %v1331_v1 = vshra.s32 %v9434_v22, 16  ;;  %v1174_v60 = vsel %vm1158_vm12, %v9305_v50, 8 }
 0x2d2   : > { %v9442_v39 = vsel %vm938_vm0, %v1174_v60, 2147483647 }
 0x2d3   : > { %1319 = vmin.xlane.f32.xlu1 %v9431_v40  ;;  %v9444_v7 = vcvt.s32.f32 %v1331_v1  ;;  %v1346_v5 = vshra.s32 %v9442_v39, 16 }
 0x2d5   : > { %1334 = vmin.xlane.f32.xlu0 %v9444_v7  ;;  %v9448_v36 = vcvt.s32.f32 %v1346_v5 }
 0x2d7   : > { %1349 = vmin.xlane.f32.xlu1 %v9448_v36 }
 0x2d9   : > { %v9451_v42 = vpop.xlane.xlu0 %976 }
 0x2da   : > { %14394 = vst [vmem:[#allocation39_spill] sm:$0xff] %v9451_v42  ;;  %vm1159_vm13 = vcmp.ge.f32.partialorder %v9288_v51, %v9451_v42 }
 0x2db   : > { %v9455_v34 = vpop.xlane.xlu1 %979  ;;  %v1175_v60 = vsel %vm1159_vm13, %v9305_v50, 8 }
 0x2dc   : > { %14395 = vst [vmem:[#allocation40_spill] sm:$0xff] %v9455_v34  ;;  %v9459_v1 = vsel %vm938_vm0, %v1175_v60, 2147483647  ;;  %vm1160_vm14 = vcmp.ge.f32.partialorder %v9292_v58, %v9455_v34 }
 0x2dd   : > { %v9463_v23 = vpop.xlane.xlu0 %982  ;;  %v1361_v5 = vshra.s32 %v9459_v1, 16  ;;  %v1176_v54 = vsel %vm1160_vm14, %v9305_v50, 8 }
 0x2de   : > { %14396 = vst [vmem:[#allocation41_spill] sm:$0xff] %v9463_v23  ;;  %v9468_v24 = vsel %vm938_vm0, %v1176_v54, 2147483647  ;;  %vm1161_vm15 = vcmp.ge.f32.partialorder %v9290_v57, %v9463_v23 }
 0x2df   : > { %v9470_v51 = vpop.xlane.xlu1 %985  ;;  %v9472_v42 = vcvt.s32.f32 %v1361_v5  ;;  %v1376_v48 = vshra.s32 %v9468_v24, 16  ;;  %v1177_v60 = vsel %vm1161_vm15, %v9305_v50, 8 }
 0x2e0   : > { %14397 = vst [vmem:[#allocation42_spill] sm:$0xff] %v9470_v51  ;;  %v9482_v34 = vsel %vm938_vm0, %v1177_v60, 2147483647  ;;  %vm1162_vm1 = vcmp.ge.f32.partialorder %v9296_v61, %v9470_v51  ;;  %v1180_v61 = vand.u32 65535, %v9320_v16  ;;  %v1225_v16 = vand.u32 65535, %v9341_v33 }
 0x2e1   : > { %1364 = vmin.xlane.f32.xlu0 %v9472_v42  ;;  %v9479_v58 = vcvt.s32.f32 %v1376_v48  ;;  %v1391_v54 = vshra.s32 %v9482_v34, 16  ;;  %v1178_v5 = vsel %vm1162_vm1, %v9305_v50, 8  ;;  %v1240_v33 = vand.u32 65535, %v9363_v52 }
 0x2e2   : > { %v9490_v57 = vsel %vm938_vm0, %v1178_v5, 2147483647  ;;  %v1182_v19 = vcvt.s32.f32 %v1180_v61  ;;  %v1210_v5 = vand.u32 65535, %v9323_v18 }
 0x2e3   : > { %1379 = vmin.xlane.f32.xlu1 %v9479_v58  ;;  %v9492_v23 = vcvt.s32.f32 %v1391_v54  ;;  %v1406_v48 = vshra.s32 %v9490_v57, 16 }
 0x2e4   : > { %v1212_v4 = vcvt.s32.f32 %v1210_v5  ;;  %v1242_v5 = vcvt.s32.f32 %v1240_v33  ;;  %v1330_v33 = vand.u32 65535, %v9434_v22 }
 0x2e5   : > { %1394 = vmin.xlane.f32.xlu0 %v9492_v23  ;;  %v9496_v60 = vcvt.s32.f32 %v1406_v48 }
 0x2e7   : > { %1409 = vmin.xlane.f32.xlu1 %v9496_v60 }
 0x33e   : > { %v9500_v51 = vpop.xlane.xlu0 %1184 }
 0x33f   : > { %vm1186_vm2 = vcmp.eq.f32.partialorder %v9332_v25, %v9500_v51  ;;  %v1227_v25 = vcvt.s32.f32 %v1225_v16 }
 0x340   : > { %v1187_v54 = vsel %vm1186_vm2, %v1182_v19, inf }
 0x341   : > { %1188 = vmin.xlane.f32.xlu0 %v1187_v54  ;;  %v1257_v54 = vcvt.s32.f32 %v1255_v46 }
 0x342   : > { %v9506_v9 = vpop.xlane.xlu1 %1199  ;;  %v9508_v48 = vpop.xlane.xlu0 %1214 }
 0x343   : > { %vm1201_vm3 = vcmp.eq.f32.partialorder %v9345_v37, %v9506_v9  ;;  %vm1216_vm4 = vcmp.eq.f32.partialorder %v9347_v41, %v9508_v48 }
 0x344   : > { %v1202_v61 = vsel %vm1201_vm3, %v1197_v15, inf  ;;  %v1217_v18 = vsel %vm1216_vm4, %v1212_v4, inf  ;;  %v1270_v4 = vand.u32 65535, %v9386_v30 }
 0x345   : > { %1203 = vmin.xlane.f32.xlu1 %v1202_v61  ;;  %1218 = vmin.xlane.f32.xlu0 %v1217_v18 }
 0x346   : > { %v9515_v19 = vpop.xlane.xlu1 %1229  ;;  %v1272_v16 = vcvt.s32.f32 %v1270_v4 }
 0x347   : > { %vm1231_vm5 = vcmp.eq.f32.partialorder %v9352_v45, %v9515_v19  ;;  %v1285_v45 = vand.u32 65535, %v9394_v43 }
 0x348   : > { %v1232_v32 = vsel %vm1231_vm5, %v1227_v25, inf }
 0x349   : > { %1233 = vmin.xlane.f32.xlu1 %v1232_v32  ;;  %v1287_v61 = vcvt.s32.f32 %v1285_v45 }
 0x34e   : > { %v9521_v37 = vpop.xlane.xlu0 %1244 }
 0x34f   : > { %vm1246_vm6 = vcmp.eq.f32.partialorder %v9376_v13, %v9521_v37 }
 0x350   : > { %v9526_v15 = vpop.xlane.xlu1 %1259  ;;  %v1247_v41 = vsel %vm1246_vm6, %v1242_v5, inf }
 0x351   : > { %1248 = vmin.xlane.f32.xlu0 %v1247_v41  ;;  %vm1261_vm7 = vcmp.eq.f32.partialorder %v9383_v28, %v9526_v15  ;;  %v9542_v28 = vld [vmem:[%s13992_s9] sm:$0xf] }
 0x352   : > { %v1262_v52 = vsel %vm1261_vm7, %v1257_v54, inf  ;;  %v9531_v3 = vpop.xlane.xlu0 %1274  ;;  %7920 = vmatprep.subr.msk.bf16.mxu1 %vm1499_vm10, %v9542_v28  ;;  %v9548_v43 = vsel %vm1499_vm10, %v9542_v28, 0  ;;  %v1332_v54 = vcvt.s32.f32 %v1330_v33 }
 0x353   : > { %1263 = vmin.xlane.f32.xlu1 %v1262_v52  ;;  %vm1276_vm8 = vcmp.eq.f32.partialorder %v9396_v49, %v9531_v3  ;;  %v1300_v49 = vand.u32 65535, %v9411_v31  ;;  %7449 = vmatpush3.bf16.msra.mxu1 %v9548_v43  ;;  %v1345_v31 = vand.u32 65535, %v9442_v39  ;;  %v1360_v39 = vand.u32 65535, %v9459_v1 }
 0x354   : > { %v9535_v13 = vpop.xlane.xlu1 %1289  ;;  %v1277_v30 = vsel %vm1276_vm8, %v1272_v16, inf }
 0x355   : > { %1278 = vmin.xlane.f32.xlu0 %v1277_v30  ;;  %vm1291_vm9 = vcmp.eq.f32.partialorder %v9400_v63, %v9535_v13  ;;  %v1315_v63 = vand.u32 65535, %v9420_v27  ;;  %v1302_v32 = vcvt.s32.f32 %v1300_v49  ;;  %v1347_v45 = vcvt.s32.f32 %v1345_v31 }
 0x356   : > { %v1292_v18 = vsel %vm1291_vm9, %v1287_v61, inf  ;;  %v1362_v30 = vcvt.s32.f32 %v1360_v39 }
 0x357   : > { %1293 = vmin.xlane.f32.xlu1 %v1292_v18  ;;  %v1317_v4 = vcvt.s32.f32 %v1315_v63 }
 0x35e   : > { %v9553_v25 = vpop.xlane.xlu0 %1304 }
 0x35f   : > { %vm1306_vm11 = vcmp.eq.f32.partialorder %v9424_v14, %v9553_v25 }
 0x360   : > { %v9558_v46 = vpop.xlane.xlu1 %1319  ;;  %v1307_v5 = vsel %vm1306_vm11, %v1302_v32, inf }
 0x361   : > { %1308 = vmin.xlane.f32.xlu0 %v1307_v5  ;;  %vm1321_vm12 = vcmp.eq.f32.partialorder %v9431_v40, %v9558_v46  ;;  %v1375_v40 = vand.u32 65535, %v9468_v24  ;;  %v1206_v5 = vcvt.f32.s32 %v9506_v9 }
 0x362   : > { %v1322_v41 = vsel %vm1321_vm12, %v1317_v4, inf  ;;  %v9563_v27 = vpop.xlane.xlu0 %1334 }
 0x363   : > { %1323 = vmin.xlane.f32.xlu1 %v1322_v41  ;;  %vm1336_vm13 = vcmp.eq.f32.partialorder %v9444_v7, %v9563_v27  ;;  %v1390_v7 = vand.u32 65535, %v9482_v34  ;;  %v1377_v49 = vcvt.s32.f32 %v1375_v40  ;;  %v1221_v41 = vcvt.f32.s32 %v9508_v48 }
 0x364   : > { %v9567_v14 = vpop.xlane.xlu1 %1349  ;;  %v1337_v22 = vsel %vm1336_vm13, %v1332_v54, inf  ;;  %v14041_v48 = vmov 0.0  }
 0x365   : > { %1338 = vmin.xlane.f32.xlu0 %v1337_v22  ;;  %vm1351_vm14 = vcmp.eq.f32.partialorder %v9448_v36, %v9567_v14  ;;  %v1405_v36 = vand.u32 65535, %v9490_v57  ;;  %v1392_v63 = vcvt.s32.f32 %v1390_v7  ;;  %v9594_v57 = vld [vmem:[%s13988_s5] sm:$0xff]   ;;  %v1222_v40 = vshll.u32 %v1221_v41, 16 }
 0x366   : > { %v1352_v52 = vsel %vm1351_vm14, %v1347_v45, inf  ;;  %7466 = vmatprep.subr.bf16.mxu0 %v9594_v57  ;;  %v1207_v45 = vshll.u32 %v1206_v5, 16 }
 0x367   : > { %1353 = vmin.xlane.f32.xlu1 %v1352_v52  ;;  %v1407_v32 = vcvt.s32.f32 %v1405_v36  ;;  %7467 = vmatpush3.bf16.msra.mxu0 %v9594_v57 }
 0x36e   : > { %v9573_v16 = vpop.xlane.xlu0 %1364 }
 0x36f   : > { %vm1366_vm15 = vcmp.eq.f32.partialorder %v9472_v42, %v9573_v16 }
 0x370   : > { %v9578_v61 = vpop.xlane.xlu1 %1379  ;;  %v1367_v18 = vsel %vm1366_vm15, %v1362_v30, inf  ;;  %v1236_v30 = vcvt.f32.s32 %v9515_v19 }
 0x371   : > { %1368 = vmin.xlane.f32.xlu0 %v1367_v18  ;;  %vm1381_vm1 = vcmp.eq.f32.partialorder %v9479_v58, %v9578_v61  ;;  %v9599_v58 = vld [vmem:[%s13988_s5 + $0x8] sm:$0xff]  }
 0x372   : > { %v1382_v1 = vsel %vm1381_vm1, %v1377_v49, inf  ;;  %v9583_v24 = vpop.xlane.xlu0 %1394  ;;  %7468 = vmatprep.subr.bf16.mxu0 %v9599_v58  ;;  %v1237_v9 = vshll.u32 %v1236_v30, 16 }
 0x373   : > { %1383 = vmin.xlane.f32.xlu1 %v1382_v1  ;;  %vm1396_vm2 = vcmp.eq.f32.partialorder %v9492_v23, %v9583_v24  ;;  %v9607_v23 = vld [vmem:[%s13988_s5 + $0x10] sm:$0xff]   ;;  %7469 = vmatpush3.bf16.msra.mxu0 %v9599_v58 }
 0x374   : > { %v9587_v42 = vpop.xlane.xlu1 %1409  ;;  %v1397_v34 = vsel %vm1396_vm2, %v1392_v63, inf  ;;  %7470 = vmatprep.subr.bf16.mxu0 %v9607_v23 }
 0x375   : > { %1398 = vmin.xlane.f32.xlu0 %v1397_v34  ;;  %vm1411_vm3 = vcmp.eq.f32.partialorder %v9496_v60, %v9587_v42  ;;  %v1191_v60 = vcvt.f32.s32 %v9500_v51 }
 0x376   : > { %v1412_v33 = vsel %vm1411_vm3, %v1407_v32, inf }
 0x377   : > { %1413 = vmin.xlane.f32.xlu1 %v1412_v33  ;;  %7471 = vmatpush3.bf16.msra.mxu0 %v9607_v23  ;;  %v1192_v31 = vshll.u32 %v1191_v60, 16  ;;  %v1251_v33 = vcvt.f32.s32 %v9521_v37  ;;  %v1281_v37 = vcvt.f32.s32 %v9531_v3 }
 0x3ce   : > { %v1189_v4 = vpop.xlane.xlu0 %1188 }
 0x3cf   : > { %v1190_v54 = vcvt.f32.s32 %v1189_v4  ;;  %v1266_v4 = vcvt.f32.s32 %v9526_v15 }
 0x3d1   : > { %v1193_v22 = vadd.s32 %v1192_v31, %v1190_v54  ;;  %v1252_v54 = vshll.u32 %v1251_v33, 16  ;;  %v1311_v33 = vcvt.f32.s32 %v9553_v25 }
 0x3d2   : > { %v1204_v52 = vpop.xlane.xlu1 %1203  ;;  %v1219_v39 = vpop.xlane.xlu0 %1218 }
 0x3d3   : > { %v1205_v7 = vcvt.f32.s32 %v1204_v52  ;;  %v1220_v18 = vcvt.f32.s32 %v1219_v39  ;;  %vm1419_vm4 = vcmp.eq.s32.totalorder %v9305_v50, %v1193_v22  ;;  %v1267_v52 = vshll.u32 %v1266_v4, 16 }
 0x3d4   : > { %v9619_v63 = vsel %vm1419_vm4, 1.0, %v14041_v48  ;;  %v1296_v39 = vcvt.f32.s32 %v9535_v13 }
 0x3d5   : > { %v1208_v49 = vadd.s32 %v1207_v45, %v1205_v7  ;;  %v1223_v51 = vadd.s32 %v1222_v40, %v1220_v18  ;;  %14398 = vst [vmem:[#allocation43_spill] sm:$0xff] %v9619_v63  ;;  %v1282_v18 = vshll.u32 %v1281_v37, 16  ;;  %v1312_v37 = vshll.u32 %v1311_v33, 16 }
 0x3d6   : > { %v1234_v36 = vpop.xlane.xlu1 %1233  ;;  %v1371_v33 = vcvt.f32.s32 %v9573_v16 }
 0x3d7   : > { %vm1420_vm5 = vcmp.eq.s32.totalorder %v9305_v50, %v1208_v49  ;;  %v1235_v1 = vcvt.f32.s32 %v1234_v36  ;;  %vm1421_vm6 = vcmp.eq.s32.totalorder %v9305_v50, %v1223_v51  ;;  %v1297_v51 = vshll.u32 %v1296_v39, 16 }
 0x3d8   : > { %v9622_v34 = vsel %vm1420_vm5, 1.0, %v14041_v48  ;;  %v9631_v60 = vsel %vm1421_vm6, 1.0, %v14041_v48 }
 0x3d9   : > { %14399 = vst [vmem:[#allocation44_spill] sm:$0xff] %v9622_v34  ;;  %v1238_v19 = vadd.s32 %v1237_v9, %v1235_v1  ;;  %v1467_v32 = vpack.c.bf16 %v9622_v34, %v9619_v63  ;;  %14400 = vst [vmem:[#allocation45_spill] sm:$0xff] %v9631_v60 }
 0x3db   : > { %vm1422_vm7 = vcmp.eq.s32.totalorder %v9305_v50, %v1238_v19  ;;  %7450 = vmatprep.mubr.msk.bf16.mxu1 %vm938_vm0, %v1467_v32 }
 0x3dc   : > { %v9634_v5 = vsel %vm1422_vm7, 1.0, %v14041_v48 }
 0x3dd   : > { %14401 = vst [vmem:[#allocation46_spill] sm:$0xff] %v9634_v5  ;;  %v1468_v31 = vpack.c.bf16 %v9634_v5, %v9631_v60 }
 0x3de   : > { %v1249_v41 = vpop.xlane.xlu0 %1248 }
 0x3df   : > { %v1250_v22 = vcvt.f32.s32 %v1249_v41  ;;  %7451 = vmatmul.mubr.msk.bf16.vlgmr.msra.gmra.mrb[16].mxu1 %vm938_vm0, %v1468_v31 }
 0x3e0   : > { %v1264_v45 = vpop.xlane.xlu1 %1263 }
 0x3e1   : > { %v1253_v40 = vadd.s32 %v1252_v54, %v1250_v22  ;;  %v1265_v30 = vcvt.f32.s32 %v1264_v45  ;;  %v1326_v54 = vcvt.f32.s32 %v9558_v46 }
 0x3e2   : > { %v1279_v15 = vpop.xlane.xlu0 %1278 }
 0x3e3   : > { %vm1423_vm8 = vcmp.eq.s32.totalorder %v9305_v50, %v1253_v40  ;;  %v1268_v7 = vadd.s32 %v1267_v52, %v1265_v30  ;;  %v1280_v49 = vcvt.f32.s32 %v1279_v15  ;;  %v1341_v52 = vcvt.f32.s32 %v9563_v27 }
 0x3e4   : > { %v1294_v36 = vpop.xlane.xlu1 %1293  ;;  %v9645_v9 = vsel %vm1423_vm8, 1.0, %v14041_v48  ;;  %v1327_v25 = vshll.u32 %v1326_v54, 16  ;;  %v1356_v40 = vcvt.f32.s32 %v9567_v14 }
 0x3e5   : > { %vm1424_vm9 = vcmp.eq.s32.totalorder %v9305_v50, %v1268_v7  ;;  %14402 = vst [vmem:[#allocation47_spill] sm:$0xff] %v9645_v9  ;;  %v1283_v1 = vadd.s32 %v1282_v18, %v1280_v49  ;;  %v1295_v13 = vcvt.f32.s32 %v1294_v36  ;;  %v1342_v49 = vshll.u32 %v1341_v52, 16 }
 0x3e6   : > { %v9648_v3 = vsel %vm1424_vm9, 1.0, %v14041_v48  ;;  %v1357_v46 = vshll.u32 %v1356_v40, 16  ;;  %v1372_v52 = vshll.u32 %v1371_v33, 16 }
 0x3e7   : > { %14403 = vst [vmem:[#allocation48_spill] sm:$0xff] %v9648_v3  ;;  %v1469_v19 = vpack.c.bf16 %v9648_v3, %v9645_v9  ;;  %vm1425_vm11 = vcmp.eq.s32.totalorder %v9305_v50, %v1283_v1  ;;  %v1298_v32 = vadd.s32 %v1297_v51, %v1295_v13 }
 0x3e8   : > { %v9657_v4 = vsel %vm1425_vm11, 1.0, %v14041_v48 }
 0x3e9   : > { %7454 = vmatprep.mubr.msk.bf16.mxu1 %vm938_vm0, %v1469_v19  ;;  %vm1426_vm12 = vcmp.eq.s32.totalorder %v9305_v50, %v1298_v32  ;;  %14404 = vst [vmem:[#allocation49_spill] sm:$0xff] %v9657_v4 }
 0x3ea   : > { %v9660_v31 = vsel %vm1426_vm12, 1.0, %v14041_v48 }
 0x3eb   : > { %14405 = vst [vmem:[#allocation50_spill] sm:$0xff] %v9660_v31  ;;  %v1470_v41 = vpack.c.bf16 %v9660_v31, %v9657_v4 }
 0x3ed   : > { %7455 = vmatmul.mubr.msk.bf16.gmra.mrb[20].mxu1 %vm938_vm0, %v1470_v41 }
 0x3ee   : > { %v1309_v22 = vpop.xlane.xlu0 %1308 }
 0x3ef   : > { %v1310_v45 = vcvt.f32.s32 %v1309_v22 }
 0x3f0   : > { %v1324_v39 = vpop.xlane.xlu1 %1323 }
 0x3f1   : > { %v1313_v30 = vadd.s32 %v1312_v37, %v1310_v45  ;;  %v1325_v7 = vcvt.f32.s32 %v1324_v39  ;;  %v1386_v37 = vcvt.f32.s32 %v9578_v61 }
 0x3f2   : > { %v1339_v18 = vpop.xlane.xlu0 %1338 }
 0x3f3   : > { %vm1427_vm13 = vcmp.eq.s32.totalorder %v9305_v50, %v1313_v30  ;;  %v1328_v15 = vadd.s32 %v1327_v25, %v1325_v7  ;;  %v1340_v51 = vcvt.f32.s32 %v1339_v18  ;;  %v1401_v25 = vcvt.f32.s32 %v9583_v24 }
 0x3f4   : > { %v1354_v36 = vpop.xlane.xlu1 %1353  ;;  %v9671_v1 = vsel %vm1427_vm13, 1.0, %v14041_v48  ;;  %v1387_v16 = vshll.u32 %v1386_v37, 16  ;;  %v1416_v30 = vcvt.f32.s32 %v9587_v42 }
 0x3f5   : > { %vm1428_vm14 = vcmp.eq.s32.totalorder %v9305_v50, %v1328_v15  ;;  %14406 = vst [vmem:[#allocation51_spill] sm:$0xff] %v9671_v1  ;;  %v1343_v13 = vadd.s32 %v1342_v49, %v1340_v51  ;;  %v1355_v14 = vcvt.f32.s32 %v1354_v36  ;;  %v1402_v51 = vshll.u32 %v1401_v25, 16  ;;  %v9739_v25 = vld [vmem:[%s13988_s5 + $0x30] sm:$0xff]  }
 0x3f6   : > { %v9674_v27 = vsel %vm1428_vm14, 1.0, %v14041_v48  ;;  %v1417_v61 = vshll.u32 %v1416_v30, 16 }
 0x3f7   : > { %14407 = vst [vmem:[#allocation52_spill] sm:$0xff] %v9674_v27  ;;  %v1471_v19 = vpack.c.bf16 %v9674_v27, %v9671_v1  ;;  %vm1429_vm15 = vcmp.eq.s32.totalorder %v9305_v50, %v1343_v13  ;;  %v1358_v32 = vadd.s32 %v1357_v46, %v1355_v14 }
 0x3f8   : > { %v9683_v41 = vsel %vm1429_vm15, 1.0, %v14041_v48 }
 0x3f9   : > { %7458 = vmatprep.mubr.msk.bf16.mxu1 %vm938_vm0, %v1471_v19  ;;  %vm1430_vm1 = vcmp.eq.s32.totalorder %v9305_v50, %v1358_v32  ;;  %14408 = vst [vmem:[#allocation53_spill] sm:$0xff] %v9683_v41 }
 0x3fa   : > { %v9686_v54 = vsel %vm1430_vm1, 1.0, %v14041_v48 }
 0x3fb   : > { %14409 = vst [vmem:[#allocation54_spill] sm:$0xff] %v9686_v54  ;;  %v1472_v22 = vpack.c.bf16 %v9686_v54, %v9683_v41 }
 0x3fd   : > { %7459 = vmatmul.mubr.msk.bf16.gmra.mrb[24].mxu1 %vm938_vm0, %v1472_v22 }
 0x3fe   : > { %v1369_v45 = vpop.xlane.xlu0 %1368 }
 0x3ff   : > { %v1370_v39 = vcvt.f32.s32 %v1369_v45  ;;  %v9719_v45 = vld [vmem:[%s13988_s5 + $0x18] sm:$0xff]  }
 0x400   : > { %v1384_v40 = vpop.xlane.xlu1 %1383  ;;  %7472 = vmatprep.subr.bf16.mxu0 %v9719_v45 }
 0x401   : > { %v1373_v7 = vadd.s32 %v1372_v52, %v1370_v39  ;;  %v1385_v15 = vcvt.f32.s32 %v1384_v40  ;;  %7473 = vmatpush3.bf16.msra.mxu0 %v9719_v45  ;;  %v9726_v52 = vld [vmem:[%s13988_s5 + $0x20] sm:$0xff]   ;;  %v9731_v39 = vld [vmem:[%s13988_s5 + $0x28] sm:$0xff]   ;;  %v9747_v40 = vld [vmem:[%s13988_s5 + $0x38] sm:$0xff]  }
 0x402   : > { %v1399_v49 = vpop.xlane.xlu0 %1398  ;;  %7474 = vmatprep.subr.bf16.mxu0 %v9726_v52 }
 0x403   : > { %vm1431_vm2 = vcmp.eq.s32.totalorder %v9305_v50, %v1373_v7  ;;  %v1388_v18 = vadd.s32 %v1387_v16, %v1385_v15  ;;  %v1400_v46 = vcvt.f32.s32 %v1399_v49  ;;  %v9754_v16 = vld [vmem:[%s13984_s1 + $0x4] ss:$8 sps:$4 sm:$0xff]  }
 0x404   : > { %v1414_v36 = vpop.xlane.xlu1 %1413  ;;  %v9697_v13 = vsel %vm1431_vm2, 1.0, %v14041_v48 }
 0x405   : > { %vm1432_vm3 = vcmp.eq.s32.totalorder %v9305_v50, %v1388_v18  ;;  %14410 = vst [vmem:[#allocation55_spill] sm:$0xff] %v9697_v13  ;;  %v1403_v14 = vadd.s32 %v1402_v51, %v1400_v46  ;;  %v1415_v42 = vcvt.f32.s32 %v1414_v36  ;;  %7475 = vmatpush3.bf16.msra.mxu0 %v9726_v52  ;;  %v8017_v36 = vld [vmem:[%s13990_s7 + $0x8] sm:$0xff]  }
 0x406   : > { %v9700_v24 = vsel %vm1432_vm3, 1.0, %v14041_v48  ;;  %7476 = vmatprep.subr.bf16.mxu0 %v9731_v39 }
 0x407   : > { %14411 = vst [vmem:[#allocation56_spill] sm:$0xff] %v9700_v24  ;;  %v1473_v19 = vpack.c.bf16 %v9700_v24, %v9697_v13  ;;  %vm1433_vm4 = vcmp.eq.s32.totalorder %v9305_v50, %v1403_v14  ;;  %v1418_v32 = vadd.s32 %v1417_v61, %v1415_v42  ;;  %v9763_v61 = vld [vmem:[%s13990_s7] sm:$0xff]  }
 0x408   : > { %v9708_v33 = vsel %vm1433_vm4, 1.0, %v14041_v48  ;;  %7498 = vmatprep.subr.bf16.mxu1 %v9763_v61 }
 0x409   : > { %7462 = vmatprep.mubr.msk.bf16.mxu1 %vm938_vm0, %v1473_v19  ;;  %vm1434_vm5 = vcmp.eq.s32.totalorder %v9305_v50, %v1418_v32  ;;  %14412 = vst [vmem:[#allocation57_spill] sm:$0xff] %v9708_v33  ;;  %7477 = vmatpush3.bf16.msra.mxu0 %v9731_v39  ;;  %v8020_v32 = vld [vmem:[%s13990_s7 + $0x20] sm:$0xff]  }
 0x40a   : > { %v9711_v22 = vsel %vm1434_vm5, 1.0, %v14041_v48  ;;  %7478 = vmatprep.subr.bf16.mxu0 %v9739_v25  ;;  %7499 = vmatpush3.bf16.msra.mxu1 %v9763_v61 }
 0x40b   : > { %14413 = vst [vmem:[#allocation58_spill] sm:$0xff] %v9711_v22  ;;  %v1474_v37 = vpack.c.bf16 %v9711_v22, %v9708_v33  ;;  %7500 = vmatprep.subr.bf16.mxu1 %v8017_v36 }
 0x40d   : > { %7463 = vmatmul.mubr.msk.bf16.gmra.mrb[28].mxu1 %vm938_vm0, %v1474_v37  ;;  %7479 = vmatpush3.bf16.msra.mxu0 %v9739_v25 }
 0x40e   : > { %7480 = vmatprep.subr.bf16.mxu0 %v9747_v40  ;;  %7501 = vmatpush3.bf16.msra.mxu1 %v8017_v36 }
 0x411   : > { %7481 = vmatpush3.bf16.msra.mxu0 %v9747_v40 }
 0x412   : > { %2270 = vmatprep.subr.bf16.mxu0 %v9754_v16 }
 0x4b2   : > { %v7452_v30 = vpop.f32.mrb[16].mxu1 }
 0x4b3   : > { %v1602_v7 = vadd.f32 %v7452_v30, %v9196_v62  ;;  %v1537_v15 = vpop.f32.mrb[17].mxu1 }
 0x4b4   : > { %v1600_v18 = vadd.f32 %v1537_v15, %v9190_v53  ;;  %v7453_v49 = vpop.f32.mrb[18].mxu1  ;;  %v8018_v53 = vld [vmem:[%s13990_s7 + $0x10] sm:$0xff]  }
 0x4b5   : > { %8032 = vtanh.f32 %v1602_v7  ;;  %v1603_v51 = vadd.f32 %v7453_v49, %v9199_v2  ;;  %v1540_v46 = vpop.f32.mrb[19].mxu1  ;;  %7502 = vmatprep.subr.bf16.mxu1 %v8018_v53  ;;  %v8019_v2 = vld [vmem:[%s13990_s7 + $0x18] sm:$0xff]  }
 0x4b6   : > { %8034 = vtanh.f32 %v1600_v18  ;;  %v1601_v62 = vadd.f32 %v1540_v46, %v9193_v56  ;;  %7503 = vmatpush3.bf16.msra.mxu1 %v8018_v53  ;;  %v8676_v53 = vld [vmem:[%s13984_s1 + $0x24] ss:$8 sps:$4 sm:$0xff]  }
 0x4b7   : > { %8036 = vtanh.f32 %v1603_v51  ;;  %7504 = vmatprep.subr.bf16.mxu1 %v8019_v2 }
 0x4b8   : > { %8038 = vtanh.f32 %v1601_v62 }
 0x4ba   : > { %7505 = vmatpush3.bf16.msra.mxu1 %v8019_v2 }
 0x4bb   : > { %7506 = vmatprep.subr.bf16.mxu1 %v8020_v32 }
 0x4be   : > { %7507 = vmatpush3.bf16.msra.mxu1 %v8020_v32 }
 0x4bf   : > { %v8033_v14 = vpop.eup %8032 }
 0x4c0   : > { %v8035_v42 = vpop.eup %8034  ;;  %v7456_v19 = vpop.f32.mrb[20].mxu1 }
 0x4c1   : > { %v8037_v56 = vpop.eup %8036  ;;  %v1606_v30 = vadd.f32 %v7456_v19, %v9208_v17  ;;  %v1553_v7 = vpop.f32.mrb[21].mxu1  ;;  %v8021_v17 = vld [vmem:[%s13990_s7 + $0x28] sm:$0xff]   ;;  %v8678_v19 = vld [vmem:[%s13984_s1 + $0x34] ss:$8 sps:$4 sm:$0xff]  }
 0x4c2   : > { %v8039_v37 = vpop.eup %8038  ;;  %v9781_v15 = vpack.c.bf16 %v8037_v56, %v8033_v14  ;;  %v1604_v18 = vadd.f32 %v1553_v7, %v9202_v8  ;;  %v7457_v49 = vpop.f32.mrb[22].mxu1  ;;  %v8673_v8 = vld [vmem:[%s13984_s1] ss:$8 sps:$4 sm:$0xff]   ;;  %7508 = vmatprep.subr.bf16.mxu1 %v8021_v17 }
 0x4c3   : > { %v9784_v51 = vpack.c.bf16 %v8039_v37, %v8035_v42  ;;  %8040 = vtanh.f32 %v1606_v30  ;;  %v1607_v46 = vadd.f32 %v7457_v49, %v9211_v20  ;;  %v1556_v36 = vpop.f32.mrb[23].mxu1  ;;  %v8675_v20 = vld [vmem:[%s13984_s1 + $0x10] ss:$8 sps:$4 sm:$0xff]   ;;  %7509 = vmatpush3.bf16.msra.mxu1 %v8021_v17  ;;  %v8677_v42 = vld [vmem:[%s13984_s1 + $0x20] ss:$8 sps:$4 sm:$0xff]  }
 0x4c4   : > { %8042 = vtanh.f32 %v1604_v18  ;;  %v1605_v62 = vadd.f32 %v1556_v36, %v9205_v11  ;;  %v8674_v11 = vld [vmem:[%s13984_s1 + $0x14] ss:$8 sps:$4 sm:$0xff]  }
 0x4c5   : > { %7482 = vmatprep.mubr.bf16.mxu0 %v9784_v51  ;;  %8044 = vtanh.f32 %v1607_v46 }
 0x4c6   : > { %7483 = vmatmul.mubr.bf16.vlgmr.msra.gmra.mrb[32].mxu0 %v9781_v15  ;;  %8046 = vtanh.f32 %v1605_v62  ;;  %v8679_v62 = vld [vmem:[%s13984_s1 + $0x30] ss:$8 sps:$4 sm:$0xff]  }
 0x4c7   : > { %2271 = vmatpush1.bf16.msra.mxu0 %v8673_v8 }
 0x4c8   : > { %2272 = vmatprep.subr.bf16.mxu0 %v8674_v11  ;;  %v8681_v11 = vld [vmem:[%s13984_s1 + $0x40] ss:$8 sps:$4 sm:$0xff]  }
 0x4cb   : > { %2273 = vmatpush1.bf16.msra.mxu0 %v8675_v20  ;;  %v8683_v20 = vld [vmem:[%s13984_s1 + $0x50] ss:$8 sps:$4 sm:$0xff]  }
 0x4cc   : > { %2274 = vmatprep.subr.bf16.mxu0 %v8676_v53 }
 0x4cd   : > { %v8041_v2 = vpop.eup %8040 }
 0x4ce   : > { %v8043_v14 = vpop.eup %8042 }
 0x4cf   : > { %2275 = vmatpush1.bf16.msra.mxu0 %v8677_v42  ;;  %v8045_v56 = vpop.eup %8044 }
 0x4d0   : > { %2276 = vmatprep.subr.bf16.mxu0 %v8678_v19  ;;  %v8047_v32 = vpop.eup %8046  ;;  %v7460_v37 = vpop.f32.mrb[24].mxu1  ;;  %v9811_v30 = vpack.c.bf16 %v8045_v56, %v8041_v2  ;;  %v8686_v56 = vld [vmem:[%s13984_s1 + $0x74] ss:$8 sps:$4 sm:$0xff]  }
 0x4d1   : > { %v1610_v7 = vadd.f32 %v7460_v37, %v9220_v35  ;;  %v1569_v18 = vpop.f32.mrb[25].mxu1  ;;  %v9814_v49 = vpack.c.bf16 %v8047_v32, %v8043_v14  ;;  %v8680_v35 = vld [vmem:[%s13984_s1 + $0x44] ss:$8 sps:$4 sm:$0xff]   ;;  %v8685_v14 = vld [vmem:[%s13984_s1 + $0x60] ss:$8 sps:$4 sm:$0xff]  }
 0x4d2   : > { %v1608_v46 = vadd.f32 %v1569_v18, %v9214_v26  ;;  %v7461_v36 = vpop.f32.mrb[26].mxu1 }
 0x4d3   : > { %2277 = vmatpush1.bf16.msra.mxu0 %v8679_v62  ;;  %8048 = vtanh.f32 %v1610_v7  ;;  %v1611_v17 = vadd.f32 %v7461_v36, %v9223_v38  ;;  %v1572_v8 = vpop.f32.mrb[27].mxu1  ;;  %7486 = vmatprep.mubr.bf16.mxu0 %v9814_v49  ;;  %v8682_v38 = vld [vmem:[%s13984_s1 + $0x54] ss:$8 sps:$4 sm:$0xff]  }
 0x4d4   : > { %2278 = vmatprep.subr.bf16.mxu0 %v8680_v35  ;;  %8050 = vtanh.f32 %v1608_v46  ;;  %v1609_v26 = vadd.f32 %v1572_v8, %v9217_v29  ;;  %7487 = vmatmul.mubr.bf16.gmra.mrb[36].mxu0 %v9811_v30  ;;  %v8684_v29 = vld [vmem:[%s13984_s1 + $0x64] ss:$8 sps:$4 sm:$0xff]  }
 0x4d5   : > { %8052 = vtanh.f32 %v1611_v17  ;;  %v8687_v17 = vld [vmem:[%s13984_s1 + $0x70] ss:$8 sps:$4 sm:$0xff]  }
 0x4d6   : > { %8054 = vtanh.f32 %v1609_v26 }
 0x4d7   : > { %2279 = vmatpush1.bf16.msra.mxu0 %v8681_v11 }
 0x4d8   : > { %2280 = vmatprep.subr.bf16.mxu0 %v8682_v38 }
 0x4db   : > { %2281 = vmatpush1.bf16.msra.mxu0 %v8683_v20 }
 0x4dc   : > { %2282 = vmatprep.subr.bf16.mxu0 %v8684_v29 }
 0x4dd   : > { %v8049_v53 = vpop.eup %8048 }
 0x4de   : > { %v8051_v2 = vpop.eup %8050 }
 0x4df   : > { %2283 = vmatpush1.bf16.msra.mxu0 %v8685_v14  ;;  %v8053_v42 = vpop.eup %8052 }
 0x4e0   : > { %2284 = vmatprep.subr.bf16.mxu0 %v8686_v56  ;;  %v8055_v19 = vpop.eup %8054  ;;  %v7464_v32 = vpop.f32.mrb[28].mxu1  ;;  %v1637_v37 = vpack.c.bf16 %v8053_v42, %v8049_v53  ;;  %v14414_v53 = vmov 0   ;;  %v8689_v56 = vld [vmem:[%s13986_s3 + $0x8] sm:$0xff]  }
 0x4e1   : > { %v1614_v7 = vadd.f32 %v7464_v32, %v9232_v55  ;;  %v1585_v18 = vpop.f32.mrb[29].mxu1  ;;  %v1636_v46 = vpack.c.bf16 %v8055_v19, %v8051_v2 }
 0x4e2   : > { %v1612_v36 = vadd.f32 %v1585_v18, %v9226_v44  ;;  %v7465_v62 = vpop.f32.mrb[30].mxu1 }
 0x4e3   : > { %2285 = vmatpush1.bf16.msra.mxu0 %v8687_v17  ;;  %8056 = vtanh.f32 %v1614_v7  ;;  %v1615_v8 = vadd.f32 %v7465_v62, %v9235_v59  ;;  %v1588_v35 = vpop.f32.mrb[31].mxu1  ;;  %7490 = vmatprep.mubr.bf16.mxu0 %v1636_v46  ;;  %v8023_v59 = vld [vmem:[%s13990_s7 + $0x38] sm:$0xff]  }
 0x4e4   : > { %7580 = vmatprep.subr.bf16.mxu0 %v9594_v57  ;;  %8058 = vtanh.f32 %v1612_v36  ;;  %v1613_v55 = vadd.f32 %v1588_v35, %v9229_v47  ;;  %7491 = vmatmul.mubr.bf16.gmra.mrb[40].mxu0 %v1637_v37  ;;  %v8022_v47 = vld [vmem:[%s13990_s7 + $0x30] sm:$0xff]  }
 0x4e5   : > { %8060 = vtanh.f32 %v1615_v8  ;;  %7510 = vmatprep.subr.bf16.mxu1 %v8022_v47 }
 0x4e6   : > { %8062 = vtanh.f32 %v1613_v55  ;;  %7511 = vmatpush3.bf16.msra.mxu1 %v8022_v47 }
 0x4e7   : > { %7512 = vmatprep.subr.bf16.mxu1 %v8023_v59 }
 0x4ea   : > { %7513 = vmatpush3.bf16.msra.mxu1 %v8023_v59 }
 0x4ed   : > { %v8057_v44 = vpop.eup %8056 }
 0x4ee   : > { %v8059_v26 = vpop.eup %8058 }
 0x4ef   : > { %v8061_v11 = vpop.eup %8060 }
 0x4f0   : > { %v8063_v38 = vpop.eup %8062  ;;  %v1639_v20 = vpack.c.bf16 %v8061_v11, %v8057_v44 }
 0x4f1   : > { %v1638_v29 = vpack.c.bf16 %v8063_v38, %v8059_v26  ;;  %v8691_v26 = vld [vmem:[%s13986_s3 + $0x18] sm:$0xff]  }
 0x4f3   : > { %7494 = vmatprep.mubr.bf16.mxu0 %v1638_v29 }
 0x4f4   : > { %7495 = vmatmul.mubr.bf16.gmra.mrb[44].mxu0 %v1639_v20 }
 0x4f5   : > { %2302 = vmatprep.mubr.bf16.mxu0 %v14414_v53 }
 0x4fc   : > { %2303 = vmatmul.mubr.bf16.vlgmr.msra.gmra.mrb[48].mxu0 %v9784_v51 }
 0x4fd   : > { %2312 = vmatprep.mubr.bf16.mxu0 %v14414_v53  ;;  %7581 = vmatpush3.bf16.msra.mxu0 %v9594_v57  ;;  %v8688_v57 = vld [vmem:[%s13986_s3] sm:$0xff]  }
 0x4fe   : > { %7582 = vmatprep.subr.bf16.mxu0 %v9599_v58  ;;  %7530 = vmatprep.subr.bf16.mxu1 %v8688_v57 }
 0x501   : > { %7583 = vmatpush3.bf16.msra.mxu0 %v9599_v58  ;;  %v9893_v58 = vld [vmem:[%s13989_s6] ss:$0 sm:$0xff] }
 0x502   : > { %7584 = vmatprep.subr.bf16.mxu0 %v9607_v23 }
 0x504   : > { %2313 = vmatmul.mubr.bf16.gmra.mrb[52].mxu0 %v9781_v15 }
 0x505   : > { %2322 = vmatprep.mubr.bf16.mxu0 %v14414_v53  ;;  %7585 = vmatpush3.bf16.msra.mxu0 %v9607_v23 }
 0x506   : > { %7586 = vmatprep.subr.bf16.mxu0 %v9719_v45 }
 0x509   : > { %7587 = vmatpush3.bf16.msra.mxu0 %v9719_v45 }
 0x50a   : > { %7588 = vmatprep.subr.bf16.mxu0 %v9726_v52 }
 0x50c   : > { %2323 = vmatmul.mubr.bf16.gmra.mrb[56].mxu0 %v9814_v49 }
 0x50d   : > { %2332 = vmatprep.mubr.bf16.mxu0 %v14414_v53  ;;  %7589 = vmatpush3.bf16.msra.mxu0 %v9726_v52 }
 0x50e   : > { %7590 = vmatprep.subr.bf16.mxu0 %v9731_v39 }
 0x511   : > { %7591 = vmatpush3.bf16.msra.mxu0 %v9731_v39 }
 0x512   : > { %7592 = vmatprep.subr.bf16.mxu0 %v9739_v25 }
 0x514   : > { %2333 = vmatmul.mubr.bf16.gmra.mrb[60].mxu0 %v9811_v30 }
 0x515   : > { %2342 = vmatprep.mubr.bf16.mxu0 %v14414_v53  ;;  %7593 = vmatpush3.bf16.msra.mxu0 %v9739_v25 }
 0x516   : > { %7594 = vmatprep.subr.bf16.mxu0 %v9747_v40 }
 0x519   : > { %7595 = vmatpush3.bf16.msra.mxu0 %v9747_v40 }
 0x51a   : > { %3739 = vmatprep.subr.bf16.mxu0 %v9754_v16 }
 0x51c   : > { %2343 = vmatmul.mubr.bf16.gmra.mrb[64].mxu0 %v1636_v46  ;;  %v8690_v46 = vld [vmem:[%s13986_s3 + $0x10] sm:$0xff]  }
 0x51d   : > { %2352 = vmatprep.mubr.bf16.mxu0 %v14414_v53 }
 0x524   : > { %2353 = vmatmul.mubr.bf16.gmra.mrb[68].mxu0 %v1637_v37 }
 0x525   : > { %2362 = vmatprep.mubr.bf16.mxu0 %v14414_v53 }
 0x52c   : > { %2363 = vmatmul.mubr.bf16.gmra.mrb[72].mxu0 %v1638_v29  ;;  %v8693_v29 = vld [vmem:[%s13986_s3 + $0x28] sm:$0xff]  }
 0x52d   : > { %2372 = vmatprep.mubr.bf16.mxu0 %v14414_v53 }
 0x534   : > { %2373 = vmatmul.mubr.bf16.gmra.mrb[76].mxu0 %v1639_v20  ;;  %v8692_v20 = vld [vmem:[%s13986_s3 + $0x20] sm:$0xff]  }
 0x599   : > { %v7484_v23 = vpop.f32.mrb[32].mxu0 }
 0x59a   : > { %v1737_v45 = vadd.f32 %v7484_v23, %v9893_v58  ;;  %v1728_v52 = vpop.f32.mrb[33].mxu0 }
 0x59b   : > { %v1729_v39 = vadd.f32 %v9893_v58, %v1728_v52  ;;  %v7485_v25 = vpop.f32.mrb[34].mxu0  ;;  %v8694_v52 = vld [vmem:[%s13986_s3 + $0x30] sm:$0xff]  }
 0x59c   : > { %v1740_v40 = vadd.f32 %v7485_v25, %v9893_v58  ;;  %v1731_v16 = vpop.f32.mrb[35].mxu0  ;;  %v1793_v51 = vmax.f32 %v1737_v45, 0.0 }
 0x59d   : > { %v1732_v15 = vadd.f32 %v9893_v58, %v1731_v16  ;;  %v1791_v49 = vmax.f32 %v1729_v39, 0.0 }
 0x59e   : > { %v1794_v30 = vmax.f32 %v1740_v40, 0.0 }
 0x59f   : > { %v1792_v2 = vmax.f32 %v1732_v15, 0.0 }
 0x5a0   : > { %v1808_v14 = vpack.c.bf16 %v1794_v30, %v1793_v51 }
 0x5a1   : > { %v1807_v42 = vpack.c.bf16 %v1792_v2, %v1791_v49  ;;  %v8695_v49 = vld [vmem:[%s13986_s3 + $0x38] sm:$0xff]  }
 0x5a3   : > { %7514 = vmatprep.mubr.bf16.mxu1 %v1807_v42 }
 0x5a4   : > { %7515 = vmatmul.mubr.bf16.vlgmr.msra.gmra.mrb[32].mxu1 %v1808_v14 }
 0x5a5   : > { %7531 = vmatpush3.bf16.msra.mxu1 %v8688_v57 }
 0x5a6   : > { %7532 = vmatprep.subr.bf16.mxu1 %v8689_v56 }
 0x5a7   : > { %v7488_v19 = vpop.f32.mrb[36].mxu0 }
 0x5a8   : > { %v1753_v32 = vadd.f32 %v7488_v19, %v9893_v58  ;;  %v1744_v37 = vpop.f32.mrb[37].mxu0 }
 0x5a9   : > { %7533 = vmatpush3.bf16.msra.mxu1 %v8689_v56  ;;  %v1745_v7 = vadd.f32 %v9893_v58, %v1744_v37  ;;  %v7489_v18 = vpop.f32.mrb[38].mxu0 }
 0x5aa   : > { %7534 = vmatprep.subr.bf16.mxu1 %v8690_v46  ;;  %v1756_v36 = vadd.f32 %v7489_v18, %v9893_v58  ;;  %v1747_v62 = vpop.f32.mrb[39].mxu0  ;;  %v1797_v8 = vmax.f32 %v1753_v32, 0.0 }
 0x5ab   : > { %v1748_v17 = vadd.f32 %v9893_v58, %v1747_v62  ;;  %v1795_v55 = vmax.f32 %v1745_v7, 0.0 }
 0x5ac   : > { %v1798_v35 = vmax.f32 %v1756_v36, 0.0 }
 0x5ad   : > { %7535 = vmatpush3.bf16.msra.mxu1 %v8690_v46  ;;  %v1796_v44 = vmax.f32 %v1748_v17, 0.0 }
 0x5ae   : > { %7536 = vmatprep.subr.bf16.mxu1 %v8691_v26  ;;  %v1810_v11 = vpack.c.bf16 %v1798_v35, %v1797_v8 }
 0x5af   : > { %v1809_v38 = vpack.c.bf16 %v1796_v44, %v1795_v55  ;;  %v9937_v44 = vld [vmem:[%s13985_s2] ss:$0 sm:$0xff] }
 0x5b1   : > { %7537 = vmatpush3.bf16.msra.mxu1 %v8691_v26  ;;  %7518 = vmatprep.mubr.bf16.mxu1 %v1809_v38 }
 0x5b2   : > { %7538 = vmatprep.subr.bf16.mxu1 %v8692_v20  ;;  %7519 = vmatmul.mubr.bf16.gmra.mrb[36].mxu1 %v1810_v11 }
 0x5b5   : > { %7539 = vmatpush3.bf16.msra.mxu1 %v8692_v20 }
 0x5b6   : > { %7540 = vmatprep.subr.bf16.mxu1 %v8693_v29 }
 0x5b7   : > { %v7492_v47 = vpop.f32.mrb[40].mxu0 }
 0x5b8   : > { %v1769_v59 = vadd.f32 %v7492_v47, %v9893_v58  ;;  %v1760_v57 = vpop.f32.mrb[41].mxu0 }
 0x5b9   : > { %7541 = vmatpush3.bf16.msra.mxu1 %v8693_v29  ;;  %v1761_v23 = vadd.f32 %v9893_v58, %v1760_v57  ;;  %v7493_v45 = vpop.f32.mrb[42].mxu0 }
 0x5ba   : > { %7542 = vmatprep.subr.bf16.mxu1 %v8694_v52  ;;  %v1772_v39 = vadd.f32 %v7493_v45, %v9893_v58  ;;  %v1763_v25 = vpop.f32.mrb[43].mxu0  ;;  %v1801_v16 = vmax.f32 %v1769_v59, 0.0 }
 0x5bb   : > { %v1764_v40 = vadd.f32 %v9893_v58, %v1763_v25  ;;  %v1799_v51 = vmax.f32 %v1761_v23, 0.0 }
 0x5bc   : > { %v1802_v15 = vmax.f32 %v1772_v39, 0.0 }
 0x5bd   : > { %7543 = vmatpush3.bf16.msra.mxu1 %v8694_v52  ;;  %v1800_v30 = vmax.f32 %v1764_v40, 0.0 }
 0x5be   : > { %7544 = vmatprep.subr.bf16.mxu1 %v8695_v49  ;;  %v1812_v2 = vpack.c.bf16 %v1802_v15, %v1801_v16 }
 0x5bf   : > { %v1811_v14 = vpack.c.bf16 %v1800_v30, %v1799_v51 }
 0x5c1   : > { %7545 = vmatpush3.bf16.msra.mxu1 %v8695_v49  ;;  %7522 = vmatprep.mubr.bf16.mxu1 %v1811_v14 }
 0x5c2   : > { %7921 = vmatprep.subr.msk.bf16.mxu1 %vm1499_vm10, %v9542_v28  ;;  %7523 = vmatmul.mubr.bf16.gmra.mrb[40].mxu1 %v1812_v2 }
 0x5c7   : > { %v7496_v42 = vpop.f32.mrb[44].mxu0 }
 0x5c8   : > { %v1785_v56 = vadd.f32 %v7496_v42, %v9893_v58  ;;  %v1776_v19 = vpop.f32.mrb[45].mxu0 }
 0x5c9   : > { %v1777_v32 = vadd.f32 %v9893_v58, %v1776_v19  ;;  %v7497_v37 = vpop.f32.mrb[46].mxu0 }
 0x5ca   : > { %v1788_v7 = vadd.f32 %v7497_v37, %v9893_v58  ;;  %v1779_v18 = vpop.f32.mrb[47].mxu0  ;;  %v1805_v36 = vmax.f32 %v1785_v56, 0.0 }
 0x5cb   : > { %v1780_v46 = vadd.f32 %v9893_v58, %v1779_v18  ;;  %v1803_v17 = vmax.f32 %v1777_v32, 0.0 }
 0x5cc   : > { %v1806_v62 = vmax.f32 %v1788_v7, 0.0 }
 0x5cd   : > { %v1804_v8 = vmax.f32 %v1780_v46, 0.0 }
 0x5ce   : > { %v1814_v35 = vpack.c.bf16 %v1806_v62, %v1805_v36 }
 0x5cf   : > { %v1813_v55 = vpack.c.bf16 %v1804_v8, %v1803_v17  ;;  %v2304_v28 = vpop.f32.mrb[48].mxu0 }
 0x5d0   : > { %v2383_v26 = vadd.f32 %v9937_v44, %v2304_v28  ;;  %v9940_v11 = vpop.f32.mrb[49].mxu0 }
 0x5d1   : > { %7526 = vmatprep.mubr.bf16.mxu1 %v1813_v55  ;;  %v2308_v38 = vpop.f32.mrb[50].mxu0 }
 0x5d2   : > { %v2384_v58 = vadd.f32 %v9937_v44, %v2308_v38  ;;  %7527 = vmatmul.mubr.bf16.gmra.mrb[44].mxu1 %v1814_v35  ;;  %v9943_v20 = vpop.f32.mrb[51].mxu0  ;;  %v2399_v29 = vmax.f32 %v2383_v26, 0.0 }
 0x5d4   : > { %v2400_v47 = vmax.f32 %v2384_v58, 0.0 }
 0x5d6   : > { %v2415_v59 = vpack.c.bf16 %v2400_v47, %v2399_v29 }
 0x5d7   : > { %v2314_v57 = vpop.f32.mrb[52].mxu0 }
 0x5d8   : > { %v2385_v23 = vadd.f32 %v9937_v44, %v2314_v57  ;;  %v9946_v45 = vpop.f32.mrb[53].mxu0  ;;  %7546 = vmatprep.mubr.bf16.mxu1 %v2415_v59 }
 0x5d9   : > { %v2318_v52 = vpop.f32.mrb[54].mxu0 }
 0x5da   : > { %v2386_v39 = vadd.f32 %v9937_v44, %v2318_v52  ;;  %v9949_v25 = vpop.f32.mrb[55].mxu0  ;;  %v2401_v40 = vmax.f32 %v2385_v23, 0.0 }
 0x5dc   : > { %v2402_v16 = vmax.f32 %v2386_v39, 0.0 }
 0x5de   : > { %v2416_v15 = vpack.c.bf16 %v2402_v16, %v2401_v40 }
 0x5df   : > { %v2324_v51 = vpop.f32.mrb[56].mxu0 }
 0x5e0   : > { %v2387_v30 = vadd.f32 %v9937_v44, %v2324_v51  ;;  %v9952_v49 = vpop.f32.mrb[57].mxu0  ;;  %7547 = vmatmul.mubr.bf16.vlgmr.msra.gmra.mrb[48].mxu1 %v2416_v15 }
 0x5e1   : > { %v2328_v2 = vpop.f32.mrb[58].mxu0  ;;  %7563 = vmatpush3.bf16.msra.mxu1 %v9548_v43 }
 0x5e2   : > { %v2388_v14 = vadd.f32 %v9937_v44, %v2328_v2  ;;  %v9956_v42 = vpop.f32.mrb[59].mxu0  ;;  %7612 = vmatprep.subr.bf16.mxu1 %v9763_v61  ;;  %v2403_v56 = vmax.f32 %v2387_v30, 0.0 }
 0x5e4   : > { %v2404_v19 = vmax.f32 %v2388_v14, 0.0 }
 0x5e6   : > { %v2417_v32 = vpack.c.bf16 %v2404_v19, %v2403_v56 }
 0x5e7   : > { %v2334_v37 = vpop.f32.mrb[60].mxu0 }
 0x5e8   : > { %v2389_v7 = vadd.f32 %v9937_v44, %v2334_v37  ;;  %v9960_v18 = vpop.f32.mrb[61].mxu0  ;;  %7550 = vmatprep.mubr.bf16.mxu1 %v2417_v32 }
 0x5e9   : > { %v2338_v46 = vpop.f32.mrb[62].mxu0 }
 0x5ea   : > { %v2390_v36 = vadd.f32 %v9937_v44, %v2338_v46  ;;  %v9963_v62 = vpop.f32.mrb[63].mxu0  ;;  %v2405_v17 = vmax.f32 %v2389_v7, 0.0 }
 0x5ec   : > { %v2406_v8 = vmax.f32 %v2390_v36, 0.0 }
 0x5ee   : > { %v2418_v35 = vpack.c.bf16 %v2406_v8, %v2405_v17 }
 0x5ef   : > { %v2344_v55 = vpop.f32.mrb[64].mxu0 }
 0x5f0   : > { %v2391_v61 = vadd.f32 %v9937_v44, %v2344_v55  ;;  %v9966_v28 = vpop.f32.mrb[65].mxu0  ;;  %7551 = vmatmul.mubr.bf16.gmra.mrb[52].mxu1 %v2418_v35 }
 0x5f1   : > { %v2348_v26 = vpop.f32.mrb[66].mxu0 }
 0x5f2   : > { %v2392_v38 = vadd.f32 %v9937_v44, %v2348_v26  ;;  %v9969_v58 = vpop.f32.mrb[67].mxu0  ;;  %v2407_v29 = vmax.f32 %v2391_v61, 0.0 }
 0x5f4   : > { %v2408_v47 = vmax.f32 %v2392_v38, 0.0 }
 0x5f6   : > { %v2419_v59 = vpack.c.bf16 %v2408_v47, %v2407_v29 }
 0x5f7   : > { %v2354_v57 = vpop.f32.mrb[68].mxu0 }
 0x5f8   : > { %v2393_v23 = vadd.f32 %v9937_v44, %v2354_v57  ;;  %v9972_v52 = vpop.f32.mrb[69].mxu0  ;;  %7554 = vmatprep.mubr.bf16.mxu1 %v2419_v59 }
 0x5f9   : > { %v2358_v39 = vpop.f32.mrb[70].mxu0 }
 0x5fa   : > { %v2394_v40 = vadd.f32 %v9937_v44, %v2358_v39  ;;  %v9975_v16 = vpop.f32.mrb[71].mxu0  ;;  %v2409_v15 = vmax.f32 %v2393_v23, 0.0 }
 0x5fc   : > { %v2410_v51 = vmax.f32 %v2394_v40, 0.0 }
 0x5fe   : > { %v2420_v30 = vpack.c.bf16 %v2410_v51, %v2409_v15 }
 0x5ff   : > { %v2364_v2 = vpop.f32.mrb[72].mxu0 }
 0x600   : > { %v2395_v14 = vadd.f32 %v9937_v44, %v2364_v2  ;;  %v9978_v56 = vpop.f32.mrb[73].mxu0  ;;  %7555 = vmatmul.mubr.bf16.gmra.mrb[56].mxu1 %v2420_v30 }
 0x601   : > { %v2368_v19 = vpop.f32.mrb[74].mxu0 }
 0x602   : > { %v2396_v32 = vadd.f32 %v9937_v44, %v2368_v19  ;;  %v9981_v37 = vpop.f32.mrb[75].mxu0  ;;  %v2411_v7 = vmax.f32 %v2395_v14, 0.0 }
 0x604   : > { %v2412_v46 = vmax.f32 %v2396_v32, 0.0 }
 0x606   : > { %v2421_v36 = vpack.c.bf16 %v2412_v46, %v2411_v7 }
 0x607   : > { %v2374_v17 = vpop.f32.mrb[76].mxu0 }
 0x608   : > { %v2397_v8 = vadd.f32 %v9937_v44, %v2374_v17  ;;  %v9984_v35 = vpop.f32.mrb[77].mxu0  ;;  %7558 = vmatprep.mubr.bf16.mxu1 %v2421_v36 }
 0x609   : > { %v2378_v55 = vpop.f32.mrb[78].mxu0 }
 0x60a   : > { %v2398_v61 = vadd.f32 %v9937_v44, %v2378_v55  ;;  %v9987_v26 = vpop.f32.mrb[79].mxu0  ;;  %v2413_v38 = vmax.f32 %v2397_v8, 0.0  ;;  %v8697_v55 = vld [vmem:[%s13987_s4] ss:$0 sm:$0xff] }
 0x60c   : > { %v2414_v29 = vmax.f32 %v2398_v61, 0.0 }
 0x60e   : > { %v2422_v47 = vpack.c.bf16 %v2414_v29, %v2413_v38 }
 0x610   : > { %7559 = vmatmul.mubr.bf16.gmra.mrb[60].mxu1 %v2422_v47 }
 0x677   : > { %v9989_v59 = vpop.f32.mrb[32].mxu1 }
 0x678   : > { %14415 = vst [vmem:[#allocation59_spill] sm:$0xff] %v9989_v59  ;;  %v9991_v57 = vpop.f32.mrb[33].mxu1 }
 0x679   : > { %14416 = vst [vmem:[#allocation60_spill] sm:$0xff] %v9991_v57  ;;  %v9993_v23 = vpop.f32.mrb[34].mxu1 }
 0x67a   : > { %14417 = vst [vmem:[#allocation61_spill] sm:$0xff] %v9993_v23  ;;  %v9995_v39 = vpop.f32.mrb[35].mxu1 }
 0x67b   : > { %14418 = vst [vmem:[#allocation62_spill] sm:$0xff] %v9995_v39 }
 0x685   : > { %v9997_v40 = vpop.f32.mrb[36].mxu1 }
 0x686   : > { %14419 = vst [vmem:[#allocation63_spill] sm:$0xff] %v9997_v40  ;;  %v9999_v15 = vpop.f32.mrb[37].mxu1 }
 0x687   : > { %14420 = vst [vmem:[#allocation64_spill] sm:$0xff] %v9999_v15  ;;  %v10001_v51 = vpop.f32.mrb[38].mxu1 }
 0x688   : > { %14421 = vst [vmem:[#allocation65_spill] sm:$0xff] %v10001_v51  ;;  %v10003_v44 = vpop.f32.mrb[39].mxu1 }
 0x689   : > { %14422 = vst [vmem:[#allocation66_spill] sm:$0xff] %v10003_v44 }
 0x695   : > { %v10005_v30 = vpop.f32.mrb[40].mxu1 }
 0x696   : > { %14423 = vst [vmem:[#allocation67_spill] sm:$0xff] %v10005_v30  ;;  %v10007_v2 = vpop.f32.mrb[41].mxu1 }
 0x697   : > { %14424 = vst [vmem:[#allocation68_spill] sm:$0xff] %v10007_v2  ;;  %v10009_v14 = vpop.f32.mrb[42].mxu1 }
 0x698   : > { %14425 = vst [vmem:[#allocation69_spill] sm:$0xff] %v10009_v14  ;;  %v10011_v19 = vpop.f32.mrb[43].mxu1 }
 0x699   : > { %14426 = vst [vmem:[#allocation70_spill] sm:$0xff] %v10011_v19 }
 0x6a5   : > { %v10013_v32 = vpop.f32.mrb[44].mxu1 }
 0x6a6   : > { %14427 = vst [vmem:[#allocation71_spill] sm:$0xff] %v10013_v32  ;;  %v10015_v7 = vpop.f32.mrb[45].mxu1 }
 0x6a7   : > { %14428 = vst [vmem:[#allocation72_spill] sm:$0xff] %v10015_v7  ;;  %v10017_v46 = vpop.f32.mrb[46].mxu1 }
 0x6a8   : > { %14429 = vst [vmem:[#allocation73_spill] sm:$0xff] %v10017_v46  ;;  %v10019_v36 = vpop.f32.mrb[47].mxu1 }
 0x6a9   : > { %14430 = vst [vmem:[#allocation74_spill] sm:$0xff] %v10019_v36 }
 0x6b3   : > { %v7548_v17 = vpop.f32.mrb[48].mxu1 }
 0x6b4   : > { %v2457_v8 = vpop.f32.mrb[49].mxu1  ;;  %v10026_v47 = vadd.f32 %v8697_v55, %v7548_v17 }
 0x6b5   : > { %v10024_v61 = vadd.f32 %v8697_v55, %v2457_v8  ;;  %v7549_v38 = vpop.f32.mrb[50].mxu1 }
 0x6b6   : > { %v2460_v29 = vpop.f32.mrb[51].mxu1  ;;  %14432 = vst [vmem:[#allocation76_spill] sm:$0xff] %v10026_v47  ;;  %v10032_v33 = vadd.f32 %v8697_v55, %v7549_v38  ;;  %v2526_v8 = vsel %vm938_vm0, %v10026_v47, -inf }
 0x6b7   : > { %14431 = vst [vmem:[#allocation75_spill] sm:$0xff] %v10024_v61  ;;  %v10028_v48 = vadd.f32 %v8697_v55, %v2460_v29  ;;  %v2520_v22 = vsel %vm938_vm0, %v10024_v61, -inf }
 0x6b8   : > { %2521 = vmax.xlane.f32.xlu0 %v2520_v22  ;;  %14434 = vst [vmem:[#allocation78_spill] sm:$0xff] %v10032_v33  ;;  %v2529_v17 = vsel %vm938_vm0, %v10032_v33, -inf }
 0x6b9   : > { %14433 = vst [vmem:[#allocation77_spill] sm:$0xff] %v10028_v48  ;;  %v2523_v24 = vsel %vm938_vm0, %v10028_v48, -inf }
 0x6ba   : > { %2524 = vmax.xlane.f32.xlu1 %v2523_v24 }
 0x6bc   : > { %2527 = vmax.xlane.f32.xlu0 %v2526_v8 }
 0x6be   : > { %2530 = vmax.xlane.f32.xlu1 %v2529_v17 }
 0x6c3   : > { %v7552_v29 = vpop.f32.mrb[52].mxu1 }
 0x6c4   : > { %v2473_v13 = vpop.f32.mrb[53].mxu1  ;;  %v10042_v38 = vadd.f32 %v8697_v55, %v7552_v29 }
 0x6c5   : > { %v10040_v1 = vadd.f32 %v8697_v55, %v2473_v13  ;;  %v7553_v54 = vpop.f32.mrb[54].mxu1 }
 0x6c6   : > { %v2476_v22 = vpop.f32.mrb[55].mxu1  ;;  %14436 = vst [vmem:[#allocation80_spill] sm:$0xff] %v10042_v38  ;;  %v10048_v41 = vadd.f32 %v8697_v55, %v7553_v54  ;;  %v2538_v13 = vsel %vm938_vm0, %v10042_v38, -inf }
 0x6c7   : > { %14435 = vst [vmem:[#allocation79_spill] sm:$0xff] %v10040_v1  ;;  %v10044_v31 = vadd.f32 %v8697_v55, %v2476_v22  ;;  %v2532_v24 = vsel %vm938_vm0, %v10040_v1, -inf }
 0x6c8   : > { %2533 = vmax.xlane.f32.xlu0 %v2532_v24  ;;  %14438 = vst [vmem:[#allocation82_spill] sm:$0xff] %v10048_v41  ;;  %v2541_v17 = vsel %vm938_vm0, %v10048_v41, -inf }
 0x6c9   : > { %14437 = vst [vmem:[#allocation81_spill] sm:$0xff] %v10044_v31  ;;  %v2535_v8 = vsel %vm938_vm0, %v10044_v31, -inf }
 0x6ca   : > { %2536 = vmax.xlane.f32.xlu1 %v2535_v8 }
 0x6cc   : > { %2539 = vmax.xlane.f32.xlu0 %v2538_v13 }
 0x6ce   : > { %2542 = vmax.xlane.f32.xlu1 %v2541_v17 }
 0x6d3   : > { %v7556_v29 = vpop.f32.mrb[56].mxu1 }
 0x6d4   : > { %v2489_v22 = vpop.f32.mrb[57].mxu1  ;;  %v10058_v54 = vadd.f32 %v8697_v55, %v7556_v29 }
 0x6d5   : > { %v10056_v27 = vadd.f32 %v8697_v55, %v2489_v22  ;;  %v7557_v4 = vpop.f32.mrb[58].mxu1 }
 0x6d6   : > { %v2492_v24 = vpop.f32.mrb[59].mxu1  ;;  %14440 = vst [vmem:[#allocation84_spill] sm:$0xff] %v10058_v54  ;;  %v10064_v9 = vadd.f32 %v8697_v55, %v7557_v4  ;;  %v2550_v17 = vsel %vm938_vm0, %v10058_v54, -inf }
 0x6d7   : > { %14439 = vst [vmem:[#allocation83_spill] sm:$0xff] %v10056_v27  ;;  %v10060_v3 = vadd.f32 %v8697_v55, %v2492_v24  ;;  %v2544_v8 = vsel %vm938_vm0, %v10056_v27, -inf }
 0x6d8   : > { %2545 = vmax.xlane.f32.xlu0 %v2544_v8  ;;  %14442 = vst [vmem:[#allocation86_spill] sm:$0xff] %v10064_v9  ;;  %v2553_v29 = vsel %vm938_vm0, %v10064_v9, -inf }
 0x6d9   : > { %14441 = vst [vmem:[#allocation85_spill] sm:$0xff] %v10060_v3  ;;  %v2547_v13 = vsel %vm938_vm0, %v10060_v3, -inf }
 0x6da   : > { %2548 = vmax.xlane.f32.xlu1 %v2547_v13 }
 0x6dc   : > { %2551 = vmax.xlane.f32.xlu0 %v2550_v17 }
 0x6de   : > { %2554 = vmax.xlane.f32.xlu1 %v2553_v29 }
 0x6e3   : > { %v7560_v22 = vpop.f32.mrb[60].mxu1 }
 0x6e4   : > { %v2505_v24 = vpop.f32.mrb[61].mxu1  ;;  %v10074_v4 = vadd.f32 %v8697_v55, %v7560_v22 }
 0x6e5   : > { %v10072_v5 = vadd.f32 %v8697_v55, %v2505_v24  ;;  %v7561_v60 = vpop.f32.mrb[62].mxu1 }
 0x6e6   : > { %v2508_v8 = vpop.f32.mrb[63].mxu1  ;;  %14444 = vst [vmem:[#allocation88_spill] sm:$0xff] %v10074_v4  ;;  %v10080_v34 = vadd.f32 %v8697_v55, %v7561_v60  ;;  %v2562_v29 = vsel %vm938_vm0, %v10074_v4, -inf }
 0x6e7   : > { %14443 = vst [vmem:[#allocation87_spill] sm:$0xff] %v10072_v5  ;;  %v10076_v63 = vadd.f32 %v8697_v55, %v2508_v8  ;;  %v2556_v13 = vsel %vm938_vm0, %v10072_v5, -inf }
 0x6e8   : > { %2557 = vmax.xlane.f32.xlu0 %v2556_v13  ;;  %14446 = vst [vmem:[#allocation90_spill] sm:$0xff] %v10080_v34  ;;  %v2565_v22 = vsel %vm938_vm0, %v10080_v34, -inf }
 0x6e9   : > { %14445 = vst [vmem:[#allocation89_spill] sm:$0xff] %v10076_v63  ;;  %v2559_v17 = vsel %vm938_vm0, %v10076_v63, -inf }
 0x6ea   : > { %2560 = vmax.xlane.f32.xlu1 %v2559_v17 }
 0x6ec   : > { %2563 = vmax.xlane.f32.xlu0 %v2562_v29 }
 0x6ee   : > { %2566 = vmax.xlane.f32.xlu1 %v2565_v22 }
 0x745   : > { %v10088_v24 = vpop.xlane.xlu0 %2521 }
 0x746   : > { %14447 = vst [vmem:[#allocation91_spill] sm:$0xff] %v10088_v24  ;;  %vm2728_vm6 = vcmp.ge.f32.partialorder %v10024_v61, %v10088_v24 }
 0x747   : > { %v10092_v8 = vpop.xlane.xlu1 %2524  ;;  %v2744_v60 = vsel %vm2728_vm6, %v9305_v50, 8 }
 0x748   : > { %14448 = vst [vmem:[#allocation92_spill] sm:$0xff] %v10092_v8  ;;  %v10096_v55 = vsel %vm938_vm0, %v2744_v60, 2147483647  ;;  %vm2729_vm7 = vcmp.ge.f32.partialorder %v10028_v48, %v10092_v8 }
 0x749   : > { %v10100_v13 = vpop.xlane.xlu0 %2527  ;;  %v2762_v17 = vshra.s32 %v10096_v55, 16  ;;  %v2745_v29 = vsel %vm2729_vm7, %v9305_v50, 8 }
 0x74a   : > { %14449 = vst [vmem:[#allocation93_spill] sm:$0xff] %v10100_v13  ;;  %v10105_v22 = vsel %vm938_vm0, %v2745_v29, 2147483647  ;;  %vm2730_vm8 = vcmp.ge.f32.partialorder %v10026_v47, %v10100_v13 }
 0x74b   : > { %v10107_v61 = vpop.xlane.xlu1 %2530  ;;  %v10109_v24 = vcvt.s32.f32 %v2762_v17  ;;  %v2777_v46 = vshra.s32 %v10105_v22, 16  ;;  %v2746_v60 = vsel %vm2730_vm8, %v9305_v50, 8 }
 0x74c   : > { %14450 = vst [vmem:[#allocation94_spill] sm:$0xff] %v10107_v61  ;;  %v10119_v8 = vsel %vm938_vm0, %v2746_v60, 2147483647  ;;  %vm2731_vm9 = vcmp.ge.f32.partialorder %v10032_v33, %v10107_v61 }
 0x74d   : > { %2765 = vmin.xlane.f32.xlu0 %v10109_v24  ;;  %v10116_v48 = vcvt.s32.f32 %v2777_v46  ;;  %v2792_v17 = vshra.s32 %v10119_v8, 16  ;;  %v2747_v29 = vsel %vm2731_vm9, %v9305_v50, 8 }
 0x74e   : > { %v10127_v47 = vsel %vm938_vm0, %v2747_v29, 2147483647 }
 0x74f   : > { %2780 = vmin.xlane.f32.xlu1 %v10116_v48  ;;  %v10129_v13 = vcvt.s32.f32 %v2792_v17  ;;  %v2807_v46 = vshra.s32 %v10127_v47, 16 }
 0x751   : > { %2795 = vmin.xlane.f32.xlu0 %v10129_v13  ;;  %v10133_v60 = vcvt.s32.f32 %v2807_v46 }
 0x753   : > { %2810 = vmin.xlane.f32.xlu1 %v10133_v60 }
 0x755   : > { %v10136_v33 = vpop.xlane.xlu0 %2533 }
 0x756   : > { %14451 = vst [vmem:[#allocation95_spill] sm:$0xff] %v10136_v33  ;;  %vm2732_vm11 = vcmp.ge.f32.partialorder %v10040_v1, %v10136_v33 }
 0x757   : > { %v10140_v61 = vpop.xlane.xlu1 %2536  ;;  %v2748_v29 = vsel %vm2732_vm11, %v9305_v50, 8 }
 0x758   : > { %14452 = vst [vmem:[#allocation96_spill] sm:$0xff] %v10140_v61  ;;  %v10144_v17 = vsel %vm938_vm0, %v2748_v29, 2147483647  ;;  %vm2733_vm12 = vcmp.ge.f32.partialorder %v10044_v31, %v10140_v61 }
 0x759   : > { %v10148_v32 = vpop.xlane.xlu0 %2539  ;;  %v2822_v46 = vshra.s32 %v10144_v17, 16  ;;  %v2749_v36 = vsel %vm2733_vm12, %v9305_v50, 8 }
 0x75a   : > { %14453 = vst [vmem:[#allocation97_spill] sm:$0xff] %v10148_v32  ;;  %v10153_v7 = vsel %vm938_vm0, %v2749_v36, 2147483647  ;;  %vm2734_vm13 = vcmp.ge.f32.partialorder %v10042_v38, %v10148_v32 }
 0x75b   : > { %v10155_v1 = vpop.xlane.xlu1 %2542  ;;  %v10157_v33 = vcvt.s32.f32 %v2822_v46  ;;  %v2837_v14 = vshra.s32 %v10153_v7, 16  ;;  %v2750_v29 = vsel %vm2734_vm13, %v9305_v50, 8 }
 0x75c   : > { %14454 = vst [vmem:[#allocation98_spill] sm:$0xff] %v10155_v1  ;;  %v10167_v61 = vsel %vm938_vm0, %v2750_v29, 2147483647  ;;  %vm2735_vm14 = vcmp.ge.f32.partialorder %v10048_v41, %v10155_v1 }
 0x75d   : > { %2825 = vmin.xlane.f32.xlu0 %v10157_v33  ;;  %v10164_v31 = vcvt.s32.f32 %v2837_v14  ;;  %v2852_v36 = vshra.s32 %v10167_v61, 16  ;;  %v2751_v46 = vsel %vm2735_vm14, %v9305_v50, 8 }
 0x75e   : > { %v10175_v38 = vsel %vm938_vm0, %v2751_v46, 2147483647 }
 0x75f   : > { %2840 = vmin.xlane.f32.xlu1 %v10164_v31  ;;  %v10177_v32 = vcvt.s32.f32 %v2852_v36  ;;  %v2867_v14 = vshra.s32 %v10175_v38, 16 }
 0x761   : > { %2855 = vmin.xlane.f32.xlu0 %v10177_v32  ;;  %v10181_v29 = vcvt.s32.f32 %v2867_v14 }
 0x763   : > { %2870 = vmin.xlane.f32.xlu1 %v10181_v29 }
 0x765   : > { %v10184_v41 = vpop.xlane.xlu0 %2545 }
 0x766   : > { %14455 = vst [vmem:[#allocation99_spill] sm:$0xff] %v10184_v41  ;;  %vm2736_vm15 = vcmp.ge.f32.partialorder %v10056_v27, %v10184_v41 }
 0x767   : > { %v10188_v1 = vpop.xlane.xlu1 %2548  ;;  %v2752_v46 = vsel %vm2736_vm15, %v9305_v50, 8 }
 0x768   : > { %14456 = vst [vmem:[#allocation100_spill] sm:$0xff] %v10188_v1  ;;  %v10192_v36 = vsel %vm938_vm0, %v2752_v46, 2147483647  ;;  %vm2737_vm1 = vcmp.ge.f32.partialorder %v10060_v3, %v10188_v1 }
 0x769   : > { %v10196_v30 = vpop.xlane.xlu0 %2551  ;;  %v2882_v14 = vshra.s32 %v10192_v36, 16  ;;  %v2753_v19 = vsel %vm2737_vm1, %v9305_v50, 8 }
 0x76a   : > { %14457 = vst [vmem:[#allocation101_spill] sm:$0xff] %v10196_v30  ;;  %v10201_v2 = vsel %vm938_vm0, %v2753_v19, 2147483647  ;;  %vm2738_vm2 = vcmp.ge.f32.partialorder %v10058_v54, %v10196_v30 }
 0x76b   : > { %v10203_v27 = vpop.xlane.xlu1 %2554  ;;  %v10205_v41 = vcvt.s32.f32 %v2882_v14  ;;  %v2897_v51 = vshra.s32 %v10201_v2, 16  ;;  %v2754_v46 = vsel %vm2738_vm2, %v9305_v50, 8 }
 0x76c   : > { %14458 = vst [vmem:[#allocation102_spill] sm:$0xff] %v10203_v27  ;;  %v10215_v1 = vsel %vm938_vm0, %v2754_v46, 2147483647  ;;  %vm2739_vm3 = vcmp.ge.f32.partialorder %v10064_v9, %v10203_v27 }
 0x76d   : > { %2885 = vmin.xlane.f32.xlu0 %v10205_v41  ;;  %v10212_v3 = vcvt.s32.f32 %v2897_v51  ;;  %v2912_v19 = vshra.s32 %v10215_v1, 16  ;;  %v2755_v14 = vsel %vm2739_vm3, %v9305_v50, 8 }
 0x76e   : > { %v10223_v54 = vsel %vm938_vm0, %v2755_v14, 2147483647 }
 0x76f   : > { %2900 = vmin.xlane.f32.xlu1 %v10212_v3  ;;  %v10225_v30 = vcvt.s32.f32 %v2912_v19  ;;  %v2927_v51 = vshra.s32 %v10223_v54, 16 }
 0x771   : > { %2915 = vmin.xlane.f32.xlu0 %v10225_v30  ;;  %v10229_v46 = vcvt.s32.f32 %v2927_v51 }
 0x773   : > { %2930 = vmin.xlane.f32.xlu1 %v10229_v46 }
 0x775   : > { %v10232_v9 = vpop.xlane.xlu0 %2557 }
 0x776   : > { %14459 = vst [vmem:[#allocation103_spill] sm:$0xff] %v10232_v9  ;;  %vm2740_vm4 = vcmp.ge.f32.partialorder %v10072_v5, %v10232_v9 }
 0x777   : > { %v10236_v27 = vpop.xlane.xlu1 %2560  ;;  %v2756_v14 = vsel %vm2740_vm4, %v9305_v50, 8 }
 0x778   : > { %14460 = vst [vmem:[#allocation104_spill] sm:$0xff] %v10236_v27  ;;  %v10240_v19 = vsel %vm938_vm0, %v2756_v14, 2147483647  ;;  %vm2741_vm5 = vcmp.ge.f32.partialorder %v10076_v63, %v10236_v27 }
 0x779   : > { %v10244_v40 = vpop.xlane.xlu0 %2563  ;;  %v2942_v51 = vshra.s32 %v10240_v19, 16  ;;  %v2757_v44 = vsel %vm2741_vm5, %v9305_v50, 8 }
 0x77a   : > { %14461 = vst [vmem:[#allocation105_spill] sm:$0xff] %v10244_v40  ;;  %v10249_v15 = vsel %vm938_vm0, %v2757_v44, 2147483647  ;;  %vm2742_vm6 = vcmp.ge.f32.partialorder %v10074_v4, %v10244_v40 }
 0x77b   : > { %v10251_v5 = vpop.xlane.xlu1 %2566  ;;  %v10253_v9 = vcvt.s32.f32 %v2942_v51  ;;  %v2957_v23 = vshra.s32 %v10249_v15, 16  ;;  %v2758_v14 = vsel %vm2742_vm6, %v9305_v50, 8 }
 0x77c   : > { %14462 = vst [vmem:[#allocation106_spill] sm:$0xff] %v10251_v5  ;;  %v10263_v27 = vsel %vm938_vm0, %v2758_v14, 2147483647  ;;  %vm2743_vm7 = vcmp.ge.f32.partialorder %v10080_v34, %v10251_v5  ;;  %v2761_v34 = vand.u32 65535, %v10096_v55  ;;  %v2776_v5 = vand.u32 65535, %v10105_v22 }
 0x77d   : > { %2945 = vmin.xlane.f32.xlu0 %v10253_v9  ;;  %v10260_v63 = vcvt.s32.f32 %v2957_v23  ;;  %v2972_v44 = vshra.s32 %v10263_v27, 16  ;;  %v2759_v51 = vsel %vm2743_vm7, %v9305_v50, 8  ;;  %v2806_v55 = vand.u32 65535, %v10127_v47 }
 0x77e   : > { %v10271_v4 = vsel %vm938_vm0, %v2759_v51, 2147483647  ;;  %v2763_v39 = vcvt.s32.f32 %v2761_v34  ;;  %v2778_v10 = vcvt.s32.f32 %v2776_v5  ;;  %v2851_v47 = vand.u32 65535, %v10167_v61 }
 0x77f   : > { %2960 = vmin.xlane.f32.xlu1 %v10260_v63  ;;  %v10273_v40 = vcvt.s32.f32 %v2972_v44  ;;  %v2987_v23 = vshra.s32 %v10271_v4, 16  ;;  %v2791_v44 = vand.u32 65535, %v10119_v8  ;;  %v2808_v12 = vcvt.s32.f32 %v2806_v55 }
 0x781   : > { %2975 = vmin.xlane.f32.xlu0 %v10273_v40  ;;  %v10277_v14 = vcvt.s32.f32 %v2987_v23  ;;  %v2793_v34 = vcvt.s32.f32 %v2791_v44 }
 0x783   : > { %2990 = vmin.xlane.f32.xlu1 %v10277_v14 }
 0x7da   : > { %v10282_v59 = vpop.xlane.xlu0 %2765 }
 0x7db   : > { %vm2767_vm8 = vcmp.eq.f32.partialorder %v10109_v24, %v10282_v59 }
 0x7dc   : > { %v10287_v51 = vpop.xlane.xlu1 %2780  ;;  %v2768_v57 = vsel %vm2767_vm8, %v2763_v39, inf }
 0x7dd   : > { %2769 = vmin.xlane.f32.xlu0 %v2768_v57  ;;  %vm2782_vm9 = vcmp.eq.f32.partialorder %v10116_v48, %v10287_v51  ;;  %v2821_v48 = vand.u32 65535, %v10144_v17  ;;  %v2853_v17 = vcvt.s32.f32 %v2851_v47 }
 0x7de   : > { %v2783_v23 = vsel %vm2782_vm9, %v2778_v10, inf  ;;  %v10292_v22 = vpop.xlane.xlu0 %2795  ;;  %v2836_v10 = vand.u32 65535, %v10153_v7 }
 0x7df   : > { %2784 = vmin.xlane.f32.xlu1 %v2783_v23  ;;  %vm2797_vm11 = vcmp.eq.f32.partialorder %v10129_v13, %v10292_v22  ;;  %v2823_v39 = vcvt.s32.f32 %v2821_v48 }
 0x7e0   : > { %v10296_v24 = vpop.xlane.xlu1 %2810  ;;  %v2798_v8 = vsel %vm2797_vm11, %v2793_v34, inf  ;;  %v2838_v55 = vcvt.s32.f32 %v2836_v10 }
 0x7e1   : > { %2799 = vmin.xlane.f32.xlu0 %v2798_v8  ;;  %vm2812_vm12 = vcmp.eq.f32.partialorder %v10133_v60, %v10296_v24 }
 0x7e2   : > { %v2813_v5 = vsel %vm2812_vm12, %v2808_v12, inf  ;;  %v2866_v12 = vand.u32 65535, %v10175_v38  ;;  %v2896_v38 = vand.u32 65535, %v10201_v2 }
 0x7e3   : > { %2814 = vmin.xlane.f32.xlu1 %v2813_v5 }
 0x7e4   : > { %v2868_v23 = vcvt.s32.f32 %v2866_v12 }
 0x7ea   : > { %v10302_v57 = vpop.xlane.xlu0 %2825 }
 0x7eb   : > { %vm2827_vm13 = vcmp.eq.f32.partialorder %v10157_v33, %v10302_v57 }
 0x7ec   : > { %v10307_v13 = vpop.xlane.xlu1 %2840  ;;  %v2828_v44 = vsel %vm2827_vm13, %v2823_v39, inf  ;;  %v2898_v39 = vcvt.s32.f32 %v2896_v38 }
 0x7ed   : > { %2829 = vmin.xlane.f32.xlu0 %v2828_v44  ;;  %vm2842_vm14 = vcmp.eq.f32.partialorder %v10164_v31, %v10307_v13  ;;  %v2881_v31 = vand.u32 65535, %v10192_v36 }
 0x7ee   : > { %v2843_v60 = vsel %vm2842_vm14, %v2838_v55, inf  ;;  %v10312_v7 = vpop.xlane.xlu0 %2855 }
 0x7ef   : > { %2844 = vmin.xlane.f32.xlu1 %v2843_v60  ;;  %vm2857_vm15 = vcmp.eq.f32.partialorder %v10177_v32, %v10312_v7  ;;  %v2883_v5 = vcvt.s32.f32 %v2881_v31  ;;  %v2911_v32 = vand.u32 65535, %v10215_v1 }
 0x7f0   : > { %v10316_v33 = vpop.xlane.xlu1 %2870  ;;  %v2858_v61 = vsel %vm2857_vm15, %v2853_v17, inf }
 0x7f1   : > { %2859 = vmin.xlane.f32.xlu0 %v2858_v61  ;;  %vm2872_vm1 = vcmp.eq.f32.partialorder %v10181_v29, %v10316_v33  ;;  %v2926_v29 = vand.u32 65535, %v10223_v54  ;;  %v2913_v47 = vcvt.s32.f32 %v2911_v32  ;;  %v2956_v54 = vand.u32 65535, %v10249_v15 }
 0x7f2   : > { %v2873_v34 = vsel %vm2872_vm1, %v2868_v23, inf }
 0x7f3   : > { %2874 = vmin.xlane.f32.xlu1 %v2873_v34  ;;  %v2928_v44 = vcvt.s32.f32 %v2926_v29  ;;  %v2958_v23 = vcvt.s32.f32 %v2956_v54  ;;  %v14463_v54 = vmov 0.0  }
 0x7fa   : > { %v10322_v8 = vpop.xlane.xlu0 %2885 }
 0x7fb   : > { %vm2887_vm2 = vcmp.eq.f32.partialorder %v10205_v41, %v10322_v8 }
 0x7fc   : > { %v10327_v48 = vpop.xlane.xlu1 %2900  ;;  %v2888_v10 = vsel %vm2887_vm2, %v2883_v5, inf }
 0x7fd   : > { %2889 = vmin.xlane.f32.xlu0 %v2888_v10  ;;  %vm2902_vm3 = vcmp.eq.f32.partialorder %v10212_v3, %v10327_v48  ;;  %v2941_v3 = vand.u32 65535, %v10240_v19 }
 0x7fe   : > { %v2903_v36 = vsel %vm2902_vm3, %v2898_v39, inf  ;;  %v10332_v2 = vpop.xlane.xlu0 %2915  ;;  %v2802_v39 = vcvt.f32.s32 %v10292_v22 }
 0x7ff   : > { %2904 = vmin.xlane.f32.xlu1 %v2903_v36  ;;  %vm2917_vm4 = vcmp.eq.f32.partialorder %v10225_v30, %v10332_v2  ;;  %v2943_v60 = vcvt.s32.f32 %v2941_v3  ;;  %v2971_v30 = vand.u32 65535, %v10263_v27  ;;  %v2817_v36 = vcvt.f32.s32 %v10296_v24 }
 0x800   : > { %v10336_v41 = vpop.xlane.xlu1 %2930  ;;  %v2918_v1 = vsel %vm2917_vm4, %v2913_v47, inf }
 0x801   : > { %2919 = vmin.xlane.f32.xlu0 %v2918_v1  ;;  %vm2932_vm5 = vcmp.eq.f32.partialorder %v10229_v46, %v10336_v41  ;;  %v2986_v46 = vand.u32 65535, %v10271_v4  ;;  %v2973_v34 = vcvt.s32.f32 %v2971_v30  ;;  %v2787_v4 = vcvt.f32.s32 %v10287_v51 }
 0x802   : > { %v2933_v55 = vsel %vm2932_vm5, %v2928_v44, inf }
 0x803   : > { %2934 = vmin.xlane.f32.xlu1 %v2933_v55  ;;  %v2988_v31 = vcvt.s32.f32 %v2986_v46  ;;  %v2788_v29 = vshll.u32 %v2787_v4, 16  ;;  %v2803_v55 = vshll.u32 %v2802_v39, 16  ;;  %v2832_v46 = vcvt.f32.s32 %v10302_v57  ;;  %v10391_v57 = vld [vmem:[%s13990_s7] sm:$0xff]  }
 0x804   : > { %v2877_v39 = vcvt.f32.s32 %v10316_v33 }
 0x80a   : > { %v10342_v12 = vpop.xlane.xlu0 %2945 }
 0x80b   : > { %vm2947_vm6 = vcmp.eq.f32.partialorder %v10253_v9, %v10342_v12 }
 0x80c   : > { %v10347_v17 = vpop.xlane.xlu1 %2960  ;;  %v2948_v61 = vsel %vm2947_vm6, %v2943_v60, inf }
 0x80d   : > { %2949 = vmin.xlane.f32.xlu0 %v2948_v61  ;;  %vm2962_vm7 = vcmp.eq.f32.partialorder %v10260_v63, %v10347_v17  ;;  %v2772_v63 = vcvt.f32.s32 %v10282_v59  ;;  %v2818_v59 = vshll.u32 %v2817_v36, 16 }
 0x80e   : > { %v2963_v19 = vsel %vm2962_vm7, %v2958_v23, inf  ;;  %v10352_v15 = vpop.xlane.xlu0 %2975 }
 0x80f   : > { %2964 = vmin.xlane.f32.xlu1 %v2963_v19  ;;  %vm2977_vm8 = vcmp.eq.f32.partialorder %v10273_v40, %v10352_v15  ;;  %v2773_v32 = vshll.u32 %v2772_v63, 16  ;;  %v2833_v63 = vshll.u32 %v2832_v46, 16 }
 0x810   : > { %v10356_v9 = vpop.xlane.xlu1 %2990  ;;  %v2978_v27 = vsel %vm2977_vm8, %v2973_v34, inf }
 0x811   : > { %2979 = vmin.xlane.f32.xlu0 %v2978_v27  ;;  %vm2992_vm9 = vcmp.eq.f32.partialorder %v10277_v14, %v10356_v9 }
 0x812   : > { %v2993_v38 = vsel %vm2992_vm9, %v2988_v31, inf  ;;  %v2847_v31 = vcvt.f32.s32 %v10307_v13 }
 0x813   : > { %2994 = vmin.xlane.f32.xlu1 %v2993_v38 }
 0x814   : > { %v2848_v13 = vshll.u32 %v2847_v31, 16 }
 0x86a   : > { %v2770_v5 = vpop.xlane.xlu0 %2769 }
 0x86b   : > { %v2771_v10 = vcvt.f32.s32 %v2770_v5  ;;  %v2862_v5 = vcvt.f32.s32 %v10312_v7  ;;  %v8700_v7 = vld [vmem:[%s13990_s7 + $0x10] sm:$0xff]  }
 0x86c   : > { %v2785_v40 = vpop.xlane.xlu1 %2784 }
 0x86d   : > { %v2774_v47 = vadd.s32 %v2773_v32, %v2771_v10  ;;  %v2786_v1 = vcvt.f32.s32 %v2785_v40  ;;  %v8699_v10 = vld [vmem:[%s13990_s7 + $0x8] sm:$0xff]  }
 0x86e   : > { %v2800_v44 = vpop.xlane.xlu0 %2799 }
 0x86f   : > { %vm3000_vm11 = vcmp.eq.s32.totalorder %v9305_v50, %v2774_v47  ;;  %v2789_v14 = vadd.s32 %v2788_v29, %v2786_v1  ;;  %v2801_v3 = vcvt.f32.s32 %v2800_v44  ;;  %v2863_v1 = vshll.u32 %v2862_v5, 16 }
 0x870   : > { %v2815_v51 = vpop.xlane.xlu1 %2814  ;;  %v10367_v60 = vsel %vm3000_vm11, 1.0, %v14463_v54  ;;  %v2878_v44 = vshll.u32 %v2877_v39, 16 }
 0x871   : > { %vm3001_vm12 = vcmp.eq.s32.totalorder %v9305_v50, %v2789_v14  ;;  %14464 = vst [vmem:[#allocation107_spill] sm:$0xff] %v10367_v60  ;;  %v2804_v30 = vadd.s32 %v2803_v55, %v2801_v3  ;;  %v2816_v24 = vcvt.f32.s32 %v2815_v51 }
 0x872   : > { %v10370_v22 = vsel %vm3001_vm12, 1.0, %v14463_v54 }
 0x873   : > { %14465 = vst [vmem:[#allocation108_spill] sm:$0xff] %v10370_v22  ;;  %v3048_v61 = vpack.c.bf16 %v10370_v22, %v10367_v60  ;;  %vm3002_vm13 = vcmp.eq.s32.totalorder %v9305_v50, %v2804_v30  ;;  %v2819_v23 = vadd.s32 %v2818_v59, %v2816_v24 }
 0x874   : > { %v10379_v19 = vsel %vm3002_vm13, 1.0, %v14463_v54 }
 0x875   : > { %7564 = vmatprep.mubr.msk.bf16.mxu1 %vm938_vm0, %v3048_v61  ;;  %vm3003_vm14 = vcmp.eq.s32.totalorder %v9305_v50, %v2819_v23  ;;  %14466 = vst [vmem:[#allocation109_spill] sm:$0xff] %v10379_v19  ;;  %v8701_v61 = vld [vmem:[%s13990_s7 + $0x18] sm:$0xff]   ;;  %v2892_v23 = vcvt.f32.s32 %v10322_v8 }
 0x876   : > { %v10382_v34 = vsel %vm3003_vm14, 1.0, %v14463_v54 }
 0x877   : > { %14467 = vst [vmem:[#allocation110_spill] sm:$0xff] %v10382_v34  ;;  %v3049_v27 = vpack.c.bf16 %v10382_v34, %v10379_v19 }
 0x879   : > { %7565 = vmatmul.mubr.msk.bf16.vlgmr.msra.gmra.mrb[64].mxu1 %vm938_vm0, %v3049_v27 }
 0x87a   : > { %v2830_v38 = vpop.xlane.xlu0 %2829  ;;  %7613 = vmatpush3.bf16.msra.mxu1 %v10391_v57 }
 0x87b   : > { %v2831_v4 = vcvt.f32.s32 %v2830_v38  ;;  %7614 = vmatprep.subr.bf16.mxu1 %v8699_v10  ;;  %v8702_v38 = vld [vmem:[%s13990_s7 + $0x20] sm:$0xff]  }
 0x87c   : > { %v2845_v32 = vpop.xlane.xlu1 %2844 }
 0x87d   : > { %v2834_v40 = vadd.s32 %v2833_v63, %v2831_v4  ;;  %v2846_v29 = vcvt.f32.s32 %v2845_v32  ;;  %v2907_v63 = vcvt.f32.s32 %v10327_v48  ;;  %v2893_v4 = vshll.u32 %v2892_v23, 16 }
 0x87e   : > { %v2860_v47 = vpop.xlane.xlu0 %2859  ;;  %7615 = vmatpush3.bf16.msra.mxu1 %v8699_v10  ;;  %v2922_v32 = vcvt.f32.s32 %v10332_v2  ;;  %v8704_v2 = vld [vmem:[%s13990_s7 + $0x30] sm:$0xff]   ;;  %v2952_v23 = vcvt.f32.s32 %v10342_v12 }
 0x87f   : > { %vm3004_vm15 = vcmp.eq.s32.totalorder %v9305_v50, %v2834_v40  ;;  %v2849_v36 = vadd.s32 %v2848_v13, %v2846_v29  ;;  %v2861_v14 = vcvt.f32.s32 %v2860_v47  ;;  %7616 = vmatprep.subr.bf16.mxu1 %v8700_v7  ;;  %v8703_v13 = vld [vmem:[%s13990_s7 + $0x28] sm:$0xff]   ;;  %v2908_v39 = vshll.u32 %v2907_v63, 16 }
 0x880   : > { %v2875_v55 = vpop.xlane.xlu1 %2874  ;;  %v10405_v33 = vsel %vm3004_vm15, 1.0, %v14463_v54  ;;  %v2937_v40 = vcvt.f32.s32 %v10336_v41 }
 0x881   : > { %vm3005_vm1 = vcmp.eq.s32.totalorder %v9305_v50, %v2849_v36  ;;  %14468 = vst [vmem:[#allocation111_spill] sm:$0xff] %v10405_v33  ;;  %v2864_v59 = vadd.s32 %v2863_v1, %v2861_v14  ;;  %v2876_v51 = vcvt.f32.s32 %v2875_v55  ;;  %v2923_v1 = vshll.u32 %v2922_v32, 16 }
 0x882   : > { %v10408_v3 = vsel %vm3005_vm1, 1.0, %v14463_v54  ;;  %7617 = vmatpush3.bf16.msra.mxu1 %v8700_v7  ;;  %v2938_v7 = vshll.u32 %v2937_v40, 16  ;;  %v2997_v40 = vcvt.f32.s32 %v10356_v9 }
 0x883   : > { %14469 = vst [vmem:[#allocation112_spill] sm:$0xff] %v10408_v3  ;;  %v3050_v30 = vpack.c.bf16 %v10408_v3, %v10405_v33  ;;  %vm3006_vm2 = vcmp.eq.s32.totalorder %v9305_v50, %v2864_v59  ;;  %v2879_v24 = vadd.s32 %v2878_v44, %v2876_v51  ;;  %7618 = vmatprep.subr.bf16.mxu1 %v8701_v61 }
 0x884   : > { %v10420_v46 = vsel %vm3006_vm2, 1.0, %v14463_v54 }
 0x885   : > { %7568 = vmatprep.mubr.msk.bf16.mxu1 %vm938_vm0, %v3050_v30  ;;  %vm3007_vm3 = vcmp.eq.s32.totalorder %v9305_v50, %v2879_v24  ;;  %14470 = vst [vmem:[#allocation113_spill] sm:$0xff] %v10420_v46 }
 0x886   : > { %v10423_v27 = vsel %vm3007_vm3, 1.0, %v14463_v54  ;;  %7619 = vmatpush3.bf16.msra.mxu1 %v8701_v61  ;;  %v8705_v61 = vld [vmem:[%s13990_s7 + $0x38] sm:$0xff]  }
 0x887   : > { %14471 = vst [vmem:[#allocation114_spill] sm:$0xff] %v10423_v27  ;;  %v3051_v31 = vpack.c.bf16 %v10423_v27, %v10420_v46  ;;  %7620 = vmatprep.subr.bf16.mxu1 %v8702_v38 }
 0x889   : > { %7569 = vmatmul.mubr.msk.bf16.gmra.mrb[68].mxu1 %vm938_vm0, %v3051_v31 }
 0x88a   : > { %v2890_v8 = vpop.xlane.xlu0 %2889  ;;  %7621 = vmatpush3.bf16.msra.mxu1 %v8702_v38 }
 0x88b   : > { %v2891_v5 = vcvt.f32.s32 %v2890_v8  ;;  %7622 = vmatprep.subr.bf16.mxu1 %v8703_v13  ;;  %v10468_v8 = vld [vmem:[%s13986_s3] sm:$0xff]  }
 0x88c   : > { %v2905_v10 = vpop.xlane.xlu1 %2904 }
 0x88d   : > { %v2894_v29 = vadd.s32 %v2893_v4, %v2891_v5  ;;  %v2906_v36 = vcvt.f32.s32 %v2905_v10  ;;  %v2967_v4 = vcvt.f32.s32 %v10347_v17  ;;  %v2953_v5 = vshll.u32 %v2952_v23, 16 }
 0x88e   : > { %v2920_v47 = vpop.xlane.xlu0 %2919  ;;  %7623 = vmatpush3.bf16.msra.mxu1 %v8703_v13  ;;  %v2982_v10 = vcvt.f32.s32 %v10352_v15  ;;  %v2998_v17 = vshll.u32 %v2997_v40, 16 }
 0x88f   : > { %vm3008_vm4 = vcmp.eq.s32.totalorder %v9305_v50, %v2894_v29  ;;  %v2909_v48 = vadd.s32 %v2908_v39, %v2906_v36  ;;  %v2921_v14 = vcvt.f32.s32 %v2920_v47  ;;  %7624 = vmatprep.subr.bf16.mxu1 %v8704_v2  ;;  %v2968_v39 = vshll.u32 %v2967_v4, 16 }
 0x890   : > { %v2935_v44 = vpop.xlane.xlu1 %2934  ;;  %v10443_v41 = vsel %vm3008_vm4, 1.0, %v14463_v54 }
 0x891   : > { %vm3009_vm5 = vcmp.eq.s32.totalorder %v9305_v50, %v2909_v48  ;;  %14472 = vst [vmem:[#allocation115_spill] sm:$0xff] %v10443_v41  ;;  %v2924_v59 = vadd.s32 %v2923_v1, %v2921_v14  ;;  %v2936_v51 = vcvt.f32.s32 %v2935_v44  ;;  %v2983_v1 = vshll.u32 %v2982_v10, 16 }
 0x892   : > { %v10446_v55 = vsel %vm3009_vm5, 1.0, %v14463_v54  ;;  %7625 = vmatpush3.bf16.msra.mxu1 %v8704_v2 }
 0x893   : > { %14473 = vst [vmem:[#allocation116_spill] sm:$0xff] %v10446_v55  ;;  %v3052_v30 = vpack.c.bf16 %v10446_v55, %v10443_v41  ;;  %vm3010_vm6 = vcmp.eq.s32.totalorder %v9305_v50, %v2924_v59  ;;  %v2939_v24 = vadd.s32 %v2938_v7, %v2936_v51  ;;  %7626 = vmatprep.subr.bf16.mxu1 %v8705_v61 }
 0x894   : > { %v10458_v31 = vsel %vm3010_vm6, 1.0, %v14463_v54 }
 0x895   : > { %7572 = vmatprep.mubr.msk.bf16.mxu1 %vm938_vm0, %v3052_v30  ;;  %vm3011_vm7 = vcmp.eq.s32.totalorder %v9305_v50, %v2939_v24  ;;  %14474 = vst [vmem:[#allocation117_spill] sm:$0xff] %v10458_v31 }
 0x896   : > { %v10461_v38 = vsel %vm3011_vm7, 1.0, %v14463_v54  ;;  %7627 = vmatpush3.bf16.msra.mxu1 %v8705_v61 }
 0x897   : > { %14475 = vst [vmem:[#allocation118_spill] sm:$0xff] %v10461_v38  ;;  %v3053_v63 = vpack.c.bf16 %v10461_v38, %v10458_v31  ;;  %7644 = vmatprep.subr.bf16.mxu1 %v10468_v8 }
 0x899   : > { %7573 = vmatmul.mubr.msk.bf16.gmra.mrb[72].mxu1 %vm938_vm0, %v3053_v63 }
 0x89a   : > { %v2950_v12 = vpop.xlane.xlu0 %2949 }
 0x89b   : > { %v2951_v32 = vcvt.f32.s32 %v2950_v12 }
 0x89c   : > { %v2965_v13 = vpop.xlane.xlu1 %2964 }
 0x89d   : > { %v2954_v29 = vadd.s32 %v2953_v5, %v2951_v32  ;;  %v2966_v36 = vcvt.f32.s32 %v2965_v13 }
 0x89e   : > { %v2980_v47 = vpop.xlane.xlu0 %2979 }
 0x89f   : > { %vm3012_vm8 = vcmp.eq.s32.totalorder %v9305_v50, %v2954_v29  ;;  %v2969_v48 = vadd.s32 %v2968_v39, %v2966_v36  ;;  %v2981_v14 = vcvt.f32.s32 %v2980_v47 }
 0x8a0   : > { %v2995_v2 = vpop.xlane.xlu1 %2994  ;;  %v10478_v7 = vsel %vm3012_vm8, 1.0, %v14463_v54 }
 0x8a1   : > { %vm3013_vm9 = vcmp.eq.s32.totalorder %v9305_v50, %v2969_v48  ;;  %14476 = vst [vmem:[#allocation119_spill] sm:$0xff] %v10478_v7  ;;  %v2984_v44 = vadd.s32 %v2983_v1, %v2981_v14  ;;  %v2996_v9 = vcvt.f32.s32 %v2995_v2 }
 0x8a2   : > { %v10481_v15 = vsel %vm3013_vm9, 1.0, %v14463_v54 }
 0x8a3   : > { %14477 = vst [vmem:[#allocation120_spill] sm:$0xff] %v10481_v15  ;;  %v3054_v59 = vpack.c.bf16 %v10481_v15, %v10478_v7  ;;  %vm3014_vm11 = vcmp.eq.s32.totalorder %v9305_v50, %v2984_v44  ;;  %v2999_v51 = vadd.s32 %v2998_v17, %v2996_v9  ;;  %v8711_v9 = vld [vmem:[%s13984_s1 + $0x20] ss:$8 sps:$4 sm:$0xff]  }
 0x8a4   : > { %v10489_v30 = vsel %vm3014_vm11, 1.0, %v14463_v54 }
 0x8a5   : > { %7576 = vmatprep.mubr.msk.bf16.mxu1 %vm938_vm0, %v3054_v59  ;;  %vm3015_vm12 = vcmp.eq.s32.totalorder %v9305_v50, %v2999_v51  ;;  %14478 = vst [vmem:[#allocation121_spill] sm:$0xff] %v10489_v30  ;;  %v8712_v51 = vld [vmem:[%s13984_s1 + $0x34] ss:$8 sps:$4 sm:$0xff]  }
 0x8a6   : > { %v10492_v24 = vsel %vm3015_vm12, 1.0, %v14463_v54 }
 0x8a7   : > { %14479 = vst [vmem:[#allocation122_spill] sm:$0xff] %v10492_v24  ;;  %v3055_v61 = vpack.c.bf16 %v10492_v24, %v10489_v30 }
 0x8a9   : > { %7577 = vmatmul.mubr.msk.bf16.gmra.mrb[76].mxu1 %vm938_vm0, %v3055_v61 }
 0x94c   : > { %v7566_v23 = vpop.f32.mrb[64].mxu1 }
 0x94d   : > { %v3179_v63 = vadd.f32 %v7566_v23, %v9946_v45  ;;  %v3114_v4 = vpop.f32.mrb[65].mxu1 }
 0x94e   : > { %v3177_v12 = vadd.f32 %v3114_v4, %v9940_v11  ;;  %v7567_v5 = vpop.f32.mrb[66].mxu1 }
 0x94f   : > { %8064 = vtanh.f32 %v3179_v63  ;;  %v3180_v32 = vadd.f32 %v7567_v5, %v9949_v25  ;;  %v3117_v10 = vpop.f32.mrb[67].mxu1 }
 0x950   : > { %8066 = vtanh.f32 %v3177_v12  ;;  %v3178_v13 = vadd.f32 %v3117_v10, %v9943_v20  ;;  %v8713_v10 = vld [vmem:[%s13984_s1 + $0x30] ss:$8 sps:$4 sm:$0xff]  }
 0x951   : > { %8068 = vtanh.f32 %v3180_v32 }
 0x952   : > { %8070 = vtanh.f32 %v3178_v13 }
 0x959   : > { %v8065_v39 = vpop.eup %8064 }
 0x95a   : > { %v8067_v40 = vpop.eup %8066 }
 0x95b   : > { %v8069_v29 = vpop.eup %8068 }
 0x95c   : > { %v8071_v36 = vpop.eup %8070  ;;  %v7570_v48 = vpop.f32.mrb[68].mxu1  ;;  %v10501_v47 = vpack.c.bf16 %v8069_v29, %v8065_v39 }
 0x95d   : > { %v3183_v45 = vadd.f32 %v7570_v48, %v9960_v18  ;;  %v3130_v11 = vpop.f32.mrb[69].mxu1  ;;  %v10504_v1 = vpack.c.bf16 %v8071_v36, %v8067_v40  ;;  %v8707_v18 = vld [vmem:[%s13984_s1] ss:$8 sps:$4 sm:$0xff]   ;;  %v8714_v40 = vld [vmem:[%s13984_s1 + $0x44] ss:$8 sps:$4 sm:$0xff]  }
 0x95e   : > { %v3181_v25 = vadd.f32 %v3130_v11, %v9952_v49  ;;  %v7571_v14 = vpop.f32.mrb[70].mxu1  ;;  %v8708_v49 = vld [vmem:[%s13984_s1 + $0x14] ss:$8 sps:$4 sm:$0xff]   ;;  %v8719_v11 = vld [vmem:[%s13984_s1 + $0x60] ss:$8 sps:$4 sm:$0xff]  }
 0x95f   : > { %8072 = vtanh.f32 %v3183_v45  ;;  %v3184_v20 = vadd.f32 %v7571_v14, %v9963_v62  ;;  %v3133_v17 = vpop.f32.mrb[71].mxu1  ;;  %7596 = vmatprep.mubr.bf16.mxu0 %v10504_v1  ;;  %v8709_v62 = vld [vmem:[%s13984_s1 + $0x10] ss:$8 sps:$4 sm:$0xff]   ;;  %v8716_v48 = vld [vmem:[%s13984_s1 + $0x54] ss:$8 sps:$4 sm:$0xff]  }
 0x960   : > { %8074 = vtanh.f32 %v3181_v25  ;;  %v3182_v2 = vadd.f32 %v3133_v17, %v9956_v42  ;;  %7597 = vmatmul.mubr.bf16.vlgmr.msra.gmra.mrb[80].mxu0 %v10501_v47  ;;  %v8710_v42 = vld [vmem:[%s13984_s1 + $0x24] ss:$8 sps:$4 sm:$0xff]   ;;  %v8720_v14 = vld [vmem:[%s13984_s1 + $0x74] ss:$8 sps:$4 sm:$0xff]  }
 0x961   : > { %8076 = vtanh.f32 %v3184_v20  ;;  %3740 = vmatpush1.bf16.msra.mxu0 %v8707_v18 }
 0x962   : > { %8078 = vtanh.f32 %v3182_v2  ;;  %3741 = vmatprep.subr.bf16.mxu0 %v8708_v49 }
 0x965   : > { %3742 = vmatpush1.bf16.msra.mxu0 %v8709_v62 }
 0x966   : > { %3743 = vmatprep.subr.bf16.mxu0 %v8710_v42 }
 0x969   : > { %v8073_v44 = vpop.eup %8072  ;;  %3744 = vmatpush1.bf16.msra.mxu0 %v8711_v9 }
 0x96a   : > { %v8075_v59 = vpop.eup %8074  ;;  %3745 = vmatprep.subr.bf16.mxu0 %v8712_v51  ;;  %v8722_v51 = vld [vmem:[%s13988_s5] sm:$0xff]  }
 0x96b   : > { %v8077_v61 = vpop.eup %8076 }
 0x96c   : > { %v8079_v23 = vpop.eup %8078  ;;  %v7574_v63 = vpop.f32.mrb[72].mxu1  ;;  %v10529_v4 = vpack.c.bf16 %v8077_v61, %v8073_v44  ;;  %v8721_v44 = vld [vmem:[%s13984_s1 + $0x70] ss:$8 sps:$4 sm:$0xff]  }
 0x96d   : > { %v3187_v12 = vadd.f32 %v7574_v63, %v9972_v52  ;;  %v3146_v5 = vpop.f32.mrb[73].mxu1  ;;  %v10532_v32 = vpack.c.bf16 %v8079_v23, %v8075_v59  ;;  %3746 = vmatpush1.bf16.msra.mxu0 %v8713_v10 }
 0x96e   : > { %v3185_v13 = vadd.f32 %v3146_v5, %v9966_v28  ;;  %v7575_v39 = vpop.f32.mrb[74].mxu1  ;;  %3747 = vmatprep.subr.bf16.mxu0 %v8714_v40  ;;  %v8715_v28 = vld [vmem:[%s13984_s1 + $0x40] ss:$8 sps:$4 sm:$0xff]   ;;  %v8728_v40 = vld [vmem:[%s13988_s5 + $0x30] sm:$0xff]  }
 0x96f   : > { %8080 = vtanh.f32 %v3187_v12  ;;  %v3188_v29 = vadd.f32 %v7575_v39, %v9975_v16  ;;  %v3149_v52 = vpop.f32.mrb[75].mxu1  ;;  %7600 = vmatprep.mubr.bf16.mxu0 %v10532_v32  ;;  %v8717_v16 = vld [vmem:[%s13984_s1 + $0x50] ss:$8 sps:$4 sm:$0xff]   ;;  %v8726_v39 = vld [vmem:[%s13988_s5 + $0x20] sm:$0xff]  }
 0x970   : > { %8082 = vtanh.f32 %v3185_v13  ;;  %v3186_v36 = vadd.f32 %v3149_v52, %v9969_v58  ;;  %7601 = vmatmul.mubr.bf16.gmra.mrb[84].mxu0 %v10529_v4  ;;  %v8718_v58 = vld [vmem:[%s13984_s1 + $0x64] ss:$8 sps:$4 sm:$0xff]   ;;  %v10612_v52 = vld [vmem:[%s13989_s6] ss:$0 sm:$0xff] }
 0x971   : > { %8084 = vtanh.f32 %v3188_v29  ;;  %3748 = vmatpush1.bf16.msra.mxu0 %v8715_v28  ;;  %v8730_v29 = vld [vmem:[%s13984_s1 + $0x4] ss:$8 sps:$4 sm:$0xff]  }
 0x972   : > { %8086 = vtanh.f32 %v3186_v36  ;;  %3749 = vmatprep.subr.bf16.mxu0 %v8716_v48 }
 0x975   : > { %3750 = vmatpush1.bf16.msra.mxu0 %v8717_v16 }
 0x976   : > { %3751 = vmatprep.subr.bf16.mxu0 %v8718_v58 }
 0x979   : > { %v8081_v45 = vpop.eup %8080  ;;  %3752 = vmatpush1.bf16.msra.mxu0 %v8719_v11 }
 0x97a   : > { %v8083_v25 = vpop.eup %8082  ;;  %3753 = vmatprep.subr.bf16.mxu0 %v8720_v14 }
 0x97b   : > { %v8085_v20 = vpop.eup %8084 }
 0x97c   : > { %v8087_v17 = vpop.eup %8086  ;;  %v7578_v2 = vpop.f32.mrb[76].mxu1  ;;  %v3214_v18 = vpack.c.bf16 %v8085_v20, %v8081_v45 }
 0x97d   : > { %v3191_v49 = vadd.f32 %v7578_v2, %v9984_v35  ;;  %v3162_v62 = vpop.f32.mrb[77].mxu1  ;;  %v3213_v42 = vpack.c.bf16 %v8087_v17, %v8083_v25  ;;  %3754 = vmatpush1.bf16.msra.mxu0 %v8721_v44 }
 0x97e   : > { %v3189_v9 = vadd.f32 %v3162_v62, %v9978_v56  ;;  %v7579_v59 = vpop.f32.mrb[78].mxu1  ;;  %7694 = vmatprep.subr.bf16.mxu0 %v8722_v51 }
 0x97f   : > { %8088 = vtanh.f32 %v3191_v49  ;;  %v3192_v61 = vadd.f32 %v7579_v59, %v9987_v26  ;;  %v3165_v23 = vpop.f32.mrb[79].mxu1  ;;  %7604 = vmatprep.mubr.bf16.mxu0 %v3213_v42  ;;  %v8724_v26 = vld [vmem:[%s13988_s5 + $0x10] sm:$0xff]   ;;  %v8732_v49 = vld [vmem:[%s13986_s3 + $0x8] sm:$0xff]  }
 0x980   : > { %8090 = vtanh.f32 %v3189_v9  ;;  %v3190_v35 = vadd.f32 %v3165_v23, %v9981_v37  ;;  %7605 = vmatmul.mubr.bf16.gmra.mrb[88].mxu0 %v3214_v18  ;;  %v8723_v37 = vld [vmem:[%s13988_s5 + $0x8] sm:$0xff]   ;;  %v8733_v9 = vld [vmem:[%s13986_s3 + $0x10] sm:$0xff]  }
 0x981   : > { %8092 = vtanh.f32 %v3192_v61 }
 0x982   : > { %8094 = vtanh.f32 %v3190_v35 }
 0x989   : > { %v8089_v63 = vpop.eup %8088 }
 0x98a   : > { %v8091_v12 = vpop.eup %8090 }
 0x98b   : > { %v8093_v56 = vpop.eup %8092 }
 0x98c   : > { %v8095_v5 = vpop.eup %8094  ;;  %v3216_v10 = vpack.c.bf16 %v8093_v56, %v8089_v63 }
 0x98d   : > { %v3215_v13 = vpack.c.bf16 %v8095_v5, %v8091_v12  ;;  %v8734_v12 = vld [vmem:[%s13986_s3 + $0x18] sm:$0xff]  }
 0x98f   : > { %7608 = vmatprep.mubr.bf16.mxu0 %v3215_v13 }
 0x990   : > { %7609 = vmatmul.mubr.bf16.gmra.mrb[92].mxu0 %v3216_v10 }
 0x991   : > { %3771 = vmatprep.mubr.bf16.mxu0 %v14414_v53 }
 0x998   : > { %3772 = vmatmul.mubr.bf16.vlgmr.msra.gmra.mrb[96].mxu0 %v10504_v1  ;;  %v8725_v1 = vld [vmem:[%s13988_s5 + $0x18] sm:$0xff]  }
 0x999   : > { %3781 = vmatprep.mubr.bf16.mxu0 %v14414_v53  ;;  %7695 = vmatpush3.bf16.msra.mxu0 %v8722_v51 }
 0x99a   : > { %7696 = vmatprep.subr.bf16.mxu0 %v8723_v37 }
 0x99d   : > { %7697 = vmatpush3.bf16.msra.mxu0 %v8723_v37  ;;  %v8735_v37 = vld [vmem:[%s13986_s3 + $0x20] sm:$0xff]  }
 0x99e   : > { %7698 = vmatprep.subr.bf16.mxu0 %v8724_v26 }
 0x9a0   : > { %3782 = vmatmul.mubr.bf16.gmra.mrb[100].mxu0 %v10501_v47  ;;  %v8727_v47 = vld [vmem:[%s13988_s5 + $0x28] sm:$0xff]  }
 0x9a1   : > { %3791 = vmatprep.mubr.bf16.mxu0 %v14414_v53  ;;  %7699 = vmatpush3.bf16.msra.mxu0 %v8724_v26  ;;  %v8736_v26 = vld [vmem:[%s13986_s3 + $0x28] sm:$0xff]  }
 0x9a2   : > { %7700 = vmatprep.subr.bf16.mxu0 %v8725_v1 }
 0x9a5   : > { %7701 = vmatpush3.bf16.msra.mxu0 %v8725_v1 }
 0x9a6   : > { %7702 = vmatprep.subr.bf16.mxu0 %v8726_v39 }
 0x9a8   : > { %3792 = vmatmul.mubr.bf16.gmra.mrb[104].mxu0 %v10532_v32  ;;  %v8729_v32 = vld [vmem:[%s13988_s5 + $0x38] sm:$0xff]  }
 0x9a9   : > { %3801 = vmatprep.mubr.bf16.mxu0 %v14414_v53  ;;  %7703 = vmatpush3.bf16.msra.mxu0 %v8726_v39 }
 0x9aa   : > { %7704 = vmatprep.subr.bf16.mxu0 %v8727_v47 }
 0x9ad   : > { %7705 = vmatpush3.bf16.msra.mxu0 %v8727_v47 }
 0x9ae   : > { %7706 = vmatprep.subr.bf16.mxu0 %v8728_v40 }
 0x9b0   : > { %3802 = vmatmul.mubr.bf16.gmra.mrb[108].mxu0 %v10529_v4 }
 0x9b1   : > { %3811 = vmatprep.mubr.bf16.mxu0 %v14414_v53  ;;  %7707 = vmatpush3.bf16.msra.mxu0 %v8728_v40  ;;  %v8737_v40 = vld [vmem:[%s13986_s3 + $0x30] sm:$0xff]  }
 0x9b2   : > { %7708 = vmatprep.subr.bf16.mxu0 %v8729_v32 }
 0x9b5   : > { %7709 = vmatpush3.bf16.msra.mxu0 %v8729_v32 }
 0x9b6   : > { %5208 = vmatprep.subr.bf16.mxu0 %v8730_v29 }
 0x9b8   : > { %3812 = vmatmul.mubr.bf16.gmra.mrb[112].mxu0 %v3213_v42 }
 0x9b9   : > { %3821 = vmatprep.mubr.bf16.mxu0 %v14414_v53 }
 0x9c0   : > { %3822 = vmatmul.mubr.bf16.gmra.mrb[116].mxu0 %v3214_v18 }
 0x9c1   : > { %3831 = vmatprep.mubr.bf16.mxu0 %v14414_v53 }
 0x9c8   : > { %3832 = vmatmul.mubr.bf16.gmra.mrb[120].mxu0 %v3215_v13 }
 0x9c9   : > { %3841 = vmatprep.mubr.bf16.mxu0 %v14414_v53 }
 0x9d0   : > { %3842 = vmatmul.mubr.bf16.gmra.mrb[124].mxu0 %v3216_v10 }
 0xa33   : > { %v7598_v4 = vpop.f32.mrb[80].mxu0 }
 0xa34   : > { %v3260_v36 = vadd.f32 %v10612_v52, %v7598_v4  ;;  %v3251_v28 = vpop.f32.mrb[81].mxu0 }
 0xa35   : > { %v3252_v48 = vadd.f32 %v10612_v52, %v3251_v28  ;;  %v7599_v16 = vpop.f32.mrb[82].mxu0 }
 0xa36   : > { %v3263_v58 = vadd.f32 %v10612_v52, %v7599_v16  ;;  %v3254_v45 = vpop.f32.mrb[83].mxu0  ;;  %v3316_v25 = vmax.f32 %v3260_v36, 0.0 }
 0xa37   : > { %v3255_v11 = vadd.f32 %v10612_v52, %v3254_v45  ;;  %v3314_v20 = vmax.f32 %v3252_v48, 0.0 }
 0xa38   : > { %v3317_v14 = vmax.f32 %v3263_v58, 0.0  ;;  %v8738_v58 = vld [vmem:[%s13986_s3 + $0x38] sm:$0xff]  }
 0xa39   : > { %v3315_v17 = vmax.f32 %v3255_v11, 0.0 }
 0xa3a   : > { %v3331_v2 = vpack.c.bf16 %v3317_v14, %v3316_v25 }
 0xa3b   : > { %v3330_v18 = vpack.c.bf16 %v3315_v17, %v3314_v20  ;;  %v8739_v20 = vld [vmem:[%s13992_s9] sm:$0xf] }
 0xa3d   : > { %7628 = vmatprep.mubr.bf16.mxu1 %v3330_v18 }
 0xa3e   : > { %7629 = vmatmul.mubr.bf16.vlgmr.msra.gmra.mrb[80].mxu1 %v3331_v2 }
 0xa3f   : > { %7645 = vmatpush3.bf16.msra.mxu1 %v10468_v8 }
 0xa40   : > { %7646 = vmatprep.subr.bf16.mxu1 %v8732_v49 }
 0xa43   : > { %v7602_v62 = vpop.f32.mrb[84].mxu0  ;;  %7647 = vmatpush3.bf16.msra.mxu1 %v8732_v49 }
 0xa44   : > { %v3276_v42 = vadd.f32 %v10612_v52, %v7602_v62  ;;  %v3267_v44 = vpop.f32.mrb[85].mxu0  ;;  %7648 = vmatprep.subr.bf16.mxu1 %v8733_v9 }
 0xa45   : > { %v3268_v59 = vadd.f32 %v10612_v52, %v3267_v44  ;;  %v7603_v51 = vpop.f32.mrb[86].mxu0 }
 0xa46   : > { %v3279_v8 = vadd.f32 %v10612_v52, %v7603_v51  ;;  %v3270_v61 = vpop.f32.mrb[87].mxu0  ;;  %v3320_v35 = vmax.f32 %v3276_v42, 0.0 }
 0xa47   : > { %v3271_v23 = vadd.f32 %v10612_v52, %v3270_v61  ;;  %7649 = vmatpush3.bf16.msra.mxu1 %v8733_v9  ;;  %v3318_v56 = vmax.f32 %v3268_v59, 0.0 }
 0xa48   : > { %v3321_v63 = vmax.f32 %v3279_v8, 0.0  ;;  %7650 = vmatprep.subr.bf16.mxu1 %v8734_v12 }
 0xa49   : > { %v3319_v5 = vmax.f32 %v3271_v23, 0.0 }
 0xa4a   : > { %v3333_v10 = vpack.c.bf16 %v3321_v63, %v3320_v35 }
 0xa4b   : > { %v3332_v13 = vpack.c.bf16 %v3319_v5, %v3318_v56  ;;  %7651 = vmatpush3.bf16.msra.mxu1 %v8734_v12  ;;  %v10659_v12 = vld [vmem:[%s13985_s2] ss:$0 sm:$0xff] }
 0xa4c   : > { %7652 = vmatprep.subr.bf16.mxu1 %v8735_v37 }
 0xa4d   : > { %7632 = vmatprep.mubr.bf16.mxu1 %v3332_v13 }
 0xa4e   : > { %7633 = vmatmul.mubr.bf16.gmra.mrb[84].mxu1 %v3333_v10 }
 0xa4f   : > { %7653 = vmatpush3.bf16.msra.mxu1 %v8735_v37 }
 0xa50   : > { %7654 = vmatprep.subr.bf16.mxu1 %v8736_v26 }
 0xa53   : > { %v7606_v1 = vpop.f32.mrb[88].mxu0  ;;  %7655 = vmatpush3.bf16.msra.mxu1 %v8736_v26 }
 0xa54   : > { %v3292_v39 = vadd.f32 %v10612_v52, %v7606_v1  ;;  %v3283_v47 = vpop.f32.mrb[89].mxu0  ;;  %7656 = vmatprep.subr.bf16.mxu1 %v8737_v40 }
 0xa55   : > { %v3284_v32 = vadd.f32 %v10612_v52, %v3283_v47  ;;  %v7607_v29 = vpop.f32.mrb[90].mxu0 }
 0xa56   : > { %v3295_v4 = vadd.f32 %v10612_v52, %v7607_v29  ;;  %v3286_v36 = vpop.f32.mrb[91].mxu0  ;;  %v3324_v48 = vmax.f32 %v3292_v39, 0.0 }
 0xa57   : > { %v3287_v28 = vadd.f32 %v10612_v52, %v3286_v36  ;;  %7657 = vmatpush3.bf16.msra.mxu1 %v8737_v40  ;;  %v3322_v45 = vmax.f32 %v3284_v32, 0.0 }
 0xa58   : > { %v3325_v16 = vmax.f32 %v3295_v4, 0.0  ;;  %7658 = vmatprep.subr.bf16.mxu1 %v8738_v58 }
 0xa59   : > { %v3323_v11 = vmax.f32 %v3287_v28, 0.0 }
 0xa5a   : > { %v3335_v25 = vpack.c.bf16 %v3325_v16, %v3324_v48 }
 0xa5b   : > { %v3334_v14 = vpack.c.bf16 %v3323_v11, %v3322_v45  ;;  %7659 = vmatpush3.bf16.msra.mxu1 %v8738_v58 }
 0xa5c   : > { %7922 = vmatprep.subr.msk.bf16.mxu1 %vm1499_vm10, %v8739_v20 }
 0xa5d   : > { %7636 = vmatprep.mubr.bf16.mxu1 %v3334_v14 }
 0xa5e   : > { %7637 = vmatmul.mubr.bf16.gmra.mrb[88].mxu1 %v3335_v25 }
 0xa63   : > { %v7610_v17 = vpop.f32.mrb[92].mxu0 }
 0xa64   : > { %v3308_v2 = vadd.f32 %v10612_v52, %v7610_v17  ;;  %v3299_v18 = vpop.f32.mrb[93].mxu0 }
 0xa65   : > { %v3300_v49 = vadd.f32 %v10612_v52, %v3299_v18  ;;  %v7611_v62 = vpop.f32.mrb[94].mxu0 }
 0xa66   : > { %v3311_v42 = vadd.f32 %v10612_v52, %v7611_v62  ;;  %v3302_v44 = vpop.f32.mrb[95].mxu0  ;;  %v3328_v59 = vmax.f32 %v3308_v2, 0.0 }
 0xa67   : > { %v3303_v9 = vadd.f32 %v10612_v52, %v3302_v44  ;;  %v3326_v8 = vmax.f32 %v3300_v49, 0.0 }
 0xa68   : > { %v3329_v51 = vmax.f32 %v3311_v42, 0.0 }
 0xa69   : > { %v3327_v61 = vmax.f32 %v3303_v9, 0.0 }
 0xa6a   : > { %v3337_v23 = vpack.c.bf16 %v3329_v51, %v3328_v59 }
 0xa6b   : > { %v3336_v35 = vpack.c.bf16 %v3327_v61, %v3326_v8  ;;  %v3773_v63 = vpop.f32.mrb[96].mxu0 }
 0xa6c   : > { %v3852_v56 = vadd.f32 %v10659_v12, %v3773_v63  ;;  %v10662_v5 = vpop.f32.mrb[97].mxu0 }
 0xa6d   : > { %7640 = vmatprep.mubr.bf16.mxu1 %v3336_v35  ;;  %v3777_v10 = vpop.f32.mrb[98].mxu0 }
 0xa6e   : > { %v3853_v52 = vadd.f32 %v10659_v12, %v3777_v10  ;;  %7641 = vmatmul.mubr.bf16.gmra.mrb[92].mxu1 %v3337_v23  ;;  %v10665_v13 = vpop.f32.mrb[99].mxu0  ;;  %v3868_v37 = vmax.f32 %v3852_v56, 0.0 }
 0xa70   : > { %v3869_v26 = vmax.f32 %v3853_v52, 0.0 }
 0xa72   : > { %v3884_v1 = vpack.c.bf16 %v3869_v26, %v3868_v37 }
 0xa73   : > { %v3783_v39 = vpop.f32.mrb[100].mxu0 }
 0xa74   : > { %v3854_v47 = vadd.f32 %v10659_v12, %v3783_v39  ;;  %v10668_v40 = vpop.f32.mrb[101].mxu0  ;;  %7660 = vmatprep.mubr.bf16.mxu1 %v3884_v1 }
 0xa75   : > { %v3787_v32 = vpop.f32.mrb[102].mxu0 }
 0xa76   : > { %v3855_v29 = vadd.f32 %v10659_v12, %v3787_v32  ;;  %v10671_v4 = vpop.f32.mrb[103].mxu0  ;;  %v3870_v36 = vmax.f32 %v3854_v47, 0.0 }
 0xa78   : > { %v3871_v28 = vmax.f32 %v3855_v29, 0.0 }
 0xa7a   : > { %v3885_v48 = vpack.c.bf16 %v3871_v28, %v3870_v36 }
 0xa7b   : > { %v3793_v16 = vpop.f32.mrb[104].mxu0 }
 0xa7c   : > { %v3856_v58 = vadd.f32 %v10659_v12, %v3793_v16  ;;  %v10674_v45 = vpop.f32.mrb[105].mxu0  ;;  %7661 = vmatmul.mubr.bf16.vlgmr.msra.gmra.mrb[96].mxu1 %v3885_v48 }
 0xa7d   : > { %v3797_v11 = vpop.f32.mrb[106].mxu0  ;;  %7677 = vmatpush3.bf16.msra.mxu1 %v9548_v43 }
 0xa7e   : > { %v3857_v25 = vadd.f32 %v10659_v12, %v3797_v11  ;;  %v10678_v14 = vpop.f32.mrb[107].mxu0  ;;  %7726 = vmatprep.subr.bf16.mxu1 %v10391_v57  ;;  %v3872_v20 = vmax.f32 %v3856_v58, 0.0 }
 0xa80   : > { %v3873_v17 = vmax.f32 %v3857_v25, 0.0 }
 0xa82   : > { %v3886_v2 = vpack.c.bf16 %v3873_v17, %v3872_v20 }
 0xa83   : > { %v3803_v18 = vpop.f32.mrb[108].mxu0 }
 0xa84   : > { %v3858_v49 = vadd.f32 %v10659_v12, %v3803_v18  ;;  %v10682_v62 = vpop.f32.mrb[109].mxu0  ;;  %7664 = vmatprep.mubr.bf16.mxu1 %v3886_v2 }
 0xa85   : > { %v3807_v42 = vpop.f32.mrb[110].mxu0 }
 0xa86   : > { %v3859_v44 = vadd.f32 %v10659_v12, %v3807_v42  ;;  %v10685_v9 = vpop.f32.mrb[111].mxu0  ;;  %v3874_v59 = vmax.f32 %v3858_v49, 0.0 }
 0xa88   : > { %v3875_v51 = vmax.f32 %v3859_v44, 0.0 }
 0xa8a   : > { %v3887_v8 = vpack.c.bf16 %v3875_v51, %v3874_v59 }
 0xa8b   : > { %v3813_v61 = vpop.f32.mrb[112].mxu0 }
 0xa8c   : > { %v3860_v57 = vadd.f32 %v10659_v12, %v3813_v61  ;;  %v10688_v23 = vpop.f32.mrb[113].mxu0  ;;  %7665 = vmatmul.mubr.bf16.gmra.mrb[100].mxu1 %v3887_v8 }
 0xa8d   : > { %v3817_v35 = vpop.f32.mrb[114].mxu0 }
 0xa8e   : > { %v3861_v63 = vadd.f32 %v10659_v12, %v3817_v35  ;;  %v10691_v56 = vpop.f32.mrb[115].mxu0  ;;  %v3876_v10 = vmax.f32 %v3860_v57, 0.0 }
 0xa90   : > { %v3877_v52 = vmax.f32 %v3861_v63, 0.0 }
 0xa92   : > { %v3888_v37 = vpack.c.bf16 %v3877_v52, %v3876_v10 }
 0xa93   : > { %v3823_v26 = vpop.f32.mrb[116].mxu0 }
 0xa94   : > { %v3862_v1 = vadd.f32 %v10659_v12, %v3823_v26  ;;  %v10694_v39 = vpop.f32.mrb[117].mxu0  ;;  %7668 = vmatprep.mubr.bf16.mxu1 %v3888_v37 }
 0xa95   : > { %v3827_v47 = vpop.f32.mrb[118].mxu0 }
 0xa96   : > { %v3863_v32 = vadd.f32 %v10659_v12, %v3827_v47  ;;  %v10697_v29 = vpop.f32.mrb[119].mxu0  ;;  %v3878_v36 = vmax.f32 %v3862_v1, 0.0 }
 0xa98   : > { %v3879_v28 = vmax.f32 %v3863_v32, 0.0 }
 0xa9a   : > { %v3889_v48 = vpack.c.bf16 %v3879_v28, %v3878_v36 }
 0xa9b   : > { %v3833_v16 = vpop.f32.mrb[120].mxu0 }
 0xa9c   : > { %v3864_v58 = vadd.f32 %v10659_v12, %v3833_v16  ;;  %v10700_v11 = vpop.f32.mrb[121].mxu0  ;;  %7669 = vmatmul.mubr.bf16.gmra.mrb[104].mxu1 %v3889_v48 }
 0xa9d   : > { %v3837_v25 = vpop.f32.mrb[122].mxu0 }
 0xa9e   : > { %v3865_v20 = vadd.f32 %v10659_v12, %v3837_v25  ;;  %v10703_v17 = vpop.f32.mrb[123].mxu0  ;;  %v3880_v2 = vmax.f32 %v3864_v58, 0.0 }
 0xaa0   : > { %v3881_v18 = vmax.f32 %v3865_v20, 0.0 }
 0xaa2   : > { %v3890_v49 = vpack.c.bf16 %v3881_v18, %v3880_v2 }
 0xaa3   : > { %v3843_v42 = vpop.f32.mrb[124].mxu0 }
 0xaa4   : > { %v3866_v44 = vadd.f32 %v10659_v12, %v3843_v42  ;;  %v10706_v59 = vpop.f32.mrb[125].mxu0  ;;  %7672 = vmatprep.mubr.bf16.mxu1 %v3890_v49  ;;  %v8741_v42 = vld [vmem:[%s13987_s4] ss:$0 sm:$0xff] }
 0xaa5   : > { %v3847_v51 = vpop.f32.mrb[126].mxu0 }
 0xaa6   : > { %v3867_v8 = vadd.f32 %v10659_v12, %v3847_v51  ;;  %v10709_v61 = vpop.f32.mrb[127].mxu0  ;;  %v3882_v57 = vmax.f32 %v3866_v44, 0.0 }
 0xaa8   : > { %v3883_v35 = vmax.f32 %v3867_v8, 0.0 }
 0xaaa   : > { %v3891_v63 = vpack.c.bf16 %v3883_v35, %v3882_v57 }
 0xaac   : > { %7673 = vmatmul.mubr.bf16.gmra.mrb[108].mxu1 %v3891_v63 }
 0xb11   : > { %v10711_v10 = vpop.f32.mrb[80].mxu1 }
 0xb12   : > { %14480 = vst [vmem:[#allocation123_spill] sm:$0xff] %v10711_v10  ;;  %v10713_v52 = vpop.f32.mrb[81].mxu1 }
 0xb13   : > { %14481 = vst [vmem:[#allocation124_spill] sm:$0xff] %v10713_v52  ;;  %v10715_v37 = vpop.f32.mrb[82].mxu1 }
 0xb14   : > { %14482 = vst [vmem:[#allocation125_spill] sm:$0xff] %v10715_v37  ;;  %v10717_v26 = vpop.f32.mrb[83].mxu1 }
 0xb15   : > { %14483 = vst [vmem:[#allocation126_spill] sm:$0xff] %v10717_v26 }
 0xb21   : > { %v10719_v1 = vpop.f32.mrb[84].mxu1 }
 0xb22   : > { %14484 = vst [vmem:[#allocation127_spill] sm:$0xff] %v10719_v1  ;;  %v10721_v47 = vpop.f32.mrb[85].mxu1 }
 0xb23   : > { %14485 = vst [vmem:[#allocation128_spill] sm:$0xff] %v10721_v47  ;;  %v10723_v32 = vpop.f32.mrb[86].mxu1 }
 0xb24   : > { %14486 = vst [vmem:[#allocation129_spill] sm:$0xff] %v10723_v32  ;;  %v10725_v12 = vpop.f32.mrb[87].mxu1 }
 0xb25   : > { %14487 = vst [vmem:[#allocation130_spill] sm:$0xff] %v10725_v12 }
 0xb31   : > { %v10727_v36 = vpop.f32.mrb[88].mxu1 }
 0xb32   : > { %14488 = vst [vmem:[#allocation131_spill] sm:$0xff] %v10727_v36  ;;  %v10729_v28 = vpop.f32.mrb[89].mxu1 }
 0xb33   : > { %14489 = vst [vmem:[#allocation132_spill] sm:$0xff] %v10729_v28  ;;  %v10731_v48 = vpop.f32.mrb[90].mxu1 }
 0xb34   : > { %14490 = vst [vmem:[#allocation133_spill] sm:$0xff] %v10731_v48  ;;  %v10733_v16 = vpop.f32.mrb[91].mxu1 }
 0xb35   : > { %14491 = vst [vmem:[#allocation134_spill] sm:$0xff] %v10733_v16 }
 0xb41   : > { %v10735_v58 = vpop.f32.mrb[92].mxu1 }
 0xb42   : > { %14492 = vst [vmem:[#allocation135_spill] sm:$0xff] %v10735_v58  ;;  %v10737_v25 = vpop.f32.mrb[93].mxu1 }
 0xb43   : > { %14493 = vst [vmem:[#allocation136_spill] sm:$0xff] %v10737_v25  ;;  %v10739_v20 = vpop.f32.mrb[94].mxu1 }
 0xb44   : > { %14494 = vst [vmem:[#allocation137_spill] sm:$0xff] %v10739_v20  ;;  %v10741_v2 = vpop.f32.mrb[95].mxu1 }
 0xb45   : > { %14495 = vst [vmem:[#allocation138_spill] sm:$0xff] %v10741_v2 }
 0xb4f   : > { %v7662_v18 = vpop.f32.mrb[96].mxu1 }
 0xb50   : > { %v3926_v49 = vpop.f32.mrb[97].mxu1  ;;  %v10748_v57 = vadd.f32 %v8741_v42, %v7662_v18 }
 0xb51   : > { %v10746_v44 = vadd.f32 %v8741_v42, %v3926_v49  ;;  %v7663_v51 = vpop.f32.mrb[98].mxu1 }
 0xb52   : > { %v3929_v8 = vpop.f32.mrb[99].mxu1  ;;  %14497 = vst [vmem:[#allocation140_spill] sm:$0xff] %v10748_v57  ;;  %v10754_v24 = vadd.f32 %v8741_v42, %v7663_v51  ;;  %v3995_v49 = vsel %vm938_vm0, %v10748_v57, -inf }
 0xb53   : > { %14496 = vst [vmem:[#allocation139_spill] sm:$0xff] %v10746_v44  ;;  %v10750_v35 = vadd.f32 %v8741_v42, %v3929_v8  ;;  %v3989_v63 = vsel %vm938_vm0, %v10746_v44, -inf }
 0xb54   : > { %3990 = vmax.xlane.f32.xlu0 %v3989_v63  ;;  %14499 = vst [vmem:[#allocation142_spill] sm:$0xff] %v10754_v24  ;;  %v3998_v18 = vsel %vm938_vm0, %v10754_v24, -inf }
 0xb55   : > { %14498 = vst [vmem:[#allocation141_spill] sm:$0xff] %v10750_v35  ;;  %v3992_v30 = vsel %vm938_vm0, %v10750_v35, -inf }
 0xb56   : > { %3993 = vmax.xlane.f32.xlu1 %v3992_v30 }
 0xb58   : > { %3996 = vmax.xlane.f32.xlu0 %v3995_v49 }
 0xb5a   : > { %3999 = vmax.xlane.f32.xlu1 %v3998_v18 }
 0xb5f   : > { %v7666_v8 = vpop.f32.mrb[100].mxu1 }
 0xb60   : > { %v3942_v15 = vpop.f32.mrb[101].mxu1  ;;  %v10764_v51 = vadd.f32 %v8741_v42, %v7666_v8 }
 0xb61   : > { %v10762_v7 = vadd.f32 %v8741_v42, %v3942_v15  ;;  %v7667_v38 = vpop.f32.mrb[102].mxu1 }
 0xb62   : > { %v3945_v63 = vpop.f32.mrb[103].mxu1  ;;  %14501 = vst [vmem:[#allocation144_spill] sm:$0xff] %v10764_v51  ;;  %v10770_v55 = vadd.f32 %v8741_v42, %v7667_v38  ;;  %v4007_v15 = vsel %vm938_vm0, %v10764_v51, -inf }
 0xb63   : > { %14500 = vst [vmem:[#allocation143_spill] sm:$0xff] %v10762_v7  ;;  %v10766_v31 = vadd.f32 %v8741_v42, %v3945_v63  ;;  %v4001_v30 = vsel %vm938_vm0, %v10762_v7, -inf }
 0xb64   : > { %4002 = vmax.xlane.f32.xlu0 %v4001_v30  ;;  %14503 = vst [vmem:[#allocation146_spill] sm:$0xff] %v10770_v55  ;;  %v4010_v18 = vsel %vm938_vm0, %v10770_v55, -inf }
 0xb65   : > { %14502 = vst [vmem:[#allocation145_spill] sm:$0xff] %v10766_v31  ;;  %v4004_v49 = vsel %vm938_vm0, %v10766_v31, -inf }
 0xb66   : > { %4005 = vmax.xlane.f32.xlu1 %v4004_v49 }
 0xb68   : > { %4008 = vmax.xlane.f32.xlu0 %v4007_v15 }
 0xb6a   : > { %4011 = vmax.xlane.f32.xlu1 %v4010_v18 }
 0xb6f   : > { %v7670_v8 = vpop.f32.mrb[104].mxu1 }
 0xb70   : > { %v3958_v63 = vpop.f32.mrb[105].mxu1  ;;  %v10780_v38 = vadd.f32 %v8741_v42, %v7670_v8 }
 0xb71   : > { %v10778_v41 = vadd.f32 %v8741_v42, %v3958_v63  ;;  %v7671_v27 = vpop.f32.mrb[106].mxu1 }
 0xb72   : > { %v3961_v30 = vpop.f32.mrb[107].mxu1  ;;  %14505 = vst [vmem:[#allocation148_spill] sm:$0xff] %v10780_v38  ;;  %v10786_v3 = vadd.f32 %v8741_v42, %v7671_v27  ;;  %v4019_v18 = vsel %vm938_vm0, %v10780_v38, -inf }
 0xb73   : > { %14504 = vst [vmem:[#allocation147_spill] sm:$0xff] %v10778_v41  ;;  %v10782_v46 = vadd.f32 %v8741_v42, %v3961_v30  ;;  %v4013_v49 = vsel %vm938_vm0, %v10778_v41, -inf }
 0xb74   : > { %4014 = vmax.xlane.f32.xlu0 %v4013_v49  ;;  %14507 = vst [vmem:[#allocation150_spill] sm:$0xff] %v10786_v3  ;;  %v4022_v8 = vsel %vm938_vm0, %v10786_v3, -inf }
 0xb75   : > { %14506 = vst [vmem:[#allocation149_spill] sm:$0xff] %v10782_v46  ;;  %v4016_v15 = vsel %vm938_vm0, %v10782_v46, -inf }
 0xb76   : > { %4017 = vmax.xlane.f32.xlu1 %v4016_v15 }
 0xb78   : > { %4020 = vmax.xlane.f32.xlu0 %v4019_v18 }
 0xb7a   : > { %4023 = vmax.xlane.f32.xlu1 %v4022_v8 }
 0xb7f   : > { %v7674_v63 = vpop.f32.mrb[108].mxu1 }
 0xb80   : > { %v3974_v30 = vpop.f32.mrb[109].mxu1  ;;  %v10796_v27 = vadd.f32 %v8741_v42, %v7674_v63 }
 0xb81   : > { %v10794_v33 = vadd.f32 %v8741_v42, %v3974_v30  ;;  %v7675_v34 = vpop.f32.mrb[110].mxu1 }
 0xb82   : > { %v3977_v49 = vpop.f32.mrb[111].mxu1  ;;  %14509 = vst [vmem:[#allocation152_spill] sm:$0xff] %v10796_v27  ;;  %v10802_v60 = vadd.f32 %v8741_v42, %v7675_v34  ;;  %v4031_v8 = vsel %vm938_vm0, %v10796_v27, -inf }
 0xb83   : > { %14508 = vst [vmem:[#allocation151_spill] sm:$0xff] %v10794_v33  ;;  %v10798_v19 = vadd.f32 %v8741_v42, %v3977_v49  ;;  %v4025_v15 = vsel %vm938_vm0, %v10794_v33, -inf }
 0xb84   : > { %4026 = vmax.xlane.f32.xlu0 %v4025_v15  ;;  %14511 = vst [vmem:[#allocation154_spill] sm:$0xff] %v10802_v60  ;;  %v4034_v63 = vsel %vm938_vm0, %v10802_v60, -inf }
 0xb85   : > { %14510 = vst [vmem:[#allocation153_spill] sm:$0xff] %v10798_v19  ;;  %v4028_v18 = vsel %vm938_vm0, %v10798_v19, -inf }
 0xb86   : > { %4029 = vmax.xlane.f32.xlu1 %v4028_v18 }
 0xb88   : > { %4032 = vmax.xlane.f32.xlu0 %v4031_v8 }
 0xb8a   : > { %4035 = vmax.xlane.f32.xlu1 %v4034_v63 }
 0xbe1   : > { %v10810_v30 = vpop.xlane.xlu0 %3990 }
 0xbe2   : > { %14512 = vst [vmem:[#allocation155_spill] sm:$0xff] %v10810_v30  ;;  %vm4197_vm13 = vcmp.ge.f32.partialorder %v10746_v44, %v10810_v30 }
 0xbe3   : > { %v10814_v49 = vpop.xlane.xlu1 %3993  ;;  %v4213_v34 = vsel %vm4197_vm13, %v9305_v50, 8 }
 0xbe4   : > { %14513 = vst [vmem:[#allocation156_spill] sm:$0xff] %v10814_v49  ;;  %v10818_v42 = vsel %vm938_vm0, %v4213_v34, 2147483647  ;;  %vm4198_vm14 = vcmp.ge.f32.partialorder %v10750_v35, %v10814_v49 }
 0xbe5   : > { %v10822_v15 = vpop.xlane.xlu0 %3996  ;;  %v4231_v18 = vshra.s32 %v10818_v42, 16  ;;  %v4214_v8 = vsel %vm4198_vm14, %v9305_v50, 8 }
 0xbe6   : > { %14514 = vst [vmem:[#allocation157_spill] sm:$0xff] %v10822_v15  ;;  %v10827_v63 = vsel %vm938_vm0, %v4214_v8, 2147483647  ;;  %vm4199_vm15 = vcmp.ge.f32.partialorder %v10748_v57, %v10822_v15 }
 0xbe7   : > { %v10829_v22 = vpop.xlane.xlu1 %3999  ;;  %v10831_v44 = vcvt.s32.f32 %v4231_v18  ;;  %v4246_v30 = vshra.s32 %v10827_v63, 16  ;;  %v4215_v34 = vsel %vm4199_vm15, %v9305_v50, 8 }
 0xbe8   : > { %14515 = vst [vmem:[#allocation158_spill] sm:$0xff] %v10829_v22  ;;  %v10841_v49 = vsel %vm938_vm0, %v4215_v34, 2147483647  ;;  %vm4200_vm1 = vcmp.ge.f32.partialorder %v10754_v24, %v10829_v22 }
 0xbe9   : > { %4234 = vmin.xlane.f32.xlu0 %v10831_v44  ;;  %v10838_v35 = vcvt.s32.f32 %v4246_v30  ;;  %v4261_v18 = vshra.s32 %v10841_v49, 16  ;;  %v4216_v8 = vsel %vm4200_vm1, %v9305_v50, 8 }
 0xbea   : > { %v10849_v57 = vsel %vm938_vm0, %v4216_v8, 2147483647 }
 0xbeb   : > { %4249 = vmin.xlane.f32.xlu1 %v10838_v35  ;;  %v10851_v15 = vcvt.s32.f32 %v4261_v18  ;;  %v4276_v30 = vshra.s32 %v10849_v57, 16 }
 0xbed   : > { %4264 = vmin.xlane.f32.xlu0 %v10851_v15  ;;  %v10855_v34 = vcvt.s32.f32 %v4276_v30 }
 0xbef   : > { %4279 = vmin.xlane.f32.xlu1 %v10855_v34 }
 0xbf1   : > { %v10858_v24 = vpop.xlane.xlu0 %4002 }
 0xbf2   : > { %14516 = vst [vmem:[#allocation159_spill] sm:$0xff] %v10858_v24  ;;  %vm4201_vm2 = vcmp.ge.f32.partialorder %v10762_v7, %v10858_v24 }
 0xbf3   : > { %v10862_v22 = vpop.xlane.xlu1 %4005  ;;  %v4217_v8 = vsel %vm4201_vm2, %v9305_v50, 8 }
 0xbf4   : > { %14517 = vst [vmem:[#allocation160_spill] sm:$0xff] %v10862_v22  ;;  %v10866_v18 = vsel %vm938_vm0, %v4217_v8, 2147483647  ;;  %vm4202_vm3 = vcmp.ge.f32.partialorder %v10766_v31, %v10862_v22 }
 0xbf5   : > { %v10870_v20 = vpop.xlane.xlu0 %4008  ;;  %v4291_v30 = vshra.s32 %v10866_v18, 16  ;;  %v4218_v58 = vsel %vm4202_vm3, %v9305_v50, 8 }
 0xbf6   : > { %14518 = vst [vmem:[#allocation161_spill] sm:$0xff] %v10870_v20  ;;  %v10875_v2 = vsel %vm938_vm0, %v4218_v58, 2147483647  ;;  %vm4203_vm4 = vcmp.ge.f32.partialorder %v10764_v51, %v10870_v20 }
 0xbf7   : > { %v10877_v7 = vpop.xlane.xlu1 %4011  ;;  %v10879_v24 = vcvt.s32.f32 %v4291_v30  ;;  %v4306_v25 = vshra.s32 %v10875_v2, 16  ;;  %v4219_v8 = vsel %vm4203_vm4, %v9305_v50, 8 }
 0xbf8   : > { %14519 = vst [vmem:[#allocation162_spill] sm:$0xff] %v10877_v7  ;;  %v10889_v22 = vsel %vm938_vm0, %v4219_v8, 2147483647  ;;  %vm4204_vm5 = vcmp.ge.f32.partialorder %v10770_v55, %v10877_v7 }
 0xbf9   : > { %4294 = vmin.xlane.f32.xlu0 %v10879_v24  ;;  %v10886_v31 = vcvt.s32.f32 %v4306_v25  ;;  %v4321_v58 = vshra.s32 %v10889_v22, 16  ;;  %v4220_v30 = vsel %vm4204_vm5, %v9305_v50, 8 }
 0xbfa   : > { %v10897_v51 = vsel %vm938_vm0, %v4220_v30, 2147483647 }
 0xbfb   : > { %4309 = vmin.xlane.f32.xlu1 %v10886_v31  ;;  %v10899_v20 = vcvt.s32.f32 %v4321_v58  ;;  %v4336_v25 = vshra.s32 %v10897_v51, 16 }
 0xbfd   : > { %4324 = vmin.xlane.f32.xlu0 %v10899_v20  ;;  %v10903_v8 = vcvt.s32.f32 %v4336_v25 }
 0xbff   : > { %4339 = vmin.xlane.f32.xlu1 %v10903_v8 }
 0xc01   : > { %v10906_v55 = vpop.xlane.xlu0 %4014 }
 0xc02   : > { %14520 = vst [vmem:[#allocation163_spill] sm:$0xff] %v10906_v55  ;;  %vm4205_vm6 = vcmp.ge.f32.partialorder %v10778_v41, %v10906_v55 }
 0xc03   : > { %v10910_v7 = vpop.xlane.xlu1 %4017  ;;  %v4221_v30 = vsel %vm4205_vm6, %v9305_v50, 8 }
 0xc04   : > { %14521 = vst [vmem:[#allocation164_spill] sm:$0xff] %v10910_v7  ;;  %v10914_v58 = vsel %vm938_vm0, %v4221_v30, 2147483647  ;;  %vm4206_vm7 = vcmp.ge.f32.partialorder %v10782_v46, %v10910_v7 }
 0xc05   : > { %v10918_v48 = vpop.xlane.xlu0 %4020  ;;  %v4351_v25 = vshra.s32 %v10914_v58, 16  ;;  %v4222_v36 = vsel %vm4206_vm7, %v9305_v50, 8 }
 0xc06   : > { %14522 = vst [vmem:[#allocation165_spill] sm:$0xff] %v10918_v48  ;;  %v10923_v16 = vsel %vm938_vm0, %v4222_v36, 2147483647  ;;  %vm4207_vm8 = vcmp.ge.f32.partialorder %v10780_v38, %v10918_v48 }
 0xc07   : > { %v10925_v41 = vpop.xlane.xlu1 %4023  ;;  %v10927_v55 = vcvt.s32.f32 %v4351_v25  ;;  %v4366_v28 = vshra.s32 %v10923_v16, 16  ;;  %v4223_v30 = vsel %vm4207_vm8, %v9305_v50, 8 }
 0xc08   : > { %14523 = vst [vmem:[#allocation166_spill] sm:$0xff] %v10925_v41  ;;  %v10937_v7 = vsel %vm938_vm0, %v4223_v30, 2147483647  ;;  %vm4208_vm9 = vcmp.ge.f32.partialorder %v10786_v3, %v10925_v41 }
 0xc09   : > { %4354 = vmin.xlane.f32.xlu0 %v10927_v55  ;;  %v10934_v46 = vcvt.s32.f32 %v4366_v28  ;;  %v4381_v36 = vshra.s32 %v10937_v7, 16  ;;  %v4224_v25 = vsel %vm4208_vm9, %v9305_v50, 8 }
 0xc0a   : > { %v10945_v38 = vsel %vm938_vm0, %v4224_v25, 2147483647 }
 0xc0b   : > { %4369 = vmin.xlane.f32.xlu1 %v10934_v46  ;;  %v10947_v48 = vcvt.s32.f32 %v4381_v36  ;;  %v4396_v28 = vshra.s32 %v10945_v38, 16 }
 0xc0d   : > { %4384 = vmin.xlane.f32.xlu0 %v10947_v48  ;;  %v10951_v30 = vcvt.s32.f32 %v4396_v28 }
 0xc0f   : > { %4399 = vmin.xlane.f32.xlu1 %v10951_v30 }
 0xc11   : > { %v10954_v3 = vpop.xlane.xlu0 %4026 }
 0xc12   : > { %14524 = vst [vmem:[#allocation167_spill] sm:$0xff] %v10954_v3  ;;  %vm4209_vm11 = vcmp.ge.f32.partialorder %v10794_v33, %v10954_v3 }
 0xc13   : > { %v10958_v41 = vpop.xlane.xlu1 %4029  ;;  %v4225_v25 = vsel %vm4209_vm11, %v9305_v50, 8 }
 0xc14   : > { %14525 = vst [vmem:[#allocation168_spill] sm:$0xff] %v10958_v41  ;;  %v10962_v36 = vsel %vm938_vm0, %v4225_v25, 2147483647  ;;  %vm4210_vm12 = vcmp.ge.f32.partialorder %v10798_v19, %v10958_v41 }
 0xc15   : > { %v10966_v32 = vpop.xlane.xlu0 %4032  ;;  %v4411_v28 = vshra.s32 %v10962_v36, 16  ;;  %v4226_v1 = vsel %vm4210_vm12, %v9305_v50, 8 }
 0xc16   : > { %14526 = vst [vmem:[#allocation169_spill] sm:$0xff] %v10966_v32  ;;  %v10971_v12 = vsel %vm938_vm0, %v4226_v1, 2147483647  ;;  %vm4211_vm13 = vcmp.ge.f32.partialorder %v10796_v27, %v10966_v32 }
 0xc17   : > { %v10973_v33 = vpop.xlane.xlu1 %4035  ;;  %v10975_v3 = vcvt.s32.f32 %v4411_v28  ;;  %v4426_v47 = vshra.s32 %v10971_v12, 16  ;;  %v4227_v25 = vsel %vm4211_vm13, %v9305_v50, 8 }
 0xc18   : > { %14527 = vst [vmem:[#allocation170_spill] sm:$0xff] %v10973_v33  ;;  %v10985_v41 = vsel %vm938_vm0, %v4227_v25, 2147483647  ;;  %vm4212_vm14 = vcmp.ge.f32.partialorder %v10802_v60, %v10973_v33  ;;  %v4230_v60 = vand.u32 65535, %v10818_v42  ;;  %v4245_v33 = vand.u32 65535, %v10827_v63 }
 0xc19   : > { %4414 = vmin.xlane.f32.xlu0 %v10975_v3  ;;  %v10982_v19 = vcvt.s32.f32 %v4426_v47  ;;  %v4441_v1 = vshra.s32 %v10985_v41, 16  ;;  %v4228_v28 = vsel %vm4212_vm14, %v9305_v50, 8  ;;  %v4275_v42 = vand.u32 65535, %v10849_v57 }
 0xc1a   : > { %v10993_v27 = vsel %vm938_vm0, %v4228_v28, 2147483647  ;;  %v4232_v10 = vcvt.s32.f32 %v4230_v60  ;;  %v4247_v52 = vcvt.s32.f32 %v4245_v33 }
 0xc1b   : > { %4429 = vmin.xlane.f32.xlu1 %v10982_v19  ;;  %v10995_v32 = vcvt.s32.f32 %v4441_v1  ;;  %v4456_v47 = vshra.s32 %v10993_v27, 16  ;;  %v4260_v1 = vand.u32 65535, %v10841_v49  ;;  %v4277_v21 = vcvt.s32.f32 %v4275_v42 }
 0xc1d   : > { %4444 = vmin.xlane.f32.xlu0 %v10995_v32  ;;  %v10999_v25 = vcvt.s32.f32 %v4456_v47  ;;  %v4262_v60 = vcvt.s32.f32 %v4260_v1 }
 0xc1f   : > { %4459 = vmin.xlane.f32.xlu1 %v10999_v25 }
 0xc76   : > { %v11004_v37 = vpop.xlane.xlu0 %4234 }
 0xc77   : > { %vm4236_vm15 = vcmp.eq.f32.partialorder %v10831_v44, %v11004_v37 }
 0xc78   : > { %v11009_v28 = vpop.xlane.xlu1 %4249  ;;  %v4237_v26 = vsel %vm4236_vm15, %v4232_v10, inf  ;;  %v4290_v10 = vand.u32 65535, %v10866_v18 }
 0xc79   : > { %4238 = vmin.xlane.f32.xlu0 %v4237_v26  ;;  %vm4251_vm1 = vcmp.eq.f32.partialorder %v10838_v35, %v11009_v28  ;;  %v4320_v35 = vand.u32 65535, %v10889_v22 }
 0xc7a   : > { %v4252_v47 = vsel %vm4251_vm1, %v4247_v52, inf  ;;  %v11014_v63 = vpop.xlane.xlu0 %4264  ;;  %v4305_v52 = vand.u32 65535, %v10875_v2  ;;  %v4292_v57 = vcvt.s32.f32 %v4290_v10 }
 0xc7b   : > { %4253 = vmin.xlane.f32.xlu1 %v4252_v47  ;;  %vm4266_vm2 = vcmp.eq.f32.partialorder %v10851_v15, %v11014_v63  ;;  %v4322_v18 = vcvt.s32.f32 %v4320_v35 }
 0xc7c   : > { %v11018_v44 = vpop.xlane.xlu1 %4279  ;;  %v4267_v49 = vsel %vm4266_vm2, %v4262_v60, inf  ;;  %v4307_v42 = vcvt.s32.f32 %v4305_v52 }
 0xc7d   : > { %4268 = vmin.xlane.f32.xlu0 %v4267_v49  ;;  %vm4281_vm3 = vcmp.eq.f32.partialorder %v10855_v34, %v11018_v44 }
 0xc7e   : > { %v4282_v33 = vsel %vm4281_vm3, %v4277_v21, inf  ;;  %v4335_v21 = vand.u32 65535, %v10897_v51  ;;  %v4365_v51 = vand.u32 65535, %v10923_v16 }
 0xc7f   : > { %4283 = vmin.xlane.f32.xlu1 %v4282_v33 }
 0xc80   : > { %v4337_v47 = vcvt.s32.f32 %v4335_v21 }
 0xc86   : > { %v11024_v26 = vpop.xlane.xlu0 %4294 }
 0xc87   : > { %vm4296_vm4 = vcmp.eq.f32.partialorder %v10879_v24, %v11024_v26 }
 0xc88   : > { %v11029_v15 = vpop.xlane.xlu1 %4309  ;;  %v4297_v1 = vsel %vm4296_vm4, %v4292_v57, inf  ;;  %v4367_v57 = vcvt.s32.f32 %v4365_v51 }
 0xc89   : > { %4298 = vmin.xlane.f32.xlu0 %v4297_v1  ;;  %vm4311_vm5 = vcmp.eq.f32.partialorder %v10886_v31, %v11029_v15  ;;  %v4350_v31 = vand.u32 65535, %v10914_v58 }
 0xc8a   : > { %v4312_v34 = vsel %vm4311_vm5, %v4307_v42, inf  ;;  %v11034_v2 = vpop.xlane.xlu0 %4324 }
 0xc8b   : > { %4313 = vmin.xlane.f32.xlu1 %v4312_v34  ;;  %vm4326_vm6 = vcmp.eq.f32.partialorder %v10899_v20, %v11034_v2  ;;  %v4352_v33 = vcvt.s32.f32 %v4350_v31  ;;  %v4380_v20 = vand.u32 65535, %v10937_v7 }
 0xc8c   : > { %v11038_v24 = vpop.xlane.xlu1 %4339  ;;  %v4327_v22 = vsel %vm4326_vm6, %v4322_v18, inf }
 0xc8d   : > { %4328 = vmin.xlane.f32.xlu0 %v4327_v22  ;;  %vm4341_vm7 = vcmp.eq.f32.partialorder %v10903_v8, %v11038_v24  ;;  %v4395_v8 = vand.u32 65535, %v10945_v38  ;;  %v4382_v35 = vcvt.s32.f32 %v4380_v20  ;;  %v4425_v38 = vand.u32 65535, %v10971_v12 }
 0xc8e   : > { %v4342_v60 = vsel %vm4341_vm7, %v4337_v47, inf }
 0xc8f   : > { %4343 = vmin.xlane.f32.xlu1 %v4342_v60  ;;  %v4397_v1 = vcvt.s32.f32 %v4395_v8  ;;  %v4427_v47 = vcvt.s32.f32 %v4425_v38 }
 0xc96   : > { %v11044_v49 = vpop.xlane.xlu0 %4354 }
 0xc97   : > { %vm4356_vm8 = vcmp.eq.f32.partialorder %v10927_v55, %v11044_v49 }
 0xc98   : > { %v11049_v10 = vpop.xlane.xlu1 %4369  ;;  %v4357_v52 = vsel %vm4356_vm8, %v4352_v33, inf }
 0xc99   : > { %4358 = vmin.xlane.f32.xlu0 %v4357_v52  ;;  %vm4371_vm9 = vcmp.eq.f32.partialorder %v10934_v46, %v11049_v10  ;;  %v4410_v46 = vand.u32 65535, %v10962_v36 }
 0xc9a   : > { %v4372_v58 = vsel %vm4371_vm9, %v4367_v57, inf  ;;  %v11054_v16 = vpop.xlane.xlu0 %4384  ;;  %v4271_v57 = vcvt.f32.s32 %v11014_v63 }
 0xc9b   : > { %4373 = vmin.xlane.f32.xlu1 %v4372_v58  ;;  %vm4386_vm11 = vcmp.eq.f32.partialorder %v10947_v48, %v11054_v16  ;;  %v4412_v34 = vcvt.s32.f32 %v4410_v46  ;;  %v4440_v48 = vand.u32 65535, %v10985_v41  ;;  %v4286_v58 = vcvt.f32.s32 %v11018_v44 }
 0xc9c   : > { %v11058_v55 = vpop.xlane.xlu1 %4399  ;;  %v4387_v7 = vsel %vm4386_vm11, %v4382_v35, inf }
 0xc9d   : > { %4388 = vmin.xlane.f32.xlu0 %v4387_v7  ;;  %vm4401_vm12 = vcmp.eq.f32.partialorder %v10951_v30, %v11058_v55  ;;  %v4455_v30 = vand.u32 65535, %v10993_v27  ;;  %v4442_v60 = vcvt.s32.f32 %v4440_v48  ;;  %v4256_v27 = vcvt.f32.s32 %v11009_v28 }
 0xc9e   : > { %v4402_v42 = vsel %vm4401_vm12, %v4397_v1, inf }
 0xc9f   : > { %4403 = vmin.xlane.f32.xlu1 %v4402_v42  ;;  %v4457_v31 = vcvt.s32.f32 %v4455_v30  ;;  %v4257_v8 = vshll.u32 %v4256_v27, 16  ;;  %v4272_v42 = vshll.u32 %v4271_v57, 16  ;;  %v4331_v27 = vcvt.f32.s32 %v11034_v2  ;;  %v8744_v2 = vld [vmem:[%s13990_s7 + $0x10] sm:$0xff]  }
 0xca6   : > { %v11064_v21 = vpop.xlane.xlu0 %4414 }
 0xca7   : > { %vm4416_vm13 = vcmp.eq.f32.partialorder %v10975_v3, %v11064_v21 }
 0xca8   : > { %v11069_v18 = vpop.xlane.xlu1 %4429  ;;  %v4417_v22 = vsel %vm4416_vm13, %v4412_v34, inf }
 0xca9   : > { %4418 = vmin.xlane.f32.xlu0 %v4417_v22  ;;  %vm4431_vm14 = vcmp.eq.f32.partialorder %v10982_v19, %v11069_v18  ;;  %v4241_v19 = vcvt.f32.s32 %v11004_v37  ;;  %v4287_v37 = vshll.u32 %v4286_v58, 16 }
 0xcaa   : > { %v4432_v36 = vsel %vm4431_vm14, %v4427_v47, inf  ;;  %v11074_v12 = vpop.xlane.xlu0 %4444  ;;  %v4301_v47 = vcvt.f32.s32 %v11024_v26  ;;  %v11113_v26 = vld [vmem:[%s13990_s7] sm:$0xff]  }
 0xcab   : > { %4433 = vmin.xlane.f32.xlu1 %v4432_v36  ;;  %vm4446_vm15 = vcmp.eq.f32.partialorder %v10995_v32, %v11074_v12  ;;  %v4242_v20 = vshll.u32 %v4241_v19, 16 }
 0xcac   : > { %v11078_v3 = vpop.xlane.xlu1 %4459  ;;  %v4447_v41 = vsel %vm4446_vm15, %v4442_v60, inf }
 0xcad   : > { %4448 = vmin.xlane.f32.xlu0 %v4447_v41  ;;  %vm4461_vm1 = vcmp.eq.f32.partialorder %v10999_v25, %v11078_v3  ;;  %v4316_v41 = vcvt.f32.s32 %v11029_v15 }
 0xcae   : > { %v4462_v51 = vsel %vm4461_vm1, %v4457_v31, inf }
 0xcaf   : > { %4463 = vmin.xlane.f32.xlu1 %v4462_v51  ;;  %v4302_v51 = vshll.u32 %v4301_v47, 16  ;;  %v4317_v15 = vshll.u32 %v4316_v41, 16  ;;  %v8746_v41 = vld [vmem:[%s13990_s7 + $0x20] sm:$0xff]  }
 0xd06   : > { %v4239_v33 = vpop.xlane.xlu0 %4238 }
 0xd07   : > { %v4240_v52 = vcvt.f32.s32 %v4239_v33 }
 0xd08   : > { %v4254_v32 = vpop.xlane.xlu1 %4253 }
 0xd09   : > { %v4243_v35 = vadd.s32 %v4242_v20, %v4240_v52  ;;  %v4255_v7 = vcvt.f32.s32 %v4254_v32  ;;  %v8743_v20 = vld [vmem:[%s13990_s7 + $0x8] sm:$0xff]   ;;  %v4346_v52 = vcvt.f32.s32 %v11038_v24 }
 0xd0a   : > { %v4269_v1 = vpop.xlane.xlu0 %4268 }
 0xd0b   : > { %vm4469_vm2 = vcmp.eq.s32.totalorder %v9305_v50, %v4243_v35  ;;  %v4258_v25 = vadd.s32 %v4257_v8, %v4255_v7  ;;  %v4270_v46 = vcvt.f32.s32 %v4269_v1  ;;  %v4332_v35 = vshll.u32 %v4331_v27, 16 }
 0xd0c   : > { %v4284_v28 = vpop.xlane.xlu1 %4283  ;;  %v11089_v38 = vsel %vm4469_vm2, 1.0, %v14463_v54  ;;  %v4391_v27 = vcvt.f32.s32 %v11054_v16  ;;  %v8748_v16 = vld [vmem:[%s13990_s7 + $0x30] sm:$0xff]  }
 0xd0d   : > { %vm4470_vm3 = vcmp.eq.s32.totalorder %v9305_v50, %v4258_v25  ;;  %14528 = vst [vmem:[#allocation171_spill] sm:$0xff] %v11089_v38  ;;  %v4273_v34 = vadd.s32 %v4272_v42, %v4270_v46  ;;  %v4285_v44 = vcvt.f32.s32 %v4284_v28  ;;  %v4347_v25 = vshll.u32 %v4346_v52, 16 }
 0xd0e   : > { %v11092_v63 = vsel %vm4470_vm3, 1.0, %v14463_v54  ;;  %v4406_v52 = vcvt.f32.s32 %v11058_v55 }
 0xd0f   : > { %14529 = vst [vmem:[#allocation172_spill] sm:$0xff] %v11092_v63  ;;  %v4517_v48 = vpack.c.bf16 %v11092_v63, %v11089_v38  ;;  %vm4471_vm4 = vcmp.eq.s32.totalorder %v9305_v50, %v4273_v34  ;;  %v4288_v22 = vadd.s32 %v4287_v37, %v4285_v44  ;;  %v8745_v44 = vld [vmem:[%s13990_s7 + $0x18] sm:$0xff]  }
 0xd10   : > { %v11101_v30 = vsel %vm4471_vm4, 1.0, %v14463_v54 }
 0xd11   : > { %7678 = vmatprep.mubr.msk.bf16.mxu1 %vm938_vm0, %v4517_v48  ;;  %vm4472_vm5 = vcmp.eq.s32.totalorder %v9305_v50, %v4288_v22  ;;  %14530 = vst [vmem:[#allocation173_spill] sm:$0xff] %v11101_v30  ;;  %v4361_v48 = vcvt.f32.s32 %v11044_v49 }
 0xd12   : > { %v11104_v36 = vsel %vm4472_vm5, 1.0, %v14463_v54 }
 0xd13   : > { %14531 = vst [vmem:[#allocation174_spill] sm:$0xff] %v11104_v36  ;;  %v4518_v60 = vpack.c.bf16 %v11104_v36, %v11101_v30 }
 0xd15   : > { %7679 = vmatmul.mubr.msk.bf16.vlgmr.msra.gmra.mrb[112].mxu1 %vm938_vm0, %v4518_v60 }
 0xd16   : > { %v4299_v31 = vpop.xlane.xlu0 %4298  ;;  %7727 = vmatpush3.bf16.msra.mxu1 %v11113_v26 }
 0xd17   : > { %v4300_v19 = vcvt.f32.s32 %v4299_v31  ;;  %7728 = vmatprep.subr.bf16.mxu1 %v8743_v20  ;;  %v4376_v31 = vcvt.f32.s32 %v11049_v10 }
 0xd18   : > { %v4314_v33 = vpop.xlane.xlu1 %4313 }
 0xd19   : > { %v4303_v57 = vadd.s32 %v4302_v51, %v4300_v19  ;;  %v4315_v32 = vcvt.f32.s32 %v4314_v33  ;;  %v4362_v51 = vshll.u32 %v4361_v48, 16 }
 0xd1a   : > { %v4329_v58 = vpop.xlane.xlu0 %4328  ;;  %7729 = vmatpush3.bf16.msra.mxu1 %v8743_v20  ;;  %v8747_v20 = vld [vmem:[%s13990_s7 + $0x28] sm:$0xff]  }
 0xd1b   : > { %vm4473_vm6 = vcmp.eq.s32.totalorder %v9305_v50, %v4303_v57  ;;  %v4318_v8 = vadd.s32 %v4317_v15, %v4315_v32  ;;  %v4330_v7 = vcvt.f32.s32 %v4329_v58  ;;  %7730 = vmatprep.subr.bf16.mxu1 %v8744_v2  ;;  %v4377_v15 = vshll.u32 %v4376_v31, 16  ;;  %v11190_v31 = vld [vmem:[%s13986_s3] sm:$0xff]  }
 0xd1c   : > { %v4344_v1 = vpop.xlane.xlu1 %4343  ;;  %v11127_v24 = vsel %vm4473_vm6, 1.0, %v14463_v54  ;;  %v4392_v58 = vshll.u32 %v4391_v27, 16  ;;  %v4451_v27 = vcvt.f32.s32 %v11074_v12 }
 0xd1d   : > { %vm4474_vm7 = vcmp.eq.s32.totalorder %v9305_v50, %v4318_v8  ;;  %14532 = vst [vmem:[#allocation175_spill] sm:$0xff] %v11127_v24  ;;  %v4333_v46 = vadd.s32 %v4332_v35, %v4330_v7  ;;  %v4345_v37 = vcvt.f32.s32 %v4344_v1  ;;  %v4407_v7 = vshll.u32 %v4406_v52, 16 }
 0xd1e   : > { %v11130_v42 = vsel %vm4474_vm7, 1.0, %v14463_v54  ;;  %7731 = vmatpush3.bf16.msra.mxu1 %v8744_v2 }
 0xd1f   : > { %14533 = vst [vmem:[#allocation176_spill] sm:$0xff] %v11130_v42  ;;  %v4519_v28 = vpack.c.bf16 %v11130_v42, %v11127_v24  ;;  %vm4475_vm8 = vcmp.eq.s32.totalorder %v9305_v50, %v4333_v46  ;;  %v4348_v34 = vadd.s32 %v4347_v25, %v4345_v37  ;;  %7732 = vmatprep.subr.bf16.mxu1 %v8745_v44 }
 0xd20   : > { %v11142_v22 = vsel %vm4475_vm8, 1.0, %v14463_v54 }
 0xd21   : > { %7682 = vmatprep.mubr.msk.bf16.mxu1 %vm938_vm0, %v4519_v28  ;;  %vm4476_vm9 = vcmp.eq.s32.totalorder %v9305_v50, %v4348_v34  ;;  %14534 = vst [vmem:[#allocation177_spill] sm:$0xff] %v11142_v22  ;;  %v8749_v34 = vld [vmem:[%s13990_s7 + $0x38] sm:$0xff]  }
 0xd22   : > { %v11145_v47 = vsel %vm4476_vm9, 1.0, %v14463_v54  ;;  %7733 = vmatpush3.bf16.msra.mxu1 %v8745_v44  ;;  %v4421_v44 = vcvt.f32.s32 %v11064_v21 }
 0xd23   : > { %14535 = vst [vmem:[#allocation178_spill] sm:$0xff] %v11145_v47  ;;  %v4520_v60 = vpack.c.bf16 %v11145_v47, %v11142_v22  ;;  %7734 = vmatprep.subr.bf16.mxu1 %v8746_v41 }
 0xd25   : > { %7683 = vmatmul.mubr.msk.bf16.gmra.mrb[116].mxu1 %vm938_vm0, %v4520_v60 }
 0xd26   : > { %v4359_v49 = vpop.xlane.xlu0 %4358  ;;  %7735 = vmatpush3.bf16.msra.mxu1 %v8746_v41 }
 0xd27   : > { %v4360_v19 = vcvt.f32.s32 %v4359_v49  ;;  %7736 = vmatprep.subr.bf16.mxu1 %v8747_v20  ;;  %v4436_v49 = vcvt.f32.s32 %v11069_v18 }
 0xd28   : > { %v4374_v33 = vpop.xlane.xlu1 %4373 }
 0xd29   : > { %v4363_v57 = vadd.s32 %v4362_v51, %v4360_v19  ;;  %v4375_v32 = vcvt.f32.s32 %v4374_v33  ;;  %v4422_v51 = vshll.u32 %v4421_v44, 16 }
 0xd2a   : > { %v4389_v8 = vpop.xlane.xlu0 %4388  ;;  %7737 = vmatpush3.bf16.msra.mxu1 %v8747_v20  ;;  %v4437_v20 = vshll.u32 %v4436_v49, 16 }
 0xd2b   : > { %vm4477_vm11 = vcmp.eq.s32.totalorder %v9305_v50, %v4363_v57  ;;  %v4378_v10 = vadd.s32 %v4377_v15, %v4375_v32  ;;  %v4390_v35 = vcvt.f32.s32 %v4389_v8  ;;  %7738 = vmatprep.subr.bf16.mxu1 %v8748_v16  ;;  %v4466_v15 = vcvt.f32.s32 %v11078_v3 }
 0xd2c   : > { %v4404_v2 = vpop.xlane.xlu1 %4403  ;;  %v11165_v55 = vsel %vm4477_vm11, 1.0, %v14463_v54  ;;  %v4452_v8 = vshll.u32 %v4451_v27, 16 }
 0xd2d   : > { %vm4478_vm12 = vcmp.eq.s32.totalorder %v9305_v50, %v4378_v10  ;;  %14536 = vst [vmem:[#allocation179_spill] sm:$0xff] %v11165_v55  ;;  %v4393_v1 = vadd.s32 %v4392_v58, %v4390_v35  ;;  %v4405_v46 = vcvt.f32.s32 %v4404_v2  ;;  %v4467_v18 = vshll.u32 %v4466_v15, 16 }
 0xd2e   : > { %v11168_v25 = vsel %vm4478_vm12, 1.0, %v14463_v54  ;;  %7739 = vmatpush3.bf16.msra.mxu1 %v8748_v16 }
 0xd2f   : > { %14537 = vst [vmem:[#allocation180_spill] sm:$0xff] %v11168_v25  ;;  %v4521_v37 = vpack.c.bf16 %v11168_v25, %v11165_v55  ;;  %vm4479_vm13 = vcmp.eq.s32.totalorder %v9305_v50, %v4393_v1  ;;  %v4408_v28 = vadd.s32 %v4407_v7, %v4405_v46  ;;  %7740 = vmatprep.subr.bf16.mxu1 %v8749_v34 }
 0xd30   : > { %v11180_v48 = vsel %vm4479_vm13, 1.0, %v14463_v54 }
 0xd31   : > { %7686 = vmatprep.mubr.msk.bf16.mxu1 %vm938_vm0, %v4521_v37  ;;  %vm4480_vm14 = vcmp.eq.s32.totalorder %v9305_v50, %v4408_v28  ;;  %14538 = vst [vmem:[#allocation181_spill] sm:$0xff] %v11180_v48 }
 0xd32   : > { %v11183_v60 = vsel %vm4480_vm14, 1.0, %v14463_v54  ;;  %7741 = vmatpush3.bf16.msra.mxu1 %v8749_v34 }
 0xd33   : > { %14539 = vst [vmem:[#allocation182_spill] sm:$0xff] %v11183_v60  ;;  %v4522_v41 = vpack.c.bf16 %v11183_v60, %v11180_v48  ;;  %7758 = vmatprep.subr.bf16.mxu1 %v11190_v31 }
 0xd35   : > { %7687 = vmatmul.mubr.msk.bf16.gmra.mrb[120].mxu1 %vm938_vm0, %v4522_v41 }
 0xd36   : > { %v4419_v21 = vpop.xlane.xlu0 %4418 }
 0xd37   : > { %v4420_v19 = vcvt.f32.s32 %v4419_v21 }
 0xd38   : > { %v4434_v33 = vpop.xlane.xlu1 %4433 }
 0xd39   : > { %v4423_v52 = vadd.s32 %v4422_v51, %v4420_v19  ;;  %v4435_v57 = vcvt.f32.s32 %v4434_v33 }
 0xd3a   : > { %v4449_v10 = vpop.xlane.xlu0 %4448 }
 0xd3b   : > { %vm4481_vm15 = vcmp.eq.s32.totalorder %v9305_v50, %v4423_v52  ;;  %v4438_v32 = vadd.s32 %v4437_v20, %v4435_v57  ;;  %v4450_v58 = vcvt.f32.s32 %v4449_v10 }
 0xd3c   : > { %v4464_v35 = vpop.xlane.xlu1 %4463  ;;  %v11200_v16 = vsel %vm4481_vm15, 1.0, %v14463_v54 }
 0xd3d   : > { %vm4482_vm1 = vcmp.eq.s32.totalorder %v9305_v50, %v4438_v32  ;;  %14540 = vst [vmem:[#allocation183_spill] sm:$0xff] %v11200_v16  ;;  %v4453_v7 = vadd.s32 %v4452_v8, %v4450_v58  ;;  %v4465_v3 = vcvt.f32.s32 %v4464_v35 }
 0xd3e   : > { %v11203_v12 = vsel %vm4482_vm1, 1.0, %v14463_v54 }
 0xd3f   : > { %14541 = vst [vmem:[#allocation184_spill] sm:$0xff] %v11203_v12  ;;  %v4523_v2 = vpack.c.bf16 %v11203_v12, %v11200_v16  ;;  %vm4483_vm2 = vcmp.eq.s32.totalorder %v9305_v50, %v4453_v7  ;;  %v4468_v1 = vadd.s32 %v4467_v18, %v4465_v3  ;;  %v8755_v7 = vld [vmem:[%s13984_s1 + $0x20] ss:$8 sps:$4 sm:$0xff]  }
 0xd40   : > { %v11211_v46 = vsel %vm4483_vm2, 1.0, %v14463_v54 }
 0xd41   : > { %7690 = vmatprep.mubr.msk.bf16.mxu1 %vm938_vm0, %v4523_v2  ;;  %vm4484_vm3 = vcmp.eq.s32.totalorder %v9305_v50, %v4468_v1  ;;  %14542 = vst [vmem:[#allocation185_spill] sm:$0xff] %v11211_v46  ;;  %v8756_v2 = vld [vmem:[%s13984_s1 + $0x34] ss:$8 sps:$4 sm:$0xff]  }
 0xd42   : > { %v11214_v37 = vsel %vm4484_vm3, 1.0, %v14463_v54 }
 0xd43   : > { %14543 = vst [vmem:[#allocation186_spill] sm:$0xff] %v11214_v37  ;;  %v4524_v28 = vpack.c.bf16 %v11214_v37, %v11211_v46 }
 0xd45   : > { %7691 = vmatmul.mubr.msk.bf16.gmra.mrb[124].mxu1 %vm938_vm0, %v4524_v28 }
 0xde8   : > { %v7680_v34 = vpop.f32.mrb[112].mxu1 }
 0xde9   : > { %v4648_v44 = vadd.f32 %v7680_v34, %v10668_v40  ;;  %v4583_v41 = vpop.f32.mrb[113].mxu1 }
 0xdea   : > { %v4646_v49 = vadd.f32 %v4583_v41, %v10662_v5  ;;  %v7681_v21 = vpop.f32.mrb[114].mxu1 }
 0xdeb   : > { %8096 = vtanh.f32 %v4648_v44  ;;  %v4649_v51 = vadd.f32 %v7681_v21, %v10671_v4  ;;  %v4586_v19 = vpop.f32.mrb[115].mxu1 }
 0xdec   : > { %8098 = vtanh.f32 %v4646_v49  ;;  %v4647_v27 = vadd.f32 %v4586_v19, %v10665_v13 }
 0xded   : > { %8100 = vtanh.f32 %v4649_v51  ;;  %v8757_v51 = vld [vmem:[%s13984_s1 + $0x30] ss:$8 sps:$4 sm:$0xff]  }
 0xdee   : > { %8102 = vtanh.f32 %v4647_v27 }
 0xdf5   : > { %v8097_v33 = vpop.eup %8096 }
 0xdf6   : > { %v8099_v20 = vpop.eup %8098 }
 0xdf7   : > { %v8101_v15 = vpop.eup %8100 }
 0xdf8   : > { %v8103_v52 = vpop.eup %8102  ;;  %v7684_v57 = vpop.f32.mrb[116].mxu1  ;;  %v11223_v32 = vpack.c.bf16 %v8101_v15, %v8097_v33  ;;  %v8758_v33 = vld [vmem:[%s13984_s1 + $0x44] ss:$8 sps:$4 sm:$0xff]  }
 0xdf9   : > { %v4652_v40 = vadd.f32 %v7684_v57, %v10682_v62  ;;  %v4599_v5 = vpop.f32.mrb[117].mxu1  ;;  %v11226_v10 = vpack.c.bf16 %v8103_v52, %v8099_v20  ;;  %v8751_v62 = vld [vmem:[%s13984_s1] ss:$8 sps:$4 sm:$0xff]   ;;  %v8760_v52 = vld [vmem:[%s13984_s1 + $0x54] ss:$8 sps:$4 sm:$0xff]  }
 0xdfa   : > { %v4650_v4 = vadd.f32 %v4599_v5, %v10674_v45  ;;  %v7685_v8 = vpop.f32.mrb[118].mxu1  ;;  %v8752_v45 = vld [vmem:[%s13984_s1 + $0x14] ss:$8 sps:$4 sm:$0xff]  }
 0xdfb   : > { %8104 = vtanh.f32 %v4652_v40  ;;  %v4653_v13 = vadd.f32 %v7685_v8, %v10685_v9  ;;  %v4602_v58 = vpop.f32.mrb[119].mxu1  ;;  %7710 = vmatprep.mubr.bf16.mxu0 %v11226_v10  ;;  %v8753_v9 = vld [vmem:[%s13984_s1 + $0x10] ss:$8 sps:$4 sm:$0xff]   ;;  %v8763_v40 = vld [vmem:[%s13984_s1 + $0x60] ss:$8 sps:$4 sm:$0xff]  }
 0xdfc   : > { %8106 = vtanh.f32 %v4650_v4  ;;  %v4651_v18 = vadd.f32 %v4602_v58, %v10678_v14  ;;  %7711 = vmatmul.mubr.bf16.vlgmr.msra.gmra.mrb[128].mxu0 %v11223_v32  ;;  %v8754_v14 = vld [vmem:[%s13984_s1 + $0x24] ss:$8 sps:$4 sm:$0xff]   ;;  %v8764_v4 = vld [vmem:[%s13984_s1 + $0x74] ss:$8 sps:$4 sm:$0xff]  }
 0xdfd   : > { %8108 = vtanh.f32 %v4653_v13  ;;  %5209 = vmatpush1.bf16.msra.mxu0 %v8751_v62 }
 0xdfe   : > { %8110 = vtanh.f32 %v4651_v18  ;;  %5210 = vmatprep.subr.bf16.mxu0 %v8752_v45 }
 0xe01   : > { %5211 = vmatpush1.bf16.msra.mxu0 %v8753_v9 }
 0xe02   : > { %5212 = vmatprep.subr.bf16.mxu0 %v8754_v14  ;;  %v8765_v14 = vld [vmem:[%s13984_s1 + $0x70] ss:$8 sps:$4 sm:$0xff]  }
 0xe05   : > { %v8105_v35 = vpop.eup %8104  ;;  %5213 = vmatpush1.bf16.msra.mxu0 %v8755_v7 }
 0xe06   : > { %v8107_v3 = vpop.eup %8106  ;;  %5214 = vmatprep.subr.bf16.mxu0 %v8756_v2 }
 0xe07   : > { %v8109_v1 = vpop.eup %8108 }
 0xe08   : > { %v8111_v28 = vpop.eup %8110  ;;  %v7688_v34 = vpop.f32.mrb[120].mxu1  ;;  %v11251_v44 = vpack.c.bf16 %v8109_v1, %v8105_v35 }
 0xe09   : > { %v4656_v41 = vadd.f32 %v7688_v34, %v10694_v39  ;;  %v4615_v49 = vpop.f32.mrb[121].mxu1  ;;  %v11254_v21 = vpack.c.bf16 %v8111_v28, %v8107_v3  ;;  %5215 = vmatpush1.bf16.msra.mxu0 %v8757_v51  ;;  %v8766_v3 = vld [vmem:[%s13988_s5] sm:$0xff]  }
 0xe0a   : > { %v4654_v19 = vadd.f32 %v4615_v49, %v10688_v23  ;;  %v7689_v27 = vpop.f32.mrb[122].mxu1  ;;  %5216 = vmatprep.subr.bf16.mxu0 %v8758_v33  ;;  %v8759_v23 = vld [vmem:[%s13984_s1 + $0x40] ss:$8 sps:$4 sm:$0xff]  }
 0xe0b   : > { %8112 = vtanh.f32 %v4656_v41  ;;  %v4657_v20 = vadd.f32 %v7689_v27, %v10697_v29  ;;  %v4618_v39 = vpop.f32.mrb[123].mxu1  ;;  %7714 = vmatprep.mubr.bf16.mxu0 %v11254_v21  ;;  %v8761_v29 = vld [vmem:[%s13984_s1 + $0x50] ss:$8 sps:$4 sm:$0xff]   ;;  %v11331_v33 = vld [vmem:[%s13989_s6] ss:$0 sm:$0xff] }
 0xe0c   : > { %8114 = vtanh.f32 %v4654_v19  ;;  %v4655_v15 = vadd.f32 %v4618_v39, %v10691_v56  ;;  %7715 = vmatmul.mubr.bf16.gmra.mrb[132].mxu0 %v11251_v44  ;;  %v8762_v56 = vld [vmem:[%s13984_s1 + $0x64] ss:$8 sps:$4 sm:$0xff]   ;;  %v8772_v27 = vld [vmem:[%s13988_s5 + $0x30] sm:$0xff]  }
 0xe0d   : > { %8116 = vtanh.f32 %v4657_v20  ;;  %5217 = vmatpush1.bf16.msra.mxu0 %v8759_v23  ;;  %v8770_v19 = vld [vmem:[%s13988_s5 + $0x20] sm:$0xff]  }
 0xe0e   : > { %8118 = vtanh.f32 %v4655_v15  ;;  %5218 = vmatprep.subr.bf16.mxu0 %v8760_v52 }
 0xe11   : > { %5219 = vmatpush1.bf16.msra.mxu0 %v8761_v29 }
 0xe12   : > { %5220 = vmatprep.subr.bf16.mxu0 %v8762_v56 }
 0xe15   : > { %v8113_v57 = vpop.eup %8112  ;;  %5221 = vmatpush1.bf16.msra.mxu0 %v8763_v40 }
 0xe16   : > { %v8115_v5 = vpop.eup %8114  ;;  %5222 = vmatprep.subr.bf16.mxu0 %v8764_v4 }
 0xe17   : > { %v8117_v8 = vpop.eup %8116 }
 0xe18   : > { %v8119_v13 = vpop.eup %8118  ;;  %v7692_v58 = vpop.f32.mrb[124].mxu1  ;;  %v4683_v18 = vpack.c.bf16 %v8117_v8, %v8113_v57 }
 0xe19   : > { %v4660_v62 = vadd.f32 %v7692_v58, %v10706_v59  ;;  %v4631_v45 = vpop.f32.mrb[125].mxu1  ;;  %v4682_v9 = vpack.c.bf16 %v8119_v13, %v8115_v5  ;;  %5223 = vmatpush1.bf16.msra.mxu0 %v8765_v14  ;;  %v8775_v13 = vld [vmem:[%s13986_s3 + $0x8] sm:$0xff]  }
 0xe1a   : > { %v4658_v35 = vadd.f32 %v4631_v45, %v10700_v11  ;;  %v7693_v7 = vpop.f32.mrb[126].mxu1  ;;  %7808 = vmatprep.subr.bf16.mxu0 %v8766_v3  ;;  %v8776_v45 = vld [vmem:[%s13986_s3 + $0x10] sm:$0xff]  }
 0xe1b   : > { %8120 = vtanh.f32 %v4660_v62  ;;  %v4661_v2 = vadd.f32 %v7693_v7, %v10709_v61  ;;  %v4634_v1 = vpop.f32.mrb[127].mxu1  ;;  %7718 = vmatprep.mubr.bf16.mxu0 %v4682_v9  ;;  %v8768_v61 = vld [vmem:[%s13988_s5 + $0x10] sm:$0xff]  }
 0xe1c   : > { %8122 = vtanh.f32 %v4658_v35  ;;  %v4659_v59 = vadd.f32 %v4634_v1, %v10703_v17  ;;  %7719 = vmatmul.mubr.bf16.gmra.mrb[136].mxu0 %v4683_v18  ;;  %v8767_v17 = vld [vmem:[%s13988_s5 + $0x8] sm:$0xff]   ;;  %v8777_v1 = vld [vmem:[%s13986_s3 + $0x18] sm:$0xff]  }
 0xe1d   : > { %8124 = vtanh.f32 %v4661_v2 }
 0xe1e   : > { %8126 = vtanh.f32 %v4659_v59 }
 0xe25   : > { %v8121_v28 = vpop.eup %8120 }
 0xe26   : > { %v8123_v34 = vpop.eup %8122 }
 0xe27   : > { %v8125_v11 = vpop.eup %8124 }
 0xe28   : > { %v8127_v41 = vpop.eup %8126  ;;  %v4685_v49 = vpack.c.bf16 %v8125_v11, %v8121_v28 }
 0xe29   : > { %v4684_v51 = vpack.c.bf16 %v8127_v41, %v8123_v34  ;;  %v8778_v41 = vld [vmem:[%s13986_s3 + $0x20] sm:$0xff]  }
 0xe2b   : > { %7722 = vmatprep.mubr.bf16.mxu0 %v4684_v51 }
 0xe2c   : > { %7723 = vmatmul.mubr.bf16.gmra.mrb[140].mxu0 %v4685_v49 }
 0xe2d   : > { %5240 = vmatprep.mubr.bf16.mxu0 %v14414_v53 }
 0xe34   : > { %5241 = vmatmul.mubr.bf16.vlgmr.msra.gmra.mrb[144].mxu0 %v11226_v10  ;;  %v8769_v10 = vld [vmem:[%s13988_s5 + $0x18] sm:$0xff]  }
 0xe35   : > { %5250 = vmatprep.mubr.bf16.mxu0 %v14414_v53  ;;  %7809 = vmatpush3.bf16.msra.mxu0 %v8766_v3 }
 0xe36   : > { %7810 = vmatprep.subr.bf16.mxu0 %v8767_v17 }
 0xe39   : > { %7811 = vmatpush3.bf16.msra.mxu0 %v8767_v17 }
 0xe3a   : > { %7812 = vmatprep.subr.bf16.mxu0 %v8768_v61 }
 0xe3c   : > { %5251 = vmatmul.mubr.bf16.gmra.mrb[148].mxu0 %v11223_v32  ;;  %v8771_v32 = vld [vmem:[%s13988_s5 + $0x28] sm:$0xff]  }
 0xe3d   : > { %5260 = vmatprep.mubr.bf16.mxu0 %v14414_v53  ;;  %7813 = vmatpush3.bf16.msra.mxu0 %v8768_v61 }
 0xe3e   : > { %7814 = vmatprep.subr.bf16.mxu0 %v8769_v10 }
 0xe41   : > { %7815 = vmatpush3.bf16.msra.mxu0 %v8769_v10  ;;  %v8780_v10 = vld [vmem:[%s13986_s3 + $0x30] sm:$0xff]  }
 0xe42   : > { %7816 = vmatprep.subr.bf16.mxu0 %v8770_v19 }
 0xe44   : > { %5261 = vmatmul.mubr.bf16.gmra.mrb[152].mxu0 %v11254_v21  ;;  %v8773_v21 = vld [vmem:[%s13988_s5 + $0x38] sm:$0xff]  }
 0xe45   : > { %5270 = vmatprep.mubr.bf16.mxu0 %v14414_v53  ;;  %7817 = vmatpush3.bf16.msra.mxu0 %v8770_v19 }
 0xe46   : > { %7818 = vmatprep.subr.bf16.mxu0 %v8771_v32 }
 0xe49   : > { %7819 = vmatpush3.bf16.msra.mxu0 %v8771_v32 }
 0xe4a   : > { %7820 = vmatprep.subr.bf16.mxu0 %v8772_v27 }
 0xe4c   : > { %5271 = vmatmul.mubr.bf16.gmra.mrb[156].mxu0 %v11251_v44 }
 0xe4d   : > { %5280 = vmatprep.mubr.bf16.mxu0 %v14414_v53  ;;  %7821 = vmatpush3.bf16.msra.mxu0 %v8772_v27 }
 0xe4e   : > { %7822 = vmatprep.subr.bf16.mxu0 %v8773_v21 }
 0xe51   : > { %7823 = vmatpush3.bf16.msra.mxu0 %v8773_v21 }
 0xe54   : > { %5281 = vmatmul.mubr.bf16.gmra.mrb[160].mxu0 %v4682_v9 }
 0xe55   : > { %5290 = vmatprep.mubr.bf16.mxu0 %v14414_v53 }
 0xe5c   : > { %5291 = vmatmul.mubr.bf16.gmra.mrb[164].mxu0 %v4683_v18 }
 0xe5d   : > { %5300 = vmatprep.mubr.bf16.mxu0 %v14414_v53 }
 0xe64   : > { %5301 = vmatmul.mubr.bf16.gmra.mrb[168].mxu0 %v4684_v51 }
 0xe65   : > { %5310 = vmatprep.mubr.bf16.mxu0 %v14414_v53 }
 0xe6c   : > { %5311 = vmatmul.mubr.bf16.gmra.mrb[172].mxu0 %v4685_v49  ;;  %v8779_v49 = vld [vmem:[%s13986_s3 + $0x28] sm:$0xff]  }
 0xecf   : > { %v7712_v44 = vpop.f32.mrb[128].mxu0 }
 0xed0   : > { %v4729_v20 = vadd.f32 %v11331_v33, %v7712_v44  ;;  %v4720_v39 = vpop.f32.mrb[129].mxu0 }
 0xed1   : > { %v4721_v15 = vadd.f32 %v11331_v33, %v4720_v39  ;;  %v7713_v23 = vpop.f32.mrb[130].mxu0 }
 0xed2   : > { %v4732_v52 = vadd.f32 %v11331_v33, %v7713_v23  ;;  %v4723_v29 = vpop.f32.mrb[131].mxu0  ;;  %v4785_v57 = vmax.f32 %v4729_v20, 0.0 }
 0xed3   : > { %v4724_v56 = vadd.f32 %v11331_v33, %v4723_v29  ;;  %v4783_v40 = vmax.f32 %v4721_v15, 0.0  ;;  %v8781_v15 = vld [vmem:[%s13986_s3 + $0x38] sm:$0xff]  }
 0xed4   : > { %v4786_v53 = vmax.f32 %v4732_v52, 0.0 }
 0xed5   : > { %v4784_v5 = vmax.f32 %v4724_v56, 0.0 }
 0xed6   : > { %v4800_v4 = vpack.c.bf16 %v4786_v53, %v4785_v57  ;;  %v8782_v57 = vld [vmem:[%s13992_s9] sm:$0xf] }
 0xed7   : > { %v4799_v8 = vpack.c.bf16 %v4784_v5, %v4783_v40 }
 0xed9   : > { %7742 = vmatprep.mubr.bf16.mxu1 %v4799_v8 }
 0xeda   : > { %7743 = vmatmul.mubr.bf16.vlgmr.msra.gmra.mrb[128].mxu1 %v4800_v4 }
 0xedb   : > { %7759 = vmatpush3.bf16.msra.mxu1 %v11190_v31 }
 0xedc   : > { %7760 = vmatprep.subr.bf16.mxu1 %v8775_v13 }
 0xedf   : > { %v7716_v58 = vpop.f32.mrb[132].mxu0  ;;  %7761 = vmatpush3.bf16.msra.mxu1 %v8775_v13 }
 0xee0   : > { %v4745_v18 = vadd.f32 %v11331_v33, %v7716_v58  ;;  %v4736_v62 = vpop.f32.mrb[133].mxu0  ;;  %7762 = vmatprep.subr.bf16.mxu1 %v8776_v45 }
 0xee1   : > { %v4737_v9 = vadd.f32 %v11331_v33, %v4736_v62  ;;  %v7717_v14 = vpop.f32.mrb[134].mxu0 }
 0xee2   : > { %v4748_v31 = vadd.f32 %v11331_v33, %v7717_v14  ;;  %v4739_v35 = vpop.f32.mrb[135].mxu0  ;;  %v4789_v3 = vmax.f32 %v4745_v18, 0.0 }
 0xee3   : > { %v4740_v7 = vadd.f32 %v11331_v33, %v4739_v35  ;;  %7763 = vmatpush3.bf16.msra.mxu1 %v8776_v45  ;;  %v4787_v59 = vmax.f32 %v4737_v9, 0.0 }
 0xee4   : > { %v4790_v2 = vmax.f32 %v4748_v31, 0.0  ;;  %7764 = vmatprep.subr.bf16.mxu1 %v8777_v1 }
 0xee5   : > { %v4788_v28 = vmax.f32 %v4740_v7, 0.0 }
 0xee6   : > { %v4802_v34 = vpack.c.bf16 %v4790_v2, %v4789_v3  ;;  %v11378_v3 = vld [vmem:[%s13985_s2] ss:$0 sm:$0xff] }
 0xee7   : > { %v4801_v11 = vpack.c.bf16 %v4788_v28, %v4787_v59  ;;  %7765 = vmatpush3.bf16.msra.mxu1 %v8777_v1 }
 0xee8   : > { %7766 = vmatprep.subr.bf16.mxu1 %v8778_v41 }
 0xee9   : > { %7746 = vmatprep.mubr.bf16.mxu1 %v4801_v11 }
 0xeea   : > { %7747 = vmatmul.mubr.bf16.gmra.mrb[132].mxu1 %v4802_v34 }
 0xeeb   : > { %7767 = vmatpush3.bf16.msra.mxu1 %v8778_v41 }
 0xeec   : > { %7768 = vmatprep.subr.bf16.mxu1 %v8779_v49 }
 0xeef   : > { %v7720_v51 = vpop.f32.mrb[136].mxu0  ;;  %7769 = vmatpush3.bf16.msra.mxu1 %v8779_v49 }
 0xef0   : > { %v4761_v17 = vadd.f32 %v11331_v33, %v7720_v51  ;;  %v4752_v61 = vpop.f32.mrb[137].mxu0  ;;  %7770 = vmatprep.subr.bf16.mxu1 %v8780_v10 }
 0xef1   : > { %v4753_v19 = vadd.f32 %v11331_v33, %v4752_v61  ;;  %v7721_v32 = vpop.f32.mrb[138].mxu0 }
 0xef2   : > { %v4764_v27 = vadd.f32 %v11331_v33, %v7721_v32  ;;  %v4755_v21 = vpop.f32.mrb[139].mxu0  ;;  %v4793_v20 = vmax.f32 %v4761_v17, 0.0 }
 0xef3   : > { %v4756_v44 = vadd.f32 %v11331_v33, %v4755_v21  ;;  %7771 = vmatpush3.bf16.msra.mxu1 %v8780_v10  ;;  %v4791_v23 = vmax.f32 %v4753_v19, 0.0 }
 0xef4   : > { %v4794_v39 = vmax.f32 %v4764_v27, 0.0  ;;  %7772 = vmatprep.subr.bf16.mxu1 %v8781_v15 }
 0xef5   : > { %v4792_v52 = vmax.f32 %v4756_v44, 0.0 }
 0xef6   : > { %v4804_v29 = vpack.c.bf16 %v4794_v39, %v4793_v20 }
 0xef7   : > { %v4803_v56 = vpack.c.bf16 %v4792_v52, %v4791_v23  ;;  %7773 = vmatpush3.bf16.msra.mxu1 %v8781_v15 }
 0xef8   : > { %7923 = vmatprep.subr.msk.bf16.mxu1 %vm1499_vm10, %v8782_v57 }
 0xef9   : > { %7750 = vmatprep.mubr.bf16.mxu1 %v4803_v56 }
 0xefa   : > { %7751 = vmatmul.mubr.bf16.gmra.mrb[136].mxu1 %v4804_v29 }
 0xeff   : > { %v7724_v53 = vpop.f32.mrb[140].mxu0 }
 0xf00   : > { %v4777_v40 = vadd.f32 %v11331_v33, %v7724_v53  ;;  %v4768_v5 = vpop.f32.mrb[141].mxu0 }
 0xf01   : > { %v4769_v4 = vadd.f32 %v11331_v33, %v4768_v5  ;;  %v7725_v8 = vpop.f32.mrb[142].mxu0 }
 0xf02   : > { %v4780_v13 = vadd.f32 %v11331_v33, %v7725_v8  ;;  %v4771_v58 = vpop.f32.mrb[143].mxu0  ;;  %v4797_v62 = vmax.f32 %v4777_v40, 0.0 }
 0xf03   : > { %v4772_v18 = vadd.f32 %v11331_v33, %v4771_v58  ;;  %v4795_v9 = vmax.f32 %v4769_v4, 0.0 }
 0xf04   : > { %v4798_v45 = vmax.f32 %v4780_v13, 0.0 }
 0xf05   : > { %v4796_v14 = vmax.f32 %v4772_v18, 0.0 }
 0xf06   : > { %v4806_v31 = vpack.c.bf16 %v4798_v45, %v4797_v62 }
 0xf07   : > { %v4805_v35 = vpack.c.bf16 %v4796_v14, %v4795_v9  ;;  %v5242_v7 = vpop.f32.mrb[144].mxu0 }
 0xf08   : > { %v5321_v2 = vadd.f32 %v11378_v3, %v5242_v7  ;;  %v11381_v1 = vpop.f32.mrb[145].mxu0 }
 0xf09   : > { %7754 = vmatprep.mubr.bf16.mxu1 %v4805_v35  ;;  %v5246_v59 = vpop.f32.mrb[146].mxu0 }
 0xf0a   : > { %v5322_v33 = vadd.f32 %v11378_v3, %v5246_v59  ;;  %7755 = vmatmul.mubr.bf16.gmra.mrb[140].mxu1 %v4806_v31  ;;  %v11384_v28 = vpop.f32.mrb[147].mxu0  ;;  %v5337_v34 = vmax.f32 %v5321_v2, 0.0 }
 0xf0b   : > { %14544 = vst [vmem:[#allocation187_spill] sm:$0xff] %v11384_v28 }
 0xf0c   : > { %v5338_v11 = vmax.f32 %v5322_v33, 0.0 }
 0xf0e   : > { %v5353_v41 = vpack.c.bf16 %v5338_v11, %v5337_v34 }
 0xf0f   : > { %v5252_v49 = vpop.f32.mrb[148].mxu0 }
 0xf10   : > { %v5323_v51 = vadd.f32 %v11378_v3, %v5252_v49  ;;  %v11387_v17 = vpop.f32.mrb[149].mxu0  ;;  %7774 = vmatprep.mubr.bf16.mxu1 %v5353_v41 }
 0xf11   : > { %v5256_v61 = vpop.f32.mrb[150].mxu0 }
 0xf12   : > { %v5324_v10 = vadd.f32 %v11378_v3, %v5256_v61  ;;  %v11390_v19 = vpop.f32.mrb[151].mxu0  ;;  %v5339_v32 = vmax.f32 %v5323_v51, 0.0 }
 0xf13   : > { %14545 = vst [vmem:[#allocation188_spill] sm:$0xff] %v11390_v19 }
 0xf14   : > { %v5340_v27 = vmax.f32 %v5324_v10, 0.0 }
 0xf16   : > { %v5354_v21 = vpack.c.bf16 %v5340_v27, %v5339_v32 }
 0xf17   : > { %v5262_v44 = vpop.f32.mrb[152].mxu0 }
 0xf18   : > { %v5325_v20 = vadd.f32 %v11378_v3, %v5262_v44  ;;  %v11393_v39 = vpop.f32.mrb[153].mxu0  ;;  %7775 = vmatmul.mubr.bf16.vlgmr.msra.gmra.mrb[144].mxu1 %v5354_v21 }
 0xf19   : > { %14546 = vst [vmem:[#allocation189_spill] sm:$0xff] %v11393_v39  ;;  %v5266_v15 = vpop.f32.mrb[154].mxu0  ;;  %7791 = vmatpush3.bf16.msra.mxu1 %v9548_v43 }
 0xf1a   : > { %v5326_v23 = vadd.f32 %v11378_v3, %v5266_v15  ;;  %v11397_v52 = vpop.f32.mrb[155].mxu0  ;;  %7840 = vmatprep.subr.bf16.mxu1 %v11113_v26  ;;  %v5341_v29 = vmax.f32 %v5325_v20, 0.0 }
 0xf1b   : > { %14547 = vst [vmem:[#allocation190_spill] sm:$0xff] %v11397_v52 }
 0xf1c   : > { %v5342_v56 = vmax.f32 %v5326_v23, 0.0 }
 0xf1e   : > { %v5355_v57 = vpack.c.bf16 %v5342_v56, %v5341_v29 }
 0xf1f   : > { %v5272_v53 = vpop.f32.mrb[156].mxu0 }
 0xf20   : > { %v5327_v40 = vadd.f32 %v11378_v3, %v5272_v53  ;;  %v11401_v5 = vpop.f32.mrb[157].mxu0  ;;  %7778 = vmatprep.mubr.bf16.mxu1 %v5355_v57 }
 0xf21   : > { %14548 = vst [vmem:[#allocation191_spill] sm:$0xff] %v11401_v5  ;;  %v5276_v4 = vpop.f32.mrb[158].mxu0 }
 0xf22   : > { %v5328_v8 = vadd.f32 %v11378_v3, %v5276_v4  ;;  %v11404_v13 = vpop.f32.mrb[159].mxu0  ;;  %v5343_v43 = vmax.f32 %v5327_v40, 0.0 }
 0xf23   : > { %14549 = vst [vmem:[#allocation192_spill] sm:$0xff] %v11404_v13 }
 0xf24   : > { %v5344_v58 = vmax.f32 %v5328_v8, 0.0 }
 0xf26   : > { %v5356_v18 = vpack.c.bf16 %v5344_v58, %v5343_v43 }
 0xf27   : > { %v5282_v62 = vpop.f32.mrb[160].mxu0 }
 0xf28   : > { %v5329_v26 = vadd.f32 %v11378_v3, %v5282_v62  ;;  %v11407_v45 = vpop.f32.mrb[161].mxu0  ;;  %7779 = vmatmul.mubr.bf16.gmra.mrb[148].mxu1 %v5356_v18 }
 0xf29   : > { %14550 = vst [vmem:[#allocation193_spill] sm:$0xff] %v11407_v45  ;;  %v5286_v9 = vpop.f32.mrb[162].mxu0 }
 0xf2a   : > { %v5330_v14 = vadd.f32 %v11378_v3, %v5286_v9  ;;  %v11410_v31 = vpop.f32.mrb[163].mxu0  ;;  %v5345_v35 = vmax.f32 %v5329_v26, 0.0 }
 0xf2b   : > { %14551 = vst [vmem:[#allocation194_spill] sm:$0xff] %v11410_v31 }
 0xf2c   : > { %v5346_v7 = vmax.f32 %v5330_v14, 0.0 }
 0xf2e   : > { %v5357_v2 = vpack.c.bf16 %v5346_v7, %v5345_v35 }
 0xf2f   : > { %v5292_v59 = vpop.f32.mrb[164].mxu0 }
 0xf30   : > { %v5331_v33 = vadd.f32 %v11378_v3, %v5292_v59  ;;  %v11413_v34 = vpop.f32.mrb[165].mxu0  ;;  %7782 = vmatprep.mubr.bf16.mxu1 %v5357_v2 }
 0xf31   : > { %14552 = vst [vmem:[#allocation195_spill] sm:$0xff] %v11413_v34  ;;  %v5296_v11 = vpop.f32.mrb[166].mxu0 }
 0xf32   : > { %v5332_v41 = vadd.f32 %v11378_v3, %v5296_v11  ;;  %v11416_v49 = vpop.f32.mrb[167].mxu0  ;;  %v5347_v51 = vmax.f32 %v5331_v33, 0.0 }
 0xf33   : > { %14553 = vst [vmem:[#allocation196_spill] sm:$0xff] %v11416_v49 }
 0xf34   : > { %v5348_v61 = vmax.f32 %v5332_v41, 0.0 }
 0xf36   : > { %v5358_v10 = vpack.c.bf16 %v5348_v61, %v5347_v51 }
 0xf37   : > { %v5302_v32 = vpop.f32.mrb[168].mxu0 }
 0xf38   : > { %v5333_v27 = vadd.f32 %v11378_v3, %v5302_v32  ;;  %v11419_v21 = vpop.f32.mrb[169].mxu0  ;;  %7783 = vmatmul.mubr.bf16.gmra.mrb[152].mxu1 %v5358_v10 }
 0xf39   : > { %14554 = vst [vmem:[#allocation197_spill] sm:$0xff] %v11419_v21  ;;  %v5306_v44 = vpop.f32.mrb[170].mxu0 }
 0xf3a   : > { %v5334_v20 = vadd.f32 %v11378_v3, %v5306_v44  ;;  %v11422_v15 = vpop.f32.mrb[171].mxu0  ;;  %v5349_v23 = vmax.f32 %v5333_v27, 0.0 }
 0xf3b   : > { %14555 = vst [vmem:[#allocation198_spill] sm:$0xff] %v11422_v15 }
 0xf3c   : > { %v5350_v29 = vmax.f32 %v5334_v20, 0.0 }
 0xf3e   : > { %v5359_v56 = vpack.c.bf16 %v5350_v29, %v5349_v23  ;;  %v8784_v23 = vld [vmem:[%s13987_s4] ss:$0 sm:$0xff] }
 0xf3f   : > { %v5312_v57 = vpop.f32.mrb[172].mxu0 }
 0xf40   : > { %v5335_v53 = vadd.f32 %v11378_v3, %v5312_v57  ;;  %v11425_v40 = vpop.f32.mrb[173].mxu0  ;;  %7786 = vmatprep.mubr.bf16.mxu1 %v5359_v56 }
 0xf41   : > { %14556 = vst [vmem:[#allocation199_spill] sm:$0xff] %v11425_v40  ;;  %v5316_v4 = vpop.f32.mrb[174].mxu0 }
 0xf42   : > { %v5336_v8 = vadd.f32 %v11378_v3, %v5316_v4  ;;  %v11428_v43 = vpop.f32.mrb[175].mxu0  ;;  %v5351_v58 = vmax.f32 %v5335_v53, 0.0 }
 0xf43   : > { %14557 = vst [vmem:[#allocation200_spill] sm:$0xff] %v11428_v43 }
 0xf44   : > { %v5352_v18 = vmax.f32 %v5336_v8, 0.0 }
 0xf46   : > { %v5360_v62 = vpack.c.bf16 %v5352_v18, %v5351_v58 }
 0xf48   : > { %7787 = vmatmul.mubr.bf16.gmra.mrb[156].mxu1 %v5360_v62 }
 0xfad   : > { %v11430_v26 = vpop.f32.mrb[128].mxu1 }
 0xfae   : > { %v11432_v9 = vpop.f32.mrb[129].mxu1 }
 0xfaf   : > { %v11434_v14 = vpop.f32.mrb[130].mxu1 }
 0xfb0   : > { %v11436_v35 = vpop.f32.mrb[131].mxu1 }
 0xfbd   : > { %v11438_v7 = vpop.f32.mrb[132].mxu1 }
 0xfbe   : > { %v11440_v2 = vpop.f32.mrb[133].mxu1 }
 0xfbf   : > { %v11442_v59 = vpop.f32.mrb[134].mxu1 }
 0xfc0   : > { %v11444_v3 = vpop.f32.mrb[135].mxu1 }
 0xfcd   : > { %v11446_v33 = vpop.f32.mrb[136].mxu1 }
 0xfce   : > { %v11448_v11 = vpop.f32.mrb[137].mxu1 }
 0xfcf   : > { %v11450_v41 = vpop.f32.mrb[138].mxu1 }
 0xfd0   : > { %v11452_v51 = vpop.f32.mrb[139].mxu1 }
 0xfdd   : > { %v11454_v61 = vpop.f32.mrb[140].mxu1 }
 0xfde   : > { %v11456_v10 = vpop.f32.mrb[141].mxu1 }
 0xfdf   : > { %v11458_v32 = vpop.f32.mrb[142].mxu1 }
 0xfe0   : > { %v11460_v27 = vpop.f32.mrb[143].mxu1 }
 0xfeb   : > { %v7776_v44 = vpop.f32.mrb[144].mxu1 }
 0xfec   : > { %v5395_v20 = vpop.f32.mrb[145].mxu1  ;;  %v11467_v53 = vadd.f32 %v8784_v23, %v7776_v44 }
 0xfed   : > { %v11465_v29 = vadd.f32 %v8784_v23, %v5395_v20  ;;  %v7777_v56 = vpop.f32.mrb[146].mxu1 }
 0xfee   : > { %v5398_v57 = vpop.f32.mrb[147].mxu1  ;;  %14559 = vst [vmem:[#allocation202_spill] sm:$0xff] %v11467_v53  ;;  %v11473_v58 = vadd.f32 %v8784_v23, %v7777_v56  ;;  %v5464_v62 = vsel %vm938_vm0, %v11467_v53, -inf }
 0xfef   : > { %14558 = vst [vmem:[#allocation201_spill] sm:$0xff] %v11465_v29  ;;  %v11469_v4 = vadd.f32 %v8784_v23, %v5398_v57  ;;  %v5458_v8 = vsel %vm938_vm0, %v11465_v29, -inf }
 0xff0   : > { %5459 = vmax.xlane.f32.xlu0 %v5458_v8  ;;  %14561 = vst [vmem:[#allocation204_spill] sm:$0xff] %v11473_v58  ;;  %v5467_v44 = vsel %vm938_vm0, %v11473_v58, -inf }
 0xff1   : > { %14560 = vst [vmem:[#allocation203_spill] sm:$0xff] %v11469_v4  ;;  %v5461_v18 = vsel %vm938_vm0, %v11469_v4, -inf }
 0xff2   : > { %5462 = vmax.xlane.f32.xlu1 %v5461_v18 }
 0xff4   : > { %5465 = vmax.xlane.f32.xlu0 %v5464_v62 }
 0xff6   : > { %5468 = vmax.xlane.f32.xlu1 %v5467_v44 }
 0xffb   : > { %v7780_v20 = vpop.f32.mrb[148].mxu1 }
 0xffc   : > { %v5411_v57 = vpop.f32.mrb[149].mxu1  ;;  %v11483_v56 = vadd.f32 %v8784_v23, %v7780_v20 }
 0xffd   : > { %v11481_v37 = vadd.f32 %v8784_v23, %v5411_v57  ;;  %v7781_v46 = vpop.f32.mrb[150].mxu1 }
 0xffe   : > { %v5414_v8 = vpop.f32.mrb[151].mxu1  ;;  %14563 = vst [vmem:[#allocation206_spill] sm:$0xff] %v11483_v56  ;;  %v11489_v16 = vadd.f32 %v8784_v23, %v7781_v46  ;;  %v5476_v44 = vsel %vm938_vm0, %v11483_v56, -inf }
 0xfff   : > { %14562 = vst [vmem:[#allocation205_spill] sm:$0xff] %v11481_v37  ;;  %v11485_v12 = vadd.f32 %v8784_v23, %v5414_v8  ;;  %v5470_v18 = vsel %vm938_vm0, %v11481_v37, -inf }
0x1000   : > { %5471 = vmax.xlane.f32.xlu0 %v5470_v18  ;;  %14565 = vst [vmem:[#allocation208_spill] sm:$0xff] %v11489_v16  ;;  %v5479_v20 = vsel %vm938_vm0, %v11489_v16, -inf }
0x1001   : > { %14564 = vst [vmem:[#allocation207_spill] sm:$0xff] %v11485_v12  ;;  %v5473_v62 = vsel %vm938_vm0, %v11485_v12, -inf }
0x1002   : > { %5474 = vmax.xlane.f32.xlu1 %v5473_v62 }
0x1004   : > { %5477 = vmax.xlane.f32.xlu0 %v5476_v44 }
0x1006   : > { %5480 = vmax.xlane.f32.xlu1 %v5479_v20 }
0x100b   : > { %v7784_v57 = vpop.f32.mrb[152].mxu1 }
0x100c   : > { %v5427_v8 = vpop.f32.mrb[153].mxu1  ;;  %v11499_v46 = vadd.f32 %v8784_v23, %v7784_v57 }
0x100d   : > { %v11497_v60 = vadd.f32 %v8784_v23, %v5427_v8  ;;  %v7785_v47 = vpop.f32.mrb[154].mxu1 }
0x100e   : > { %v5430_v18 = vpop.f32.mrb[155].mxu1  ;;  %14567 = vst [vmem:[#allocation210_spill] sm:$0xff] %v11499_v46  ;;  %v11505_v22 = vadd.f32 %v8784_v23, %v7785_v47  ;;  %v5488_v20 = vsel %vm938_vm0, %v11499_v46, -inf }
0x100f   : > { %14566 = vst [vmem:[#allocation209_spill] sm:$0xff] %v11497_v60  ;;  %v11501_v48 = vadd.f32 %v8784_v23, %v5430_v18  ;;  %v5482_v62 = vsel %vm938_vm0, %v11497_v60, -inf }
0x1010   : > { %5483 = vmax.xlane.f32.xlu0 %v5482_v62  ;;  %14569 = vst [vmem:[#allocation212_spill] sm:$0xff] %v11505_v22  ;;  %v5491_v57 = vsel %vm938_vm0, %v11505_v22, -inf }
0x1011   : > { %14568 = vst [vmem:[#allocation211_spill] sm:$0xff] %v11501_v48  ;;  %v5485_v44 = vsel %vm938_vm0, %v11501_v48, -inf }
0x1012   : > { %5486 = vmax.xlane.f32.xlu1 %v5485_v44 }
0x1014   : > { %5489 = vmax.xlane.f32.xlu0 %v5488_v20 }
0x1016   : > { %5492 = vmax.xlane.f32.xlu1 %v5491_v57 }
0x101b   : > { %v7788_v8 = vpop.f32.mrb[156].mxu1 }
0x101c   : > { %v5443_v18 = vpop.f32.mrb[157].mxu1  ;;  %v11515_v47 = vadd.f32 %v8784_v23, %v7788_v8 }
0x101d   : > { %v11513_v25 = vadd.f32 %v8784_v23, %v5443_v18  ;;  %v7789_v55 = vpop.f32.mrb[158].mxu1 }
0x101e   : > { %v5446_v62 = vpop.f32.mrb[159].mxu1  ;;  %14571 = vst [vmem:[#allocation214_spill] sm:$0xff] %v11515_v47  ;;  %v11521_v24 = vadd.f32 %v8784_v23, %v7789_v55  ;;  %v5500_v57 = vsel %vm938_vm0, %v11515_v47, -inf }
0x101f   : > { %14570 = vst [vmem:[#allocation213_spill] sm:$0xff] %v11513_v25  ;;  %v11517_v42 = vadd.f32 %v8784_v23, %v5446_v62  ;;  %v5494_v44 = vsel %vm938_vm0, %v11513_v25, -inf }
0x1020   : > { %5495 = vmax.xlane.f32.xlu0 %v5494_v44  ;;  %14573 = vst [vmem:[#allocation216_spill] sm:$0xff] %v11521_v24  ;;  %v5503_v8 = vsel %vm938_vm0, %v11521_v24, -inf }
0x1021   : > { %14572 = vst [vmem:[#allocation215_spill] sm:$0xff] %v11517_v42  ;;  %v5497_v20 = vsel %vm938_vm0, %v11517_v42, -inf }
0x1022   : > { %5498 = vmax.xlane.f32.xlu1 %v5497_v20 }
0x1024   : > { %5501 = vmax.xlane.f32.xlu0 %v5500_v57 }
0x1026   : > { %5504 = vmax.xlane.f32.xlu1 %v5503_v8 }
0x107d   : > { %v11529_v18 = vpop.xlane.xlu0 %5459 }
0x107e   : > { %14574 = vst [vmem:[#allocation217_spill] sm:$0xff] %v11529_v18  ;;  %vm5666_vm10 = vcmp.ge.f32.partialorder %v11465_v29, %v11529_v18 }
0x107f   : > { %v11533_v62 = vpop.xlane.xlu1 %5462  ;;  %v5682_v55 = vsel %vm5666_vm10, %v9305_v50, 8 }
0x1080   : > { %14575 = vst [vmem:[#allocation218_spill] sm:$0xff] %v11533_v62  ;;  %v11537_v23 = vsel %vm938_vm0, %v5682_v55, 2147483647  ;;  %vm5667_vm4 = vcmp.ge.f32.partialorder %v11469_v4, %v11533_v62 }
0x1081   : > { %v11541_v44 = vpop.xlane.xlu0 %5465  ;;  %v5700_v20 = vshra.s32 %v11537_v23, 16  ;;  %v5683_v57 = vsel %vm5667_vm4, %v9305_v50, 8 }
0x1082   : > { %14576 = vst [vmem:[#allocation219_spill] sm:$0xff] %v11541_v44  ;;  %v11546_v8 = vsel %vm938_vm0, %v5683_v57, 2147483647  ;;  %vm5668_vm5 = vcmp.ge.f32.partialorder %v11467_v53, %v11541_v44 }
0x1083   : > { %v11548_v36 = vpop.xlane.xlu1 %5468  ;;  %v11550_v30 = vcvt.s32.f32 %v5700_v20  ;;  %v5715_v63 = vshra.s32 %v11546_v8, 16  ;;  %v5684_v55 = vsel %vm5668_vm5, %v9305_v50, 8 }
0x1084   : > { %14577 = vst [vmem:[#allocation220_spill] sm:$0xff] %v11548_v36  ;;  %v11560_v29 = vsel %vm938_vm0, %v5684_v55, 2147483647  ;;  %vm5669_vm6 = vcmp.ge.f32.partialorder %v11473_v58, %v11548_v36 }
0x1085   : > { %5703 = vmin.xlane.f32.xlu0 %v11550_v30  ;;  %v11557_v38 = vcvt.s32.f32 %v5715_v63  ;;  %v5730_v20 = vshra.s32 %v11560_v29, 16  ;;  %v5685_v57 = vsel %vm5669_vm6, %v9305_v50, 8 }
0x1086   : > { %v11568_v53 = vsel %vm938_vm0, %v5685_v57, 2147483647 }
0x1087   : > { %5718 = vmin.xlane.f32.xlu1 %v11557_v38  ;;  %v11570_v44 = vcvt.s32.f32 %v5730_v20  ;;  %v5745_v63 = vshra.s32 %v11568_v53, 16 }
0x1089   : > { %5733 = vmin.xlane.f32.xlu0 %v11570_v44  ;;  %v11574_v55 = vcvt.s32.f32 %v5745_v63 }
0x108b   : > { %5748 = vmin.xlane.f32.xlu1 %v11574_v55 }
0x108d   : > { %v11577_v18 = vpop.xlane.xlu0 %5471 }
0x108e   : > { %14578 = vst [vmem:[#allocation221_spill] sm:$0xff] %v11577_v18  ;;  %vm5670_vm7 = vcmp.ge.f32.partialorder %v11481_v37, %v11577_v18 }
0x108f   : > { %v11581_v58 = vpop.xlane.xlu1 %5474  ;;  %v5686_v57 = vsel %vm5670_vm7, %v9305_v50, 8 }
0x1090   : > { %14579 = vst [vmem:[#allocation222_spill] sm:$0xff] %v11581_v58  ;;  %v11585_v20 = vsel %vm938_vm0, %v5686_v57, 2147483647  ;;  %vm5671_vm8 = vcmp.ge.f32.partialorder %v11485_v12, %v11581_v58 }
0x1091   : > { %v11589_v36 = vpop.xlane.xlu0 %5477  ;;  %v5760_v63 = vshra.s32 %v11585_v20, 16  ;;  %v5687_v4 = vsel %vm5671_vm8, %v9305_v50, 8 }
0x1092   : > { %14580 = vst [vmem:[#allocation223_spill] sm:$0xff] %v11589_v36  ;;  %v11594_v62 = vsel %vm938_vm0, %v5687_v4, 2147483647  ;;  %vm5672_vm9 = vcmp.ge.f32.partialorder %v11483_v56, %v11589_v36 }
0x1093   : > { %v11596_v37 = vpop.xlane.xlu1 %5480  ;;  %v11598_v18 = vcvt.s32.f32 %v5760_v63  ;;  %v5775_v15 = vshra.s32 %v11594_v62, 16  ;;  %v5688_v57 = vsel %vm5672_vm9, %v9305_v50, 8 }
0x1094   : > { %14581 = vst [vmem:[#allocation224_spill] sm:$0xff] %v11596_v37  ;;  %v11608_v58 = vsel %vm938_vm0, %v5688_v57, 2147483647  ;;  %vm5673_vm11 = vcmp.ge.f32.partialorder %v11489_v16, %v11596_v37 }
0x1095   : > { %5763 = vmin.xlane.f32.xlu0 %v11598_v18  ;;  %v11605_v12 = vcvt.s32.f32 %v5775_v15  ;;  %v5790_v4 = vshra.s32 %v11608_v58, 16  ;;  %v5689_v63 = vsel %vm5673_vm11, %v9305_v50, 8 }
0x1096   : > { %v11616_v56 = vsel %vm938_vm0, %v5689_v63, 2147483647 }
0x1097   : > { %5778 = vmin.xlane.f32.xlu1 %v11605_v12  ;;  %v11618_v36 = vcvt.s32.f32 %v5790_v4  ;;  %v5805_v15 = vshra.s32 %v11616_v56, 16 }
0x1099   : > { %5793 = vmin.xlane.f32.xlu0 %v11618_v36  ;;  %v11622_v57 = vcvt.s32.f32 %v5805_v15 }
0x109b   : > { %5808 = vmin.xlane.f32.xlu1 %v11622_v57 }
0x109d   : > { %v11625_v16 = vpop.xlane.xlu0 %5483 }
0x109e   : > { %14582 = vst [vmem:[#allocation225_spill] sm:$0xff] %v11625_v16  ;;  %vm5674_vm12 = vcmp.ge.f32.partialorder %v11497_v60, %v11625_v16 }
0x109f   : > { %v11629_v37 = vpop.xlane.xlu1 %5486  ;;  %v5690_v63 = vsel %vm5674_vm12, %v9305_v50, 8 }
0x10a0   : > { %14583 = vst [vmem:[#allocation226_spill] sm:$0xff] %v11629_v37  ;;  %v11633_v4 = vsel %vm938_vm0, %v5690_v63, 2147483647  ;;  %vm5675_vm13 = vcmp.ge.f32.partialorder %v11501_v48, %v11629_v37 }
0x10a1   : > { %v11637_v43 = vpop.xlane.xlu0 %5489  ;;  %v5820_v15 = vshra.s32 %v11633_v4, 16  ;;  %v5691_v21 = vsel %vm5675_vm13, %v9305_v50, 8 }
0x10a2   : > { %14584 = vst [vmem:[#allocation227_spill] sm:$0xff] %v11637_v43  ;;  %v11642_v40 = vsel %vm938_vm0, %v5691_v21, 2147483647  ;;  %vm5676_vm14 = vcmp.ge.f32.partialorder %v11499_v46, %v11637_v43 }
0x10a3   : > { %v11644_v60 = vpop.xlane.xlu1 %5492  ;;  %v11646_v16 = vcvt.s32.f32 %v5820_v15  ;;  %v5835_v31 = vshra.s32 %v11642_v40, 16  ;;  %v5692_v63 = vsel %vm5676_vm14, %v9305_v50, 8 }
0x10a4   : > { %14585 = vst [vmem:[#allocation228_spill] sm:$0xff] %v11644_v60  ;;  %v11656_v37 = vsel %vm938_vm0, %v5692_v63, 2147483647  ;;  %vm5677_vm15 = vcmp.ge.f32.partialorder %v11505_v22, %v11644_v60 }
0x10a5   : > { %5823 = vmin.xlane.f32.xlu0 %v11646_v16  ;;  %v11653_v48 = vcvt.s32.f32 %v5835_v31  ;;  %v5850_v21 = vshra.s32 %v11656_v37, 16  ;;  %v5693_v15 = vsel %vm5677_vm15, %v9305_v50, 8 }
0x10a6   : > { %v11664_v46 = vsel %vm938_vm0, %v5693_v15, 2147483647 }
0x10a7   : > { %5838 = vmin.xlane.f32.xlu1 %v11653_v48  ;;  %v11666_v43 = vcvt.s32.f32 %v5850_v21  ;;  %v5865_v31 = vshra.s32 %v11664_v46, 16 }
0x10a9   : > { %5853 = vmin.xlane.f32.xlu0 %v11666_v43  ;;  %v11670_v63 = vcvt.s32.f32 %v5865_v31 }
0x10ab   : > { %5868 = vmin.xlane.f32.xlu1 %v11670_v63 }
0x10ad   : > { %v11673_v22 = vpop.xlane.xlu0 %5495 }
0x10ae   : > { %14586 = vst [vmem:[#allocation229_spill] sm:$0xff] %v11673_v22  ;;  %vm5678_vm1 = vcmp.ge.f32.partialorder %v11513_v25, %v11673_v22 }
0x10af   : > { %v11677_v60 = vpop.xlane.xlu1 %5498  ;;  %v5694_v15 = vsel %vm5678_vm1, %v9305_v50, 8 }
0x10b0   : > { %14587 = vst [vmem:[#allocation230_spill] sm:$0xff] %v11677_v60  ;;  %v11681_v21 = vsel %vm938_vm0, %v5694_v15, 2147483647  ;;  %vm5679_vm2 = vcmp.ge.f32.partialorder %v11517_v42, %v11677_v60 }
0x10b1   : > { %v11685_v49 = vpop.xlane.xlu0 %5501  ;;  %v5880_v31 = vshra.s32 %v11681_v21, 16  ;;  %v5695_v45 = vsel %vm5679_vm2, %v9305_v50, 8 }
0x10b2   : > { %14588 = vst [vmem:[#allocation231_spill] sm:$0xff] %v11685_v49  ;;  %v11690_v34 = vsel %vm938_vm0, %v5695_v45, 2147483647  ;;  %vm5680_vm3 = vcmp.ge.f32.partialorder %v11515_v47, %v11685_v49 }
0x10b3   : > { %v11692_v25 = vpop.xlane.xlu1 %5504  ;;  %v11694_v22 = vcvt.s32.f32 %v5880_v31  ;;  %v5895_v52 = vshra.s32 %v11690_v34, 16  ;;  %v5696_v15 = vsel %vm5680_vm3, %v9305_v50, 8 }
0x10b4   : > { %14589 = vst [vmem:[#allocation232_spill] sm:$0xff] %v11692_v25  ;;  %v11704_v60 = vsel %vm938_vm0, %v5696_v15, 2147483647  ;;  %vm5681_vm10 = vcmp.ge.f32.partialorder %v11521_v24, %v11692_v25  ;;  %v5699_v24 = vand.u32 65535, %v11537_v23  ;;  %v5714_v25 = vand.u32 65535, %v11546_v8 }
0x10b5   : > { %5883 = vmin.xlane.f32.xlu0 %v11694_v22  ;;  %v11701_v42 = vcvt.s32.f32 %v5895_v52  ;;  %v5910_v45 = vshra.s32 %v11704_v60, 16  ;;  %v5697_v31 = vsel %vm5681_vm10, %v9305_v50, 8  ;;  %v5744_v23 = vand.u32 65535, %v11568_v53 }
0x10b6   : > { %v11712_v47 = vsel %vm938_vm0, %v5697_v31, 2147483647  ;;  %v5701_v39 = vcvt.s32.f32 %v5699_v24  ;;  %v5716_v28 = vcvt.s32.f32 %v5714_v25  ;;  %v5789_v53 = vand.u32 65535, %v11608_v58 }
0x10b7   : > { %5898 = vmin.xlane.f32.xlu1 %v11701_v42  ;;  %v11714_v49 = vcvt.s32.f32 %v5910_v45  ;;  %v5925_v52 = vshra.s32 %v11712_v47, 16  ;;  %v5729_v45 = vand.u32 65535, %v11560_v29  ;;  %v5746_v19 = vcvt.s32.f32 %v5744_v23 }
0x10b9   : > { %5913 = vmin.xlane.f32.xlu0 %v11714_v49  ;;  %v11718_v15 = vcvt.s32.f32 %v5925_v52  ;;  %v5731_v24 = vcvt.s32.f32 %v5729_v45 }
0x10bb   : > { %5928 = vmin.xlane.f32.xlu1 %v11718_v15 }
0x1112   : > { %v11723_v13 = vpop.xlane.xlu0 %5703 }
0x1113   : > { %vm5705_vm4 = vcmp.eq.f32.partialorder %v11550_v30, %v11723_v13 }
0x1114   : > { %v11728_v31 = vpop.xlane.xlu1 %5718  ;;  %v5706_v5 = vsel %vm5705_vm4, %v5701_v39, inf }
0x1115   : > { %5707 = vmin.xlane.f32.xlu0 %v5706_v5  ;;  %vm5720_vm5 = vcmp.eq.f32.partialorder %v11557_v38, %v11728_v31  ;;  %v5759_v38 = vand.u32 65535, %v11585_v20  ;;  %v5791_v20 = vcvt.s32.f32 %v5789_v53 }
0x1116   : > { %v5721_v52 = vsel %vm5720_vm5, %v5716_v28, inf  ;;  %v11733_v8 = vpop.xlane.xlu0 %5733  ;;  %v5774_v28 = vand.u32 65535, %v11594_v62 }
0x1117   : > { %5722 = vmin.xlane.f32.xlu1 %v5721_v52  ;;  %vm5735_vm6 = vcmp.eq.f32.partialorder %v11570_v44, %v11733_v8  ;;  %v5761_v5 = vcvt.s32.f32 %v5759_v38 }
0x1118   : > { %v11737_v30 = vpop.xlane.xlu1 %5748  ;;  %v5736_v29 = vsel %vm5735_vm6, %v5731_v24, inf  ;;  %v5776_v23 = vcvt.s32.f32 %v5774_v28 }
0x1119   : > { %5737 = vmin.xlane.f32.xlu0 %v5736_v29  ;;  %vm5750_vm7 = vcmp.eq.f32.partialorder %v11574_v55, %v11737_v30 }
0x111a   : > { %v5751_v25 = vsel %vm5750_vm7, %v5746_v19, inf  ;;  %v5804_v19 = vand.u32 65535, %v11616_v56  ;;  %v5834_v56 = vand.u32 65535, %v11642_v40 }
0x111b   : > { %5752 = vmin.xlane.f32.xlu1 %v5751_v25 }
0x111c   : > { %v5806_v52 = vcvt.s32.f32 %v5804_v19  ;;  %v14590_v19 = vld [vmem:[#allocation30_spill] sm:$0xff] }
0x1122   : > { %v11743_v39 = vpop.xlane.xlu0 %5763 }
0x1123   : > { %vm5765_vm8 = vcmp.eq.f32.partialorder %v11598_v18, %v11743_v39 }
0x1124   : > { %v11748_v44 = vpop.xlane.xlu1 %5778  ;;  %v5766_v45 = vsel %vm5765_vm8, %v5761_v5, inf  ;;  %v5836_v5 = vcvt.s32.f32 %v5834_v56 }
0x1125   : > { %5767 = vmin.xlane.f32.xlu0 %v5766_v45  ;;  %vm5780_vm9 = vcmp.eq.f32.partialorder %v11605_v12, %v11748_v44  ;;  %v5819_v12 = vand.u32 65535, %v11633_v4 }
0x1126   : > { %v5781_v55 = vsel %vm5780_vm9, %v5776_v23, inf  ;;  %v11753_v62 = vpop.xlane.xlu0 %5793 }
0x1127   : > { %5782 = vmin.xlane.f32.xlu1 %v5781_v55  ;;  %vm5795_vm11 = vcmp.eq.f32.partialorder %v11618_v36, %v11753_v62  ;;  %v5821_v25 = vcvt.s32.f32 %v5819_v12  ;;  %v5849_v36 = vand.u32 65535, %v11656_v37  ;;  %v14591_v55 = vld [vmem:[#allocation13_spill] sm:$0xff]  ;;  %v14595_v12 = vld [vmem:[#allocation12_spill] sm:$0xff] }
0x1128   : > { %v11757_v18 = vpop.xlane.xlu1 %5808  ;;  %v5796_v58 = vsel %vm5795_vm11, %v5791_v20, inf  ;;  %v14593_v20 = vld [vmem:[#allocation11_spill] sm:$0xff] }
0x1129   : > { %5797 = vmin.xlane.f32.xlu0 %v5796_v58  ;;  %vm5810_vm12 = vcmp.eq.f32.partialorder %v11622_v57, %v11757_v18  ;;  %v5864_v57 = vand.u32 65535, %v11664_v46  ;;  %v5851_v53 = vcvt.s32.f32 %v5849_v36  ;;  %v14592_v46 = vld [vmem:[#allocation27_spill] sm:$0xff] }
0x112a   : > { %v5811_v24 = vsel %vm5810_vm12, %v5806_v52, inf  ;;  %v989_v58 = vsub.f32 %v14593_v20, %v14592_v46  ;;  %v14600_v20 = vld [vmem:[#allocation33_spill] sm:$0xff] }
0x112b   : > { %5812 = vmin.xlane.f32.xlu1 %v5811_v24  ;;  %v5866_v23 = vcvt.s32.f32 %v5864_v57 }
0x112c   : > { %v1007_v36 = vmul.f32 1.442695, %v989_v58  ;;  %v14601_v58 = vld [vmem:[#allocation15_spill] sm:$0xff] }
0x1132   : > { %v11763_v29 = vpop.xlane.xlu0 %5823 }
0x1133   : > { %vm5825_vm13 = vcmp.eq.f32.partialorder %v11646_v16, %v11763_v29  ;;  %v987_v16 = vsub.f32 %v9242_v6, %v9309_v0  ;;  %v14594_v6 = vld [vmem:[#allocation29_spill] sm:$0xff] }
0x1134   : > { %v11768_v38 = vpop.xlane.xlu1 %5838  ;;  %v5826_v28 = vsel %vm5825_vm13, %v5821_v25, inf  ;;  %v5879_v25 = vand.u32 65535, %v11681_v21  ;;  %v5909_v21 = vand.u32 65535, %v11704_v60 }
0x1135   : > { %5827 = vmin.xlane.f32.xlu0 %v5826_v28  ;;  %vm5840_vm14 = vcmp.eq.f32.partialorder %v11653_v48, %v11768_v38  ;;  %v988_v48 = vsub.f32 %v14591_v55, %v14590_v19  ;;  %v1003_v24 = vmul.f32 1.442695, %v987_v16  ;;  %v14596_v28 = vld [vmem:[#allocation31_spill] sm:$0xff] }
0x1136   : > { %v5841_v4 = vsel %vm5840_vm14, %v5836_v5, inf  ;;  %v11773_v40 = vpop.xlane.xlu0 %5853  ;;  %v14597_v5 = vld [vmem:[#allocation14_spill] sm:$0xff]  ;;  %v5881_v55 = vcvt.s32.f32 %v5879_v25 }
0x1137   : > { %5842 = vmin.xlane.f32.xlu1 %v5841_v4  ;;  %vm5855_vm15 = vcmp.eq.f32.partialorder %v11666_v43, %v11773_v40  ;;  %v990_v43 = vsub.f32 %v14595_v12, %v14594_v6  ;;  %v1005_v56 = vmul.f32 1.442695, %v988_v48  ;;  %8128 = vpow2.f32 %v1003_v24  ;;  %v14602_v25 = vld [vmem:[#allocation34_spill] sm:$0xff] }
0x1138   : > { %v11779_v37 = vpop.xlane.xlu1 %5868  ;;  %v5856_v45 = vsel %vm5855_vm15, %v5851_v53, inf  ;;  %v991_v57 = vsub.f32 %v14597_v5, %v14596_v28  ;;  %v5894_v4 = vand.u32 65535, %v11690_v34  ;;  %v14598_v53 = vld [vmem:[#allocation32_spill] sm:$0xff]  ;;  %v5740_v6 = vcvt.f32.s32 %v11733_v8 }
0x1139   : > { %5857 = vmin.xlane.f32.xlu0 %v5856_v45  ;;  %vm5870_vm1 = vcmp.eq.f32.partialorder %v11670_v63, %v11779_v37  ;;  %v1009_v63 = vmul.f32 1.442695, %v990_v43  ;;  %8130 = vpow2.f32 %v1005_v56  ;;  %v14599_v45 = vld [vmem:[#allocation16_spill] sm:$0xff]  ;;  %v5924_v43 = vand.u32 65535, %v11712_v47 }
0x113a   : > { %v5871_v52 = vsel %vm5870_vm1, %v5866_v23, inf  ;;  %v992_v23 = vsub.f32 %v14599_v45, %v14598_v53  ;;  %8132 = vpow2.f32 %v1007_v36  ;;  %v1011_v48 = vmul.f32 1.442695, %v991_v57 }
0x113b   : > { %5872 = vmin.xlane.f32.xlu1 %v5871_v52  ;;  %v993_v52 = vsub.f32 %v14601_v58, %v14600_v20  ;;  %v5896_v12 = vcvt.s32.f32 %v5894_v4  ;;  %8134 = vpow2.f32 %v1009_v63  ;;  %v5911_v57 = vcvt.s32.f32 %v5909_v21  ;;  %v14605_v4 = vld [vmem:[#allocation18_spill] sm:$0xff] }
0x113c   : > { %v1013_v56 = vmul.f32 1.442695, %v992_v23  ;;  %8136 = vpow2.f32 %v1011_v48  ;;  %v5926_v63 = vcvt.s32.f32 %v5924_v43 }
0x113d   : > { %v1015_v45 = vmul.f32 1.442695, %v993_v52 }
0x113e   : > { %8138 = vpow2.f32 %v1013_v56 }
0x113f   : > { %8140 = vpow2.f32 %v1015_v45  ;;  %v14612_v45 = vld [vmem:[#allocation39_spill] sm:$0xff] }
0x1141   : > { %v8129_v23 = vpop.eup %8128 }
0x1142   : > { %v11795_v16 = vpop.xlane.xlu0 %5883  ;;  %v1035_v43 = vsel %vm938_vm0, %v8129_v23, 0.0 }
0x1143   : > { %vm5885_vm2 = vcmp.eq.f32.partialorder %v11694_v22, %v11795_v16  ;;  %v14603_v22 = vld [vmem:[#allocation17_spill] sm:$0xff]  ;;  %v8131_v48 = vpop.eup %8130 }
0x1144   : > { %v11802_v24 = vpop.xlane.xlu1 %5898  ;;  %v5886_v34 = vsel %vm5885_vm2, %v5881_v55, inf  ;;  %v994_v36 = vsub.f32 %v14603_v22, %v14602_v25  ;;  %v14604_v55 = vld [vmem:[#allocation35_spill] sm:$0xff]  ;;  %v14607_v22 = vld [vmem:[#allocation20_spill] sm:$0xff] }
0x1145   : > { %5887 = vmin.xlane.f32.xlu0 %v5886_v34  ;;  %vm5900_vm3 = vcmp.eq.f32.partialorder %v11701_v42, %v11802_v24  ;;  %v995_v58 = vsub.f32 %v14605_v4, %v14604_v55  ;;  %v14611_v55 = vld [vmem:[#allocation21_spill] sm:$0xff] }
0x1146   : > { %v5901_v60 = vsel %vm5900_vm3, %v5896_v12, inf  ;;  %v11809_v5 = vpop.xlane.xlu0 %5913  ;;  %v1017_v34 = vmul.f32 1.442695, %v994_v36  ;;  %v14606_v12 = vld [vmem:[#allocation36_spill] sm:$0xff]  ;;  %v14610_v36 = vld [vmem:[#allocation38_spill] sm:$0xff] }
0x1147   : > { %5902 = vmin.xlane.f32.xlu1 %v5901_v60  ;;  %vm5915_vm10 = vcmp.eq.f32.partialorder %v11714_v49, %v11809_v5  ;;  %v996_v19 = vsub.f32 %v14607_v22, %v14606_v12  ;;  %v1019_v52 = vmul.f32 1.442695, %v995_v58  ;;  %v14608_v60 = vld [vmem:[#allocation37_spill] sm:$0xff]  ;;  %v14609_v49 = vld [vmem:[#allocation19_spill] sm:$0xff]  ;;  %v998_v22 = vsub.f32 %v14611_v55, %v14610_v36  ;;  %v14613_v58 = vld [vmem:[#allocation22_spill] sm:$0xff] }
0x1148   : > { %v11815_v42 = vpop.xlane.xlu1 %5928  ;;  %v5916_v47 = vsel %vm5915_vm10, %v5911_v57, inf  ;;  %v997_v4 = vsub.f32 %v14609_v49, %v14608_v60  ;;  %v8133_v57 = vpop.eup %8132  ;;  %8142 = vpow2.f32 %v1017_v34  ;;  %v999_v12 = vsub.f32 %v14613_v58, %v14612_v45  ;;  %v14614_v34 = vld [vmem:[#allocation40_spill] sm:$0xff] }
0x1149   : > { %5917 = vmin.xlane.f32.xlu0 %v5916_v47  ;;  %vm5930_vm4 = vcmp.eq.f32.partialorder %v11718_v15, %v11815_v42  ;;  %v1021_v56 = vmul.f32 1.442695, %v996_v19  ;;  %v1038_v47 = vsel %vm938_vm0, %v8131_v48, 0.0  ;;  %v8135_v15 = vpop.eup %8134  ;;  %8144 = vpow2.f32 %v1019_v52  ;;  %v14615_v19 = vld [vmem:[#allocation24_spill] sm:$0xff]  ;;  %v14616_v52 = vld [vmem:[#allocation41_spill] sm:$0xff] }
0x114a   : > { %v5931_v21 = vsel %vm5930_vm4, %v5926_v63, inf  ;;  %v1023_v63 = vmul.f32 1.442695, %v997_v4  ;;  %v8137_v49 = vpop.eup %8136  ;;  %v1025_v23 = vmul.f32 1.442695, %v998_v22  ;;  %v1000_v60 = vsub.f32 %v14615_v19, %v14614_v34  ;;  %v14617_v4 = vld [vmem:[#allocation23_spill] sm:$0xff] }
0x114b   : > { %5932 = vmin.xlane.f32.xlu1 %v5931_v21  ;;  %v1041_v21 = vsel %vm938_vm0, %v8133_v57, 0.0  ;;  %8146 = vpow2.f32 %v1021_v56  ;;  %v1044_v55 = vsel %vm938_vm0, %v8135_v15, 0.0  ;;  %v1027_v48 = vmul.f32 1.442695, %v999_v12  ;;  %v14618_v56 = vld [vmem:[#allocation42_spill] sm:$0xff]  ;;  %v14619_v22 = vld [vmem:[#allocation25_spill] sm:$0xff] }
0x114c   : > { %8148 = vpow2.f32 %v1023_v63  ;;  %v1001_v36 = vsub.f32 %v14617_v4, %v14616_v52  ;;  %v1029_v57 = vmul.f32 1.442695, %v1000_v60  ;;  %v1002_v45 = vsub.f32 %v14619_v22, %v14618_v56 }
0x114d   : > { %1036 = vadd.xlane.f32.xlu0 %v1035_v43  ;;  %v8139_v43 = vpop.eup %8138  ;;  %8150 = vpow2.f32 %v1025_v23 }
0x114e   : > { %v8141_v58 = vpop.eup %8140  ;;  %8152 = vpow2.f32 %v1027_v48  ;;  %v1031_v15 = vmul.f32 1.442695, %v1001_v36 }
0x114f   : > { %1039 = vadd.xlane.f32.xlu1 %v1038_v47  ;;  %v1047_v47 = vsel %vm938_vm0, %v8137_v49, 0.0  ;;  %v1053_v12 = vsel %vm938_vm0, %v8141_v58, 0.0  ;;  %8154 = vpow2.f32 %v1029_v57 }
0x1150   : > { %8156 = vpow2.f32 %v1031_v15 }
0x1151   : > { %1042 = vadd.xlane.f32.xlu0 %v1041_v21  ;;  %v1050_v21 = vsel %vm938_vm0, %v8139_v43, 0.0 }
0x1152   : > { %v8143_v19 = vpop.eup %8142 }
0x1153   : > { %1045 = vadd.xlane.f32.xlu1 %v1044_v55  ;;  %v8145_v63 = vpop.eup %8144  ;;  %v1033_v55 = vmul.f32 1.442695, %v1002_v45  ;;  %v1056_v49 = vsel %vm938_vm0, %v8143_v19, 0.0 }
0x1154   : > { %v1059_v60 = vsel %vm938_vm0, %v8145_v63, 0.0 }
0x1155   : > { %1048 = vadd.xlane.f32.xlu0 %v1047_v47  ;;  %v8147_v23 = vpop.eup %8146  ;;  %8158 = vpow2.f32 %v1033_v55 }
0x1156   : > { %v8149_v4 = vpop.eup %8148  ;;  %v1062_v43 = vsel %vm938_vm0, %v8147_v23, 0.0 }
0x1157   : > { %1051 = vadd.xlane.f32.xlu1 %v1050_v21  ;;  %v8151_v36 = vpop.eup %8150  ;;  %v1065_v48 = vsel %vm938_vm0, %v8149_v4, 0.0  ;;  %v11849_v21 = vld [vmem:[%s13991_s8] ss:$0 sm:$0xff]  ;;  %v14624_v4 = vld [vmem:[#allocation59_spill] sm:$0xff] }
0x1158   : > { %v8153_v47 = vpop.eup %8152  ;;  %v1068_v45 = vsel %vm938_vm0, %v8151_v36, 0.0 }
0x1159   : > { %1054 = vadd.xlane.f32.xlu0 %v1053_v12  ;;  %v8155_v58 = vpop.eup %8154  ;;  %v1071_v57 = vsel %vm938_vm0, %v8153_v47, 0.0  ;;  %v14620_v12 = vld [vmem:[#allocation60_spill] sm:$0xff] }
0x115a   : > { %v8157_v22 = vpop.eup %8156  ;;  %v1074_v19 = vsel %vm938_vm0, %v8155_v58, 0.0  ;;  %v11854_v63 = vadd.f32 %v11849_v21, %v14620_v12  ;;  %v14628_v58 = vld [vmem:[#allocation64_spill] sm:$0xff] }
0x115b   : > { %1057 = vadd.xlane.f32.xlu1 %v1056_v49  ;;  %v1077_v55 = vsel %vm938_vm0, %v8157_v22, 0.0  ;;  %v14622_v49 = vld [vmem:[#allocation62_spill] sm:$0xff] }
0x115c   : > { %14621 = vst [vmem:[#allocation13_spill] sm:$0xff] %v11854_v63  ;;  %v11859_v23 = vadd.f32 %v11849_v21, %v14622_v49  ;;  %v1966_v36 = vsel %vm938_vm0, %v11854_v63, -inf }
0x115d   : > { %1060 = vadd.xlane.f32.xlu0 %v1059_v60 }
0x115e   : > { %14623 = vst [vmem:[#allocation11_spill] sm:$0xff] %v11859_v23 }
0x115f   : > { %1063 = vadd.xlane.f32.xlu1 %v1062_v43  ;;  %v8159_v15 = vpop.eup %8158  ;;  %v11864_v43 = vadd.f32 %v14624_v4, %v11849_v21  ;;  %v14634_v4 = vld [vmem:[#allocation65_spill] sm:$0xff] }
0x1160   : > { %v1080_v60 = vsel %vm938_vm0, %v8159_v15, 0.0 }
0x1161   : > { %1066 = vadd.xlane.f32.xlu0 %v1065_v48  ;;  %14625 = vst [vmem:[#allocation12_spill] sm:$0xff] %v11864_v43  ;;  %v14626_v48 = vld [vmem:[#allocation61_spill] sm:$0xff]  ;;  %v1972_v22 = vsel %vm938_vm0, %v11864_v43, -inf }
0x1162   : > { %v11870_v47 = vadd.f32 %v14626_v48, %v11849_v21 }
0x1163   : > { %1069 = vadd.xlane.f32.xlu1 %v1068_v45  ;;  %v1969_v45 = vsel %vm938_vm0, %v11859_v23, -inf }
0x1164   : > { %14627 = vst [vmem:[#allocation14_spill] sm:$0xff] %v11870_v47  ;;  %v1975_v12 = vsel %vm938_vm0, %v11870_v47, -inf }
0x1165   : > { %1072 = vadd.xlane.f32.xlu0 %v1071_v57  ;;  %v11876_v57 = vadd.f32 %v11849_v21, %v14628_v58 }
0x1167   : > { %1075 = vadd.xlane.f32.xlu1 %v1074_v19  ;;  %14629 = vst [vmem:[#allocation16_spill] sm:$0xff] %v11876_v57  ;;  %v14630_v19 = vld [vmem:[#allocation66_spill] sm:$0xff] }
0x1168   : > { %v11882_v15 = vadd.f32 %v11849_v21, %v14630_v19  ;;  %v14638_v19 = vld [vmem:[#allocation70_spill] sm:$0xff] }
0x1169   : > { %1078 = vadd.xlane.f32.xlu0 %v1077_v55  ;;  %v14632_v55 = vld [vmem:[#allocation63_spill] sm:$0xff] }
0x116a   : > { %14631 = vst [vmem:[#allocation15_spill] sm:$0xff] %v11882_v15  ;;  %v11888_v49 = vadd.f32 %v14632_v55, %v11849_v21  ;;  %v1981_v48 = vsel %vm938_vm0, %v11882_v15, -inf }
0x116b   : > { %1081 = vadd.xlane.f32.xlu1 %v1080_v60  ;;  %v1978_v60 = vsel %vm938_vm0, %v11876_v57, -inf }
0x116c   : > { %14633 = vst [vmem:[#allocation17_spill] sm:$0xff] %v11888_v49 }
0x116d   : > { %1967 = vmax.xlane.f32.xlu0 %v1966_v36  ;;  %v11894_v36 = vadd.f32 %v14634_v4, %v11849_v21 }
0x116f   : > { %1970 = vmax.xlane.f32.xlu1 %v1969_v45  ;;  %14635 = vst [vmem:[#allocation18_spill] sm:$0xff] %v11894_v36  ;;  %v14636_v45 = vld [vmem:[#allocation68_spill] sm:$0xff]  ;;  %v1987_v55 = vsel %vm938_vm0, %v11894_v36, -inf }
0x1170   : > { %v11900_v58 = vadd.f32 %v11849_v21, %v14636_v45  ;;  %v14642_v45 = vld [vmem:[#allocation69_spill] sm:$0xff] }
0x1171   : > { %1973 = vmax.xlane.f32.xlu0 %v1972_v22  ;;  %v1984_v22 = vsel %vm938_vm0, %v11888_v49, -inf  ;;  %v11918_v56 = vadd.f32 %v14642_v45, %v11849_v21  ;;  %v14648_v45 = vld [vmem:[#allocation71_spill] sm:$0xff] }
0x1172   : > { %14637 = vst [vmem:[#allocation20_spill] sm:$0xff] %v11900_v58  ;;  %v11936_v25 = vadd.f32 %v14648_v45, %v11849_v21  ;;  %v5710_v45 = vcvt.f32.s32 %v11723_v13 }
0x1173   : > { %1976 = vmax.xlane.f32.xlu1 %v1975_v12  ;;  %v11906_v12 = vadd.f32 %v11849_v21, %v14638_v19  ;;  %14643 = vst [vmem:[#allocation22_spill] sm:$0xff] %v11918_v56  ;;  %v14644_v19 = vld [vmem:[#allocation72_spill] sm:$0xff] }
0x1174   : > { %v11924_v52 = vadd.f32 %v11849_v21, %v14644_v19  ;;  %14649 = vst [vmem:[#allocation25_spill] sm:$0xff] %v11936_v25  ;;  %v14650_v19 = vld [vmem:[#allocation73_spill] sm:$0xff]  ;;  %v5711_v28 = vshll.u32 %v5710_v45, 16 }
0x1175   : > { %1979 = vmax.xlane.f32.xlu0 %v1978_v60  ;;  %14639 = vst [vmem:[#allocation19_spill] sm:$0xff] %v11906_v12  ;;  %v14640_v60 = vld [vmem:[#allocation67_spill] sm:$0xff]  ;;  %v11942_v20 = vadd.f32 %v14650_v19, %v11849_v21 }
0x1176   : > { %v11912_v4 = vadd.f32 %v14640_v60, %v11849_v21  ;;  %14645 = vst [vmem:[#allocation24_spill] sm:$0xff] %v11924_v52  ;;  %v14646_v60 = vld [vmem:[#allocation74_spill] sm:$0xff] }
0x1177   : > { %1982 = vmax.xlane.f32.xlu1 %v1981_v48  ;;  %v1990_v48 = vsel %vm938_vm0, %v11900_v58, -inf  ;;  %v11930_v34 = vadd.f32 %v11849_v21, %v14646_v60  ;;  %14651 = vst [vmem:[#allocation60_spill] sm:$0xff] %v11942_v20  ;;  %v2008_v60 = vsel %vm938_vm0, %v11936_v25, -inf }
0x1178   : > { %14641 = vst [vmem:[#allocation21_spill] sm:$0xff] %v11912_v4 }
0x1179   : > { %1985 = vmax.xlane.f32.xlu0 %v1984_v22  ;;  %v1993_v22 = vsel %vm938_vm0, %v11906_v12, -inf  ;;  %14647 = vst [vmem:[#allocation23_spill] sm:$0xff] %v11930_v34 }
0x117b   : > { %1988 = vmax.xlane.f32.xlu1 %v1987_v55  ;;  %v1996_v55 = vsel %vm938_vm0, %v11912_v4, -inf }
0x117d   : > { %1991 = vmax.xlane.f32.xlu0 %v1990_v48  ;;  %v1999_v48 = vsel %vm938_vm0, %v11918_v56, -inf }
0x117f   : > { %1994 = vmax.xlane.f32.xlu1 %v1993_v22  ;;  %v2002_v22 = vsel %vm938_vm0, %v11924_v52, -inf }
0x1181   : > { %1997 = vmax.xlane.f32.xlu0 %v1996_v55  ;;  %v2005_v55 = vsel %vm938_vm0, %v11930_v34, -inf }
0x1183   : > { %2000 = vmax.xlane.f32.xlu1 %v1999_v48  ;;  %v2011_v48 = vsel %vm938_vm0, %v11942_v20, -inf }
0x1185   : > { %2003 = vmax.xlane.f32.xlu0 %v2002_v22  ;;  %v5725_v22 = vcvt.f32.s32 %v11728_v31 }
0x1187   : > { %2006 = vmax.xlane.f32.xlu1 %v2005_v55  ;;  %v5726_v0 = vshll.u32 %v5725_v22, 16  ;;  %v5755_v55 = vcvt.f32.s32 %v11737_v30 }
0x1189   : > { %2009 = vmax.xlane.f32.xlu0 %v2008_v60  ;;  %v5756_v13 = vshll.u32 %v5755_v55, 16  ;;  %v5800_v55 = vcvt.f32.s32 %v11753_v62  ;;  %v8787_v62 = vld [vmem:[%s13990_s7 + $0x10] sm:$0xff]  }
0x118b   : > { %2012 = vmax.xlane.f32.xlu1 %v2011_v48  ;;  %v5741_v48 = vshll.u32 %v5740_v6, 16  ;;  %v5770_v6 = vcvt.f32.s32 %v11743_v39  ;;  %v8785_v39 = vld [vmem:[%s13990_s7] sm:$0xff]  }
0x118d   : > { %v5771_v22 = vshll.u32 %v5770_v6, 16 }
0x11a2   : > { %v5708_v53 = vpop.xlane.xlu0 %5707 }
0x11a3   : > { %v5709_v19 = vcvt.f32.s32 %v5708_v53 }
0x11a4   : > { %v5723_v46 = vpop.xlane.xlu1 %5722 }
0x11a5   : > { %v5712_v34 = vadd.s32 %v5711_v28, %v5709_v19  ;;  %v5724_v25 = vcvt.f32.s32 %v5723_v46 }
0x11a6   : > { %v5738_v20 = vpop.xlane.xlu0 %5737 }
0x11a7   : > { %vm5938_vm5 = vcmp.eq.s32.totalorder %v9305_v50, %v5712_v34  ;;  %v5727_v60 = vadd.s32 %v5726_v0, %v5724_v25  ;;  %v5739_v52 = vcvt.f32.s32 %v5738_v20  ;;  %v5785_v34 = vcvt.f32.s32 %v11748_v44 }
0x11a8   : > { %v5753_v31 = vpop.xlane.xlu1 %5752  ;;  %v11957_v53 = vsel %vm5938_vm5, 1.0, %v14463_v54  ;;  %v5815_v44 = vcvt.f32.s32 %v11757_v18 }
0x11a9   : > { %vm5939_vm6 = vcmp.eq.s32.totalorder %v9305_v50, %v5727_v60  ;;  %14652 = vst [vmem:[#allocation62_spill] sm:$0xff] %v11957_v53  ;;  %v5742_v45 = vadd.s32 %v5741_v48, %v5739_v52  ;;  %v5754_v30 = vcvt.f32.s32 %v5753_v31  ;;  %v8786_v48 = vld [vmem:[%s13990_s7 + $0x8] sm:$0xff]  }
0x11aa   : > { %v11960_v8 = vsel %vm5939_vm6, 1.0, %v14463_v54 }
0x11ab   : > { %14653 = vst [vmem:[#allocation59_spill] sm:$0xff] %v11960_v8  ;;  %v5986_v46 = vpack.c.bf16 %v11960_v8, %v11957_v53  ;;  %vm5940_vm7 = vcmp.eq.s32.totalorder %v9305_v50, %v5742_v45  ;;  %v5757_v0 = vadd.s32 %v5756_v13, %v5754_v30  ;;  %v5786_v13 = vshll.u32 %v5785_v34, 16  ;;  %v14714_v8 = vld [vmem:[#allocation134_spill] sm:$0xff] }
0x11ac   : > { %v11969_v28 = vsel %vm5940_vm7, 1.0, %v14463_v54  ;;  %v12263_v53 = vadd.f32 %v11849_v21, %v14714_v8 }
0x11ad   : > { %7792 = vmatprep.mubr.msk.bf16.mxu1 %vm938_vm0, %v5986_v46  ;;  %vm5941_vm8 = vcmp.eq.s32.totalorder %v9305_v50, %v5757_v0  ;;  %14654 = vst [vmem:[#allocation61_spill] sm:$0xff] %v11969_v28  ;;  %v5801_v0 = vshll.u32 %v5800_v55, 16 }
0x11ae   : > { %v11972_v20 = vsel %vm5941_vm8, 1.0, %v14463_v54  ;;  %14715 = vst [vmem:[#allocation134_spill] sm:$0xff] %v12263_v53  ;;  %v3462_v8 = vsel %vm938_vm0, %v12263_v53, -inf }
0x11af   : > { %14655 = vst [vmem:[#allocation64_spill] sm:$0xff] %v11972_v20  ;;  %v5987_v25 = vpack.c.bf16 %v11972_v20, %v11969_v28 }
0x11b1   : > { %7793 = vmatmul.mubr.msk.bf16.vlgmr.msra.gmra.mrb[160].mxu1 %vm938_vm0, %v5987_v25  ;;  %v5816_v25 = vshll.u32 %v5815_v44, 16 }
0x11b2   : > { %v5768_v52 = vpop.xlane.xlu0 %5767  ;;  %7841 = vmatpush3.bf16.msra.mxu1 %v8785_v39 }
0x11b3   : > { %v5769_v19 = vcvt.f32.s32 %v5768_v52  ;;  %7842 = vmatprep.subr.bf16.mxu1 %v8786_v48 }
0x11b4   : > { %v5783_v60 = vpop.xlane.xlu1 %5782 }
0x11b5   : > { %v5772_v31 = vadd.s32 %v5771_v22, %v5769_v19  ;;  %v5784_v45 = vcvt.f32.s32 %v5783_v60  ;;  %v8788_v60 = vld [vmem:[%s13990_s7 + $0x18] sm:$0xff]  }
0x11b6   : > { %v5798_v46 = vpop.xlane.xlu0 %5797  ;;  %7843 = vmatpush3.bf16.msra.mxu1 %v8786_v48  ;;  %v5830_v48 = vcvt.f32.s32 %v11763_v29 }
0x11b7   : > { %vm5942_vm9 = vcmp.eq.s32.totalorder %v9305_v50, %v5772_v31  ;;  %v5787_v30 = vadd.s32 %v5786_v13, %v5784_v45  ;;  %v5799_v6 = vcvt.f32.s32 %v5798_v46  ;;  %7844 = vmatprep.subr.bf16.mxu1 %v8787_v62  ;;  %v8789_v45 = vld [vmem:[%s13990_s7 + $0x20] sm:$0xff]  }
0x11b8   : > { %v5813_v34 = vpop.xlane.xlu1 %5812  ;;  %v11992_v18 = vsel %vm5942_vm9, 1.0, %v14463_v54  ;;  %v5831_v46 = vshll.u32 %v5830_v48, 16 }
0x11b9   : > { %vm5943_vm11 = vcmp.eq.s32.totalorder %v9305_v50, %v5787_v30  ;;  %14656 = vst [vmem:[#allocation66_spill] sm:$0xff] %v11992_v18  ;;  %v5802_v22 = vadd.s32 %v5801_v0, %v5799_v6  ;;  %v5814_v19 = vcvt.f32.s32 %v5813_v34  ;;  %v5845_v30 = vcvt.f32.s32 %v11768_v38 }
0x11ba   : > { %v11995_v52 = vsel %vm5943_vm11, 1.0, %v14463_v54  ;;  %7845 = vmatpush3.bf16.msra.mxu1 %v8787_v62  ;;  %v5860_v6 = vcvt.f32.s32 %v11773_v40  ;;  %v8791_v40 = vld [vmem:[%s13990_s7 + $0x30] sm:$0xff]  }
0x11bb   : > { %14657 = vst [vmem:[#allocation63_spill] sm:$0xff] %v11995_v52  ;;  %v5988_v39 = vpack.c.bf16 %v11995_v52, %v11992_v18  ;;  %vm5944_vm12 = vcmp.eq.s32.totalorder %v9305_v50, %v5802_v22  ;;  %v5817_v55 = vadd.s32 %v5816_v25, %v5814_v19  ;;  %7846 = vmatprep.subr.bf16.mxu1 %v8788_v60  ;;  %v8790_v25 = vld [vmem:[%s13990_s7 + $0x28] sm:$0xff]   ;;  %v5846_v34 = vshll.u32 %v5845_v30, 16 }
0x11bc   : > { %v12007_v13 = vsel %vm5944_vm12, 1.0, %v14463_v54  ;;  %v5875_v22 = vcvt.f32.s32 %v11779_v37 }
0x11bd   : > { %7796 = vmatprep.mubr.msk.bf16.mxu1 %vm938_vm0, %v5988_v39  ;;  %vm5945_vm13 = vcmp.eq.s32.totalorder %v9305_v50, %v5817_v55  ;;  %14658 = vst [vmem:[#allocation65_spill] sm:$0xff] %v12007_v13 }
0x11be   : > { %v12010_v44 = vsel %vm5945_vm13, 1.0, %v14463_v54  ;;  %7847 = vmatpush3.bf16.msra.mxu1 %v8788_v60  ;;  %v5861_v60 = vshll.u32 %v5860_v6, 16 }
0x11bf   : > { %14659 = vst [vmem:[#allocation68_spill] sm:$0xff] %v12010_v44  ;;  %v5989_v31 = vpack.c.bf16 %v12010_v44, %v12007_v13  ;;  %7848 = vmatprep.subr.bf16.mxu1 %v8789_v45 }
0x11c1   : > { %7797 = vmatmul.mubr.msk.bf16.gmra.mrb[164].mxu1 %vm938_vm0, %v5989_v31  ;;  %v5876_v31 = vshll.u32 %v5875_v22, 16 }
0x11c2   : > { %v5828_v29 = vpop.xlane.xlu0 %5827  ;;  %7849 = vmatpush3.bf16.msra.mxu1 %v8789_v45 }
0x11c3   : > { %v5829_v0 = vcvt.f32.s32 %v5828_v29  ;;  %7850 = vmatprep.subr.bf16.mxu1 %v8790_v25 }
0x11c4   : > { %v5843_v62 = vpop.xlane.xlu1 %5842 }
0x11c5   : > { %v5832_v19 = vadd.s32 %v5831_v46, %v5829_v0  ;;  %v5844_v39 = vcvt.f32.s32 %v5843_v62  ;;  %v8792_v62 = vld [vmem:[%s13990_s7 + $0x38] sm:$0xff]  }
0x11c6   : > { %v5858_v55 = vpop.xlane.xlu0 %5857  ;;  %7851 = vmatpush3.bf16.msra.mxu1 %v8790_v25  ;;  %v5890_v25 = vcvt.f32.s32 %v11795_v16 }
0x11c7   : > { %vm5946_vm14 = vcmp.eq.s32.totalorder %v9305_v50, %v5832_v19  ;;  %v5847_v38 = vadd.s32 %v5846_v34, %v5844_v39  ;;  %v5859_v48 = vcvt.f32.s32 %v5858_v55  ;;  %7852 = vmatprep.subr.bf16.mxu1 %v8791_v40  ;;  %v5905_v39 = vcvt.f32.s32 %v11802_v24 }
0x11c8   : > { %v5873_v45 = vpop.xlane.xlu1 %5872  ;;  %v12030_v37 = vsel %vm5946_vm14, 1.0, %v14463_v54  ;;  %v5891_v55 = vshll.u32 %v5890_v25, 16 }
0x11c9   : > { %vm5947_vm15 = vcmp.eq.s32.totalorder %v9305_v50, %v5847_v38  ;;  %14660 = vst [vmem:[#allocation70_spill] sm:$0xff] %v12030_v37  ;;  %v5862_v29 = vadd.s32 %v5861_v60, %v5859_v48  ;;  %v5874_v46 = vcvt.f32.s32 %v5873_v45  ;;  %v5920_v48 = vcvt.f32.s32 %v11809_v5 }
0x11ca   : > { %v12033_v30 = vsel %vm5947_vm15, 1.0, %v14463_v54  ;;  %7853 = vmatpush3.bf16.msra.mxu1 %v8791_v40  ;;  %v5906_v40 = vshll.u32 %v5905_v39, 16 }
0x11cb   : > { %14661 = vst [vmem:[#allocation67_spill] sm:$0xff] %v12033_v30  ;;  %v5990_v0 = vpack.c.bf16 %v12033_v30, %v12030_v37  ;;  %vm5948_vm1 = vcmp.eq.s32.totalorder %v9305_v50, %v5862_v29  ;;  %v5877_v6 = vadd.s32 %v5876_v31, %v5874_v46  ;;  %7854 = vmatprep.subr.bf16.mxu1 %v8792_v62  ;;  %v5935_v31 = vcvt.f32.s32 %v11815_v42 }
0x11cc   : > { %v12045_v34 = vsel %vm5948_vm1, 1.0, %v14463_v54 }
0x11cd   : > { %7800 = vmatprep.mubr.msk.bf16.mxu1 %vm938_vm0, %v5990_v0  ;;  %vm5949_vm2 = vcmp.eq.s32.totalorder %v9305_v50, %v5877_v6  ;;  %14662 = vst [vmem:[#allocation69_spill] sm:$0xff] %v12045_v34  ;;  %v5921_v6 = vshll.u32 %v5920_v48, 16  ;;  %v5936_v24 = vshll.u32 %v5935_v31, 16 }
0x11ce   : > { %v12048_v22 = vsel %vm5949_vm2, 1.0, %v14463_v54  ;;  %7855 = vmatpush3.bf16.msra.mxu1 %v8792_v62 }
0x11cf   : > { %14663 = vst [vmem:[#allocation72_spill] sm:$0xff] %v12048_v22  ;;  %v5991_v19 = vpack.c.bf16 %v12048_v22, %v12045_v34 }
0x11d1   : > { %7801 = vmatmul.mubr.msk.bf16.gmra.mrb[168].mxu1 %vm938_vm0, %v5991_v19 }
0x11d2   : > { %v5888_v38 = vpop.xlane.xlu0 %5887 }
0x11d3   : > { %v5889_v60 = vcvt.f32.s32 %v5888_v38 }
0x11d4   : > { %v5903_v16 = vpop.xlane.xlu1 %5902 }
0x11d5   : > { %v5892_v45 = vadd.s32 %v5891_v55, %v5889_v60  ;;  %v5904_v29 = vcvt.f32.s32 %v5903_v16 }
0x11d6   : > { %v5918_v0 = vpop.xlane.xlu0 %5917 }
0x11d7   : > { %vm5950_vm3 = vcmp.eq.s32.totalorder %v9305_v50, %v5892_v45  ;;  %v5907_v46 = vadd.s32 %v5906_v40, %v5904_v29  ;;  %v5919_v62 = vcvt.f32.s32 %v5918_v0 }
0x11d8   : > { %v5933_v19 = vpop.xlane.xlu1 %5932  ;;  %v12059_v25 = vsel %vm5950_vm3, 1.0, %v14463_v54 }
0x11d9   : > { %vm5951_vm10 = vcmp.eq.s32.totalorder %v9305_v50, %v5907_v46  ;;  %14664 = vst [vmem:[#allocation74_spill] sm:$0xff] %v12059_v25  ;;  %v5922_v39 = vadd.s32 %v5921_v6, %v5919_v62  ;;  %v5934_v42 = vcvt.f32.s32 %v5933_v19 }
0x11da   : > { %v12062_v5 = vsel %vm5951_vm10, 1.0, %v14463_v54  ;;  %v12064_v38 = vpop.xlane.xlu0 %1036 }
0x11db   : > { %14665 = vst [vmem:[#allocation71_spill] sm:$0xff] %v12062_v5  ;;  %14666 = vst [vmem:[#allocation73_spill] sm:$0xff] %v12064_v38  ;;  %v5992_v55 = vpack.c.bf16 %v12062_v5, %v12059_v25  ;;  %vm5952_vm4 = vcmp.eq.s32.totalorder %v9305_v50, %v5922_v39  ;;  %v5937_v60 = vadd.s32 %v5936_v24, %v5934_v42 }
0x11dc   : > { %v12069_v48 = vpop.xlane.xlu1 %1039  ;;  %v12074_v16 = vsel %vm5952_vm4, 1.0, %v14463_v54 }
0x11dd   : > { %14667 = vst [vmem:[#allocation233_spill] sm:$0xff] %v12069_v48  ;;  %7804 = vmatprep.mubr.msk.bf16.mxu1 %vm938_vm0, %v5992_v55  ;;  %vm5953_vm5 = vcmp.eq.s32.totalorder %v9305_v50, %v5937_v60  ;;  %14668 = vst [vmem:[#allocation234_spill] sm:$0xff] %v12074_v16 }
0x11de   : > { %v12077_v40 = vsel %vm5953_vm5, 1.0, %v14463_v54  ;;  %v12079_v31 = vpop.xlane.xlu0 %1042 }
0x11df   : > { %14669 = vst [vmem:[#allocation235_spill] sm:$0xff] %v12077_v40  ;;  %14670 = vst [vmem:[#allocation236_spill] sm:$0xff] %v12079_v31  ;;  %v5993_v45 = vpack.c.bf16 %v12077_v40, %v12074_v16 }
0x11e0   : > { %v12083_v29 = vpop.xlane.xlu1 %1045 }
0x11e1   : > { %14671 = vst [vmem:[#allocation237_spill] sm:$0xff] %v12083_v29  ;;  %7805 = vmatmul.mubr.msk.bf16.gmra.mrb[172].mxu1 %vm938_vm0, %v5993_v45 }
0x11e2   : > { %v12086_v46 = vpop.xlane.xlu0 %1048 }
0x11e3   : > { %14672 = vst [vmem:[#allocation238_spill] sm:$0xff] %v12086_v46 }
0x11e4   : > { %v12088_v0 = vpop.xlane.xlu1 %1051 }
0x11e5   : > { %14673 = vst [vmem:[#allocation239_spill] sm:$0xff] %v12088_v0 }
0x11e6   : > { %v12090_v6 = vpop.xlane.xlu0 %1054 }
0x11e7   : > { %14674 = vst [vmem:[#allocation240_spill] sm:$0xff] %v12090_v6 }
0x11e8   : > { %v12092_v62 = vpop.xlane.xlu1 %1057 }
0x11e9   : > { %14675 = vst [vmem:[#allocation241_spill] sm:$0xff] %v12092_v62 }
0x11ea   : > { %v12094_v24 = vpop.xlane.xlu0 %1060 }
0x11eb   : > { %14676 = vst [vmem:[#allocation242_spill] sm:$0xff] %v12094_v24 }
0x11ec   : > { %v12096_v54 = vpop.xlane.xlu1 %1063 }
0x11ed   : > { %14677 = vst [vmem:[#allocation243_spill] sm:$0xff] %v12096_v54 }
0x11ee   : > { %v12098_v19 = vpop.xlane.xlu0 %1066 }
0x11ef   : > { %14678 = vst [vmem:[#allocation244_spill] sm:$0xff] %v12098_v19 }
0x11f0   : > { %v12100_v39 = vpop.xlane.xlu1 %1069 }
0x11f1   : > { %14679 = vst [vmem:[#allocation245_spill] sm:$0xff] %v12100_v39 }
0x11f2   : > { %v12102_v42 = vpop.xlane.xlu0 %1072 }
0x11f3   : > { %14680 = vst [vmem:[#allocation246_spill] sm:$0xff] %v12102_v42 }
0x11f4   : > { %v12104_v55 = vpop.xlane.xlu1 %1075 }
0x11f5   : > { %14681 = vst [vmem:[#allocation247_spill] sm:$0xff] %v12104_v55 }
0x11f6   : > { %v12106_v60 = vpop.xlane.xlu0 %1078 }
0x11f7   : > { %14682 = vst [vmem:[#allocation248_spill] sm:$0xff] %v12106_v60 }
0x11f8   : > { %v12108_v45 = vpop.xlane.xlu1 %1081 }
0x11f9   : > { %14683 = vst [vmem:[#allocation249_spill] sm:$0xff] %v12108_v45 }
0x11fa   : > { %v12110_v50 = vpop.xlane.xlu0 %1967 }
0x11fb   : > { %14684 = vst [vmem:[#allocation250_spill] sm:$0xff] %v12110_v50  ;;  %v2014_v48 = vsub.f32 %v11854_v63, %v12110_v50 }
0x11fc   : > { %v12114_v24 = vpop.xlane.xlu1 %1970 }
0x11fd   : > { %14685 = vst [vmem:[#allocation251_spill] sm:$0xff] %v12114_v24  ;;  %v2030_v54 = vmul.f32 1.442695, %v2014_v48  ;;  %v2015_v16 = vsub.f32 %v11859_v23, %v12114_v24 }
0x11fe   : > { %v12118_v39 = vpop.xlane.xlu0 %1973 }
0x11ff   : > { %14686 = vst [vmem:[#allocation252_spill] sm:$0xff] %v12118_v39  ;;  %8160 = vpow2.f32 %v2030_v54  ;;  %v2032_v5 = vmul.f32 1.442695, %v2015_v16  ;;  %v2016_v60 = vsub.f32 %v11864_v43, %v12118_v39  ;;  %v8025_v43 = vld [vmem:[%s13993_s10 + $0x8] sm:$0xff]   ;;  %v14747_v39 = vld [vmem:[#allocation192_spill] sm:$0xff] }
0x1200   : > { %v12122_v55 = vpop.xlane.xlu1 %1976 }
0x1201   : > { %14687 = vst [vmem:[#allocation253_spill] sm:$0xff] %v12122_v55  ;;  %8162 = vpow2.f32 %v2032_v5  ;;  %v2034_v45 = vmul.f32 1.442695, %v2016_v60  ;;  %v2017_v42 = vsub.f32 %v11870_v47, %v12122_v55 }
0x1202   : > { %v12126_v19 = vpop.xlane.xlu0 %1979 }
0x1203   : > { %14688 = vst [vmem:[#allocation254_spill] sm:$0xff] %v12126_v19  ;;  %8164 = vpow2.f32 %v2034_v45  ;;  %v2036_v48 = vmul.f32 1.442695, %v2017_v42  ;;  %v2018_v25 = vsub.f32 %v11876_v57, %v12126_v19 }
0x1204   : > { %v12130_v40 = vpop.xlane.xlu1 %1982 }
0x1205   : > { %14689 = vst [vmem:[#allocation255_spill] sm:$0xff] %v12130_v40  ;;  %8166 = vpow2.f32 %v2036_v48  ;;  %v2038_v16 = vmul.f32 1.442695, %v2018_v25  ;;  %v2019_v54 = vsub.f32 %v11882_v15, %v12130_v40 }
0x1206   : > { %v12134_v30 = vpop.xlane.xlu0 %1985 }
0x1207   : > { %14690 = vst [vmem:[#allocation256_spill] sm:$0xff] %v12134_v30  ;;  %8168 = vpow2.f32 %v2038_v16  ;;  %v2040_v5 = vmul.f32 1.442695, %v2019_v54  ;;  %v2020_v60 = vsub.f32 %v11888_v49, %v12134_v30  ;;  %v14739_v30 = vld [vmem:[#allocation187_spill] sm:$0xff] }
0x1208   : > { %v12138_v22 = vpop.xlane.xlu1 %1988 }
0x1209   : > { %14691 = vst [vmem:[#allocation257_spill] sm:$0xff] %v12138_v22  ;;  %v8161_v42 = vpop.eup %8160  ;;  %8170 = vpow2.f32 %v2040_v5  ;;  %v2042_v45 = vmul.f32 1.442695, %v2020_v60  ;;  %v2021_v62 = vsub.f32 %v11894_v36, %v12138_v22 }
0x120a   : > { %v2062_v25 = vsel %vm938_vm0, %v8161_v42, 0.0 }
0x120b   : > { %v8163_v48 = vpop.eup %8162  ;;  %8172 = vpow2.f32 %v2042_v45  ;;  %v2044_v37 = vmul.f32 1.442695, %v2021_v62  ;;  %2063 = vadd.xlane.f32.xlu0 %v2062_v25  ;;  %v14692_v25 = vld [vmem:[#allocation124_spill] sm:$0xff] }
0x120c   : > { %v2065_v16 = vsel %vm938_vm0, %v8163_v48, 0.0  ;;  %v12351_v46 = vpop.xlane.xlu1 %1994 }
0x120d   : > { %v8165_v54 = vpop.eup %8164  ;;  %8174 = vpow2.f32 %v2044_v37  ;;  %2066 = vadd.xlane.f32.xlu1 %v2065_v16  ;;  %v12150_v37 = vadd.f32 %v11849_v21, %v14692_v25  ;;  %14736 = vst [vmem:[#allocation270_spill] sm:$0xff] %v12351_v46 }
0x120e   : > { %v2068_v34 = vsel %vm938_vm0, %v8165_v54, 0.0 }
0x120f   : > { %v8167_v52 = vpop.eup %8166  ;;  %2069 = vadd.xlane.f32.xlu0 %v2068_v34  ;;  %14693 = vst [vmem:[#allocation124_spill] sm:$0xff] %v12150_v37  ;;  %v14694_v34 = vld [vmem:[#allocation126_spill] sm:$0xff] }
0x1210   : > { %v2071_v5 = vsel %vm938_vm0, %v8167_v52, 0.0  ;;  %v12155_v52 = vadd.f32 %v11849_v21, %v14694_v34  ;;  %v12184_v34 = vadd.f32 %v11430_v26, %v11849_v21  ;;  %v12359_v15 = vpop.xlane.xlu1 %2000 }
0x1211   : > { %v8169_v60 = vpop.eup %8168  ;;  %2072 = vadd.xlane.f32.xlu1 %v2071_v5  ;;  %14740 = vst [vmem:[#allocation187_spill] sm:$0xff] %v12359_v15 }
0x1212   : > { %v2074_v44 = vsel %vm938_vm0, %v8169_v60, 0.0  ;;  %14695 = vst [vmem:[#allocation126_spill] sm:$0xff] %v12155_v52  ;;  %v3435_v60 = vsel %vm938_vm0, %v12150_v37, -inf  ;;  %v4910_v26 = vsel %vm938_vm0, %v12184_v34, -inf }
0x1213   : > { %v8171_v42 = vpop.eup %8170  ;;  %2075 = vadd.xlane.f32.xlu0 %v2074_v44  ;;  %v14696_v44 = vld [vmem:[#allocation123_spill] sm:$0xff] }
0x1214   : > { %v2077_v62 = vsel %vm938_vm0, %v8171_v42, 0.0  ;;  %v12160_v5 = vadd.f32 %v14696_v44, %v11849_v21  ;;  %v12166_v42 = vadd.f32 %v11849_v21, %v11432_v9 }
0x1215   : > { %v8173_v45 = vpop.eup %8172  ;;  %2078 = vadd.xlane.f32.xlu1 %v2077_v62  ;;  %v3438_v62 = vsel %vm938_vm0, %v12155_v52, -inf }
0x1216   : > { %v2080_v48 = vsel %vm938_vm0, %v8173_v45, 0.0  ;;  %14697 = vst [vmem:[#allocation123_spill] sm:$0xff] %v12160_v5  ;;  %14698 = vst [vmem:[#allocation258_spill] sm:$0xff] %v12166_v42  ;;  %v12172_v45 = vadd.f32 %v11849_v21, %v11436_v35  ;;  %v3441_v25 = vsel %vm938_vm0, %v12160_v5, -inf  ;;  %v4904_v9 = vsel %vm938_vm0, %v12166_v42, -inf }
0x1217   : > { %v8175_v16 = vpop.eup %8174  ;;  %2081 = vadd.xlane.f32.xlu0 %v2080_v48  ;;  %v14700_v48 = vld [vmem:[#allocation125_spill] sm:$0xff] }
0x1218   : > { %v2083_v54 = vsel %vm938_vm0, %v8175_v16, 0.0  ;;  %14699 = vst [vmem:[#allocation259_spill] sm:$0xff] %v12172_v45  ;;  %v12178_v16 = vadd.f32 %v14700_v48, %v11849_v21  ;;  %v4907_v35 = vsel %vm938_vm0, %v12172_v45, -inf }
0x1219   : > { %2084 = vadd.xlane.f32.xlu1 %v2083_v54  ;;  %v14702_v54 = vld [vmem:[#allocation128_spill] sm:$0xff] }
0x121a   : > { %14701 = vst [vmem:[#allocation125_spill] sm:$0xff] %v12178_v16  ;;  %v12190_v44 = vadd.f32 %v11849_v21, %v14702_v54  ;;  %v14704_v54 = vld [vmem:[#allocation127_spill] sm:$0xff] }
0x121b   : > { %3436 = vmax.xlane.f32.xlu0 %v3435_v60  ;;  %v3444_v60 = vsel %vm938_vm0, %v12178_v16, -inf }
0x121c   : > { %v3447_v48 = vsel %vm938_vm0, %v12190_v44, -inf }
0x121d   : > { %3439 = vmax.xlane.f32.xlu1 %v3438_v62  ;;  %v12196_v62 = vadd.f32 %v11434_v14, %v11849_v21 }
0x121f   : > { %3442 = vmax.xlane.f32.xlu0 %v3441_v25  ;;  %v12202_v25 = vadd.f32 %v11849_v21, %v11440_v2  ;;  %v4913_v14 = vsel %vm938_vm0, %v12196_v62, -inf }
0x1221   : > { %4905 = vmax.xlane.f32.xlu1 %v4904_v9  ;;  %v14703_v9 = vld [vmem:[#allocation130_spill] sm:$0xff]  ;;  %v4916_v2 = vsel %vm938_vm0, %v12202_v25, -inf }
0x1223   : > { %4908 = vmax.xlane.f32.xlu0 %v4907_v35  ;;  %v12208_v35 = vadd.f32 %v11849_v21, %v14703_v9  ;;  %v12226_v9 = vadd.f32 %v11438_v7, %v11849_v21  ;;  %v14710_v7 = vld [vmem:[#allocation132_spill] sm:$0xff] }
0x1224   : > { %v12244_v18 = vadd.f32 %v11849_v21, %v14710_v7 }
0x1225   : > { %3445 = vmax.xlane.f32.xlu1 %v3444_v60  ;;  %v12214_v60 = vadd.f32 %v14704_v54, %v11849_v21  ;;  %14707 = vst [vmem:[#allocation127_spill] sm:$0xff] %v12226_v9  ;;  %v12233_v54 = vld [vmem:[%s13993_s10] sm:$0xff]  }
0x1226   : > { %7872 = vmatprep.subr.bf16.mxu0 %v12233_v54  ;;  %14711 = vst [vmem:[#allocation132_spill] sm:$0xff] %v12244_v18  ;;  %7904 = vmatprep.subr.bf16.mxu1 %v12233_v54  ;;  %v3459_v7 = vsel %vm938_vm0, %v12244_v18, -inf }
0x1227   : > { %4911 = vmax.xlane.f32.xlu0 %v4910_v26  ;;  %14705 = vst [vmem:[#allocation128_spill] sm:$0xff] %v12214_v60  ;;  %v12220_v26 = vadd.f32 %v11849_v21, %v11444_v3  ;;  %v14708_v3 = vld [vmem:[#allocation129_spill] sm:$0xff] }
0x1229   : > { %3448 = vmax.xlane.f32.xlu1 %v3447_v48  ;;  %14706 = vst [vmem:[#allocation130_spill] sm:$0xff] %v12220_v26  ;;  %v3450_v48 = vsel %vm938_vm0, %v12208_v35, -inf }
0x122b   : > { %4914 = vmax.xlane.f32.xlu0 %v4913_v14  ;;  %v3453_v14 = vsel %vm938_vm0, %v12214_v60, -inf }
0x122d   : > { %4917 = vmax.xlane.f32.xlu1 %v4916_v2  ;;  %v12237_v2 = vadd.f32 %v14708_v3, %v11849_v21  ;;  %v12251_v3 = vadd.f32 %v11442_v59, %v11849_v21 }
0x122f   : > { %3451 = vmax.xlane.f32.xlu0 %v3450_v48  ;;  %14709 = vst [vmem:[#allocation129_spill] sm:$0xff] %v12237_v2  ;;  %v4919_v48 = vsel %vm938_vm0, %v12220_v26, -inf  ;;  %14712 = vst [vmem:[#allocation260_spill] sm:$0xff] %v12251_v3  ;;  %v3456_v13 = vsel %vm938_vm0, %v12237_v2, -inf  ;;  %v4925_v59 = vsel %vm938_vm0, %v12251_v3, -inf }
0x1231   : > { %3454 = vmax.xlane.f32.xlu1 %v3453_v14  ;;  %v4922_v14 = vsel %vm938_vm0, %v12226_v9, -inf }
0x1233   : > { %4920 = vmax.xlane.f32.xlu0 %v4919_v48  ;;  %v12257_v48 = vadd.f32 %v11849_v21, %v11448_v11 }
0x1235   : > { %4923 = vmax.xlane.f32.xlu1 %v4922_v14  ;;  %14713 = vst [vmem:[#allocation261_spill] sm:$0xff] %v12257_v48  ;;  %v14716_v14 = vld [vmem:[#allocation131_spill] sm:$0xff]  ;;  %v4928_v11 = vsel %vm938_vm0, %v12257_v48, -inf }
0x1236   : > { %v12269_v20 = vadd.f32 %v14716_v14, %v11849_v21  ;;  %v14720_v14 = vld [vmem:[#allocation133_spill] sm:$0xff] }
0x1237   : > { %3457 = vmax.xlane.f32.xlu0 %v3456_v13  ;;  %v12275_v13 = vadd.f32 %v11849_v21, %v11452_v51  ;;  %v12287_v28 = vadd.f32 %v14720_v14, %v11849_v21  ;;  %v12305_v14 = vadd.f32 %v11849_v21, %v11456_v10 }
0x1238   : > { %14717 = vst [vmem:[#allocation131_spill] sm:$0xff] %v12269_v20 }
0x1239   : > { %3460 = vmax.xlane.f32.xlu1 %v3459_v7  ;;  %14718 = vst [vmem:[#allocation262_spill] sm:$0xff] %v12275_v13  ;;  %v12281_v7 = vadd.f32 %v11446_v33, %v11849_v21  ;;  %14721 = vst [vmem:[#allocation133_spill] sm:$0xff] %v12287_v28  ;;  %v4931_v51 = vsel %vm938_vm0, %v12275_v13, -inf  ;;  %v4940_v10 = vsel %vm938_vm0, %v12305_v14, -inf }
0x123a   : > { %14725 = vst [vmem:[#allocation265_spill] sm:$0xff] %v12305_v14 }
0x123b   : > { %4926 = vmax.xlane.f32.xlu0 %v4925_v59  ;;  %14719 = vst [vmem:[#allocation263_spill] sm:$0xff] %v12281_v7  ;;  %v3465_v59 = vsel %vm938_vm0, %v12269_v20, -inf  ;;  %v4934_v33 = vsel %vm938_vm0, %v12281_v7, -inf }
0x123d   : > { %4929 = vmax.xlane.f32.xlu1 %v4928_v11  ;;  %v14722_v11 = vld [vmem:[#allocation136_spill] sm:$0xff] }
0x123e   : > { %v12293_v6 = vadd.f32 %v11849_v21, %v14722_v11  ;;  %v14726_v11 = vld [vmem:[#allocation138_spill] sm:$0xff] }
0x123f   : > { %3463 = vmax.xlane.f32.xlu0 %v3462_v8  ;;  %v12299_v8 = vadd.f32 %v11450_v41, %v11849_v21  ;;  %v12311_v36 = vadd.f32 %v11849_v21, %v14726_v11  ;;  %v12329_v11 = vadd.f32 %v11454_v61, %v11849_v21 }
0x1240   : > { %14723 = vst [vmem:[#allocation136_spill] sm:$0xff] %v12293_v6 }
0x1241   : > { %3466 = vmax.xlane.f32.xlu1 %v3465_v59  ;;  %14724 = vst [vmem:[#allocation264_spill] sm:$0xff] %v12299_v8  ;;  %v3468_v59 = vsel %vm938_vm0, %v12287_v28, -inf  ;;  %14727 = vst [vmem:[#allocation138_spill] sm:$0xff] %v12311_v36  ;;  %v4937_v41 = vsel %vm938_vm0, %v12299_v8, -inf  ;;  %v4946_v61 = vsel %vm938_vm0, %v12329_v11, -inf }
0x1242   : > { %14731 = vst [vmem:[#allocation267_spill] sm:$0xff] %v12329_v11 }
0x1243   : > { %4932 = vmax.xlane.f32.xlu0 %v4931_v51  ;;  %v3471_v51 = vsel %vm938_vm0, %v12293_v6, -inf }
0x1245   : > { %4935 = vmax.xlane.f32.xlu1 %v4934_v33  ;;  %v14728_v33 = vld [vmem:[#allocation135_spill] sm:$0xff] }
0x1246   : > { %v12317_v22 = vadd.f32 %v14728_v33, %v11849_v21  ;;  %v14732_v33 = vld [vmem:[#allocation137_spill] sm:$0xff] }
0x1247   : > { %3469 = vmax.xlane.f32.xlu0 %v3468_v59  ;;  %v12323_v59 = vadd.f32 %v11849_v21, %v11460_v27  ;;  %v12335_v0 = vadd.f32 %v14732_v33, %v11849_v21  ;;  %v12349_v33 = vpop.xlane.xlu0 %1991 }
0x1248   : > { %14729 = vst [vmem:[#allocation135_spill] sm:$0xff] %v12317_v22  ;;  %14735 = vst [vmem:[#allocation269_spill] sm:$0xff] %v12349_v33 }
0x1249   : > { %3472 = vmax.xlane.f32.xlu1 %v3471_v51  ;;  %14730 = vst [vmem:[#allocation266_spill] sm:$0xff] %v12323_v59  ;;  %v3474_v51 = vsel %vm938_vm0, %v12311_v36, -inf  ;;  %14733 = vst [vmem:[#allocation137_spill] sm:$0xff] %v12335_v0  ;;  %v4943_v27 = vsel %vm938_vm0, %v12323_v59, -inf }
0x124b   : > { %4938 = vmax.xlane.f32.xlu0 %v4937_v41  ;;  %v3477_v41 = vsel %vm938_vm0, %v12317_v22, -inf }
0x124d   : > { %4941 = vmax.xlane.f32.xlu1 %v4940_v10  ;;  %v12341_v10 = vadd.f32 %v11458_v32, %v11849_v21 }
0x124f   : > { %3475 = vmax.xlane.f32.xlu0 %v3474_v51  ;;  %14734 = vst [vmem:[#allocation268_spill] sm:$0xff] %v12341_v10  ;;  %v3480_v51 = vsel %vm938_vm0, %v12335_v0, -inf }
0x1251   : > { %3478 = vmax.xlane.f32.xlu1 %v3477_v41  ;;  %v4949_v41 = vsel %vm938_vm0, %v12341_v10, -inf  ;;  %v14759_v10 = vld [vmem:[#allocation196_spill] sm:$0xff] }
0x1253   : > { %4944 = vmax.xlane.f32.xlu0 %v4943_v27 }
0x1255   : > { %4947 = vmax.xlane.f32.xlu1 %v4946_v61  ;;  %v14737_v61 = vld [vmem:[#allocation188_spill] sm:$0xff] }
0x1257   : > { %3481 = vmax.xlane.f32.xlu0 %v3480_v51  ;;  %v12356_v51 = vpop.xlane.xlu0 %1997 }
0x1258   : > { %14738 = vst [vmem:[#allocation188_spill] sm:$0xff] %v12356_v51 }
0x1259   : > { %4950 = vmax.xlane.f32.xlu1 %v4949_v41 }
0x125b   : > { %v12361_v40 = vpop.xlane.xlu0 %2003 }
0x125c   : > { %14741 = vst [vmem:[#allocation271_spill] sm:$0xff] %v12361_v40 }
0x125f   : > { %v12365_v57 = vpop.xlane.xlu0 %2009 }
0x1260   : > { %14743 = vst [vmem:[#allocation273_spill] sm:$0xff] %v12365_v57 }
0x1284   : > { %v7794_v27 = vpop.f32.mrb[160].mxu1 }
0x1285   : > { %v6117_v32 = vadd.f32 %v7794_v27, %v11387_v17  ;;  %v6052_v21 = vpop.f32.mrb[161].mxu1  ;;  %v12363_v17 = vpop.xlane.xlu1 %2006 }
0x1286   : > { %v6115_v29 = vadd.f32 %v6052_v21, %v11381_v1  ;;  %v7795_v31 = vpop.f32.mrb[162].mxu1  ;;  %14742 = vst [vmem:[#allocation272_spill] sm:$0xff] %v12363_v17 }
0x1287   : > { %8176 = vtanh.f32 %v6117_v32  ;;  %v6118_v49 = vadd.f32 %v7795_v31, %v14737_v61  ;;  %v6055_v38 = vpop.f32.mrb[163].mxu1 }
0x1288   : > { %8178 = vtanh.f32 %v6115_v29  ;;  %v6116_v41 = vadd.f32 %v6055_v38, %v14739_v30  ;;  %v14744_v29 = vld [vmem:[#allocation191_spill] sm:$0xff] }
0x1289   : > { %8180 = vtanh.f32 %v6118_v49  ;;  %v12372_v38 = vpop.xlane.xlu1 %2012 }
0x128a   : > { %8182 = vtanh.f32 %v6116_v41  ;;  %14745 = vst [vmem:[#allocation191_spill] sm:$0xff] %v12372_v38  ;;  %v14746_v41 = vld [vmem:[#allocation189_spill] sm:$0xff] }
0x1291   : > { %v8177_v27 = vpop.eup %8176 }
0x1292   : > { %v8179_v1 = vpop.eup %8178 }
0x1293   : > { %v8181_v21 = vpop.eup %8180 }
0x1294   : > { %v8183_v32 = vpop.eup %8182  ;;  %v7798_v31 = vpop.f32.mrb[164].mxu1  ;;  %v12367_v61 = vpack.c.bf16 %v8181_v21, %v8177_v27  ;;  %v14748_v27 = vld [vmem:[#allocation190_spill] sm:$0xff] }
0x1295   : > { %v6121_v19 = vadd.f32 %v7798_v31, %v14744_v29  ;;  %v6068_v30 = vpop.f32.mrb[165].mxu1  ;;  %v12370_v49 = vpack.c.bf16 %v8183_v32, %v8179_v1  ;;  %v8028_v29 = vld [vmem:[%s13993_s10 + $0x20] sm:$0xff]  }
0x1296   : > { %v6119_v47 = vadd.f32 %v6068_v30, %v14746_v41  ;;  %v7799_v55 = vpop.f32.mrb[166].mxu1 }
0x1297   : > { %8184 = vtanh.f32 %v6121_v19  ;;  %v6122_v63 = vadd.f32 %v7799_v55, %v14747_v39  ;;  %v6071_v50 = vpop.f32.mrb[167].mxu1  ;;  %7824 = vmatprep.mubr.bf16.mxu0 %v12370_v49  ;;  %v8026_v19 = vld [vmem:[%s13993_s10 + $0x10] sm:$0xff]  }
0x1298   : > { %8186 = vtanh.f32 %v6119_v47  ;;  %v6120_v21 = vadd.f32 %v6071_v50, %v14748_v27  ;;  %7825 = vmatmul.mubr.bf16.vlgmr.msra.gmra.mrb[176].mxu0 %v12367_v61  ;;  %v12382_v1 = vpop.xlane.xlu0 %2063  ;;  %v8027_v50 = vld [vmem:[%s13993_s10 + $0x18] sm:$0xff]  }
0x1299   : > { %14749 = vst [vmem:[#allocation189_spill] sm:$0xff] %v12382_v1  ;;  %8188 = vtanh.f32 %v6122_v63  ;;  %7873 = vmatpush3.bf16.msra.mxu0 %v12233_v54 }
0x129a   : > { %8190 = vtanh.f32 %v6120_v21  ;;  %v12385_v32 = vpop.xlane.xlu1 %2066  ;;  %7874 = vmatprep.subr.bf16.mxu0 %v8025_v43 }
0x129b   : > { %14750 = vst [vmem:[#allocation192_spill] sm:$0xff] %v12385_v32  ;;  %v8029_v32 = vld [vmem:[%s13993_s10 + $0x28] sm:$0xff]  }
0x129c   : > { %v12390_v39 = vpop.xlane.xlu0 %2069 }
0x129d   : > { %14751 = vst [vmem:[#allocation190_spill] sm:$0xff] %v12390_v39  ;;  %7875 = vmatpush3.bf16.msra.mxu0 %v8025_v43 }
0x129e   : > { %v12392_v47 = vpop.xlane.xlu1 %2072  ;;  %7876 = vmatprep.subr.bf16.mxu0 %v8026_v19 }
0x129f   : > { %14752 = vst [vmem:[#allocation274_spill] sm:$0xff] %v12392_v47  ;;  %v14756_v47 = vld [vmem:[#allocation195_spill] sm:$0xff] }
0x12a0   : > { %v12397_v63 = vpop.xlane.xlu0 %2075 }
0x12a1   : > { %14753 = vst [vmem:[#allocation275_spill] sm:$0xff] %v12397_v63  ;;  %v8185_v55 = vpop.eup %8184  ;;  %7877 = vmatpush3.bf16.msra.mxu0 %v8026_v19  ;;  %v14757_v19 = vld [vmem:[#allocation193_spill] sm:$0xff] }
0x12a2   : > { %v8187_v54 = vpop.eup %8186  ;;  %v12399_v31 = vpop.xlane.xlu1 %2078  ;;  %7878 = vmatprep.subr.bf16.mxu0 %v8027_v50 }
0x12a3   : > { %14754 = vst [vmem:[#allocation276_spill] sm:$0xff] %v12399_v31  ;;  %v8189_v43 = vpop.eup %8188 }
0x12a4   : > { %v8191_v30 = vpop.eup %8190  ;;  %v7802_v41 = vpop.f32.mrb[168].mxu1  ;;  %v12406_v21 = vpack.c.bf16 %v8189_v43, %v8185_v55 }
0x12a5   : > { %v12404_v27 = vpop.xlane.xlu0 %2081  ;;  %v6125_v39 = vadd.f32 %v7802_v41, %v14756_v47  ;;  %v6084_v63 = vpop.f32.mrb[169].mxu1  ;;  %v12409_v23 = vpack.c.bf16 %v8191_v30, %v8187_v54  ;;  %7879 = vmatpush3.bf16.msra.mxu0 %v8027_v50  ;;  %v14760_v47 = vld [vmem:[#allocation194_spill] sm:$0xff] }
0x12a6   : > { %14755 = vst [vmem:[#allocation277_spill] sm:$0xff] %v12404_v27  ;;  %v6123_v31 = vadd.f32 %v6084_v63, %v14757_v19  ;;  %v7803_v24 = vpop.f32.mrb[170].mxu1  ;;  %v12412_v1 = vpop.xlane.xlu1 %2084  ;;  %7880 = vmatprep.subr.bf16.mxu0 %v8028_v29 }
0x12a7   : > { %14758 = vst [vmem:[#allocation195_spill] sm:$0xff] %v12412_v1  ;;  %v6126_v27 = vadd.f32 %v7803_v24, %v14759_v10  ;;  %v6087_v55 = vpop.f32.mrb[171].mxu1  ;;  %7828 = vmatprep.mubr.bf16.mxu0 %v12409_v23  ;;  %8192 = vtanh.f32 %v6125_v39  ;;  %v8030_v24 = vld [vmem:[%s13993_s10 + $0x30] sm:$0xff]  }
0x12a8   : > { %v6124_v54 = vadd.f32 %v6087_v55, %v14760_v47  ;;  %7829 = vmatmul.mubr.bf16.gmra.mrb[180].mxu0 %v12406_v21 }
0x12a9   : > { %v12421_v50 = vpop.xlane.xlu0 %3436  ;;  %8194 = vtanh.f32 %v6126_v27  ;;  %7881 = vmatpush3.bf16.msra.mxu0 %v8028_v29  ;;  %v8031_v27 = vld [vmem:[%s13993_s10 + $0x38] sm:$0xff]  }
0x12aa   : > { %v3483_v63 = vsub.f32 %v12150_v37, %v12421_v50  ;;  %8196 = vtanh.f32 %v6123_v31  ;;  %v12425_v43 = vpop.xlane.xlu1 %3439  ;;  %7882 = vmatprep.subr.bf16.mxu0 %v8029_v32 }
0x12ab   : > { %8198 = vtanh.f32 %v6124_v54  ;;  %v3484_v39 = vsub.f32 %v12155_v52, %v12425_v43 }
0x12ac   : > { %v3499_v10 = vmul.f32 1.442695, %v3483_v63 }
0x12ad   : > { %v12432_v30 = vpop.xlane.xlu0 %3442  ;;  %v3501_v41 = vmul.f32 1.442695, %v3484_v39  ;;  %7883 = vmatpush3.bf16.msra.mxu0 %v8029_v32 }
0x12ae   : > { %14761 = vst [vmem:[#allocation193_spill] sm:$0xff] %v12432_v30  ;;  %8200 = vpow2.f32 %v3499_v10  ;;  %v3485_v29 = vsub.f32 %v12160_v5, %v12432_v30  ;;  %v12436_v31 = vpop.xlane.xlu1 %4905  ;;  %7884 = vmatprep.subr.bf16.mxu0 %v8030_v24 }
0x12af   : > { %14762 = vst [vmem:[#allocation196_spill] sm:$0xff] %v12436_v31  ;;  %8202 = vpow2.f32 %v3501_v41  ;;  %v4952_v55 = vsub.f32 %v12166_v42, %v12436_v31 }
0x12b0   : > { %v3503_v19 = vmul.f32 1.442695, %v3485_v29 }
0x12b1   : > { %v12443_v47 = vpop.xlane.xlu0 %4908  ;;  %v4968_v54 = vmul.f32 1.442695, %v4952_v55  ;;  %7885 = vmatpush3.bf16.msra.mxu0 %v8030_v24  ;;  %v8193_v32 = vpop.eup %8192  ;;  %v14765_v24 = vld [vmem:[#allocation199_spill] sm:$0xff] }
0x12b2   : > { %14763 = vst [vmem:[#allocation194_spill] sm:$0xff] %v12443_v47  ;;  %8204 = vpow2.f32 %v3503_v19  ;;  %v4953_v63 = vsub.f32 %v12172_v45, %v12443_v47  ;;  %v12447_v10 = vpop.xlane.xlu1 %3445  ;;  %7886 = vmatprep.subr.bf16.mxu0 %v8031_v27 }
0x12b3   : > { %14764 = vst [vmem:[#allocation278_spill] sm:$0xff] %v12447_v10  ;;  %v8195_v39 = vpop.eup %8194  ;;  %8206 = vpow2.f32 %v4968_v54  ;;  %v3486_v41 = vsub.f32 %v12178_v16, %v12447_v10 }
0x12b4   : > { %v4970_v1 = vmul.f32 1.442695, %v4953_v63  ;;  %v8197_v29 = vpop.eup %8196  ;;  %v7806_v5 = vpop.f32.mrb[172].mxu1  ;;  %v12453_v19 = vpack.c.bf16 %v8195_v39, %v8193_v32  ;;  %v14766_v63 = vld [vmem:[#allocation197_spill] sm:$0xff]  ;;  %v14767_v32 = vld [vmem:[#allocation200_spill] sm:$0xff] }
0x12b5   : > { %v12451_v30 = vpop.xlane.xlu0 %4911  ;;  %v8199_v55 = vpop.eup %8198  ;;  %v3505_v45 = vmul.f32 1.442695, %v3486_v41  ;;  %v6129_v47 = vadd.f32 %v7806_v5, %v14765_v24  ;;  %7887 = vmatpush3.bf16.msra.mxu0 %v8031_v27  ;;  %v14768_v41 = vld [vmem:[#allocation198_spill] sm:$0xff] }
0x12b6   : > { %8208 = vpow2.f32 %v4970_v1  ;;  %v6100_v42 = vpop.f32.mrb[173].mxu1  ;;  %v4954_v54 = vsub.f32 %v12184_v34, %v12451_v30  ;;  %v12459_v16 = vpop.xlane.xlu1 %3448  ;;  %v12461_v10 = vpack.c.bf16 %v8199_v55, %v8197_v29 }
0x12b7   : > { %v6127_v31 = vadd.f32 %v6100_v42, %v14766_v63  ;;  %v7807_v37 = vpop.f32.mrb[174].mxu1  ;;  %8210 = vpow2.f32 %v3505_v45  ;;  %v3487_v1 = vsub.f32 %v12190_v44, %v12459_v16 }
0x12b8   : > { %v8201_v52 = vpop.eup %8200  ;;  %v6130_v39 = vadd.f32 %v7807_v37, %v14767_v32  ;;  %v6103_v5 = vpop.f32.mrb[175].mxu1  ;;  %8212 = vtanh.f32 %v6129_v47  ;;  %v4972_v27 = vmul.f32 1.442695, %v4954_v54  ;;  %7832 = vmatprep.mubr.bf16.mxu0 %v12461_v10 }
0x12b9   : > { %v6128_v24 = vadd.f32 %v6103_v5, %v14768_v41  ;;  %v12468_v42 = vpop.xlane.xlu0 %4914  ;;  %v3531_v63 = vsel %vm938_vm0, %v8201_v52, 0.0  ;;  %v8203_v29 = vpop.eup %8202  ;;  %8214 = vtanh.f32 %v6127_v31  ;;  %v3507_v55 = vmul.f32 1.442695, %v3487_v1  ;;  %7833 = vmatmul.mubr.bf16.gmra.mrb[184].mxu0 %v12453_v19 }
0x12ba   : > { %v4955_v37 = vsub.f32 %v12196_v62, %v12468_v42  ;;  %3532 = vadd.xlane.f32.xlu0 %v3531_v63  ;;  %8216 = vpow2.f32 %v4972_v27  ;;  %v12474_v45 = vpop.xlane.xlu1 %4917  ;;  %v3534_v47 = vsel %vm938_vm0, %v8203_v29, 0.0 }
0x12bb   : > { %8218 = vtanh.f32 %v6130_v39  ;;  %v4956_v52 = vsub.f32 %v12202_v25, %v12474_v45  ;;  %3535 = vadd.xlane.f32.xlu1 %v3534_v47 }
0x12bc   : > { %v8205_v54 = vpop.eup %8204  ;;  %v4974_v32 = vmul.f32 1.442695, %v4955_v37  ;;  %8220 = vpow2.f32 %v3507_v55 }
0x12bd   : > { %v12479_v31 = vpop.xlane.xlu0 %3451  ;;  %v3537_v1 = vsel %vm938_vm0, %v8205_v54, 0.0  ;;  %v8207_v5 = vpop.eup %8206  ;;  %8222 = vtanh.f32 %v6128_v24  ;;  %v4976_v41 = vmul.f32 1.442695, %v4956_v52 }
0x12be   : > { %v3488_v27 = vsub.f32 %v12208_v35, %v12479_v31  ;;  %3538 = vadd.xlane.f32.xlu0 %v3537_v1  ;;  %8224 = vpow2.f32 %v4974_v32  ;;  %v12484_v63 = vpop.xlane.xlu1 %3454  ;;  %v5000_v39 = vsel %vm938_vm0, %v8207_v5, 0.0  ;;  %v2022_v5 = vsub.f32 %v11900_v58, %v12349_v33 }
0x12bf   : > { %14769 = vst [vmem:[#allocation199_spill] sm:$0xff] %v12484_v63  ;;  %8226 = vpow2.f32 %v4976_v41  ;;  %v3489_v55 = vsub.f32 %v12214_v60, %v12484_v63  ;;  %5001 = vadd.xlane.f32.xlu1 %v5000_v39 }
0x12c0   : > { %v8209_v29 = vpop.eup %8208  ;;  %v3509_v37 = vmul.f32 1.442695, %v3488_v27 }
0x12c1   : > { %v12489_v47 = vpop.xlane.xlu0 %4920  ;;  %v5003_v24 = vsel %vm938_vm0, %v8209_v29, 0.0  ;;  %v8211_v54 = vpop.eup %8210  ;;  %v3511_v52 = vmul.f32 1.442695, %v3489_v55 }
0x12c2   : > { %14770 = vst [vmem:[#allocation197_spill] sm:$0xff] %v12489_v47  ;;  %8228 = vpow2.f32 %v3509_v37  ;;  %v4957_v32 = vsub.f32 %v12220_v26, %v12489_v47  ;;  %5004 = vadd.xlane.f32.xlu0 %v5003_v24  ;;  %v8213_v1 = vpop.eup %8212  ;;  %v12496_v41 = vpop.xlane.xlu1 %4923  ;;  %v3540_v27 = vsel %vm938_vm0, %v8211_v54, 0.0  ;;  %v2046_v54 = vmul.f32 1.442695, %v2022_v5 }
0x12c3   : > { %14771 = vst [vmem:[#allocation200_spill] sm:$0xff] %v12496_v41  ;;  %v8215_v39 = vpop.eup %8214  ;;  %8230 = vpow2.f32 %v3511_v52  ;;  %v4958_v29 = vsub.f32 %v12226_v9, %v12496_v41  ;;  %3541 = vadd.xlane.f32.xlu1 %v3540_v27 }
0x12c4   : > { %v4978_v60 = vmul.f32 1.442695, %v4957_v32  ;;  %v8217_v37 = vpop.eup %8216 }
0x12c5   : > { %v12501_v55 = vpop.xlane.xlu0 %3457  ;;  %v8219_v26 = vpop.eup %8218  ;;  %v4980_v24 = vmul.f32 1.442695, %v4958_v29  ;;  %v5006_v33 = vsel %vm938_vm0, %v8217_v37, 0.0 }
0x12c6   : > { %8232 = vpow2.f32 %v4978_v60  ;;  %v3490_v58 = vsub.f32 %v12237_v2, %v12501_v55  ;;  %v8221_v47 = vpop.eup %8220  ;;  %5007 = vadd.xlane.f32.xlu0 %v5006_v33  ;;  %v12506_v52 = vpop.xlane.xlu1 %3460  ;;  %v12508_v32 = vpack.c.bf16 %v8219_v26, %v8213_v1 }
0x12c7   : > { %14772 = vst [vmem:[#allocation198_spill] sm:$0xff] %v12506_v52  ;;  %v8223_v9 = vpop.eup %8222  ;;  %8234 = vpow2.f32 %v4980_v24  ;;  %v3491_v41 = vsub.f32 %v12244_v18, %v12506_v52  ;;  %v3543_v60 = vsel %vm938_vm0, %v8221_v47, 0.0 }
0x12c8   : > { %v3513_v27 = vmul.f32 1.442695, %v3490_v58  ;;  %v8225_v29 = vpop.eup %8224  ;;  %v12513_v63 = vpack.c.bf16 %v8223_v9, %v8215_v39  ;;  %3544 = vadd.xlane.f32.xlu1 %v3543_v60  ;;  %v2023_v58 = vsub.f32 %v11906_v12, %v12351_v46 }
0x12c9   : > { %v12515_v37 = vpop.xlane.xlu0 %4926  ;;  %v8227_v5 = vpop.eup %8226  ;;  %v3515_v33 = vmul.f32 1.442695, %v3491_v41  ;;  %v5009_v1 = vsel %vm938_vm0, %v8225_v29, 0.0 }
0x12ca   : > { %14773 = vst [vmem:[#allocation279_spill] sm:$0xff] %v12515_v37  ;;  %8236 = vpow2.f32 %v3513_v27  ;;  %v4959_v26 = vsub.f32 %v12251_v3, %v12515_v37  ;;  %7836 = vmatprep.mubr.bf16.mxu0 %v12513_v63  ;;  %5010 = vadd.xlane.f32.xlu0 %v5009_v1  ;;  %v12523_v9 = vpop.xlane.xlu1 %4929  ;;  %v5012_v47 = vsel %vm938_vm0, %v8227_v5, 0.0  ;;  %v2048_v29 = vmul.f32 1.442695, %v2023_v58 }
0x12cb   : > { %8238 = vpow2.f32 %v2046_v54  ;;  %14774 = vst [vmem:[#allocation280_spill] sm:$0xff] %v12523_v9  ;;  %7837 = vmatmul.mubr.bf16.gmra.mrb[188].mxu0 %v12508_v32  ;;  %v4960_v5 = vsub.f32 %v12257_v48, %v12523_v9 }
0x12cc   : > { %v8229_v39 = vpop.eup %8228  ;;  %v4982_v41 = vmul.f32 1.442695, %v4959_v26  ;;  %8240 = vpow2.f32 %v3515_v33  ;;  %7888 = vmatprep.mubr.bf16.mxu0 %v12370_v49  ;;  %5013 = vadd.xlane.f32.xlu1 %v5012_v47 }
0x12cd   : > { %v12528_v24 = vpop.xlane.xlu0 %3463  ;;  %v3546_v54 = vsel %vm938_vm0, %v8229_v39, 0.0  ;;  %v8231_v27 = vpop.eup %8230 }
0x12ce   : > { %14775 = vst [vmem:[#allocation281_spill] sm:$0xff] %v12528_v24  ;;  %v3492_v60 = vsub.f32 %v12263_v53, %v12528_v24  ;;  %8242 = vpow2.f32 %v4982_v41  ;;  %3547 = vadd.xlane.f32.xlu0 %v3546_v54  ;;  %v12535_v1 = vpop.xlane.xlu1 %3466  ;;  %v3549_v33 = vsel %vm938_vm0, %v8231_v27, 0.0  ;;  %v2024_v54 = vsub.f32 %v11912_v4, %v12356_v51 }
0x12cf   : > { %14776 = vst [vmem:[#allocation282_spill] sm:$0xff] %v12535_v1  ;;  %v3493_v47 = vsub.f32 %v12269_v20, %v12535_v1  ;;  %v4984_v24 = vmul.f32 1.442695, %v4960_v5  ;;  %v14791_v1 = vld [vmem:[#allocation76_spill] sm:$0xff] }
0x12d0   : > { %v8233_v49 = vpop.eup %8232  ;;  %v3517_v26 = vmul.f32 1.442695, %v3492_v60  ;;  %3550 = vadd.xlane.f32.xlu1 %v3549_v33 }
0x12d1   : > { %v12540_v39 = vpop.xlane.xlu0 %4932  ;;  %v5015_v53 = vsel %vm938_vm0, %v8233_v49, 0.0  ;;  %v8235_v58 = vpop.eup %8234  ;;  %v3519_v41 = vmul.f32 1.442695, %v3493_v47 }
0x12d2   : > { %14777 = vst [vmem:[#allocation283_spill] sm:$0xff] %v12540_v39  ;;  %8244 = vpow2.f32 %v3517_v26  ;;  %5016 = vadd.xlane.f32.xlu0 %v5015_v53  ;;  %v12545_v27 = vpop.xlane.xlu1 %4935  ;;  %v5018_v60 = vsel %vm938_vm0, %v8235_v58, 0.0  ;;  %v2050_v26 = vmul.f32 1.442695, %v2024_v54  ;;  %v4961_v47 = vsub.f32 %v12275_v13, %v12540_v39 }
0x12d3   : > { %8246 = vpow2.f32 %v2048_v29  ;;  %14778 = vst [vmem:[#allocation284_spill] sm:$0xff] %v12545_v27  ;;  %7889 = vmatmul.mubr.bf16.vlgmr.msra.gmra.mrb[192].mxu0 %v12367_v61  ;;  %v2025_v54 = vsub.f32 %v11918_v56, %v12359_v15 }
0x12d4   : > { %v8237_v3 = vpop.eup %8236  ;;  %8248 = vpow2.f32 %v3519_v41  ;;  %7892 = vmatprep.mubr.bf16.mxu0 %v12409_v23  ;;  %5019 = vadd.xlane.f32.xlu1 %v5018_v60 }
0x12d5   : > { %v8239_v33 = vpop.eup %8238  ;;  %v12550_v49 = vpop.xlane.xlu0 %3469  ;;  %v3552_v29 = vsel %vm938_vm0, %v8237_v3, 0.0  ;;  %8250 = vpow2.f32 %v4984_v24 }
0x12d6   : > { %14779 = vst [vmem:[#allocation285_spill] sm:$0xff] %v12550_v49  ;;  %v3494_v5 = vsub.f32 %v12287_v28, %v12550_v49  ;;  %v8241_v53 = vpop.eup %8240  ;;  %3553 = vadd.xlane.f32.xlu0 %v3552_v29  ;;  %v12557_v61 = vpop.xlane.xlu1 %3472  ;;  %v2086_v41 = vsel %vm938_vm0, %v8239_v33, 0.0  ;;  %v4986_v29 = vmul.f32 1.442695, %v4961_v47  ;;  %v2052_v47 = vmul.f32 1.442695, %v2025_v54 }
0x12d7   : > { %14780 = vst [vmem:[#allocation286_spill] sm:$0xff] %v12557_v61  ;;  %v3495_v23 = vsub.f32 %v12293_v6, %v12557_v61  ;;  %v3555_v24 = vsel %vm938_vm0, %v8241_v53, 0.0 }
0x12d8   : > { %v3521_v58 = vmul.f32 1.442695, %v3494_v5  ;;  %v8243_v60 = vpop.eup %8242  ;;  %2087 = vadd.xlane.f32.xlu1 %v2086_v41 }
0x12d9   : > { %v12562_v3 = vpop.xlane.xlu0 %4938  ;;  %v3523_v28 = vmul.f32 1.442695, %v3495_v23  ;;  %v5021_v33 = vsel %vm938_vm0, %v8243_v60, 0.0 }
0x12da   : > { %14781 = vst [vmem:[#allocation287_spill] sm:$0xff] %v12562_v3  ;;  %8252 = vpow2.f32 %v3521_v58  ;;  %3556 = vadd.xlane.f32.xlu0 %v3555_v24  ;;  %v12567_v5 = vpop.xlane.xlu1 %4941  ;;  %v4962_v24 = vsub.f32 %v12281_v7, %v12545_v27 }
0x12db   : > { %8254 = vpow2.f32 %v2050_v26  ;;  %14782 = vst [vmem:[#allocation288_spill] sm:$0xff] %v12567_v5  ;;  %7893 = vmatmul.mubr.bf16.gmra.mrb[196].mxu0 %v12406_v21 }
0x12dc   : > { %v8245_v20 = vpop.eup %8244  ;;  %8256 = vpow2.f32 %v3523_v28  ;;  %5022 = vadd.xlane.f32.xlu1 %v5021_v33 }
0x12dd   : > { %v8247_v41 = vpop.eup %8246  ;;  %v12571_v58 = vpop.xlane.xlu0 %3475  ;;  %v3558_v53 = vsel %vm938_vm0, %v8245_v20, 0.0  ;;  %8258 = vpow2.f32 %v4986_v29  ;;  %v14786_v29 = vld [vmem:[#allocation24_spill] sm:$0xff] }
0x12de   : > { %14783 = vst [vmem:[#allocation289_spill] sm:$0xff] %v12571_v58  ;;  %v3496_v26 = vsub.f32 %v12311_v36, %v12571_v58  ;;  %v8249_v23 = vpop.eup %8248  ;;  %3559 = vadd.xlane.f32.xlu0 %v3558_v53  ;;  %v12578_v21 = vpop.xlane.xlu1 %3478  ;;  %v2089_v33 = vsel %vm938_vm0, %v8247_v41, 0.0  ;;  %v2026_v53 = vsub.f32 %v14786_v29, %v12361_v40  ;;  %v4988_v58 = vmul.f32 1.442695, %v4962_v24  ;;  %v14788_v41 = vld [vmem:[#allocation75_spill] sm:$0xff] }
0x12df   : > { %14784 = vst [vmem:[#allocation290_spill] sm:$0xff] %v12578_v21  ;;  %v3497_v28 = vsub.f32 %v12317_v22, %v12578_v21  ;;  %v8251_v6 = vpop.eup %8250  ;;  %v3561_v54 = vsel %vm938_vm0, %v8249_v23, 0.0  ;;  %v14787_v21 = vld [vmem:[#allocation91_spill] sm:$0xff]  ;;  %v4963_v24 = vsub.f32 %v12299_v8, %v12562_v3  ;;  %v14794_v8 = vld [vmem:[#allocation141_spill] sm:$0xff] }
0x12e0   : > { %v3525_v60 = vmul.f32 1.442695, %v3496_v26  ;;  %2090 = vadd.xlane.f32.xlu1 %v2089_v33  ;;  %v5024_v61 = vsel %vm938_vm0, %v8251_v6, 0.0  ;;  %v2568_v49 = vsub.f32 %v14788_v41, %v14787_v21 }
0x12e1   : > { %v12583_v20 = vpop.xlane.xlu0 %4944  ;;  %v3527_v36 = vmul.f32 1.442695, %v3497_v28  ;;  %v2054_v28 = vmul.f32 1.442695, %v2026_v53  ;;  %v14792_v53 = vld [vmem:[#allocation23_spill] sm:$0xff] }
0x12e2   : > { %14785 = vst [vmem:[#allocation291_spill] sm:$0xff] %v12583_v20  ;;  %8260 = vpow2.f32 %v3525_v60  ;;  %3562 = vadd.xlane.f32.xlu0 %v3561_v54 }
0x12e3   : > { %8262 = vpow2.f32 %v2052_v47 }
0x12e4   : > { %v8253_v26 = vpop.eup %8252  ;;  %8264 = vpow2.f32 %v3527_v36  ;;  %5025 = vadd.xlane.f32.xlu1 %v5024_v61  ;;  %v2584_v36 = vmul.f32 1.442695, %v2568_v49  ;;  %v14790_v61 = vld [vmem:[#allocation93_spill] sm:$0xff]  ;;  %v14793_v49 = vld [vmem:[#allocation156_spill] sm:$0xff] }
0x12e5   : > { %v8255_v22 = vpop.eup %8254  ;;  %v12591_v33 = vpop.xlane.xlu0 %3481  ;;  %v3564_v60 = vsel %vm938_vm0, %v8253_v26, 0.0  ;;  %8266 = vpow2.f32 %v4988_v58  ;;  %v2570_v29 = vsub.f32 %v14791_v1, %v14790_v61  ;;  %v2027_v58 = vsub.f32 %v14792_v53, %v12363_v17  ;;  %v14884_v61 = vld [vmem:[#allocation84_spill] sm:$0xff] }
0x12e6   : > { %14789 = vst [vmem:[#allocation91_spill] sm:$0xff] %v12591_v33  ;;  %v3498_v23 = vsub.f32 %v12335_v0, %v12591_v33  ;;  %v8257_v47 = vpop.eup %8256  ;;  %3565 = vadd.xlane.f32.xlu0 %v3564_v60  ;;  %v2092_v54 = vsel %vm938_vm0, %v8255_v22, 0.0  ;;  %v4990_v0 = vmul.f32 1.442695, %v4963_v24  ;;  %v4038_v3 = vsub.f32 %v14794_v8, %v14793_v49 }
0x12e7   : > { %v8259_v41 = vpop.eup %8258  ;;  %v3567_v26 = vsel %vm938_vm0, %v8257_v47, 0.0  ;;  %v2588_v22 = vmul.f32 1.442695, %v2570_v29  ;;  %v2056_v47 = vmul.f32 1.442695, %v2027_v58  ;;  %v14796_v29 = vld [vmem:[#allocation140_spill] sm:$0xff] }
0x12e8   : > { %v3529_v6 = vmul.f32 1.442695, %v3498_v23  ;;  %2093 = vadd.xlane.f32.xlu1 %v2092_v54  ;;  %v5027_v60 = vsel %vm938_vm0, %v8259_v41, 0.0  ;;  %v4055_v41 = vmul.f32 1.442695, %v4038_v3  ;;  %v14799_v3 = vld [vmem:[#allocation203_spill] sm:$0xff] }
0x12ea   : > { %8268 = vpow2.f32 %v3529_v6  ;;  %3568 = vadd.xlane.f32.xlu0 %v3567_v26 }
0x12eb   : > { %8270 = vpow2.f32 %v2054_v28  ;;  %v4964_v28 = vsub.f32 %v12305_v14, %v12567_v5 }
0x12ec   : > { %v8261_v33 = vpop.eup %8260  ;;  %8272 = vpow2.f32 %v2584_v36  ;;  %5028 = vadd.xlane.f32.xlu1 %v5027_v60  ;;  %v14795_v36 = vld [vmem:[#allocation157_spill] sm:$0xff] }
0x12ed   : > { %v8263_v23 = vpop.eup %8262  ;;  %v3570_v1 = vsel %vm938_vm0, %v8261_v33, 0.0  ;;  %8274 = vpow2.f32 %v4990_v0  ;;  %v4039_v26 = vsub.f32 %v14796_v29, %v14795_v36  ;;  %v14797_v33 = vld [vmem:[#allocation25_spill] sm:$0xff]  ;;  %v4992_v0 = vmul.f32 1.442695, %v4964_v28 }
0x12ee   : > { %v8265_v6 = vpop.eup %8264  ;;  %3571 = vadd.xlane.f32.xlu0 %v3570_v1  ;;  %v2095_v24 = vsel %vm938_vm0, %v8263_v23, 0.0  ;;  %8276 = vpow2.f32 %v2588_v22  ;;  %v2028_v58 = vsub.f32 %v14797_v33, %v12365_v57  ;;  %v14798_v22 = vld [vmem:[#allocation218_spill] sm:$0xff] }
0x12ef   : > { %v8267_v54 = vpop.eup %8266  ;;  %v3573_v8 = vsel %vm938_vm0, %v8265_v6, 0.0  ;;  %8278 = vpow2.f32 %v2056_v47  ;;  %v4057_v23 = vmul.f32 1.442695, %v4039_v26  ;;  %v5507_v14 = vsub.f32 %v14799_v3, %v14798_v22  ;;  %v12625_v3 = vpop.xlane.xlu1 %4947 }
0x12f0   : > { %2096 = vadd.xlane.f32.xlu1 %v2095_v24  ;;  %v5030_v1 = vsel %vm938_vm0, %v8267_v54, 0.0  ;;  %8280 = vpow2.f32 %v4055_v41  ;;  %v2058_v6 = vmul.f32 1.442695, %v2028_v58  ;;  %v4965_v47 = vsub.f32 %v12323_v59, %v12583_v20  ;;  %v14800_v54 = vld [vmem:[#allocation158_spill] sm:$0xff]  ;;  %14802 = vst [vmem:[#allocation75_spill] sm:$0xff] %v12625_v3  ;;  %v14803_v58 = vld [vmem:[#allocation60_spill] sm:$0xff] }
0x12f1   : > { %8282 = vpow2.f32 %v4992_v0  ;;  %v14801_v41 = vld [vmem:[#allocation142_spill] sm:$0xff]  ;;  %v5524_v33 = vmul.f32 1.442695, %v5507_v14  ;;  %v2029_v0 = vsub.f32 %v14803_v58, %v12372_v38  ;;  %v14805_v59 = vld [vmem:[#allocation81_spill] sm:$0xff] }
0x12f2   : > { %3574 = vadd.xlane.f32.xlu0 %v3573_v8  ;;  %8284 = vpow2.f32 %v4057_v23  ;;  %v4040_v26 = vsub.f32 %v14801_v41, %v14800_v54  ;;  %v4994_v22 = vmul.f32 1.442695, %v4965_v47  ;;  %v14804_v23 = vld [vmem:[#allocation96_spill] sm:$0xff] }
0x12f3   : > { %8286 = vpow2.f32 %v2058_v6  ;;  %v2573_v20 = vsub.f32 %v14805_v59, %v14804_v23  ;;  %v4966_v6 = vsub.f32 %v12329_v11, %v12625_v3  ;;  %v12636_v47 = vpop.xlane.xlu1 %4950  ;;  %v14807_v59 = vld [vmem:[#allocation220_spill] sm:$0xff] }
0x12f4   : > { %v8269_v60 = vpop.eup %8268  ;;  %5031 = vadd.xlane.f32.xlu1 %v5030_v1  ;;  %v4059_v41 = vmul.f32 1.442695, %v4040_v26  ;;  %8288 = vpow2.f32 %v5524_v33  ;;  %14806 = vst [vmem:[#allocation76_spill] sm:$0xff] %v12636_v47  ;;  %v14808_v26 = vld [vmem:[#allocation204_spill] sm:$0xff] }
0x12f5   : > { %v8271_v49 = vpop.eup %8270  ;;  %v3576_v24 = vsel %vm938_vm0, %v8269_v60, 0.0  ;;  %8290 = vpow2.f32 %v4994_v22  ;;  %v2594_v58 = vmul.f32 1.442695, %v2573_v20  ;;  %v5509_v33 = vsub.f32 %v14808_v26, %v14807_v59  ;;  %v14811_v20 = vld [vmem:[#allocation145_spill] sm:$0xff] }
0x12f6   : > { %v8273_v29 = vpop.eup %8272  ;;  %3577 = vadd.xlane.f32.xlu0 %v3576_v24  ;;  %v2098_v28 = vsel %vm938_vm0, %v8271_v49, 0.0  ;;  %8292 = vpow2.f32 %v4059_v41  ;;  %v4996_v22 = vmul.f32 1.442695, %v4966_v6  ;;  %v14813_v59 = vld [vmem:[#allocation77_spill] sm:$0xff] }
0x12f7   : > { %v8275_v8 = vpop.eup %8274  ;;  %v2616_v60 = vsel %vm938_vm0, %v8273_v29, 0.0  ;;  %v2060_v29 = vmul.f32 1.442695, %v2029_v0  ;;  %v14809_v0 = vld [vmem:[#allocation268_spill] sm:$0xff]  ;;  %v5528_v38 = vmul.f32 1.442695, %v5509_v33 }
0x12f8   : > { %2099 = vadd.xlane.f32.xlu1 %v2098_v28  ;;  %v8277_v1 = vpop.eup %8276  ;;  %v5033_v49 = vsel %vm938_vm0, %v8275_v8, 0.0  ;;  %v4967_v11 = vsub.f32 %v14809_v0, %v12636_v47  ;;  %v14815_v47 = vld [vmem:[#allocation82_spill] sm:$0xff] }
0x12f9   : > { %v8279_v24 = vpop.eup %8278  ;;  %v2622_v14 = vsel %vm938_vm0, %v8277_v1, 0.0  ;;  %8294 = vpow2.f32 %v2060_v29 }
0x12fa   : > { %2617 = vadd.xlane.f32.xlu0 %v2616_v60  ;;  %v8281_v28 = vpop.eup %8280  ;;  %v2101_v8 = vsel %vm938_vm0, %v8279_v24, 0.0  ;;  %8296 = vpow2.f32 %v2594_v58  ;;  %v14810_v24 = vld [vmem:[#allocation160_spill] sm:$0xff]  ;;  %v4998_v6 = vmul.f32 1.442695, %v4967_v11 }
0x12fb   : > { %v8283_v60 = vpop.eup %8282  ;;  %v4088_v1 = vsel %vm938_vm0, %v8281_v28, 0.0  ;;  %v4042_v41 = vsub.f32 %v14811_v20, %v14810_v24  ;;  %v14812_v28 = vld [vmem:[#allocation92_spill] sm:$0xff]  ;;  %8298 = vpow2.f32 %v4996_v22  ;;  %v14816_v20 = vld [vmem:[#allocation155_spill] sm:$0xff]  ;;  %v14818_v22 = vld [vmem:[#allocation222_spill] sm:$0xff] }
0x12fc   : > { %5034 = vadd.xlane.f32.xlu1 %v5033_v49  ;;  %v8285_v49 = vpop.eup %8284  ;;  %v2569_v29 = vsub.f32 %v14813_v59, %v14812_v28  ;;  %8300 = vpow2.f32 %v5528_v38  ;;  %v14817_v24 = vld [vmem:[#allocation139_spill] sm:$0xff] }
0x12fd   : > { %v8287_v3 = vpop.eup %8286  ;;  %v4063_v57 = vmul.f32 1.442695, %v4042_v41  ;;  %v4037_v53 = vsub.f32 %v14817_v24, %v14816_v20  ;;  %8302 = vpow2.f32 %v4998_v6 }
0x12fe   : > { %2623 = vadd.xlane.f32.xlu0 %v2622_v14  ;;  %v5036_v14 = vsel %vm938_vm0, %v8283_v60, 0.0  ;;  %v8289_v26 = vpop.eup %8288  ;;  %v14814_v60 = vld [vmem:[#allocation98_spill] sm:$0xff] }
0x12ff   : > { %v8291_v0 = vpop.eup %8290  ;;  %v2575_v58 = vsub.f32 %v14815_v47, %v14814_v60  ;;  %v5557_v33 = vsel %vm938_vm0, %v8289_v26, 0.0  ;;  %8304 = vpow2.f32 %v4063_v57  ;;  %v14820_v26 = vld [vmem:[#allocation94_spill] sm:$0xff]  ;;  %v4053_v28 = vmul.f32 1.442695, %v4037_v53 }
0x1300   : > { %2102 = vadd.xlane.f32.xlu1 %v2101_v8  ;;  %v4091_v8 = vsel %vm938_vm0, %v8285_v49, 0.0  ;;  %v2586_v49 = vmul.f32 1.442695, %v2569_v29  ;;  %v5039_v11 = vsel %vm938_vm0, %v8291_v0, 0.0  ;;  %v14821_v29 = vld [vmem:[#allocation78_spill] sm:$0xff] }
0x1301   : > { %v14822_v0 = vld [vmem:[#allocation162_spill] sm:$0xff] }
0x1302   : > { %4089 = vadd.xlane.f32.xlu0 %v4088_v1  ;;  %v2104_v1 = vsel %vm938_vm0, %v8287_v3, 0.0  ;;  %v2598_v3 = vmul.f32 1.442695, %v2575_v58  ;;  %8306 = vpow2.f32 %v2586_v49  ;;  %v14823_v58 = vld [vmem:[#allocation146_spill] sm:$0xff]  ;;  %v14824_v49 = vld [vmem:[#allocation217_spill] sm:$0xff] }
0x1303   : > { %v4044_v57 = vsub.f32 %v14823_v58, %v14822_v0  ;;  %v14830_v0 = vld [vmem:[#allocation224_spill] sm:$0xff] }
0x1304   : > { %5037 = vadd.xlane.f32.xlu1 %v5036_v14  ;;  %v8293_v14 = vpop.eup %8292  ;;  %8308 = vpow2.f32 %v2598_v3 }
0x1305   : > { %v8295_v59 = vpop.eup %8294  ;;  %v4094_v38 = vsel %vm938_vm0, %v8293_v14, 0.0  ;;  %8310 = vpow2.f32 %v4053_v28  ;;  %v4067_v60 = vmul.f32 1.442695, %v4044_v57 }
0x1306   : > { %4092 = vadd.xlane.f32.xlu0 %v4091_v8  ;;  %v14819_v8 = vld [vmem:[#allocation207_spill] sm:$0xff]  ;;  %v8297_v41 = vpop.eup %8296  ;;  %v2107_v24 = vsel %vm938_vm0, %v8295_v59, 0.0  ;;  %v14826_v59 = vld [vmem:[#allocation100_spill] sm:$0xff] }
0x1307   : > { %v5511_v47 = vsub.f32 %v14819_v8, %v14818_v22  ;;  %v8299_v6 = vpop.eup %8298  ;;  %v14825_v22 = vld [vmem:[#allocation201_spill] sm:$0xff] }
0x1308   : > { %2105 = vadd.xlane.f32.xlu1 %v2104_v1  ;;  %v2571_v1 = vsub.f32 %v14821_v29, %v14820_v26  ;;  %v8301_v8 = vpop.eup %8300  ;;  %v5506_v20 = vsub.f32 %v14825_v22, %v14824_v49  ;;  %v5042_v53 = vsel %vm938_vm0, %v8299_v6, 0.0  ;;  %v14827_v29 = vld [vmem:[#allocation85_spill] sm:$0xff]  ;;  %v14831_v49 = vld [vmem:[#allocation208_spill] sm:$0xff] }
0x1309   : > { %v2577_v3 = vsub.f32 %v14827_v29, %v14826_v59  ;;  %v5513_v29 = vsub.f32 %v14831_v49, %v14830_v0  ;;  %v14834_v49 = vld [vmem:[#allocation159_spill] sm:$0xff] }
0x130a   : > { %5558 = vadd.xlane.f32.xlu0 %v5557_v33  ;;  %v5532_v33 = vmul.f32 1.442695, %v5511_v47  ;;  %v2590_v14 = vmul.f32 1.442695, %v2571_v1  ;;  %v5563_v47 = vsel %vm938_vm0, %v8301_v8, 0.0  ;;  %v14829_v1 = vld [vmem:[#allocation79_spill] sm:$0xff] }
0x130b   : > { %v5522_v58 = vmul.f32 1.442695, %v5506_v20  ;;  %v2602_v6 = vmul.f32 1.442695, %v2577_v3 }
0x130c   : > { %5040 = vadd.xlane.f32.xlu1 %v5039_v11  ;;  %v2631_v11 = vsel %vm938_vm0, %v8297_v41, 0.0  ;;  %8312 = vpow2.f32 %v5532_v33  ;;  %v14828_v41 = vld [vmem:[#allocation95_spill] sm:$0xff] }
0x130d   : > { %8314 = vpow2.f32 %v2590_v14  ;;  %v2572_v28 = vsub.f32 %v14829_v1, %v14828_v41  ;;  %v14832_v14 = vld [vmem:[#allocation219_spill] sm:$0xff] }
0x130e   : > { %4095 = vadd.xlane.f32.xlu0 %v4094_v38  ;;  %v8303_v38 = vpop.eup %8302  ;;  %8316 = vpow2.f32 %v4067_v60  ;;  %v14835_v1 = vld [vmem:[#allocation143_spill] sm:$0xff] }
0x130f   : > { %v5045_v22 = vsel %vm938_vm0, %v8303_v38, 0.0  ;;  %v2592_v8 = vmul.f32 1.442695, %v2572_v28  ;;  %8318 = vpow2.f32 %v5522_v58  ;;  %v5536_v38 = vmul.f32 1.442695, %v5513_v29  ;;  %v14837_v29 = vld [vmem:[#allocation80_spill] sm:$0xff] }
0x1310   : > { %2108 = vadd.xlane.f32.xlu1 %v2107_v24  ;;  %v8305_v24 = vpop.eup %8304  ;;  %8320 = vpow2.f32 %v2602_v6  ;;  %v14836_v6 = vld [vmem:[#allocation97_spill] sm:$0xff] }
0x1311   : > { %v4100_v57 = vsel %vm938_vm0, %v8305_v24, 0.0  ;;  %8322 = vpow2.f32 %v2592_v8  ;;  %v4041_v24 = vsub.f32 %v14835_v1, %v14834_v49  ;;  %v14839_v1 = vld [vmem:[#allocation205_spill] sm:$0xff] }
0x1312   : > { %2632 = vadd.xlane.f32.xlu0 %v2631_v11  ;;  %v8307_v11 = vpop.eup %8306  ;;  %8324 = vpow2.f32 %v5536_v38  ;;  %v14838_v38 = vld [vmem:[#allocation221_spill] sm:$0xff] }
0x1313   : > { %v8309_v33 = vpop.eup %8308  ;;  %v2619_v20 = vsel %vm938_vm0, %v8307_v11, 0.0 }
0x1314   : > { %5043 = vadd.xlane.f32.xlu1 %v5042_v53  ;;  %v14833_v53 = vld [vmem:[#allocation202_spill] sm:$0xff]  ;;  %v2637_v60 = vsel %vm938_vm0, %v8309_v33, 0.0 }
0x1315   : > { %v5508_v59 = vsub.f32 %v14833_v53, %v14832_v14  ;;  %v2574_v53 = vsub.f32 %v14837_v29, %v14836_v6  ;;  %v14847_v14 = vld [vmem:[#allocation147_spill] sm:$0xff] }
0x1316   : > { %5564 = vadd.xlane.f32.xlu0 %v5563_v47  ;;  %v8311_v47 = vpop.eup %8310 }
0x1317   : > { %v8313_v3 = vpop.eup %8312  ;;  %v4085_v28 = vsel %vm938_vm0, %v8311_v47, 0.0  ;;  %v2596_v47 = vmul.f32 1.442695, %v2574_v53 }
0x1318   : > { %5046 = vadd.xlane.f32.xlu1 %v5045_v22  ;;  %v5526_v22 = vmul.f32 1.442695, %v5508_v59  ;;  %v8315_v58 = vpop.eup %8314  ;;  %v5569_v11 = vsel %vm938_vm0, %v8313_v3, 0.0 }
0x1319   : > { %v2625_v33 = vsel %vm938_vm0, %v8315_v58, 0.0  ;;  %v14840_v58 = vld [vmem:[#allocation161_spill] sm:$0xff] }
0x131a   : > { %4101 = vadd.xlane.f32.xlu0 %v4100_v57  ;;  %v8317_v57 = vpop.eup %8316  ;;  %8326 = vpow2.f32 %v5526_v22 }
0x131b   : > { %v8319_v8 = vpop.eup %8318  ;;  %v4106_v59 = vsel %vm938_vm0, %v8317_v57, 0.0 }
0x131c   : > { %2620 = vadd.xlane.f32.xlu1 %v2619_v20  ;;  %v4061_v20 = vmul.f32 1.442695, %v4041_v24  ;;  %v5554_v3 = vsel %vm938_vm0, %v8319_v8, 0.0 }
0x131e   : > { %2638 = vadd.xlane.f32.xlu0 %v2637_v60  ;;  %v8321_v60 = vpop.eup %8320  ;;  %8328 = vpow2.f32 %v4061_v20 }
0x131f   : > { %v8323_v0 = vpop.eup %8322  ;;  %v2643_v24 = vsel %vm938_vm0, %v8321_v60, 0.0  ;;  %8330 = vpow2.f32 %v2596_v47 }
0x1320   : > { %4086 = vadd.xlane.f32.xlu1 %v4085_v28  ;;  %v5510_v28 = vsub.f32 %v14839_v1, %v14838_v38  ;;  %v8325_v22 = vpop.eup %8324  ;;  %v2628_v57 = vsel %vm938_vm0, %v8323_v0, 0.0  ;;  %v14843_v1 = vld [vmem:[#allocation83_spill] sm:$0xff] }
0x1321   : > { %v5575_v20 = vsel %vm938_vm0, %v8325_v22, 0.0  ;;  %v14846_v22 = vld [vmem:[#allocation163_spill] sm:$0xff] }
0x1322   : > { %5570 = vadd.xlane.f32.xlu0 %v5569_v11  ;;  %v14841_v11 = vld [vmem:[#allocation144_spill] sm:$0xff] }
0x1323   : > { %v4043_v29 = vsub.f32 %v14841_v11, %v14840_v58 }
0x1324   : > { %2626 = vadd.xlane.f32.xlu1 %v2625_v33  ;;  %v5530_v33 = vmul.f32 1.442695, %v5510_v28  ;;  %v8327_v53 = vpop.eup %8326  ;;  %v14844_v28 = vld [vmem:[#allocation223_spill] sm:$0xff] }
0x1325   : > { %v4065_v38 = vmul.f32 1.442695, %v4043_v29  ;;  %v5560_v60 = vsel %vm938_vm0, %v8327_v53, 0.0 }
0x1326   : > { %4107 = vadd.xlane.f32.xlu0 %v4106_v59  ;;  %v14842_v59 = vld [vmem:[#allocation99_spill] sm:$0xff]  ;;  %8332 = vpow2.f32 %v5530_v33 }
0x1327   : > { %v2576_v8 = vsub.f32 %v14843_v1, %v14842_v59  ;;  %8334 = vpow2.f32 %v4065_v38  ;;  %v4045_v1 = vsub.f32 %v14847_v14, %v14846_v22 }
0x1328   : > { %5555 = vadd.xlane.f32.xlu1 %v5554_v3  ;;  %v8329_v47 = vpop.eup %8328 }
0x1329   : > { %v2600_v3 = vmul.f32 1.442695, %v2576_v8  ;;  %v4097_v0 = vsel %vm938_vm0, %v8329_v47, 0.0  ;;  %v4069_v53 = vmul.f32 1.442695, %v4045_v1 }
0x132a   : > { %2644 = vadd.xlane.f32.xlu0 %v2643_v24  ;;  %v14845_v24 = vld [vmem:[#allocation206_spill] sm:$0xff]  ;;  %v12715_v1 = vld [vmem:[%s13989_s6] ss:$0 sm:$0xff] }
0x132b   : > { %v5512_v11 = vsub.f32 %v14845_v24, %v14844_v28  ;;  %8336 = vpow2.f32 %v2600_v3 }
0x132c   : > { %2629 = vadd.xlane.f32.xlu1 %v2628_v57  ;;  %v8331_v57 = vpop.eup %8330 }
0x132d   : > { %v5534_v29 = vmul.f32 1.442695, %v5512_v11  ;;  %v2634_v33 = vsel %vm938_vm0, %v8331_v57, 0.0 }
0x132e   : > { %5576 = vadd.xlane.f32.xlu0 %v5575_v20 }
0x132f   : > { %8338 = vpow2.f32 %v5534_v29 }
0x1330   : > { %5561 = vadd.xlane.f32.xlu1 %v5560_v60  ;;  %v8333_v20 = vpop.eup %8332  ;;  %8340 = vpow2.f32 %v4069_v53 }
0x1331   : > { %v5566_v38 = vsel %vm938_vm0, %v8333_v20, 0.0  ;;  %v8335_v8 = vpop.eup %8334 }
0x1332   : > { %v4103_v60 = vsel %vm938_vm0, %v8335_v8, 0.0 }
0x1334   : > { %4098 = vadd.xlane.f32.xlu1 %v4097_v0 }
0x1335   : > { %v8337_v47 = vpop.eup %8336 }
0x1336   : > { %v2640_v3 = vsel %vm938_vm0, %v8337_v47, 0.0 }
0x1338   : > { %2635 = vadd.xlane.f32.xlu1 %v2634_v33 }
0x1339   : > { %v8339_v24 = vpop.eup %8338 }
0x133a   : > { %v5572_v14 = vsel %vm938_vm0, %v8339_v24, 0.0  ;;  %v8341_v11 = vpop.eup %8340 }
0x133b   : > { %v4109_v0 = vsel %vm938_vm0, %v8341_v11, 0.0 }
0x133c   : > { %5567 = vadd.xlane.f32.xlu1 %v5566_v38 }
0x1340   : > { %4104 = vadd.xlane.f32.xlu1 %v4103_v60 }
0x1344   : > { %2641 = vadd.xlane.f32.xlu1 %v2640_v3 }
0x1348   : > { %5573 = vadd.xlane.f32.xlu1 %v5572_v14 }
0x134c   : > { %4110 = vadd.xlane.f32.xlu1 %v4109_v0 }
0x136b   : > { %v7826_v57 = vpop.f32.mrb[176].mxu0 }
0x136c   : > { %v6198_v29 = vadd.f32 %v12715_v1, %v7826_v57  ;;  %v6189_v33 = vpop.f32.mrb[177].mxu0  ;;  %v8794_v57 = vld [vmem:[%s13993_s10] sm:$0xff]  }
0x136d   : > { %v6190_v20 = vadd.f32 %v12715_v1, %v6189_v33  ;;  %v7827_v53 = vpop.f32.mrb[178].mxu0  ;;  %v8795_v33 = vld [vmem:[%s13993_s10 + $0x8] sm:$0xff]  }
0x136e   : > { %v6201_v38 = vadd.f32 %v12715_v1, %v7827_v53  ;;  %v6192_v8 = vpop.f32.mrb[179].mxu0  ;;  %v6254_v47 = vmax.f32 %v6198_v29, 0.0 }
0x136f   : > { %v6193_v60 = vadd.f32 %v12715_v1, %v6192_v8  ;;  %v6252_v24 = vmax.f32 %v6190_v20, 0.0 }
0x1370   : > { %v6255_v3 = vmax.f32 %v6201_v38, 0.0  ;;  %v8796_v38 = vld [vmem:[%s13993_s10 + $0x10] sm:$0xff]  }
0x1371   : > { %v6253_v14 = vmax.f32 %v6193_v60, 0.0 }
0x1372   : > { %v6269_v11 = vpack.c.bf16 %v6255_v3, %v6254_v47 }
0x1373   : > { %v6268_v0 = vpack.c.bf16 %v6253_v14, %v6252_v24 }
0x1375   : > { %7856 = vmatprep.mubr.bf16.mxu1 %v6268_v0  ;;  %v8797_v0 = vld [vmem:[%s13993_s10 + $0x18] sm:$0xff]  }
0x1376   : > { %7857 = vmatmul.mubr.bf16.vlgmr.msra.gmra.mrb[176].mxu1 %v6269_v11 }
0x1377   : > { %7912 = vmatpush3.bf16.msra.mxu1 %v8794_v57 }
0x1378   : > { %7905 = vmatprep.subr.bf16.mxu1 %v8795_v33 }
0x137b   : > { %v7830_v53 = vpop.f32.mrb[180].mxu0  ;;  %7913 = vmatpush3.bf16.msra.mxu1 %v8795_v33 }
0x137c   : > { %v6214_v29 = vadd.f32 %v12715_v1, %v7830_v53  ;;  %v6205_v20 = vpop.f32.mrb[181].mxu0  ;;  %7906 = vmatprep.subr.bf16.mxu1 %v8796_v38 }
0x137d   : > { %v6206_v8 = vadd.f32 %v12715_v1, %v6205_v20  ;;  %v7831_v60 = vpop.f32.mrb[182].mxu0  ;;  %v8798_v20 = vld [vmem:[%s13993_s10 + $0x20] sm:$0xff]  }
0x137e   : > { %v6217_v47 = vadd.f32 %v12715_v1, %v7831_v60  ;;  %v6208_v3 = vpop.f32.mrb[183].mxu0  ;;  %v6258_v14 = vmax.f32 %v6214_v29, 0.0  ;;  %v8799_v29 = vld [vmem:[%s13993_s10 + $0x28] sm:$0xff]  }
0x137f   : > { %v6209_v24 = vadd.f32 %v12715_v1, %v6208_v3  ;;  %7914 = vmatpush3.bf16.msra.mxu1 %v8796_v38  ;;  %v6256_v57 = vmax.f32 %v6206_v8, 0.0  ;;  %v8800_v8 = vld [vmem:[%s13993_s10 + $0x30] sm:$0xff]  }
0x1380   : > { %v6259_v11 = vmax.f32 %v6217_v47, 0.0  ;;  %7907 = vmatprep.subr.bf16.mxu1 %v8797_v0 }
0x1381   : > { %v6257_v33 = vmax.f32 %v6209_v24, 0.0 }
0x1382   : > { %v6271_v53 = vpack.c.bf16 %v6259_v11, %v6258_v14 }
0x1383   : > { %v6270_v22 = vpack.c.bf16 %v6257_v33, %v6256_v57  ;;  %7915 = vmatpush3.bf16.msra.mxu1 %v8797_v0  ;;  %v8801_v0 = vld [vmem:[%s13993_s10 + $0x38] sm:$0xff]  }
0x1384   : > { %7908 = vmatprep.subr.bf16.mxu1 %v8798_v20 }
0x1385   : > { %7860 = vmatprep.mubr.bf16.mxu1 %v6270_v22 }
0x1386   : > { %7861 = vmatmul.mubr.bf16.gmra.mrb[180].mxu1 %v6271_v53 }
0x1387   : > { %7916 = vmatpush3.bf16.msra.mxu1 %v8798_v20 }
0x1388   : > { %7909 = vmatprep.subr.bf16.mxu1 %v8799_v29 }
0x138b   : > { %7917 = vmatpush3.bf16.msra.mxu1 %v8799_v29 }
0x138c   : > { %v7834_v38 = vpop.f32.mrb[184].mxu0  ;;  %7910 = vmatprep.subr.bf16.mxu1 %v8800_v8 }
0x138d   : > { %v6230_v60 = vadd.f32 %v12715_v1, %v7834_v38  ;;  %v6221_v47 = vpop.f32.mrb[185].mxu0 }
0x138e   : > { %v6222_v3 = vadd.f32 %v12715_v1, %v6221_v47  ;;  %v7835_v22 = vpop.f32.mrb[186].mxu0 }
0x138f   : > { %v6233_v24 = vadd.f32 %v12715_v1, %v7835_v22  ;;  %v6224_v14 = vpop.f32.mrb[187].mxu0  ;;  %7918 = vmatpush3.bf16.msra.mxu1 %v8800_v8  ;;  %v6262_v57 = vmax.f32 %v6230_v60, 0.0 }
0x1390   : > { %v6225_v11 = vadd.f32 %v12715_v1, %v6224_v14  ;;  %7911 = vmatprep.subr.bf16.mxu1 %v8801_v0  ;;  %v6260_v53 = vmax.f32 %v6222_v3, 0.0 }
0x1391   : > { %v6263_v33 = vmax.f32 %v6233_v24, 0.0 }
0x1392   : > { %v6261_v20 = vmax.f32 %v6225_v11, 0.0 }
0x1393   : > { %v6273_v29 = vpack.c.bf16 %v6263_v33, %v6262_v57  ;;  %7919 = vmatpush3.bf16.msra.mxu1 %v8801_v0 }
0x1394   : > { %v6272_v38 = vpack.c.bf16 %v6261_v20, %v6260_v53 }
0x1396   : > { %7864 = vmatprep.mubr.bf16.mxu1 %v6272_v38 }
0x1397   : > { %7865 = vmatmul.mubr.bf16.gmra.mrb[184].mxu1 %v6273_v29 }
0x139e   : > { %v7838_v47 = vpop.f32.mrb[188].mxu0 }
0x139f   : > { %v6246_v22 = vadd.f32 %v12715_v1, %v7838_v47  ;;  %v6237_v8 = vpop.f32.mrb[189].mxu0  ;;  %v12777_v47 = vpop.xlane.xlu1 %3535 }
0x13a0   : > { %v6238_v14 = vadd.f32 %v12715_v1, %v6237_v8  ;;  %v7839_v59 = vpop.f32.mrb[190].mxu0 }
0x13a1   : > { %v6249_v28 = vadd.f32 %v12715_v1, %v7839_v59  ;;  %v6240_v58 = vpop.f32.mrb[191].mxu0  ;;  %v6266_v24 = vmax.f32 %v6246_v22, 0.0 }
0x13a2   : > { %v6241_v60 = vadd.f32 %v12715_v1, %v6240_v58  ;;  %v6264_v11 = vmax.f32 %v6238_v14, 0.0 }
0x13a3   : > { %v6267_v3 = vmax.f32 %v6249_v28, 0.0  ;;  %v12779_v22 = vpop.xlane.xlu1 %5001 }
0x13a4   : > { %v6265_v57 = vmax.f32 %v6241_v60, 0.0 }
0x13a5   : > { %v6275_v0 = vpack.c.bf16 %v6267_v3, %v6266_v24 }
0x13a6   : > { %v6274_v33 = vpack.c.bf16 %v6265_v57, %v6264_v11  ;;  %v12757_v53 = vpop.f32.mrb[192].mxu0 }
0x13a7   : > { %14848 = vst [vmem:[#allocation141_spill] sm:$0xff] %v12757_v53  ;;  %v12759_v20 = vpop.f32.mrb[193].mxu0  ;;  %v12781_v8 = vpop.xlane.xlu1 %3541 }
0x13a8   : > { %14849 = vst [vmem:[#allocation140_spill] sm:$0xff] %v12759_v20  ;;  %7868 = vmatprep.mubr.bf16.mxu1 %v6274_v33  ;;  %v12761_v29 = vpop.f32.mrb[194].mxu0 }
0x13a9   : > { %14850 = vst [vmem:[#allocation203_spill] sm:$0xff] %v12761_v29  ;;  %7869 = vmatmul.mubr.bf16.gmra.mrb[188].mxu1 %v6275_v0  ;;  %v12763_v38 = vpop.f32.mrb[195].mxu0  ;;  %v12819_v29 = vld [vmem:[%s13991_s8] ss:$0 sm:$0xff] }
0x13aa   : > { %14851 = vst [vmem:[#allocation142_spill] sm:$0xff] %v12763_v38  ;;  %7896 = vmatprep.mubr.bf16.mxu1 %v12461_v10  ;;  %v14861_v38 = vld [vmem:[#allocation192_spill] sm:$0xff] }
0x13ab   : > { %v12783_v10 = vpop.xlane.xlu1 %3544  ;;  %8342 = vlog2.f32 %v14861_v38 }
0x13ae   : > { %v12766_v59 = vpop.f32.mrb[196].mxu0 }
0x13af   : > { %14852 = vst [vmem:[#allocation81_spill] sm:$0xff] %v12766_v59  ;;  %v12768_v58 = vpop.f32.mrb[197].mxu0  ;;  %v12785_v14 = vpop.xlane.xlu1 %5013 }
0x13b0   : > { %14853 = vst [vmem:[#allocation204_spill] sm:$0xff] %v12768_v58  ;;  %v12770_v28 = vpop.f32.mrb[198].mxu0 }
0x13b1   : > { %14854 = vst [vmem:[#allocation145_spill] sm:$0xff] %v12770_v28  ;;  %v12772_v1 = vpop.f32.mrb[199].mxu0  ;;  %7897 = vmatmul.mubr.bf16.vlgmr.msra.gmra.mrb[192].mxu1 %v12453_v19  ;;  %v12793_v19 = vpop.xlane.xlu0 %3532 }
0x13b2   : > { %14855 = vst [vmem:[#allocation77_spill] sm:$0xff] %v12772_v1  ;;  %7900 = vmatprep.mubr.bf16.mxu1 %v12513_v63 }
0x13b3   : > { %v12787_v60 = vpop.xlane.xlu1 %3550 }
0x13b5   : > { %v8343_v56 = vpop.eup %8342 }
0x13b6   : > { %v2113_v13 = vmul.f32 0.6931472, %v8343_v56 }
0x13b7   : > { %v12789_v24 = vpop.xlane.xlu1 %5019 }
0x13b8   : > { %14856 = vst [vmem:[#allocation82_spill] sm:$0xff] %v12789_v24 }
0x13b9   : > { %7901 = vmatmul.mubr.bf16.gmra.mrb[196].mxu1 %v12508_v32  ;;  %v12797_v32 = vpop.xlane.xlu0 %3538 }
0x13bb   : > { %v12791_v3 = vpop.xlane.xlu1 %2087 }
0x13bc   : > { %14857 = vst [vmem:[#allocation139_spill] sm:$0xff] %v12791_v3  ;;  %v14879_v3 = vld [vmem:[#allocation43_spill] sm:$0xff] }
0x13bd   : > { %v12801_v57 = vpop.xlane.xlu0 %5004 }
0x13bf   : > { %v12795_v63 = vpop.xlane.xlu1 %5022 }
0x13c0   : > { %14858 = vst [vmem:[#allocation207_spill] sm:$0xff] %v12795_v63 }
0x13c1   : > { %v12805_v33 = vpop.xlane.xlu0 %5007 }
0x13c3   : > { %v12799_v11 = vpop.xlane.xlu1 %2090 }
0x13c5   : > { %v12809_v28 = vpop.xlane.xlu0 %5010 }
0x13c7   : > { %v12803_v0 = vpop.xlane.xlu1 %5025 }
0x13c9   : > { %v12813_v59 = vpop.xlane.xlu0 %3547 }
0x13cb   : > { %v12807_v1 = vpop.xlane.xlu1 %2093 }
0x13cc   : > { %14859 = vst [vmem:[#allocation78_spill] sm:$0xff] %v12807_v1  ;;  %v14937_v1 = vld [vmem:[#allocation253_spill] sm:$0xff] }
0x13cd   : > { %v12834_v40 = vpop.xlane.xlu0 %5016 }
0x13cf   : > { %v12811_v58 = vpop.xlane.xlu1 %5028 }
0x13d0   : > { %14860 = vst [vmem:[#allocation146_spill] sm:$0xff] %v12811_v58  ;;  %v14904_v58 = vld [vmem:[#allocation196_spill] sm:$0xff] }
0x13d3   : > { %v12824_v17 = vpop.xlane.xlu1 %2096 }
0x13d4   : > { %14862 = vst [vmem:[#allocation201_spill] sm:$0xff] %v12824_v17 }
0x1449   : > { %v7858_v20 = vpop.f32.mrb[176].mxu1 }
0x144a   : > { %v12822_v53 = vadd.f32 %v12819_v29, %v7858_v20  ;;  %v6310_v6 = vpop.f32.mrb[177].mxu1 }
0x144b   : > { %v7859_v5 = vpop.f32.mrb[178].mxu1  ;;  %v12827_v23 = vadd.f32 %v12819_v29, %v6310_v6 }
0x144c   : > { %v12830_v37 = vadd.f32 %v12819_v29, %v7859_v5  ;;  %v6313_v38 = vpop.f32.mrb[179].mxu1  ;;  %v6379_v7 = vsel %vm938_vm0, %v12822_v53, -inf  ;;  %v12843_v5 = vpop.xlane.xlu1 %5031 }
0x144d   : > { %6380 = vmax.xlane.f32.xlu1 %v6379_v7  ;;  %v12837_v20 = vadd.f32 %v12819_v29, %v6313_v38  ;;  %v6373_v6 = vsel %vm938_vm0, %v12827_v23, -inf  ;;  %14863 = vst [vmem:[#allocation85_spill] sm:$0xff] %v12843_v5  ;;  %v12847_v7 = vpop.xlane.xlu0 %3553  ;;  %v14864_v38 = vld [vmem:[#allocation189_spill] sm:$0xff] }
0x144e   : > { %v6382_v49 = vsel %vm938_vm0, %v12830_v37, -inf  ;;  %8344 = vlog2.f32 %v14864_v38 }
0x144f   : > { %6383 = vmax.xlane.f32.xlu0 %v6382_v49  ;;  %v6376_v27 = vsel %vm938_vm0, %v12837_v20, -inf  ;;  %v14866_v49 = vld [vmem:[#allocation251_spill] sm:$0xff]  ;;  %8346 = vlog2.f32 %v12777_v47 }
0x1450   : > { %v12850_v54 = vpop.xlane.xlu1 %2099  ;;  %v2143_v4 = vadd.f32 %v2113_v13, %v14866_v49  ;;  %v14868_v49 = vld [vmem:[#allocation11_spill] sm:$0xff]  ;;  %8348 = vlog2.f32 %v12793_v19 }
0x1451   : > { %6374 = vmax.xlane.f32.xlu1 %v6373_v6  ;;  %14865 = vst [vmem:[#allocation79_spill] sm:$0xff] %v12850_v54  ;;  %v12853_v39 = vpop.xlane.xlu0 %3556 }
0x1452   : > { %v2159_v12 = vsub.f32 %v14868_v49, %v2143_v4  ;;  %v14873_v49 = vld [vmem:[#allocation250_spill] sm:$0xff] }
0x1453   : > { %6377 = vmax.xlane.f32.xlu0 %v6376_v27 }
0x1454   : > { %v12866_v48 = vpop.xlane.xlu1 %5034 }
0x1455   : > { %14867 = vst [vmem:[#allocation208_spill] sm:$0xff] %v12866_v48  ;;  %v14870_v48 = vld [vmem:[#allocation44_spill] sm:$0xff] }
0x1456   : > { %v2175_v36 = vmul.f32 %v14870_v48, %v2159_v12 }
0x1458   : > { %v8345_v54 = vpop.eup %8344 }
0x1459   : > { %v7862_v15 = vpop.f32.mrb[180].mxu1  ;;  %v2111_v5 = vmul.f32 0.6931472, %v8345_v54 }
0x145a   : > { %v12856_v6 = vadd.f32 %v12819_v29, %v7862_v15  ;;  %v6326_v41 = vpop.f32.mrb[181].mxu1 }
0x145b   : > { %v7863_v63 = vpop.f32.mrb[182].mxu1  ;;  %v12859_v51 = vadd.f32 %v12819_v29, %v6326_v41  ;;  %v12874_v41 = vpop.xlane.xlu0 %3559 }
0x145c   : > { %v12862_v27 = vadd.f32 %v12819_v29, %v7863_v63  ;;  %v6329_v56 = vpop.f32.mrb[183].mxu1  ;;  %v6391_v38 = vsel %vm938_vm0, %v12856_v6, -inf  ;;  %14869 = vst [vmem:[#allocation202_spill] sm:$0xff] %v12874_v41 }
0x145d   : > { %6392 = vmax.xlane.f32.xlu1 %v6391_v38  ;;  %v12869_v13 = vadd.f32 %v12819_v29, %v6329_v56  ;;  %v6385_v63 = vsel %vm938_vm0, %v12859_v51, -inf  ;;  %v12881_v56 = vpop.xlane.xlu1 %2102 }
0x145e   : > { %v6394_v15 = vsel %vm938_vm0, %v12862_v27, -inf  ;;  %14871 = vst [vmem:[#allocation143_spill] sm:$0xff] %v12881_v56 }
0x145f   : > { %6395 = vmax.xlane.f32.xlu0 %v6394_v15  ;;  %v6388_v38 = vsel %vm938_vm0, %v12869_v13, -inf  ;;  %v12884_v4 = vpop.xlane.xlu0 %3562  ;;  %v2193_v15 = vsel %vm938_vm0, %v2175_v36, 0.0 }
0x1460   : > { %14872 = vst [vmem:[#allocation80_spill] sm:$0xff] %v12884_v4  ;;  %v14877_v4 = vld [vmem:[#allocation190_spill] sm:$0xff] }
0x1461   : > { %6386 = vmax.xlane.f32.xlu1 %v6385_v63  ;;  %v2142_v63 = vadd.f32 %v2111_v5, %v14873_v49  ;;  %v12889_v41 = vpop.xlane.xlu1 %5037  ;;  %8350 = vlog2.f32 %v14877_v4 }
0x1462   : > { %14874 = vst [vmem:[#allocation205_spill] sm:$0xff] %v12889_v41  ;;  %8352 = vlog2.f32 %v12779_v22 }
0x1463   : > { %6389 = vmax.xlane.f32.xlu0 %v6388_v38  ;;  %v12894_v38 = vpop.xlane.xlu0 %3565  ;;  %8354 = vlog2.f32 %v12797_v32  ;;  %v14891_v32 = vld [vmem:[#allocation124_spill] sm:$0xff] }
0x1464   : > { %14875 = vst [vmem:[#allocation144_spill] sm:$0xff] %v12894_v38 }
0x1465   : > { %v12911_v41 = vpop.xlane.xlu1 %2105 }
0x1466   : > { %14878 = vst [vmem:[#allocation83_spill] sm:$0xff] %v12911_v41 }
0x1467   : > { %2194 = vadd.xlane.f32.xlu0 %v2193_v15  ;;  %v14876_v15 = vld [vmem:[#allocation13_spill] sm:$0xff] }
0x1468   : > { %v2158_v49 = vsub.f32 %v14876_v15, %v2142_v63  ;;  %v14880_v63 = vld [vmem:[#allocation164_spill] sm:$0xff]  ;;  %v14881_v15 = vld [vmem:[#allocation149_spill] sm:$0xff] }
0x1469   : > { %v4046_v4 = vsub.f32 %v14881_v15, %v14880_v63  ;;  %v14888_v63 = vld [vmem:[#allocation209_spill] sm:$0xff] }
0x146a   : > { %v7866_v9 = vpop.f32.mrb[184].mxu1  ;;  %v2174_v46 = vmul.f32 %v14879_v3, %v2158_v49  ;;  %v12926_v49 = vpop.xlane.xlu1 %5040 }
0x146b   : > { %v12892_v12 = vadd.f32 %v12819_v29, %v7866_v9  ;;  %v6342_v48 = vpop.f32.mrb[185].mxu1  ;;  %v4071_v3 = vmul.f32 1.442695, %v4046_v4  ;;  %14885 = vst [vmem:[#allocation147_spill] sm:$0xff] %v12926_v49 }
0x146c   : > { %v7867_v54 = vpop.f32.mrb[186].mxu1  ;;  %v12897_v47 = vadd.f32 %v12819_v29, %v6342_v48  ;;  %v8347_v48 = vpop.eup %8346  ;;  %v2190_v17 = vsel %vm938_vm0, %v2174_v46, 0.0  ;;  %v14889_v46 = vld [vmem:[#allocation126_spill] sm:$0xff] }
0x146d   : > { %v12900_v36 = vadd.f32 %v12819_v29, %v7867_v54  ;;  %v6345_v19 = vpop.f32.mrb[187].mxu1  ;;  %v6403_v5 = vsel %vm938_vm0, %v12892_v12, -inf  ;;  %v8349_v54 = vpop.eup %8348  ;;  %8356 = vpow2.f32 %v4071_v3  ;;  %v14894_v3 = vld [vmem:[#allocation86_spill] sm:$0xff] }
0x146e   : > { %6404 = vmax.xlane.f32.xlu1 %v6403_v5  ;;  %v12907_v9 = vadd.f32 %v12819_v29, %v6345_v19  ;;  %v6397_v56 = vsel %vm938_vm0, %v12897_v47, -inf  ;;  %v12919_v19 = vpop.xlane.xlu0 %3568  ;;  %v3582_v5 = vmul.f32 0.6931472, %v8347_v48  ;;  %v3580_v41 = vmul.f32 0.6931472, %v8349_v54  ;;  %v12937_v49 = vpop.xlane.xlu1 %2108 }
0x146f   : > { %v6406_v38 = vsel %vm938_vm0, %v12900_v36, -inf  ;;  %14882 = vst [vmem:[#allocation206_spill] sm:$0xff] %v12919_v19  ;;  %8358 = vlog2.f32 %v12801_v57  ;;  %14890 = vst [vmem:[#allocation189_spill] sm:$0xff] %v12937_v49  ;;  %v14903_v19 = vld [vmem:[#allocation274_spill] sm:$0xff] }
0x1470   : > { %6407 = vmax.xlane.f32.xlu0 %v6406_v38  ;;  %v6400_v26 = vsel %vm938_vm0, %v12907_v9, -inf  ;;  %v14883_v38 = vld [vmem:[#allocation101_spill] sm:$0xff]  ;;  %v3612_v22 = vadd.f32 %v3582_v5, %v12425_v43  ;;  %v3611_v48 = vadd.f32 %v3580_v41, %v12421_v50  ;;  %v14893_v41 = vld [vmem:[#allocation102_spill] sm:$0xff] }
0x1471   : > { %v2578_v18 = vsub.f32 %v14884_v61, %v14883_v38 }
0x1472   : > { %6398 = vmax.xlane.f32.xlu1 %v6397_v56  ;;  %v8351_v56 = vpop.eup %8350  ;;  %v12931_v15 = vpop.xlane.xlu0 %3571  ;;  %v3628_v4 = vsub.f32 %v14889_v46, %v3612_v22  ;;  %v3627_v5 = vsub.f32 %v14891_v32, %v3611_v48  ;;  %v14897_v46 = vld [vmem:[#allocation252_spill] sm:$0xff] }
0x1473   : > { %14886 = vst [vmem:[#allocation192_spill] sm:$0xff] %v12931_v15  ;;  %v2604_v54 = vmul.f32 1.442695, %v2578_v18  ;;  %v2115_v38 = vmul.f32 0.6931472, %v8351_v56  ;;  %v2579_v15 = vsub.f32 %v14894_v3, %v14893_v41  ;;  %v14898_v32 = vld [vmem:[#allocation108_spill] sm:$0xff] }
0x1474   : > { %6401 = vmax.xlane.f32.xlu0 %v6400_v26  ;;  %v14887_v26 = vld [vmem:[#allocation225_spill] sm:$0xff]  ;;  %v3644_v49 = vmul.f32 %v14898_v32, %v3628_v4 }
0x1475   : > { %v5514_v61 = vsub.f32 %v14888_v63, %v14887_v26  ;;  %8360 = vpow2.f32 %v2604_v54  ;;  %v2144_v26 = vadd.f32 %v2115_v38, %v14897_v46  ;;  %v14901_v38 = vld [vmem:[#allocation211_spill] sm:$0xff]  ;;  %v12962_v46 = vpop.xlane.xlu1 %5043 }
0x1476   : > { %2191 = vadd.xlane.f32.xlu1 %v2190_v17  ;;  %v8353_v17 = vpop.eup %8352  ;;  %8362 = vlog2.f32 %v12781_v8  ;;  %v12946_v57 = vpop.xlane.xlu0 %3574  ;;  %14902 = vst [vmem:[#allocation250_spill] sm:$0xff] %v12962_v46  ;;  %v3662_v4 = vsel %vm938_vm0, %v3644_v49, 0.0 }
0x1477   : > { %v5538_v63 = vmul.f32 1.442695, %v5514_v61  ;;  %14895 = vst [vmem:[#allocation11_spill] sm:$0xff] %v12946_v57  ;;  %v5049_v48 = vmul.f32 0.6931472, %v8353_v17  ;;  %v14899_v61 = vld [vmem:[#allocation107_spill] sm:$0xff]  ;;  %v8355_v41 = vpop.eup %8354 }
0x1478   : > { %v3643_v3 = vmul.f32 %v14899_v61, %v3627_v5  ;;  %v14900_v57 = vld [vmem:[#allocation226_spill] sm:$0xff]  ;;  %v8357_v24 = vpop.eup %8356  ;;  %v3584_v2 = vmul.f32 0.6931472, %v8355_v41 }
0x1479   : > { %8364 = vpow2.f32 %v5538_v63  ;;  %v5515_v17 = vsub.f32 %v14901_v38, %v14900_v57  ;;  %v5080_v52 = vadd.f32 %v5049_v48, %v14904_v58  ;;  %v8359_v61 = vpop.eup %8358  ;;  %v14910_v38 = vld [vmem:[#allocation148_spill] sm:$0xff] }
0x147a   : > { %8366 = vlog2.f32 %v14903_v19  ;;  %v12968_v5 = vpop.xlane.xlu0 %3577  ;;  %v14909_v19 = vld [vmem:[#allocation165_spill] sm:$0xff] }
0x147b   : > { %14906 = vst [vmem:[#allocation13_spill] sm:$0xff] %v12968_v5  ;;  %v4047_v58 = vsub.f32 %v14910_v38, %v14909_v19  ;;  %v5540_v49 = vmul.f32 1.442695, %v5515_v17  ;;  %v14916_v38 = vld [vmem:[#allocation193_spill] sm:$0xff] }
0x147c   : > { %v7870_v43 = vpop.f32.mrb[188].mxu1  ;;  %v3613_v19 = vadd.f32 %v3584_v2, %v14916_v38  ;;  %v14921_v38 = vld [vmem:[#allocation123_spill] sm:$0xff] }
0x147d   : > { %v12941_v50 = vadd.f32 %v12819_v29, %v7870_v43  ;;  %v6358_v18 = vpop.f32.mrb[189].mxu1  ;;  %v4073_v17 = vmul.f32 1.442695, %v4047_v58 }
0x147e   : > { %v12949_v22 = vadd.f32 %v12819_v29, %v6358_v18  ;;  %v7871_v56 = vpop.f32.mrb[190].mxu1  ;;  %v2606_v18 = vmul.f32 1.442695, %v2579_v15 }
0x147f   : > { %14892 = vst [vmem:[#allocation251_spill] sm:$0xff] %v12941_v50  ;;  %v12952_v54 = vpop.f32.mrb[191].mxu1  ;;  %v6415_v43 = vsel %vm938_vm0, %v12941_v50, -inf  ;;  %v12971_v15 = vadd.f32 %v12819_v29, %v7871_v56  ;;  %v8361_v41 = vpop.eup %8360 }
0x1480   : > { %14896 = vst [vmem:[#allocation44_spill] sm:$0xff] %v12949_v22  ;;  %6416 = vmax.xlane.f32.xlu0 %v6415_v43  ;;  %v6409_v8 = vsel %vm938_vm0, %v12949_v22, -inf  ;;  %v14905_v43 = vld [vmem:[#allocation12_spill] sm:$0xff]  ;;  %8368 = vpow2.f32 %v2606_v18  ;;  %v8363_v46 = vpop.eup %8362 }
0x1481   : > { %6410 = vmax.xlane.f32.xlu1 %v6409_v8  ;;  %v2160_v32 = vsub.f32 %v14905_v43, %v2144_v26  ;;  %14907 = vst [vmem:[#allocation190_spill] sm:$0xff] %v12971_v15  ;;  %v3659_v8 = vsel %vm938_vm0, %v3643_v3, 0.0  ;;  %8370 = vlog2.f32 %v12805_v33  ;;  %v14914_v43 = vld [vmem:[#allocation45_spill] sm:$0xff]  ;;  %v6418_v18 = vsel %vm938_vm0, %v12971_v15, -inf  ;;  %v12993_v33 = vpop.xlane.xlu0 %2617 }
0x1482   : > { %8372 = vpow2.f32 %v5540_v49  ;;  %v14923_v49 = vld [vmem:[#allocation87_spill] sm:$0xff] }
0x1483   : > { %v2176_v3 = vmul.f32 %v14914_v43, %v2160_v32  ;;  %v14918_v43 = vld [vmem:[#allocation171_spill] sm:$0xff]  ;;  %8374 = vpow2.f32 %v4073_v17 }
0x1484   : > { %v12973_v63 = vpop.f32.mrb[192].mxu1  ;;  %3663 = vadd.xlane.f32.xlu0 %v3662_v4  ;;  %v4112_v4 = vsel %vm938_vm0, %v8357_v24, 0.0  ;;  %v3586_v24 = vmul.f32 0.6931472, %v8363_v46  ;;  %8376 = vlog2.f32 %v12783_v10  ;;  %v14930_v10 = vld [vmem:[#allocation109_spill] sm:$0xff] }
0x1485   : > { %14908 = vst [vmem:[#allocation43_spill] sm:$0xff] %v12973_v63  ;;  %v12978_v48 = vpop.f32.mrb[193].mxu1  ;;  %3660 = vadd.xlane.f32.xlu1 %v3659_v8  ;;  %v14915_v63 = vld [vmem:[#allocation258_spill] sm:$0xff]  ;;  %v12989_v8 = vpop.xlane.xlu1 %5046  ;;  %v2196_v32 = vsel %vm938_vm0, %v2176_v3, 0.0 }
0x1486   : > { %14911 = vst [vmem:[#allocation149_spill] sm:$0xff] %v12978_v48  ;;  %v12980_v26 = vpop.f32.mrb[194].mxu1  ;;  %v5096_v57 = vsub.f32 %v14915_v63, %v5080_v52  ;;  %v5051_v48 = vmul.f32 0.6931472, %v8359_v61  ;;  %14917 = vst [vmem:[#allocation126_spill] sm:$0xff] %v12989_v8  ;;  %v8365_v63 = vpop.eup %8364  ;;  %v14928_v3 = vld [vmem:[#allocation278_spill] sm:$0xff] }
0x1487   : > { %14912 = vst [vmem:[#allocation84_spill] sm:$0xff] %v12980_v26  ;;  %v12983_v56 = vpop.f32.mrb[195].mxu1  ;;  %v3629_v26 = vsub.f32 %v14921_v38, %v3613_v19  ;;  %v8367_v58 = vpop.eup %8366 }
0x1488   : > { %14913 = vst [vmem:[#allocation209_spill] sm:$0xff] %v12983_v56  ;;  %4113 = vadd.xlane.f32.xlu0 %v4112_v4  ;;  %v5112_v52 = vmul.f32 %v14918_v43, %v5096_v57  ;;  %v14919_v56 = vld [vmem:[#allocation194_spill] sm:$0xff]  ;;  %v2646_v4 = vsel %vm938_vm0, %v8361_v41, 0.0  ;;  %v3614_v41 = vadd.f32 %v3586_v24, %v14928_v3  ;;  %v2117_v38 = vmul.f32 0.6931472, %v8367_v58  ;;  %v13016_v17 = vpop.xlane.xlu0 %2623 }
0x1489   : > { %6419 = vmax.xlane.f32.xlu1 %v6418_v18  ;;  %v5081_v2 = vadd.f32 %v5051_v48, %v14919_v56  ;;  %v14922_v18 = vld [vmem:[#allocation103_spill] sm:$0xff]  ;;  %v13007_v57 = vpop.xlane.xlu1 %2620  ;;  %v14934_v3 = vld [vmem:[#allocation166_spill] sm:$0xff] }
0x148a   : > { %v2580_v8 = vsub.f32 %v14923_v49, %v14922_v18  ;;  %14925 = vst [vmem:[#allocation252_spill] sm:$0xff] %v13007_v57  ;;  %v14927_v56 = vld [vmem:[#allocation275_spill] sm:$0xff]  ;;  %v5128_v19 = vsel %vm938_vm0, %v5112_v52, 0.0  ;;  %v8369_v43 = vpop.eup %8368  ;;  %v3645_v49 = vmul.f32 %v14930_v10, %v3629_v26  ;;  %v14933_v18 = vld [vmem:[#allocation210_spill] sm:$0xff]  ;;  %v2145_v26 = vadd.f32 %v2117_v38, %v14937_v1 }
0x148b   : > { %8378 = vlog2.f32 %v14927_v56  ;;  %v14932_v56 = vld [vmem:[#allocation227_spill] sm:$0xff]  ;;  %v2649_v58 = vsel %vm938_vm0, %v8369_v43, 0.0  ;;  %v14942_v1 = vld [vmem:[#allocation110_spill] sm:$0xff] }
0x148c   : > { %v12998_v61 = vpop.f32.mrb[196].mxu1  ;;  %2197 = vadd.xlane.f32.xlu0 %v2196_v32  ;;  %v2608_v57 = vmul.f32 1.442695, %v2580_v8  ;;  %v5516_v24 = vsub.f32 %v14933_v18, %v14932_v56  ;;  %8380 = vlog2.f32 %v12809_v28  ;;  %v3665_v8 = vsel %vm938_vm0, %v3645_v49, 0.0  ;;  %v13034_v28 = vpop.xlane.xlu0 %4089 }
0x148d   : > { %14920 = vst [vmem:[#allocation124_spill] sm:$0xff] %v12998_v61  ;;  %v13004_v46 = vpop.f32.mrb[197].mxu1  ;;  %2647 = vadd.xlane.f32.xlu1 %v2646_v4  ;;  %v5578_v4 = vsel %vm938_vm0, %v8365_v63, 0.0  ;;  %v14931_v61 = vld [vmem:[#allocation259_spill] sm:$0xff]  ;;  %14941 = vst [vmem:[#allocation274_spill] sm:$0xff] %v13034_v28 }
0x148e   : > { %14924 = vst [vmem:[#allocation86_spill] sm:$0xff] %v13004_v46  ;;  %v13009_v48 = vpop.f32.mrb[198].mxu1  ;;  %v5097_v46 = vsub.f32 %v14931_v61, %v5081_v2  ;;  %v13029_v2 = vpop.xlane.xlu1 %4086  ;;  %v14939_v61 = vld [vmem:[#allocation172_spill] sm:$0xff]  ;;  %8382 = vpow2.f32 %v2608_v57 }
0x148f   : > { %14926 = vst [vmem:[#allocation108_spill] sm:$0xff] %v13009_v48  ;;  %v13013_v32 = vpop.f32.mrb[199].mxu1  ;;  %v8371_v48 = vpop.eup %8370  ;;  %14938 = vst [vmem:[#allocation211_spill] sm:$0xff] %v13029_v2 }
0x1490   : > { %14929 = vst [vmem:[#allocation107_spill] sm:$0xff] %v13013_v32  ;;  %5129 = vadd.xlane.f32.xlu0 %v5128_v19  ;;  %v14935_v32 = vld [vmem:[#allocation150_spill] sm:$0xff]  ;;  %v14936_v19 = vld [vmem:[#allocation125_spill] sm:$0xff]  ;;  %v8373_v63 = vpop.eup %8372  ;;  %v5053_v10 = vmul.f32 0.6931472, %v8371_v48  ;;  %v5113_v18 = vmul.f32 %v14939_v61, %v5097_v46  ;;  %v14945_v61 = vld [vmem:[#allocation151_spill] sm:$0xff] }
0x1491   : > { %5579 = vadd.xlane.f32.xlu1 %v5578_v4  ;;  %v4048_v52 = vsub.f32 %v14935_v32, %v14934_v3  ;;  %v3630_v5 = vsub.f32 %v14936_v19, %v3614_v41  ;;  %v5542_v4 = vmul.f32 1.442695, %v5516_v24  ;;  %v14940_v32 = vld [vmem:[#allocation276_spill] sm:$0xff]  ;;  %v8375_v43 = vpop.eup %8374  ;;  %v5581_v19 = vsel %vm938_vm0, %v8373_v63, 0.0  ;;  %v14943_v46 = vld [vmem:[#allocation14_spill] sm:$0xff] }
0x1492   : > { %8384 = vlog2.f32 %v14940_v32  ;;  %v8377_v38 = vpop.eup %8376  ;;  %v5131_v49 = vsel %vm938_vm0, %v5113_v18, 0.0  ;;  %v2161_v57 = vsub.f32 %v14943_v46, %v2145_v26  ;;  %v13051_v26 = vpop.xlane.xlu0 %4092  ;;  %v4115_v18 = vsel %vm938_vm0, %v8375_v43, 0.0  ;;  %v14950_v43 = vld [vmem:[#allocation254_spill] sm:$0xff] }
0x1493   : > { %v4075_v41 = vmul.f32 1.442695, %v4048_v52  ;;  %v3646_v48 = vmul.f32 %v14942_v1, %v3630_v5  ;;  %8386 = vpow2.f32 %v5542_v4  ;;  %v13044_v52 = vpop.xlane.xlu1 %2626  ;;  %v3588_v5 = vmul.f32 0.6931472, %v8377_v38  ;;  %v14947_v4 = vld [vmem:[#allocation46_spill] sm:$0xff]  ;;  %v14949_v38 = vld [vmem:[#allocation89_spill] sm:$0xff] }
0x1494   : > { %2650 = vadd.xlane.f32.xlu0 %v2649_v58  ;;  %v5082_v58 = vadd.f32 %v5053_v10, %v12451_v30  ;;  %8388 = vlog2.f32 %v12785_v14  ;;  %v13048_v30 = vadd.f32 %v12819_v29, %v12952_v54 }
0x1495   : > { %3666 = vadd.xlane.f32.xlu1 %v3665_v8  ;;  %v8379_v24 = vpop.eup %8378  ;;  %v14944_v8 = vld [vmem:[#allocation167_spill] sm:$0xff]  ;;  %8390 = vpow2.f32 %v4075_v41  ;;  %v3668_v63 = vsel %vm938_vm0, %v3646_v48, 0.0  ;;  %v14948_v41 = vld [vmem:[#allocation104_spill] sm:$0xff]  ;;  %v3615_v54 = vadd.f32 %v3588_v5, %v12459_v16 }
0x1496   : > { %v4049_v32 = vsub.f32 %v14945_v61, %v14944_v8  ;;  %14946 = vst [vmem:[#allocation196_spill] sm:$0xff] %v13048_v30  ;;  %v2119_v10 = vmul.f32 0.6931472, %v8379_v24  ;;  %v5098_v14 = vsub.f32 %v12184_v34, %v5082_v58  ;;  %v8381_v1 = vpop.eup %8380  ;;  %8392 = vlog2.f32 %v12813_v59  ;;  %v14952_v58 = vld [vmem:[#allocation173_spill] sm:$0xff]  ;;  %v14953_v16 = vld [vmem:[#allocation228_spill] sm:$0xff] }
0x1497   : > { %v6412_v48 = vsel %vm938_vm0, %v13048_v30, -inf  ;;  %v14954_v5 = vld [vmem:[#allocation212_spill] sm:$0xff] }
0x1498   : > { %5582 = vadd.xlane.f32.xlu0 %v5581_v19  ;;  %v2177_v19 = vmul.f32 %v14947_v4, %v2161_v57  ;;  %v4077_v46 = vmul.f32 1.442695, %v4049_v32  ;;  %v8383_v29 = vpop.eup %8382  ;;  %v2146_v61 = vadd.f32 %v2119_v10, %v14950_v43  ;;  %v5055_v57 = vmul.f32 0.6931472, %v8381_v1  ;;  %v13069_v4 = vpop.xlane.xlu0 %5558 }
0x1499   : > { %5132 = vadd.xlane.f32.xlu1 %v5131_v49  ;;  %v2581_v49 = vsub.f32 %v14949_v38, %v14948_v41  ;;  %v5517_v59 = vsub.f32 %v14954_v5, %v14953_v16  ;;  %14955 = vst [vmem:[#allocation148_spill] sm:$0xff] %v13069_v4  ;;  %v2652_v10 = vsel %vm938_vm0, %v8383_v29, 0.0  ;;  %v3631_v1 = vsub.f32 %v12190_v44, %v3615_v54  ;;  %v14959_v29 = vld [vmem:[#allocation255_spill] sm:$0xff]  ;;  %v14979_v41 = vld [vmem:[#allocation213_spill] sm:$0xff] }
0x149a   : > { %v2199_v34 = vsel %vm938_vm0, %v2177_v19, 0.0  ;;  %8394 = vpow2.f32 %v4077_v46 }
0x149b   : > { %v2610_v32 = vmul.f32 1.442695, %v2581_v49  ;;  %v5544_v16 = vmul.f32 1.442695, %v5517_v59 }
0x149c   : > { %3669 = vadd.xlane.f32.xlu0 %v3668_v63  ;;  %v8385_v24 = vpop.eup %8384  ;;  %v13063_v63 = vpop.xlane.xlu1 %5555 }
0x149d   : > { %4116 = vadd.xlane.f32.xlu1 %v4115_v18  ;;  %14951 = vst [vmem:[#allocation12_spill] sm:$0xff] %v13063_v63  ;;  %v5114_v18 = vmul.f32 %v14952_v58, %v5098_v14  ;;  %v8387_v38 = vpop.eup %8386  ;;  %v2121_v3 = vmul.f32 0.6931472, %v8385_v24  ;;  %v14956_v14 = vld [vmem:[#allocation16_spill] sm:$0xff]  ;;  %8396 = vpow2.f32 %v2610_v32 }
0x149e   : > { %v8389_v43 = vpop.eup %8388  ;;  %v2162_v49 = vsub.f32 %v14956_v14, %v2146_v61  ;;  %v14958_v58 = vld [vmem:[#allocation88_spill] sm:$0xff]  ;;  %v5584_v54 = vsel %vm938_vm0, %v8387_v38, 0.0  ;;  %8398 = vpow2.f32 %v5544_v16  ;;  %v14962_v38 = vld [vmem:[#allocation15_spill] sm:$0xff] }
0x149f   : > { %v5134_v19 = vsel %vm938_vm0, %v5114_v18, 0.0  ;;  %v8391_v46 = vpop.eup %8390  ;;  %v2147_v56 = vadd.f32 %v2121_v3, %v14959_v29  ;;  %v5057_v44 = vmul.f32 0.6931472, %v8389_v43  ;;  %v14961_v18 = vld [vmem:[#allocation47_spill] sm:$0xff] }
0x14a0   : > { %6413 = vmax.xlane.f32.xlu0 %v6412_v48  ;;  %v5083_v48 = vadd.f32 %v5055_v57, %v12468_v42  ;;  %v13078_v24 = vpop.xlane.xlu1 %2629  ;;  %v14960_v42 = vld [vmem:[#allocation111_spill] sm:$0xff]  ;;  %v4118_v61 = vsel %vm938_vm0, %v8391_v46, 0.0  ;;  %v2178_v32 = vmul.f32 %v14961_v18, %v2162_v49  ;;  %v8393_v14 = vpop.eup %8392  ;;  %v14964_v49 = vld [vmem:[#allocation174_spill] sm:$0xff] }
0x14a1   : > { %2200 = vadd.xlane.f32.xlu1 %v2199_v34  ;;  %v14957_v34 = vld [vmem:[#allocation105_spill] sm:$0xff]  ;;  %v3647_v57 = vmul.f32 %v14960_v42, %v3631_v1  ;;  %v5084_v3 = vadd.f32 %v5057_v44, %v12474_v45  ;;  %v3590_v29 = vmul.f32 0.6931472, %v8393_v14  ;;  %v14965_v45 = vld [vmem:[#allocation48_spill] sm:$0xff] }
0x14a2   : > { %v2582_v5 = vsub.f32 %v14958_v58, %v14957_v34  ;;  %v2163_v58 = vsub.f32 %v14962_v38, %v2147_v56  ;;  %v2202_v46 = vsel %vm938_vm0, %v2178_v32, 0.0  ;;  %v14966_v32 = vld [vmem:[#allocation175_spill] sm:$0xff] }
0x14a3   : > { %v3671_v43 = vsel %vm938_vm0, %v3647_v57, 0.0  ;;  %v3616_v44 = vadd.f32 %v3590_v29, %v12479_v31 }
0x14a4   : > { %2653 = vadd.xlane.f32.xlu0 %v2652_v10  ;;  %v13083_v10 = vpop.xlane.xlu0 %4095  ;;  %v2612_v59 = vmul.f32 1.442695, %v2582_v5  ;;  %v8395_v1 = vpop.eup %8394  ;;  %v5100_v5 = vsub.f32 %v12202_v25, %v5084_v3 }
0x14a5   : > { %5135 = vadd.xlane.f32.xlu1 %v5134_v19  ;;  %v5099_v19 = vsub.f32 %v12196_v62, %v5083_v48  ;;  %v13091_v42 = vpop.xlane.xlu1 %5561  ;;  %v4121_v16 = vsel %vm938_vm0, %v8395_v1, 0.0  ;;  %v2179_v48 = vmul.f32 %v14965_v45, %v2163_v58  ;;  %v3632_v25 = vsub.f32 %v12208_v35, %v3616_v44  ;;  %v14968_v1 = vld [vmem:[#allocation112_spill] sm:$0xff] }
0x14a6   : > { %14963 = vst [vmem:[#allocation45_spill] sm:$0xff] %v13091_v42  ;;  %8400 = vpow2.f32 %v2612_v59 }
0x14a7   : > { %v8397_v56 = vpop.eup %8396  ;;  %v2205_v18 = vsel %vm938_vm0, %v2179_v48, 0.0  ;;  %v3648_v29 = vmul.f32 %v14968_v1, %v3632_v25 }
0x14a8   : > { %5585 = vadd.xlane.f32.xlu0 %v5584_v54  ;;  %v5115_v54 = vmul.f32 %v14964_v49, %v5099_v19  ;;  %v13095_v62 = vpop.xlane.xlu0 %2632  ;;  %v5116_v19 = vmul.f32 %v14966_v32, %v5100_v5  ;;  %v2655_v59 = vsel %vm938_vm0, %v8397_v56, 0.0  ;;  %v8399_v3 = vpop.eup %8398 }
0x14a9   : > { %4119 = vadd.xlane.f32.xlu1 %v4118_v61  ;;  %v13102_v61 = vpop.xlane.xlu1 %4098  ;;  %v5587_v58 = vsel %vm938_vm0, %v8399_v3, 0.0  ;;  %v3674_v35 = vsel %vm938_vm0, %v3648_v29, 0.0 }
0x14aa   : > { %v5137_v57 = vsel %vm938_vm0, %v5115_v54, 0.0  ;;  %v5140_v31 = vsel %vm938_vm0, %v5116_v19, 0.0 }
0x14ac   : > { %3672 = vadd.xlane.f32.xlu0 %v3671_v43  ;;  %v13106_v14 = vpop.xlane.xlu0 %5564 }
0x14ad   : > { %2203 = vadd.xlane.f32.xlu1 %v2202_v46  ;;  %14967 = vst [vmem:[#allocation258_spill] sm:$0xff] %v13106_v14  ;;  %v13111_v38 = vpop.xlane.xlu1 %2635  ;;  %v14987_v14 = vld [vmem:[#allocation90_spill] sm:$0xff] }
0x14b0   : > { %4122 = vadd.xlane.f32.xlu0 %v4121_v16  ;;  %v8401_v43 = vpop.eup %8400  ;;  %v13115_v46 = vpop.xlane.xlu0 %4101 }
0x14b1   : > { %5138 = vadd.xlane.f32.xlu1 %v5137_v57  ;;  %v2658_v49 = vsel %vm938_vm0, %v8401_v43, 0.0  ;;  %v13119_v54 = vpop.xlane.xlu1 %5567 }
0x14b2   : > { %14969 = vst [vmem:[#allocation193_spill] sm:$0xff] %v13119_v54 }
0x14b4   : > { %2206 = vadd.xlane.f32.xlu0 %v2205_v18  ;;  %v13121_v16 = vpop.xlane.xlu0 %2638 }
0x14b5   : > { %2656 = vadd.xlane.f32.xlu1 %v2655_v59  ;;  %v13123_v45 = vpop.xlane.xlu1 %4104 }
0x14b6   : > { %14970 = vst [vmem:[#allocation171_spill] sm:$0xff] %v13123_v45 }
0x14b8   : > { %5141 = vadd.xlane.f32.xlu0 %v5140_v31  ;;  %v13125_v48 = vpop.xlane.xlu0 %5570 }
0x14b9   : > { %5588 = vadd.xlane.f32.xlu1 %v5587_v58  ;;  %14971 = vst [vmem:[#allocation194_spill] sm:$0xff] %v13125_v48  ;;  %v13127_v5 = vpop.xlane.xlu1 %2641 }
0x14ba   : > { %14972 = vst [vmem:[#allocation123_spill] sm:$0xff] %v13127_v5 }
0x14bc   : > { %2659 = vadd.xlane.f32.xlu0 %v2658_v49  ;;  %v13129_v56 = vpop.xlane.xlu0 %4107 }
0x14bd   : > { %3675 = vadd.xlane.f32.xlu1 %v3674_v35  ;;  %14973 = vst [vmem:[#allocation87_spill] sm:$0xff] %v13129_v56  ;;  %v13131_v44 = vpop.xlane.xlu1 %5573 }
0x14be   : > { %14974 = vst [vmem:[#allocation275_spill] sm:$0xff] %v13131_v44 }
0x14c0   : > { %v13133_v57 = vpop.xlane.xlu0 %2644 }
0x14c1   : > { %14975 = vst [vmem:[#allocation278_spill] sm:$0xff] %v13133_v57  ;;  %v13135_v18 = vpop.xlane.xlu1 %4110  ;;  %v14982_v57 = vld [vmem:[#allocation153_spill] sm:$0xff] }
0x14c2   : > { %14976 = vst [vmem:[#allocation109_spill] sm:$0xff] %v13135_v18 }
0x14c4   : > { %v13137_v32 = vpop.xlane.xlu0 %5576 }
0x14c5   : > { %14977 = vst [vmem:[#allocation259_spill] sm:$0xff] %v13137_v32 }
0x14da   : > { %v13139_v19 = vpop.xlane.xlu1 %6380 }
0x14db   : > { %v6423_v59 = vsub.f32 %v12822_v53, %v13139_v19 }
0x14dc   : > { %v13143_v25 = vpop.xlane.xlu0 %6383 }
0x14dd   : > { %v6441_v3 = vmul.f32 1.442695, %v6423_v59  ;;  %v6424_v31 = vsub.f32 %v12830_v37, %v13143_v25  ;;  %v14978_v59 = vld [vmem:[#allocation229_spill] sm:$0xff] }
0x14de   : > { %v13147_v43 = vpop.xlane.xlu1 %6374  ;;  %v5518_v18 = vsub.f32 %v14979_v41, %v14978_v59 }
0x14df   : > { %8402 = vpow2.f32 %v6441_v3  ;;  %v6443_v58 = vmul.f32 1.442695, %v6424_v31  ;;  %v6421_v1 = vsub.f32 %v12827_v23, %v13147_v43  ;;  %v14980_v31 = vld [vmem:[#allocation277_spill] sm:$0xff] }
0x14e0   : > { %v13151_v29 = vpop.xlane.xlu0 %6377 }
0x14e1   : > { %8404 = vpow2.f32 %v6443_v58  ;;  %v6437_v49 = vmul.f32 1.442695, %v6421_v1  ;;  %v6422_v35 = vsub.f32 %v12837_v20, %v13151_v29 }
0x14e3   : > { %8406 = vpow2.f32 %v6437_v49  ;;  %v6439_v34 = vmul.f32 1.442695, %v6422_v35  ;;  %v5546_v49 = vmul.f32 1.442695, %v5518_v18 }
0x14e4   : > { %8408 = vlog2.f32 %v12787_v60 }
0x14e5   : > { %8410 = vpow2.f32 %v6439_v34  ;;  %v14981_v34 = vld [vmem:[#allocation168_spill] sm:$0xff] }
0x14e6   : > { %8412 = vlog2.f32 %v14980_v31  ;;  %v4050_v56 = vsub.f32 %v14982_v57, %v14981_v34 }
0x14e7   : > { %8414 = vlog2.f32 %v12834_v40  ;;  %v14983_v40 = vld [vmem:[#allocation169_spill] sm:$0xff] }
0x14e9   : > { %v8403_v3 = vpop.eup %8402 }
0x14ea   : > { %v13159_v5 = vpop.xlane.xlu1 %6392  ;;  %v6475_v32 = vsel %vm938_vm0, %v8403_v3, 0.0 }
0x14eb   : > { %v8405_v58 = vpop.eup %8404  ;;  %v6427_v1 = vsub.f32 %v12856_v6, %v13159_v5  ;;  %6476 = vadd.xlane.f32.xlu1 %v6475_v32 }
0x14ec   : > { %v6478_v35 = vsel %vm938_vm0, %v8405_v58, 0.0  ;;  %v13173_v32 = vpop.xlane.xlu0 %6395  ;;  %v4079_v58 = vmul.f32 1.442695, %v4050_v56  ;;  %v14986_v56 = vld [vmem:[#allocation106_spill] sm:$0xff] }
0x14ed   : > { %v8407_v60 = vpop.eup %8406  ;;  %v6449_v41 = vmul.f32 1.442695, %v6427_v1  ;;  %6479 = vadd.xlane.f32.xlu0 %v6478_v35  ;;  %v14984_v1 = vld [vmem:[#allocation152_spill] sm:$0xff]  ;;  %v2583_v28 = vsub.f32 %v14987_v14, %v14986_v56  ;;  %v14991_v56 = vld [vmem:[#allocation230_spill] sm:$0xff] }
0x14ee   : > { %v8409_v31 = vpop.eup %8408  ;;  %v13168_v59 = vpop.xlane.xlu1 %6386  ;;  %v6469_v3 = vsel %vm938_vm0, %v8407_v60, 0.0  ;;  %v4051_v35 = vsub.f32 %v14984_v1, %v14983_v40  ;;  %v14989_v40 = vld [vmem:[#allocation128_spill] sm:$0xff] }
0x14ef   : > { %v8411_v48 = vpop.eup %8410  ;;  %8416 = vpow2.f32 %v6449_v41  ;;  %v6425_v18 = vsub.f32 %v12859_v51, %v13168_v59  ;;  %6470 = vadd.xlane.f32.xlu1 %v6469_v3  ;;  %v3592_v54 = vmul.f32 0.6931472, %v8409_v31  ;;  %v6428_v41 = vsub.f32 %v12862_v27, %v13173_v32 }
0x14f0   : > { %8418 = vpow2.f32 %v5546_v49  ;;  %v6472_v57 = vsel %vm938_vm0, %v8411_v48, 0.0  ;;  %v8413_v44 = vpop.eup %8412  ;;  %v4081_v60 = vmul.f32 1.442695, %v4051_v35  ;;  %v14985_v49 = vld [vmem:[#allocation199_spill] sm:$0xff]  ;;  %v13181_v63 = vpop.xlane.xlu0 %6389  ;;  %v2614_v14 = vmul.f32 1.442695, %v2583_v28 }
0x14f1   : > { %v6445_v34 = vmul.f32 1.442695, %v6425_v18  ;;  %6473 = vadd.xlane.f32.xlu0 %v6472_v57  ;;  %v2123_v3 = vmul.f32 0.6931472, %v8413_v44  ;;  %v3617_v4 = vadd.f32 %v3592_v54, %v14985_v49  ;;  %v8415_v48 = vpop.eup %8414  ;;  %v6451_v18 = vmul.f32 1.442695, %v6428_v41 }
0x14f2   : > { %v14988_v57 = vld [vmem:[#allocation256_spill] sm:$0xff]  ;;  %v5059_v35 = vmul.f32 0.6931472, %v8415_v48  ;;  %v14990_v49 = vld [vmem:[#allocation73_spill] sm:$0xff] }
0x14f3   : > { %8420 = vpow2.f32 %v6445_v34  ;;  %v6426_v34 = vsub.f32 %v12869_v13, %v13181_v63  ;;  %v3633_v54 = vsub.f32 %v14989_v40, %v3617_v4  ;;  %v14994_v40 = vld [vmem:[#allocation197_spill] sm:$0xff] }
0x14f4   : > { %8422 = vpow2.f32 %v4079_v58  ;;  %v2148_v58 = vadd.f32 %v2123_v3, %v14988_v57  ;;  %v13196_v2 = vpop.xlane.xlu0 %2194  ;;  %v14995_v28 = vld [vmem:[#allocation113_spill] sm:$0xff] }
0x14f5   : > { %8424 = vpow2.f32 %v4081_v60  ;;  %v14992_v60 = vld [vmem:[#allocation215_spill] sm:$0xff]  ;;  %14993 = vst [vmem:[#allocation210_spill] sm:$0xff] %v13196_v2  ;;  %v6447_v3 = vmul.f32 1.442695, %v6426_v34 }
0x14f6   : > { %8426 = vlog2.f32 %v14990_v49  ;;  %v5519_v41 = vsub.f32 %v14992_v60, %v14991_v56  ;;  %v14996_v49 = vld [vmem:[#allocation17_spill] sm:$0xff] }
0x14f7   : > { %8428 = vlog2.f32 %v12993_v33  ;;  %v2164_v60 = vsub.f32 %v14996_v49, %v2148_v58 }
0x14f8   : > { %8430 = vpow2.f32 %v6451_v18  ;;  %v5548_v18 = vmul.f32 1.442695, %v5519_v41 }
0x14f9   : > { %v8417_v1 = vpop.eup %8416  ;;  %8432 = vpow2.f32 %v2614_v14 }
0x14fa   : > { %v8419_v31 = vpop.eup %8418  ;;  %v6487_v44 = vsel %vm938_vm0, %v8417_v1, 0.0  ;;  %v5085_v1 = vadd.f32 %v5059_v35, %v14994_v40  ;;  %8434 = vpow2.f32 %v6447_v3  ;;  %v14998_v40 = vld [vmem:[#allocation130_spill] sm:$0xff] }
0x14fb   : > { %v13191_v42 = vpop.xlane.xlu1 %6404  ;;  %6488 = vadd.xlane.f32.xlu0 %v6487_v44  ;;  %v5590_v4 = vsel %vm938_vm0, %v8419_v31, 0.0  ;;  %v3649_v44 = vmul.f32 %v14995_v28, %v3633_v54  ;;  %v14997_v54 = vld [vmem:[#allocation49_spill] sm:$0xff]  ;;  %8436 = vpow2.f32 %v5548_v18 }
0x14fc   : > { %v6431_v48 = vsub.f32 %v12892_v12, %v13191_v42  ;;  %v2180_v58 = vmul.f32 %v14997_v54, %v2164_v60  ;;  %v5101_v28 = vsub.f32 %v14998_v40, %v5085_v1 }
0x14fd   : > { %v8421_v8 = vpop.eup %8420  ;;  %v13207_v34 = vpop.xlane.xlu0 %6407  ;;  %v3677_v35 = vsel %vm938_vm0, %v3649_v44, 0.0  ;;  %v14999_v44 = vld [vmem:[#allocation176_spill] sm:$0xff] }
0x14fe   : > { %v6481_v57 = vsel %vm938_vm0, %v8421_v8, 0.0  ;;  %v8423_v56 = vpop.eup %8422  ;;  %v6457_v2 = vmul.f32 1.442695, %v6431_v48  ;;  %v6432_v41 = vsub.f32 %v12900_v36, %v13207_v34  ;;  %v5117_v60 = vmul.f32 %v14999_v44, %v5101_v28  ;;  %v15000_v28 = vld [vmem:[#allocation28_spill] sm:$0xff] }
0x14ff   : > { %v13205_v33 = vpop.xlane.xlu1 %6398  ;;  %6482 = vadd.xlane.f32.xlu1 %v6481_v57  ;;  %5591 = vadd.xlane.f32.xlu0 %v5590_v4  ;;  %v4124_v8 = vsel %vm938_vm0, %v8423_v56, 0.0  ;;  %v8425_v49 = vpop.eup %8424  ;;  %v2208_v56 = vsel %vm938_vm0, %v2180_v58, 0.0 }
0x1500   : > { %v6429_v31 = vsub.f32 %v12897_v47, %v13205_v33  ;;  %v8427_v14 = vpop.eup %8426  ;;  %8438 = vpow2.f32 %v6457_v2  ;;  %v4127_v57 = vsel %vm938_vm0, %v8425_v49, 0.0  ;;  %v5143_v40 = vsel %vm938_vm0, %v5117_v60, 0.0 }
0x1501   : > { %v8429_v48 = vpop.eup %8428  ;;  %v13217_v4 = vpop.xlane.xlu0 %6401 }
0x1502   : > { %v6453_v3 = vmul.f32 1.442695, %v6429_v31  ;;  %v8431_v1 = vpop.eup %8430  ;;  %v2665_v18 = vmul.f32 0.6931472, %v8429_v48  ;;  %v6430_v2 = vsub.f32 %v12907_v9, %v13217_v4 }
0x1503   : > { %4125 = vadd.xlane.f32.xlu1 %v4124_v8  ;;  %3678 = vadd.xlane.f32.xlu0 %v3677_v35  ;;  %v1084_v8 = vmul.f32 0.6931472, %v8427_v14  ;;  %v6459_v35 = vmul.f32 1.442695, %v6432_v41  ;;  %v8433_v31 = vpop.eup %8432  ;;  %v2192_v54 = vpop.xlane.xlu1 %2191  ;;  %v6490_v58 = vsel %vm938_vm0, %v8431_v1, 0.0 }
0x1504   : > { %8440 = vpow2.f32 %v6453_v3  ;;  %v8435_v45 = vpop.eup %8434  ;;  %v6455_v14 = vmul.f32 1.442695, %v6430_v2  ;;  %v2696_v3 = vadd.f32 %v2665_v18, %v14787_v21  ;;  %v2661_v44 = vsel %vm938_vm0, %v8433_v31, 0.0 }
0x1505   : > { %8442 = vlog2.f32 %v12847_v7  ;;  %v1115_v49 = vadd.f32 %v1084_v8, %v15000_v28  ;;  %v8437_v48 = vpop.eup %8436  ;;  %v6484_v60 = vsel %vm938_vm0, %v8435_v45, 0.0 }
0x1506   : > { %8444 = vpow2.f32 %v6459_v35  ;;  %v2712_v2 = vsub.f32 %v14787_v21, %v2696_v3  ;;  %v5593_v31 = vsel %vm938_vm0, %v8437_v48, 0.0 }
0x1507   : > { %2209 = vadd.xlane.f32.xlu1 %v2208_v56  ;;  %4128 = vadd.xlane.f32.xlu0 %v4127_v57  ;;  %v1131_v7 = vsub.f32 %v15000_v28, %v1115_v49  ;;  %8446 = vpow2.f32 %v6455_v14  ;;  %v15005_v14 = vld [vmem:[#allocation237_spill] sm:$0xff] }
0x1509   : > { %v2238_v28 = vsub.f32 %v1131_v7, %v2192_v54 }
0x150a   : > { %v8439_v1 = vpop.eup %8438 }
0x150b   : > { %5144 = vadd.xlane.f32.xlu1 %v5143_v40  ;;  %6491 = vadd.xlane.f32.xlu0 %v6490_v58  ;;  %v15004_v40 = vld [vmem:[#allocation236_spill] sm:$0xff]  ;;  %v6499_v45 = vsel %vm938_vm0, %v8439_v1, 0.0 }
0x150c   : > { %8448 = vlog2.f32 %v15004_v40 }
0x150d   : > { %v13228_v41 = vpop.xlane.xlu0 %6416  ;;  %8450 = vlog2.f32 %v12853_v39 }
0x150e   : > { %15001 = vst [vmem:[#allocation150_spill] sm:$0xff] %v13228_v41  ;;  %v6435_v56 = vsub.f32 %v12941_v50, %v13228_v41  ;;  %v13233_v57 = vpop.xlane.xlu1 %6410  ;;  %8452 = vlog2.f32 %v15005_v14  ;;  %v15027_v41 = vld [vmem:[#allocation201_spill] sm:$0xff] }
0x150f   : > { %15002 = vst [vmem:[#allocation125_spill] sm:$0xff] %v13233_v57  ;;  %2662 = vadd.xlane.f32.xlu1 %v2661_v44  ;;  %6485 = vadd.xlane.f32.xlu0 %v6484_v60  ;;  %v6433_v18 = vsub.f32 %v12949_v22, %v13233_v57  ;;  %v8441_v44 = vpop.eup %8440  ;;  %v15007_v60 = vld [vmem:[#allocation214_spill] sm:$0xff] }
0x1510   : > { %v6465_v8 = vmul.f32 1.442695, %v6435_v56  ;;  %v15006_v56 = vld [vmem:[#allocation231_spill] sm:$0xff]  ;;  %v8443_v48 = vpop.eup %8442  ;;  %v6493_v39 = vsel %vm938_vm0, %v8441_v44, 0.0 }
0x1511   : > { %v13240_v35 = vpop.xlane.xlu0 %3663  ;;  %v6461_v21 = vmul.f32 1.442695, %v6433_v18  ;;  %v8445_v54 = vpop.eup %8444 }
0x1512   : > { %15003 = vst [vmem:[#allocation253_spill] sm:$0xff] %v13240_v35  ;;  %v3661_v58 = vpop.xlane.xlu1 %3660  ;;  %v5520_v35 = vsub.f32 %v15007_v60, %v15006_v56  ;;  %8454 = vpow2.f32 %v6465_v8 }
0x1513   : > { %v3707_v49 = vsub.f32 %v2712_v2, %v3661_v58  ;;  %5594 = vadd.xlane.f32.xlu1 %v5593_v31  ;;  %6500 = vadd.xlane.f32.xlu0 %v6499_v45  ;;  %8456 = vlog2.f32 %v12799_v11  ;;  %v3594_v58 = vmul.f32 0.6931472, %v8443_v48  ;;  %v6502_v31 = vsel %vm938_vm0, %v8445_v54, 0.0  ;;  %v8447_v45 = vpop.eup %8446  ;;  %v15016_v54 = vld [vmem:[#allocation78_spill] sm:$0xff] }
0x1514   : > { %8458 = vlog2.f32 %v13016_v17  ;;  %v5550_v8 = vmul.f32 1.442695, %v5520_v35  ;;  %v6496_v14 = vsel %vm938_vm0, %v8447_v45, 0.0 }
0x1515   : > { %v13250_v3 = vadd.f32 %v3707_v49, %v2238_v28  ;;  %v13252_v40 = vpop.xlane.xlu0 %4113  ;;  %8460 = vlog2.f32 %v13044_v52  ;;  %v15013_v28 = vld [vmem:[#allocation238_spill] sm:$0xff]  ;;  %v3618_v49 = vadd.f32 %v3594_v58, %v12501_v55  ;;  %v15018_v58 = vld [vmem:[#allocation129_spill] sm:$0xff] }
0x1516   : > { %15009 = vst [vmem:[#allocation276_spill] sm:$0xff] %v13252_v40  ;;  %v13255_v1 = vpop.xlane.xlu1 %6419  ;;  %8462 = vpow2.f32 %v6461_v21  ;;  %v8449_v17 = vpop.eup %8448  ;;  %v15015_v21 = vld [vmem:[#allocation195_spill] sm:$0xff]  ;;  %v15022_v40 = vld [vmem:[#allocation154_spill] sm:$0xff] }
0x1517   : > { %15008 = vst [vmem:[#allocation172_spill] sm:$0xff] %v13250_v3  ;;  %15010 = vst [vmem:[#allocation110_spill] sm:$0xff] %v13255_v1  ;;  %v6436_v7 = vsub.f32 %v12971_v15, %v13255_v1  ;;  %6494 = vadd.xlane.f32.xlu0 %v6493_v39  ;;  %8464 = vlog2.f32 %v12803_v0  ;;  %v8451_v44 = vpop.eup %8450  ;;  %v1088_v45 = vmul.f32 0.6931472, %v8449_v17 }
0x1518   : > { %v8453_v35 = vpop.eup %8452  ;;  %v3596_v39 = vmul.f32 0.6931472, %v8451_v44  ;;  %v15019_v44 = vld [vmem:[#allocation82_spill] sm:$0xff] }
0x1519   : > { %v6467_v18 = vmul.f32 1.442695, %v6436_v7  ;;  %v13262_v2 = vpop.xlane.xlu0 %2197  ;;  %v1090_v56 = vmul.f32 0.6931472, %v8453_v35 }
0x151a   : > { %v13265_v11 = vpop.xlane.xlu1 %2647 }
0x151b   : > { %15011 = vst [vmem:[#allocation14_spill] sm:$0xff] %v13265_v11  ;;  %8466 = vpow2.f32 %v6467_v18  ;;  %6503 = vadd.xlane.f32.xlu0 %v6502_v31  ;;  %v3634_v31 = vsub.f32 %v15018_v58, %v3618_v49 }
0x151c   : > { %8468 = vlog2.f32 %v13051_v26  ;;  %v8455_v60 = vpop.eup %8454 }
0x151d   : > { %8470 = vpow2.f32 %v5550_v8  ;;  %v13269_v52 = vpop.xlane.xlu0 %5129  ;;  %v8457_v48 = vpop.eup %8456  ;;  %v6511_v55 = vsel %vm938_vm0, %v8455_v60, 0.0 }
0x151e   : > { %15012 = vst [vmem:[#allocation151_spill] sm:$0xff] %v13269_v52  ;;  %8472 = vlog2.f32 %v15013_v28  ;;  %v13273_v0 = vpop.xlane.xlu1 %5579  ;;  %v8459_v26 = vpop.eup %8458  ;;  %v15023_v52 = vld [vmem:[#allocation146_spill] sm:$0xff]  ;;  %v2129_v35 = vmul.f32 0.6931472, %v8457_v48  ;;  %v15030_v48 = vld [vmem:[#allocation132_spill] sm:$0xff] }
0x151f   : > { %15014 = vst [vmem:[#allocation46_spill] sm:$0xff] %v13273_v0  ;;  %8474 = vlog2.f32 %v15015_v21  ;;  %6497 = vadd.xlane.f32.xlu0 %v6496_v14  ;;  %v8461_v8 = vpop.eup %8460  ;;  %v15020_v21 = vld [vmem:[#allocation198_spill] sm:$0xff]  ;;  %v2669_v60 = vmul.f32 0.6931472, %v8459_v26 }
0x1520   : > { %8476 = vlog2.f32 %v15016_v54  ;;  %v8463_v28 = vpop.eup %8462  ;;  %v3619_v54 = vadd.f32 %v3596_v39, %v15020_v21  ;;  %v2671_v50 = vmul.f32 0.6931472, %v8461_v8 }
0x1521   : > { %v13278_v7 = vpop.xlane.xlu0 %2650  ;;  %8478 = vlog2.f32 %v13078_v24  ;;  %v8465_v14 = vpop.eup %8464 }
0x1522   : > { %15017 = vst [vmem:[#allocation89_spill] sm:$0xff] %v13278_v7  ;;  %v13280_v18 = vpop.xlane.xlu1 %3666  ;;  %8480 = vlog2.f32 %v15019_v44  ;;  %v15021_v7 = vld [vmem:[#allocation170_spill] sm:$0xff] }
0x1523   : > { %6512 = vadd.xlane.f32.xlu0 %v6511_v55  ;;  %v4052_v3 = vsub.f32 %v15022_v40, %v15021_v7  ;;  %8482 = vlog2.f32 %v15023_v52  ;;  %v6505_v55 = vsel %vm938_vm0, %v8463_v28, 0.0  ;;  %v15026_v44 = vld [vmem:[#allocation114_spill] sm:$0xff]  ;;  %v15028_v40 = vld [vmem:[#allocation27_spill] sm:$0xff]  ;;  %v15029_v52 = vld [vmem:[#allocation29_spill] sm:$0xff] }
0x1524   : > { %v3650_v39 = vmul.f32 %v15026_v44, %v3634_v31  ;;  %8484 = vlog2.f32 %v15027_v41  ;;  %v1117_v7 = vadd.f32 %v1088_v45, %v15028_v40  ;;  %v1118_v26 = vadd.f32 %v1090_v56, %v15029_v52  ;;  %v15031_v28 = vld [vmem:[#allocation93_spill] sm:$0xff]  ;;  %v15032_v31 = vld [vmem:[#allocation94_spill] sm:$0xff] }
0x1525   : > { %v8467_v0 = vpop.eup %8466  ;;  %v13290_v49 = vpop.xlane.xlu0 %5582  ;;  %8486 = vlog2.f32 %v13083_v10  ;;  %v2698_v22 = vadd.f32 %v2669_v60, %v15031_v28  ;;  %v2699_v44 = vadd.f32 %v2671_v50, %v15032_v31  ;;  %v13304_v41 = vmul.f32 1.442695, %v4052_v3  ;;  %v15033_v45 = vld [vmem:[#allocation270_spill] sm:$0xff]  ;;  %v15036_v3 = vld [vmem:[#allocation139_spill] sm:$0xff] }
0x1526   : > { %15024 = vst [vmem:[#allocation254_spill] sm:$0xff] %v13290_v49  ;;  %v8469_v17 = vpop.eup %8468  ;;  %v13292_v58 = vpop.xlane.xlu1 %5132  ;;  %v6514_v24 = vsel %vm938_vm0, %v8467_v0, 0.0  ;;  %v5065_v49 = vmul.f32 0.6931472, %v8465_v14  ;;  %v3680_v56 = vsel %vm938_vm0, %v3650_v39, 0.0  ;;  %v1134_v50 = vsub.f32 %v15029_v52, %v1118_v26  ;;  %v15039_v39 = vld [vmem:[#allocation85_spill] sm:$0xff] }
0x1527   : > { %15025 = vst [vmem:[#allocation173_spill] sm:$0xff] %v13292_v58  ;;  %v8471_v21 = vpop.eup %8470  ;;  %6515 = vadd.xlane.f32.xlu1 %v6514_v24  ;;  %6506 = vadd.xlane.f32.xlu0 %v6505_v55  ;;  %v3635_v58 = vsub.f32 %v15030_v48, %v3619_v54  ;;  %v4138_v11 = vmul.f32 0.6931472, %v8469_v17  ;;  %v2151_v24 = vadd.f32 %v2129_v35, %v15033_v45  ;;  %v15035_v54 = vld [vmem:[#allocation239_spill] sm:$0xff]  ;;  %v15037_v48 = vld [vmem:[#allocation280_spill] sm:$0xff] }
0x1528   : > { %v8473_v8 = vpop.eup %8472  ;;  %v5596_v14 = vsel %vm938_vm0, %v8471_v21, 0.0  ;;  %8488 = vlog2.f32 %v15035_v54  ;;  %v1133_v17 = vsub.f32 %v15028_v40, %v1117_v7  ;;  %v5088_v35 = vadd.f32 %v5065_v49, %v15037_v48  ;;  %v15038_v45 = vld [vmem:[#allocation115_spill] sm:$0xff]  ;;  %v15041_v7 = vld [vmem:[#allocation157_spill] sm:$0xff] }
0x1529   : > { %v8475_v0 = vpop.eup %8474  ;;  %v3670_v15 = vpop.xlane.xlu0 %3669  ;;  %v1092_v57 = vmul.f32 0.6931472, %v8473_v8  ;;  %8490 = vlog2.f32 %v15036_v3  ;;  %v2714_v21 = vsub.f32 %v15031_v28, %v2698_v22  ;;  %v2715_v8 = vsub.f32 %v15032_v31, %v2699_v44  ;;  %v15042_v26 = vld [vmem:[#allocation79_spill] sm:$0xff] }
0x152a   : > { %v13307_v55 = vpop.xlane.xlu1 %4116  ;;  %v8477_v10 = vpop.eup %8476  ;;  %v2125_v60 = vmul.f32 0.6931472, %v8475_v0  ;;  %8492 = vlog2.f32 %v15039_v39  ;;  %v4167_v40 = vadd.f32 %v4138_v11, %v15041_v7 }
0x152b   : > { %15034 = vst [vmem:[#allocation212_spill] sm:$0xff] %v13307_v55  ;;  %3681 = vadd.xlane.f32.xlu1 %v3680_v56  ;;  %v3651_v55 = vmul.f32 %v15038_v45, %v3635_v58  ;;  %v8479_v1 = vpop.eup %8478  ;;  %v2131_v52 = vmul.f32 0.6931472, %v8477_v10  ;;  %8494 = vlog2.f32 %v15042_v26  ;;  %v15043_v58 = vld [vmem:[#allocation19_spill] sm:$0xff]  ;;  %v3709_v22 = vsub.f32 %v2714_v21, %v13280_v18 }
0x152c   : > { %v8481_v56 = vpop.eup %8480  ;;  %v2167_v3 = vsub.f32 %v15043_v58, %v2151_v24  ;;  %8496 = vlog2.f32 %v13102_v61  ;;  %v3710_v28 = vsub.f32 %v2715_v8, %v3670_v15  ;;  %v2673_v44 = vmul.f32 0.6931472, %v8479_v1  ;;  %v15044_v45 = vld [vmem:[#allocation31_spill] sm:$0xff]  ;;  %v15045_v58 = vld [vmem:[#allocation261_spill] sm:$0xff] }
0x152d   : > { %v13320_v54 = vpop.xlane.xlu0 %6413  ;;  %v8483_v48 = vpop.eup %8482  ;;  %v3683_v10 = vsel %vm938_vm0, %v3651_v55, 0.0  ;;  %v1119_v39 = vadd.f32 %v1092_v57, %v15044_v45  ;;  %v4183_v61 = vsub.f32 %v15041_v7, %v4167_v40  ;;  %v5104_v18 = vsub.f32 %v15045_v58, %v5088_v35  ;;  %v15047_v55 = vld [vmem:[#allocation52_spill] sm:$0xff]  ;;  %v15048_v57 = vld [vmem:[#allocation257_spill] sm:$0xff]  ;;  %v15050_v35 = vld [vmem:[#allocation95_spill] sm:$0xff] }
0x152e   : > { %15040 = vst [vmem:[#allocation16_spill] sm:$0xff] %v13320_v54  ;;  %v6434_v49 = vsub.f32 %v13048_v30, %v13320_v54  ;;  %v2201_v0 = vpop.xlane.xlu1 %2200  ;;  %v8485_v26 = vpop.eup %8484  ;;  %v2240_v30 = vsub.f32 %v1133_v17, %v13262_v2  ;;  %v5067_v1 = vmul.f32 0.6931472, %v8483_v48  ;;  %v2183_v8 = vmul.f32 %v15047_v55, %v2167_v3  ;;  %v15059_v55 = vld [vmem:[#allocation232_spill] sm:$0xff] }
0x152f   : > { %v2241_v31 = vsub.f32 %v1134_v50, %v2201_v0  ;;  %5597 = vadd.xlane.f32.xlu1 %v5596_v14  ;;  %v8487_v15 = vpop.eup %8486  ;;  %v15046_v50 = vld [vmem:[#allocation188_spill] sm:$0xff]  ;;  %v15049_v0 = vld [vmem:[#allocation207_spill] sm:$0xff]  ;;  %v2700_v7 = vadd.f32 %v2673_v44, %v15050_v35 }
0x1530   : > { %v6463_v11 = vmul.f32 1.442695, %v6434_v49  ;;  %v2152_v14 = vadd.f32 %v2131_v52, %v15046_v50  ;;  %v2149_v49 = vadd.f32 %v2125_v60, %v15048_v57  ;;  %v3725_v2 = vadd.f32 %v3709_v22, %v2240_v30  ;;  %v15051_v52 = vld [vmem:[#allocation208_spill] sm:$0xff]  ;;  %v15054_v60 = vld [vmem:[#allocation179_spill] sm:$0xff] }
0x1531   : > { %v13332_v54 = vadd.f32 %v3710_v28, %v2241_v31  ;;  %v13334_v24 = vpop.xlane.xlu0 %2653  ;;  %v5061_v28 = vmul.f32 0.6931472, %v8481_v56  ;;  %v2133_v31 = vmul.f32 0.6931472, %v8485_v26  ;;  %v4140_v48 = vmul.f32 0.6931472, %v8487_v15 }
0x1532   : > { %8498 = vpow2.f32 %v6463_v11  ;;  %v5136_v21 = vpop.xlane.xlu1 %5135  ;;  %v8489_v40 = vpop.eup %8488  ;;  %v5120_v58 = vmul.f32 %v15054_v60, %v5104_v18  ;;  %v15055_v30 = vld [vmem:[#allocation283_spill] sm:$0xff]  ;;  %v2217_v56 = vsel %vm938_vm0, %v2183_v8, 0.0  ;;  %v15060_v57 = vld [vmem:[#allocation216_spill] sm:$0xff] }
0x1533   : > { %8500 = vlog2.f32 %v15049_v0  ;;  %v5178_v17 = vsub.f32 %v4183_v61, %v5136_v21  ;;  %3684 = vadd.xlane.f32.xlu1 %v3683_v10  ;;  %v8491_v50 = vpop.eup %8490  ;;  %v5089_v22 = vadd.f32 %v5067_v1, %v15055_v30  ;;  %v15058_v61 = vld [vmem:[#allocation18_spill] sm:$0xff]  ;;  %v5521_v0 = vsub.f32 %v15060_v57, %v15059_v55  ;;  %v15061_v18 = vld [vmem:[#allocation200_spill] sm:$0xff]  ;;  %v15063_v8 = vld [vmem:[#allocation143_spill] sm:$0xff] }
0x1534   : > { %8502 = vlog2.f32 %v13095_v62  ;;  %v15057_v62 = vld [vmem:[#allocation21_spill] sm:$0xff]  ;;  %v8493_v44 = vpop.eup %8492  ;;  %v2165_v15 = vsub.f32 %v15058_v61, %v2149_v49  ;;  %v1135_v30 = vsub.f32 %v15044_v45, %v1119_v39 }
0x1535   : > { %8504 = vlog2.f32 %v15051_v52  ;;  %v13345_v11 = vadd.f32 %v5178_v17, %v3725_v2  ;;  %v13347_v3 = vpop.xlane.xlu0 %5585  ;;  %v2168_v26 = vsub.f32 %v15057_v62, %v2152_v14  ;;  %v8495_v21 = vpop.eup %8494  ;;  %v5086_v2 = vadd.f32 %v5061_v28, %v15061_v18  ;;  %v15062_v17 = vld [vmem:[#allocation187_spill] sm:$0xff]  ;;  %v15065_v57 = vld [vmem:[#allocation53_spill] sm:$0xff]  ;;  %v15066_v28 = vld [vmem:[#allocation262_spill] sm:$0xff] }
0x1536   : > { %15053 = vst [vmem:[#allocation255_spill] sm:$0xff] %v13347_v3  ;;  %v13351_v10 = vpop.xlane.xlu1 %4119  ;;  %8506 = vpow2.f32 %v13304_v41  ;;  %v2153_v1 = vadd.f32 %v2133_v31, %v15062_v17  ;;  %v2716_v52 = vsub.f32 %v15050_v35, %v2700_v7  ;;  %v8497_v60 = vpop.eup %8496  ;;  %v5152_v41 = vsel %vm938_vm0, %v5120_v58, 0.0  ;;  %v15067_v17 = vld [vmem:[#allocation202_spill] sm:$0xff]  ;;  %v15069_v58 = vld [vmem:[#allocation127_spill] sm:$0xff] }
0x1537   : > { %15052 = vst [vmem:[#allocation88_spill] sm:$0xff] %v13345_v11  ;;  %15056 = vst [vmem:[#allocation111_spill] sm:$0xff] %v13351_v10  ;;  %2218 = vadd.xlane.f32.xlu1 %v2217_v56  ;;  %8508 = vlog2.f32 %v15063_v8  ;;  %v15064_v56 = vld [vmem:[#allocation158_spill] sm:$0xff]  ;;  %v5069_v62 = vmul.f32 0.6931472, %v8493_v44  ;;  %v2184_v55 = vmul.f32 %v15065_v57, %v2168_v26  ;;  %v5105_v18 = vsub.f32 %v15066_v28, %v5089_v22 }
0x1538   : > { %v4168_v49 = vadd.f32 %v4140_v48, %v15064_v56  ;;  %v2127_v31 = vmul.f32 0.6931472, %v8491_v50  ;;  %8510 = vlog2.f32 %v15067_v17  ;;  %v15068_v7 = vld [vmem:[#allocation50_spill] sm:$0xff]  ;;  %v2135_v45 = vmul.f32 0.6931472, %v8495_v21  ;;  %v15074_v17 = vld [vmem:[#allocation269_spill] sm:$0xff] }
0x1539   : > { %v3673_v14 = vpop.xlane.xlu0 %3672  ;;  %v2181_v8 = vmul.f32 %v15068_v7, %v2165_v15  ;;  %v4142_v39 = vmul.f32 0.6931472, %v8497_v60  ;;  %v5102_v11 = vsub.f32 %v15069_v58, %v5086_v2  ;;  %v15070_v48 = vld [vmem:[#allocation22_spill] sm:$0xff]  ;;  %v15072_v15 = vld [vmem:[#allocation284_spill] sm:$0xff]  ;;  %v2220_v2 = vsel %vm938_vm0, %v2184_v55, 0.0  ;;  %v15077_v58 = vld [vmem:[#allocation177_spill] sm:$0xff] }
0x153a   : > { %v3711_v61 = vsub.f32 %v2716_v52, %v3673_v14  ;;  %v2204_v10 = vpop.xlane.xlu1 %2203  ;;  %v2169_v44 = vsub.f32 %v15070_v48, %v2153_v1  ;;  %v15071_v14 = vld [vmem:[#allocation205_spill] sm:$0xff]  ;;  %v4184_v50 = vsub.f32 %v15064_v56, %v4168_v49  ;;  %v15073_v60 = vld [vmem:[#allocation180_spill] sm:$0xff]  ;;  %v2150_v7 = vadd.f32 %v2127_v31, %v15074_v17  ;;  %v15076_v49 = vld [vmem:[#allocation159_spill] sm:$0xff] }
0x153b   : > { %v2242_v35 = vsub.f32 %v1135_v30, %v2204_v10  ;;  %5153 = vadd.xlane.f32.xlu1 %v5152_v41  ;;  %8512 = vlog2.f32 %v15071_v14  ;;  %v1094_v30 = vmul.f32 0.6931472, %v8489_v40  ;;  %v5090_v41 = vadd.f32 %v5069_v62, %v15072_v15  ;;  %v15078_v48 = vld [vmem:[#allocation54_spill] sm:$0xff]  ;;  %v15079_v55 = vld [vmem:[#allocation271_spill] sm:$0xff]  ;;  %v15084_v17 = vld [vmem:[#allocation144_spill] sm:$0xff] }
0x153c   : > { %v8499_v3 = vpop.eup %8498  ;;  %v5121_v1 = vmul.f32 %v15073_v60, %v5105_v18  ;;  %v2211_v56 = vsel %vm938_vm0, %v2181_v8, 0.0  ;;  %v4169_v40 = vadd.f32 %v4142_v39, %v15076_v49  ;;  %v5118_v62 = vmul.f32 %v15077_v58, %v5102_v11  ;;  %v15080_v18 = vld [vmem:[#allocation83_spill] sm:$0xff] }
0x153d   : > { %v8501_v52 = vpop.eup %8500  ;;  %v3727_v26 = vadd.f32 %v3711_v61, %v2242_v35  ;;  %v13373_v57 = vpop.xlane.xlu0 %4122  ;;  %v6508_v22 = vsel %vm938_vm0, %v8499_v3, 0.0  ;;  %v15075_v61 = vld [vmem:[#allocation80_spill] sm:$0xff]  ;;  %v2185_v14 = vmul.f32 %v15078_v48, %v2169_v44  ;;  %v2154_v15 = vadd.f32 %v2135_v45, %v15079_v55  ;;  %v15083_v39 = vld [vmem:[#allocation263_spill] sm:$0xff] }
0x153e   : > { %v8503_v10 = vpop.eup %8502  ;;  %v5139_v21 = vpop.xlane.xlu1 %5138  ;;  %6509 = vadd.xlane.f32.xlu0 %v6508_v22  ;;  %8514 = vlog2.f32 %v15075_v61  ;;  %v5063_v3 = vmul.f32 0.6931472, %v8501_v52  ;;  %v5155_v8 = vsel %vm938_vm0, %v5121_v1, 0.0  ;;  %v5106_v11 = vsub.f32 %v15083_v39, %v5090_v41  ;;  %v15085_v45 = vld [vmem:[#allocation32_spill] sm:$0xff]  ;;  %v15087_v48 = vld [vmem:[#allocation279_spill] sm:$0xff] }
0x153f   : > { %v8505_v28 = vpop.eup %8504  ;;  %v5179_v35 = vsub.f32 %v4184_v50, %v5139_v21  ;;  %2221 = vadd.xlane.f32.xlu1 %v2220_v2  ;;  %8516 = vlog2.f32 %v15080_v18  ;;  %v2675_v60 = vmul.f32 0.6931472, %v8503_v10  ;;  %v5552_v44 = vmul.f32 1.442695, %v5521_v0  ;;  %v15088_v41 = vld [vmem:[#allocation96_spill] sm:$0xff] }
0x1540   : > { %v8507_v22 = vpop.eup %8506  ;;  %v5071_v21 = vmul.f32 0.6931472, %v8505_v28  ;;  %8518 = vlog2.f32 %v15084_v17  ;;  %v1120_v61 = vadd.f32 %v1094_v30, %v15085_v45  ;;  %v4185_v10 = vsub.f32 %v15076_v49, %v4169_v40  ;;  %v15089_v0 = vld [vmem:[#allocation24_spill] sm:$0xff]  ;;  %v15090_v17 = vld [vmem:[#allocation287_spill] sm:$0xff]  ;;  %v15091_v49 = vld [vmem:[#allocation181_spill] sm:$0xff] }
0x1541   : > { %v13389_v31 = vadd.f32 %v5179_v35, %v13332_v54  ;;  %v2207_v50 = vpop.xlane.xlu0 %2206  ;;  %v8509_v52 = vpop.eup %8508  ;;  %v5146_v54 = vsel %vm938_vm0, %v5118_v62, 0.0  ;;  %v15086_v35 = vld [vmem:[#allocation20_spill] sm:$0xff]  ;;  %v2223_v1 = vsel %vm938_vm0, %v2185_v14, 0.0  ;;  %v2701_v18 = vadd.f32 %v2675_v60, %v15088_v41  ;;  %v15092_v14 = vld [vmem:[#allocation206_spill] sm:$0xff] }
0x1542   : > { %v13391_v2 = vpop.xlane.xlu1 %2656  ;;  %2212 = vadd.xlane.f32.xlu0 %v2211_v56  ;;  %v2166_v28 = vsub.f32 %v15086_v35, %v2150_v7  ;;  %v8511_v58 = vpop.eup %8510  ;;  %v5087_v56 = vadd.f32 %v5063_v3, %v15087_v48  ;;  %v2170_v39 = vsub.f32 %v15089_v0, %v2154_v15  ;;  %v5122_v40 = vmul.f32 %v15091_v49, %v5106_v11  ;;  %v15093_v15 = vld [vmem:[#allocation51_spill] sm:$0xff]  ;;  %v15095_v11 = vld [vmem:[#allocation260_spill] sm:$0xff] }
0x1543   : > { %15081 = vst [vmem:[#allocation47_spill] sm:$0xff] %v13389_v31  ;;  %15082 = vst [vmem:[#allocation15_spill] sm:$0xff] %v13391_v2  ;;  %5156 = vadd.xlane.f32.xlu1 %v5155_v8  ;;  %v5091_v8 = vadd.f32 %v5071_v21, %v15090_v17  ;;  %v2137_v2 = vmul.f32 0.6931472, %v8509_v52  ;;  %8520 = vpow2.f32 %v5552_v44  ;;  %v4130_v3 = vsel %vm938_vm0, %v8507_v22, 0.0  ;;  %v15096_v44 = vld [vmem:[#allocation272_spill] sm:$0xff] }
0x1544   : > { %v3598_v62 = vmul.f32 0.6931472, %v8511_v58  ;;  %8522 = vlog2.f32 %v15092_v14  ;;  %v2182_v35 = vmul.f32 %v15093_v15, %v2166_v28  ;;  %v1136_v52 = vsub.f32 %v15085_v45, %v1120_v61  ;;  %v15098_v45 = vld [vmem:[#allocation281_spill] sm:$0xff]  ;;  %v15101_v14 = vld [vmem:[#allocation288_spill] sm:$0xff] }
0x1545   : > { %v5142_v55 = vpop.xlane.xlu0 %5141  ;;  %v8513_v7 = vpop.eup %8512  ;;  %v5158_v58 = vsel %vm938_vm0, %v5122_v40, 0.0 }
0x1546   : > { %v5180_v30 = vsub.f32 %v4185_v10, %v5142_v55  ;;  %v13405_v31 = vpop.xlane.xlu1 %5588  ;;  %5147 = vadd.xlane.f32.xlu0 %v5146_v54  ;;  %v2717_v10 = vsub.f32 %v15088_v41, %v2701_v18  ;;  %v15094_v54 = vld [vmem:[#allocation55_spill] sm:$0xff]  ;;  %v5103_v55 = vsub.f32 %v15095_v11, %v5087_v56  ;;  %v5073_v0 = vmul.f32 0.6931472, %v8513_v7  ;;  %v15099_v41 = vld [vmem:[#allocation192_spill] sm:$0xff] }
0x1547   : > { %2224 = vadd.xlane.f32.xlu1 %v2223_v1  ;;  %v2186_v48 = vmul.f32 %v15094_v54, %v2170_v39  ;;  %v2155_v1 = vadd.f32 %v2137_v2, %v15096_v44  ;;  %v2243_v28 = vsub.f32 %v1136_v52, %v2207_v50  ;;  %v3620_v61 = vadd.f32 %v3598_v62, %v15098_v45  ;;  %v15102_v50 = vld [vmem:[#allocation182_spill] sm:$0xff]  ;;  %v15104_v11 = vld [vmem:[#allocation11_spill] sm:$0xff]  ;;  %v15110_v45 = vld [vmem:[#allocation285_spill] sm:$0xff] }
0x1548   : > { %v13410_v60 = vadd.f32 %v5180_v30, %v3727_v26  ;;  %v8515_v21 = vpop.eup %8514  ;;  %v15097_v26 = vld [vmem:[#allocation264_spill] sm:$0xff]  ;;  %8524 = vlog2.f32 %v15099_v41  ;;  %v2214_v18 = vsel %vm938_vm0, %v2182_v35, 0.0 }
0x1549   : > { %v5107_v17 = vsub.f32 %v15097_v26, %v5091_v8  ;;  %v8517_v30 = vpop.eup %8516  ;;  %v3600_v39 = vmul.f32 0.6931472, %v8515_v21  ;;  %v2226_v7 = vsel %vm938_vm0, %v2186_v48, 0.0  ;;  %v5092_v8 = vadd.f32 %v5073_v0, %v15101_v14  ;;  %v15105_v21 = vld [vmem:[#allocation282_spill] sm:$0xff]  ;;  %v15107_v26 = vld [vmem:[#allocation273_spill] sm:$0xff] }
0x154a   : > { %v3676_v22 = vpop.xlane.xlu1 %3675  ;;  %4131 = vadd.xlane.f32.xlu0 %v4130_v3  ;;  %v8519_v56 = vpop.eup %8518  ;;  %v15100_v3 = vld [vmem:[#allocation178_spill] sm:$0xff]  ;;  %v2139_v15 = vmul.f32 0.6931472, %v8517_v30  ;;  %8526 = vlog2.f32 %v15104_v11 }
0x154b   : > { %v3712_v49 = vsub.f32 %v2717_v10, %v3676_v22  ;;  %5159 = vadd.xlane.f32.xlu1 %v5158_v58  ;;  %v5119_v40 = vmul.f32 %v15100_v3, %v5103_v55  ;;  %v5123_v52 = vmul.f32 %v15102_v50, %v5107_v17  ;;  %v15103_v10 = vld [vmem:[#allocation23_spill] sm:$0xff]  ;;  %v3602_v54 = vmul.f32 0.6931472, %v8519_v56  ;;  %v15106_v48 = vld [vmem:[#allocation134_spill] sm:$0xff]  ;;  %v15108_v17 = vld [vmem:[#allocation56_spill] sm:$0xff] }
0x154c   : > { %v2171_v62 = vsub.f32 %v15103_v10, %v2155_v1  ;;  %v3621_v44 = vadd.f32 %v3600_v39, %v15105_v21  ;;  %v3636_v58 = vsub.f32 %v15106_v48, %v3620_v61  ;;  %v2156_v0 = vadd.f32 %v2139_v15, %v15107_v26  ;;  %v15109_v1 = vld [vmem:[#allocation265_spill] sm:$0xff]  ;;  %v15111_v39 = vld [vmem:[#allocation116_spill] sm:$0xff]  ;;  %v15112_v3 = vld [vmem:[#allocation131_spill] sm:$0xff] }
0x154d   : > { %v13423_v2 = vadd.f32 %v3712_v49, %v2243_v28  ;;  %v8521_v35 = vpop.eup %8520  ;;  %v5149_v22 = vsel %vm938_vm0, %v5119_v40, 0.0  ;;  %v5161_v30 = vsel %vm938_vm0, %v5123_v52, 0.0  ;;  %v5108_v49 = vsub.f32 %v15109_v1, %v5092_v8  ;;  %v15113_v15 = vld [vmem:[#allocation183_spill] sm:$0xff]  ;;  %v15114_v52 = vld [vmem:[#allocation25_spill] sm:$0xff]  ;;  %v15116_v11 = vld [vmem:[#allocation286_spill] sm:$0xff] }
0x154e   : > { %2215 = vadd.xlane.f32.xlu0 %v2214_v18  ;;  %v8523_v55 = vpop.eup %8522  ;;  %v2187_v28 = vmul.f32 %v15108_v17, %v2171_v62  ;;  %v3622_v41 = vadd.f32 %v3602_v54, %v15110_v45  ;;  %v5599_v56 = vsel %vm938_vm0, %v8521_v35, 0.0  ;;  %v3637_v61 = vsub.f32 %v15112_v3, %v3621_v44  ;;  %v15115_v8 = vld [vmem:[#allocation133_spill] sm:$0xff]  ;;  %v15121_v45 = vld [vmem:[#allocation136_spill] sm:$0xff]  ;;  %v15123_v3 = vld [vmem:[#allocation119_spill] sm:$0xff] }
0x154f   : > { %2227 = vadd.xlane.f32.xlu1 %v2226_v7  ;;  %v3604_v18 = vmul.f32 0.6931472, %v8523_v55  ;;  %v3652_v7 = vmul.f32 %v15111_v39, %v3636_v58  ;;  %v5124_v50 = vmul.f32 %v15113_v15, %v5108_v49  ;;  %v2172_v10 = vsub.f32 %v15114_v52, %v2156_v0  ;;  %v15118_v55 = vld [vmem:[#allocation57_spill] sm:$0xff] }
0x1550   : > { %v2229_v14 = vsel %vm938_vm0, %v2187_v28, 0.0  ;;  %v3638_v62 = vsub.f32 %v15115_v8, %v3622_v41  ;;  %v15120_v0 = vld [vmem:[#allocation289_spill] sm:$0xff] }
0x1551   : > { %v3623_v54 = vadd.f32 %v3604_v18, %v15116_v11  ;;  %v3686_v35 = vsel %vm938_vm0, %v3652_v7, 0.0  ;;  %v5164_v44 = vsel %vm938_vm0, %v5124_v50, 0.0  ;;  %v2188_v26 = vmul.f32 %v15118_v55, %v2172_v10  ;;  %v15125_v50 = vld [vmem:[#allocation120_spill] sm:$0xff]  ;;  %v15126_v10 = vld [vmem:[#allocation135_spill] sm:$0xff]  ;;  %v15127_v11 = vld [vmem:[#allocation121_spill] sm:$0xff] }
0x1552   : > { %5150 = vadd.xlane.f32.xlu0 %v5149_v22  ;;  %v8525_v40 = vpop.eup %8524  ;;  %v15117_v22 = vld [vmem:[#allocation117_spill] sm:$0xff] }
0x1553   : > { %5162 = vadd.xlane.f32.xlu1 %v5161_v30  ;;  %v3606_v21 = vmul.f32 0.6931472, %v8525_v40  ;;  %v3653_v48 = vmul.f32 %v15117_v22, %v3637_v61  ;;  %v15119_v30 = vld [vmem:[#allocation118_spill] sm:$0xff]  ;;  %v3639_v41 = vsub.f32 %v15121_v45, %v3623_v54  ;;  %v2232_v18 = vsel %vm938_vm0, %v2188_v26, 0.0 }
0x1554   : > { %v8527_v58 = vpop.eup %8526  ;;  %v3654_v17 = vmul.f32 %v15119_v30, %v3638_v62  ;;  %v15124_v40 = vld [vmem:[#allocation138_spill] sm:$0xff] }
0x1555   : > { %v3624_v28 = vadd.f32 %v3606_v21, %v15120_v0  ;;  %v3608_v1 = vmul.f32 0.6931472, %v8527_v58  ;;  %v3689_v49 = vsel %vm938_vm0, %v3653_v48, 0.0  ;;  %v3655_v61 = vmul.f32 %v15123_v3, %v3639_v41  ;;  %v15128_v58 = vld [vmem:[#allocation240_spill] sm:$0xff]  ;;  %v15129_v3 = vld [vmem:[#allocation61_spill] sm:$0xff] }
0x1556   : > { %5600 = vadd.xlane.f32.xlu0 %v5599_v56  ;;  %v15122_v56 = vld [vmem:[#allocation290_spill] sm:$0xff]  ;;  %v3692_v7 = vsel %vm938_vm0, %v3654_v17, 0.0 }
0x1557   : > { %2230 = vadd.xlane.f32.xlu1 %v2229_v14  ;;  %v3625_v39 = vadd.f32 %v3608_v1, %v15122_v56  ;;  %v3640_v14 = vsub.f32 %v15124_v40, %v3624_v28  ;;  %v3695_v15 = vsel %vm938_vm0, %v3655_v61, 0.0 }
0x1559   : > { %v3656_v52 = vmul.f32 %v15125_v50, %v3640_v14  ;;  %v3641_v8 = vsub.f32 %v15126_v10, %v3625_v39 }
0x155a   : > { %3687 = vadd.xlane.f32.xlu0 %v3686_v35  ;;  %v13466_v35 = vpop.xlane.xlu0 %2659 }
0x155b   : > { %5165 = vadd.xlane.f32.xlu1 %v5164_v44  ;;  %v3698_v62 = vsel %vm938_vm0, %v3656_v52, 0.0  ;;  %v3657_v54 = vmul.f32 %v15127_v11, %v3641_v8  ;;  %v15131_v11 = vld [vmem:[#allocation62_spill] sm:$0xff] }
0x155d   : > { %v3701_v21 = vsel %vm938_vm0, %v3657_v54, 0.0 }
0x155e   : > { %3690 = vadd.xlane.f32.xlu0 %v3689_v49 }
0x155f   : > { %2233 = vadd.xlane.f32.xlu1 %v2232_v18 }
0x1562   : > { %3693 = vadd.xlane.f32.xlu0 %v3692_v7 }
0x1566   : > { %3696 = vadd.xlane.f32.xlu0 %v3695_v15 }
0x156a   : > { %3699 = vadd.xlane.f32.xlu0 %v3698_v62 }
0x156e   : > { %3702 = vadd.xlane.f32.xlu0 %v3701_v21 }
0x1578   : > { %v6477_v22 = vpop.xlane.xlu1 %6476 }
0x1579   : > { %8528 = vlog2.f32 %v6477_v22 }
0x157a   : > { %v6480_v48 = vpop.xlane.xlu0 %6479 }
0x157b   : > { %8530 = vlog2.f32 %v6480_v48  ;;  %v15133_v48 = vld [vmem:[#allocation33_spill] sm:$0xff] }
0x157c   : > { %8532 = vlog2.f32 %v15128_v58  ;;  %v6471_v44 = vpop.xlane.xlu1 %6470 }
0x157d   : > { %8534 = vlog2.f32 %v6471_v44 }
0x157e   : > { %8536 = vlog2.f32 %v13111_v38  ;;  %v6474_v55 = vpop.xlane.xlu0 %6473 }
0x157f   : > { %8538 = vlog2.f32 %v6474_v55 }
0x1580   : > { %8540 = vlog2.f32 %v13115_v46 }
0x1583   : > { %v8529_v26 = vpop.eup %8528 }
0x1584   : > { %v6522_v30 = vmul.f32 0.6931472, %v8529_v26 }
0x1585   : > { %v8531_v17 = vpop.eup %8530 }
0x1586   : > { %v8533_v0 = vpop.eup %8532  ;;  %v6551_v28 = vadd.f32 %v6522_v30, %v13139_v19  ;;  %v6524_v1 = vmul.f32 0.6931472, %v8531_v17 }
0x1587   : > { %v8535_v49 = vpop.eup %8534  ;;  %v1096_v14 = vmul.f32 0.6931472, %v8533_v0 }
0x1588   : > { %v8537_v45 = vpop.eup %8536  ;;  %v6552_v41 = vadd.f32 %v6524_v1, %v13143_v25  ;;  %v6518_v18 = vmul.f32 0.6931472, %v8535_v49  ;;  %v6489_v56 = vpop.xlane.xlu0 %6488  ;;  %v6567_v39 = vsub.f32 %v12822_v53, %v6551_v28  ;;  %v15130_v53 = vld [vmem:[#allocation64_spill] sm:$0xff]  ;;  %v15135_v28 = vld [vmem:[#allocation13_spill] sm:$0xff] }
0x1589   : > { %v8539_v38 = vpop.eup %8538  ;;  %8542 = vlog2.f32 %v6489_v56  ;;  %v2677_v19 = vmul.f32 0.6931472, %v8537_v45  ;;  %v1121_v58 = vadd.f32 %v1096_v14, %v15133_v48  ;;  %v15136_v49 = vld [vmem:[#allocation160_spill] sm:$0xff] }
0x158a   : > { %v6549_v7 = vadd.f32 %v6518_v18, %v13147_v43  ;;  %v6520_v46 = vmul.f32 0.6931472, %v8539_v38  ;;  %v6583_v61 = vmul.f32 %v15129_v3, %v6567_v39  ;;  %v6568_v40 = vsub.f32 %v12830_v37, %v6552_v41  ;;  %v8541_v15 = vpop.eup %8540  ;;  %v15137_v3 = vld [vmem:[#allocation147_spill] sm:$0xff] }
0x158b   : > { %v4144_v21 = vmul.f32 0.6931472, %v8541_v15  ;;  %v1137_v1 = vsub.f32 %v15133_v48, %v1121_v58 }
0x158c   : > { %v6550_v50 = vadd.f32 %v6520_v46, %v13151_v29  ;;  %v6483_v52 = vpop.xlane.xlu1 %6482  ;;  %v13478_v25 = vpop.xlane.xlu0 %5591  ;;  %v6603_v10 = vsel %vm938_vm0, %v6583_v61, 0.0  ;;  %v6584_v8 = vmul.f32 %v15130_v53, %v6568_v40  ;;  %v6565_v62 = vsub.f32 %v12827_v23, %v6549_v7  ;;  %v15132_v29 = vld [vmem:[#allocation97_spill] sm:$0xff]  ;;  %v15134_v23 = vld [vmem:[#allocation59_spill] sm:$0xff] }
0x158d   : > { %8544 = vlog2.f32 %v6483_v52  ;;  %6604 = vadd.xlane.f32.xlu0 %v6603_v10  ;;  %v2702_v22 = vadd.f32 %v2677_v19, %v15132_v29  ;;  %v4170_v45 = vadd.f32 %v4144_v21, %v15136_v49  ;;  %v15138_v53 = vld [vmem:[#allocation65_spill] sm:$0xff] }
0x158e   : > { %v6606_v43 = vsel %vm938_vm0, %v6584_v8, 0.0  ;;  %v6581_v37 = vmul.f32 %v15131_v11, %v6565_v62  ;;  %v6566_v54 = vsub.f32 %v12837_v20, %v6550_v50  ;;  %8546 = vlog2.f32 %v15135_v28  ;;  %v15139_v62 = vld [vmem:[#allocation189_spill] sm:$0xff] }
0x158f   : > { %6607 = vadd.xlane.f32.xlu1 %v6606_v43  ;;  %v2718_v20 = vsub.f32 %v15132_v29, %v2702_v22  ;;  %8548 = vlog2.f32 %v15137_v3  ;;  %v4186_v40 = vsub.f32 %v15136_v49, %v4170_v45  ;;  %v15141_v22 = vld [vmem:[#allocation250_spill] sm:$0xff] }
0x1590   : > { %v13488_v44 = vpop.xlane.xlu1 %4125  ;;  %v3679_v55 = vpop.xlane.xlu0 %3678  ;;  %v6597_v26 = vsel %vm938_vm0, %v6581_v37, 0.0  ;;  %v6582_v30 = vmul.f32 %v15134_v23, %v6566_v54 }
0x1591   : > { %6598 = vadd.xlane.f32.xlu0 %v6597_v26  ;;  %v3713_v39 = vsub.f32 %v2718_v20, %v3679_v55  ;;  %v15142_v55 = vld [vmem:[#allocation91_spill] sm:$0xff] }
0x1592   : > { %v6600_v17 = vsel %vm938_vm0, %v6582_v30, 0.0  ;;  %v15143_v30 = vld [vmem:[#allocation126_spill] sm:$0xff] }
0x1593   : > { %v8543_v0 = vpop.eup %8542  ;;  %6601 = vadd.xlane.f32.xlu1 %v6600_v17 }
0x1594   : > { %v6530_v41 = vmul.f32 0.6931472, %v8543_v0  ;;  %v2210_v18 = vpop.xlane.xlu1 %2209  ;;  %v13497_v56 = vpop.xlane.xlu0 %4128 }
0x1595   : > { %v2244_v38 = vsub.f32 %v1137_v1, %v2210_v18  ;;  %v15144_v1 = vld [vmem:[#allocation291_spill] sm:$0xff] }
0x1596   : > { %v6555_v7 = vadd.f32 %v6530_v41, %v13159_v5 }
0x1597   : > { %v8545_v46 = vpop.eup %8544  ;;  %v13501_v61 = vadd.f32 %v3713_v39, %v2244_v38  ;;  %v15145_v39 = vld [vmem:[#allocation137_spill] sm:$0xff] }
0x1598   : > { %v6526_v14 = vmul.f32 0.6931472, %v8545_v46  ;;  %v5145_v19 = vpop.xlane.xlu1 %5144  ;;  %v6492_v15 = vpop.xlane.xlu0 %6491  ;;  %v6571_v50 = vsub.f32 %v12856_v6, %v6555_v7  ;;  %v15140_v6 = vld [vmem:[#allocation66_spill] sm:$0xff] }
0x1599   : > { %v5181_v52 = vsub.f32 %v4186_v40, %v5145_v19  ;;  %8550 = vlog2.f32 %v6492_v15  ;;  %v8547_v54 = vpop.eup %8546  ;;  %v15146_v40 = vld [vmem:[#allocation68_spill] sm:$0xff] }
0x159a   : > { %v6553_v10 = vadd.f32 %v6526_v14, %v13168_v59  ;;  %v6587_v8 = vmul.f32 %v15138_v53, %v6571_v50  ;;  %8552 = vlog2.f32 %v15139_v62  ;;  %v3610_v29 = vmul.f32 0.6931472, %v8547_v54  ;;  %v8549_v58 = vpop.eup %8548  ;;  %v15148_v53 = vld [vmem:[#allocation122_spill] sm:$0xff] }
0x159b   : > { %v13509_v5 = vadd.f32 %v5181_v52, %v13423_v2  ;;  %v5075_v23 = vmul.f32 0.6931472, %v8549_v58 }
0x159c   : > { %v6486_v43 = vpop.xlane.xlu0 %6485  ;;  %v6615_v11 = vsel %vm938_vm0, %v6587_v8, 0.0  ;;  %v6569_v37 = vsub.f32 %v12859_v51, %v6553_v10  ;;  %v3626_v26 = vadd.f32 %v3610_v29, %v15142_v55  ;;  %v13522_v3 = vpop.xlane.xlu1 %2662 }
0x159d   : > { %6616 = vadd.xlane.f32.xlu1 %v6615_v11  ;;  %8554 = vlog2.f32 %v6486_v43  ;;  %v5093_v49 = vadd.f32 %v5075_v23, %v15144_v1 }
0x159e   : > { %v6585_v21 = vmul.f32 %v15140_v6, %v6569_v37  ;;  %8556 = vlog2.f32 %v15141_v22  ;;  %v3642_v38 = vsub.f32 %v15145_v39, %v3626_v26  ;;  %v15153_v26 = vld [vmem:[#allocation60_spill] sm:$0xff]  ;;  %v15156_v39 = vld [vmem:[#allocation58_spill] sm:$0xff] }
0x15a0   : > { %v6501_v59 = vpop.xlane.xlu0 %6500  ;;  %v6609_v48 = vsel %vm938_vm0, %v6585_v21, 0.0  ;;  %v3658_v8 = vmul.f32 %v15148_v53, %v3642_v38  ;;  %v15150_v21 = vld [vmem:[#allocation63_spill] sm:$0xff]  ;;  %v13533_v22 = vpop.xlane.xlu1 %5594 }
0x15a1   : > { %6610 = vadd.xlane.f32.xlu0 %v6609_v48  ;;  %8558 = vlog2.f32 %v6501_v59  ;;  %15151 = vst [vmem:[#allocation174_spill] sm:$0xff] %v13533_v22 }
0x15a2   : > { %8560 = vlog2.f32 %v15143_v30  ;;  %v3704_v58 = vsel %vm938_vm0, %v3658_v8, 0.0  ;;  %v15154_v30 = vld [vmem:[#allocation75_spill] sm:$0xff] }
0x15a3   : > { %v8551_v2 = vpop.eup %8550 }
0x15a4   : > { %v6532_v51 = vmul.f32 0.6931472, %v8551_v2  ;;  %v6495_v17 = vpop.xlane.xlu0 %6494  ;;  %v8553_v0 = vpop.eup %8552  ;;  %v15152_v2 = vld [vmem:[#allocation184_spill] sm:$0xff] }
0x15a5   : > { %8562 = vlog2.f32 %v6495_v17  ;;  %v2141_v45 = vmul.f32 0.6931472, %v8553_v0 }
0x15a6   : > { %v6556_v28 = vadd.f32 %v6532_v51, %v13173_v32  ;;  %v15147_v32 = vld [vmem:[#allocation191_spill] sm:$0xff] }
0x15a7   : > { %v8555_v20 = vpop.eup %8554  ;;  %v2157_v50 = vadd.f32 %v2141_v45, %v15147_v32 }
0x15a8   : > { %v6504_v41 = vpop.xlane.xlu0 %6503  ;;  %v6572_v18 = vsub.f32 %v12862_v27, %v6556_v28  ;;  %v6528_v7 = vmul.f32 0.6931472, %v8555_v20  ;;  %v8557_v46 = vpop.eup %8556  ;;  %v15149_v27 = vld [vmem:[#allocation266_spill] sm:$0xff]  ;;  %v15155_v20 = vld [vmem:[#allocation69_spill] sm:$0xff] }
0x15a9   : > { %8564 = vlog2.f32 %v6504_v41  ;;  %v5109_v62 = vsub.f32 %v15149_v27, %v5093_v49  ;;  %v5077_v43 = vmul.f32 0.6931472, %v8557_v46  ;;  %v2173_v23 = vsub.f32 %v15153_v26, %v2157_v50  ;;  %v15157_v46 = vld [vmem:[#allocation76_spill] sm:$0xff] }
0x15aa   : > { %v6588_v14 = vmul.f32 %v15146_v40, %v6572_v18  ;;  %v6554_v19 = vadd.f32 %v6528_v7, %v13181_v63 }
0x15ab   : > { %v8559_v15 = vpop.eup %8558  ;;  %v5125_v55 = vmul.f32 %v15152_v2, %v5109_v62  ;;  %v5094_v51 = vadd.f32 %v5077_v43, %v15154_v30  ;;  %v2189_v38 = vmul.f32 %v15156_v39, %v2173_v23  ;;  %v15161_v62 = vld [vmem:[#allocation185_spill] sm:$0xff]  ;;  %v15162_v43 = vld [vmem:[#allocation268_spill] sm:$0xff]  ;;  %v15167_v2 = vld [vmem:[#allocation67_spill] sm:$0xff] }
0x15ac   : > { %v6498_v52 = vpop.xlane.xlu0 %6497  ;;  %v6618_v10 = vsel %vm938_vm0, %v6588_v14, 0.0  ;;  %v6538_v11 = vmul.f32 0.6931472, %v8559_v15  ;;  %v6570_v37 = vsub.f32 %v12869_v13, %v6554_v19  ;;  %v8561_v54 = vpop.eup %8560  ;;  %v15158_v14 = vld [vmem:[#allocation267_spill] sm:$0xff]  ;;  %v15159_v15 = vld [vmem:[#allocation70_spill] sm:$0xff] }
0x15ad   : > { %8566 = vlog2.f32 %v6498_v52  ;;  %6619 = vadd.xlane.f32.xlu0 %v6618_v10  ;;  %v5079_v13 = vmul.f32 0.6931472, %v8561_v54  ;;  %v5167_v18 = vsel %vm938_vm0, %v5125_v55, 0.0  ;;  %v15160_v52 = vld [vmem:[#allocation241_spill] sm:$0xff]  ;;  %v2235_v27 = vsel %vm938_vm0, %v2189_v38, 0.0  ;;  %v15163_v54 = vld [vmem:[#allocation72_spill] sm:$0xff] }
0x15ae   : > { %v6559_v63 = vadd.f32 %v6538_v11, %v13191_v42  ;;  %v6586_v29 = vmul.f32 %v15150_v21, %v6570_v37 }
0x15af   : > { %v8563_v6 = vpop.eup %8562  ;;  %v5095_v40 = vadd.f32 %v5079_v13, %v15157_v46  ;;  %v15172_v46 = vld [vmem:[#allocation235_spill] sm:$0xff] }
0x15b0   : > { %v6534_v59 = vmul.f32 0.6931472, %v8563_v6  ;;  %v13535_v48 = vpop.xlane.xlu0 %6512  ;;  %v6612_v17 = vsel %vm938_vm0, %v6586_v29, 0.0  ;;  %v6575_v42 = vsub.f32 %v12892_v12, %v6559_v63  ;;  %v15165_v29 = vld [vmem:[#allocation171_spill] sm:$0xff] }
0x15b1   : > { %3705 = vadd.xlane.f32.xlu0 %v3704_v58  ;;  %6613 = vadd.xlane.f32.xlu1 %v6612_v17  ;;  %v5111_v11 = vsub.f32 %v15162_v43, %v5095_v40  ;;  %v15176_v43 = vld [vmem:[#allocation161_spill] sm:$0xff] }
0x15b2   : > { %v6557_v0 = vadd.f32 %v6534_v59, %v13205_v33  ;;  %v6591_v1 = vmul.f32 %v15155_v20, %v6575_v42  ;;  %v5110_v33 = vsub.f32 %v15158_v14, %v5094_v51  ;;  %v15166_v59 = vld [vmem:[#allocation186_spill] sm:$0xff]  ;;  %v15169_v20 = vld [vmem:[#allocation125_spill] sm:$0xff] }
0x15b3   : > { %v8565_v28 = vpop.eup %8564  ;;  %v5127_v58 = vmul.f32 %v15166_v59, %v5111_v11  ;;  %v15168_v42 = vld [vmem:[#allocation110_spill] sm:$0xff] }
0x15b4   : > { %v6540_v49 = vmul.f32 0.6931472, %v8565_v28  ;;  %v6516_v45 = vpop.xlane.xlu1 %6515  ;;  %v6507_v41 = vpop.xlane.xlu0 %6506  ;;  %v6573_v7 = vsub.f32 %v12897_v47, %v6557_v0  ;;  %v6627_v12 = vsel %vm938_vm0, %v6591_v1, 0.0  ;;  %v15173_v14 = vld [vmem:[#allocation74_spill] sm:$0xff] }
0x15b5   : > { %8568 = vlog2.f32 %v6516_v45  ;;  %5168 = vadd.xlane.f32.xlu1 %v5167_v18  ;;  %6628 = vadd.xlane.f32.xlu0 %v6627_v12  ;;  %v15170_v45 = vld [vmem:[#allocation190_spill] sm:$0xff]  ;;  %v15171_v18 = vld [vmem:[#allocation44_spill] sm:$0xff] }
0x15b6   : > { %v6560_v19 = vadd.f32 %v6540_v49, %v13207_v34  ;;  %8570 = vlog2.f32 %v6507_v41  ;;  %v6589_v32 = vmul.f32 %v15159_v15, %v6573_v7  ;;  %v5126_v34 = vmul.f32 %v15161_v62, %v5110_v33 }
0x15b7   : > { %v8567_v50 = vpop.eup %8566  ;;  %8572 = vlog2.f32 %v15160_v52  ;;  %v15174_v52 = vld [vmem:[#allocation98_spill] sm:$0xff] }
0x15b8   : > { %v6536_v10 = vmul.f32 0.6931472, %v8567_v50  ;;  %v3682_v53 = vpop.xlane.xlu1 %3681  ;;  %v6621_v47 = vsel %vm938_vm0, %v6589_v32, 0.0  ;;  %v6576_v8 = vsub.f32 %v12900_v36, %v6560_v19  ;;  %8574 = vlog2.f32 %v13121_v16 }
0x15b9   : > { %2236 = vadd.xlane.f32.xlu1 %v2235_v27  ;;  %6622 = vadd.xlane.f32.xlu0 %v6621_v47  ;;  %8576 = vlog2.f32 %v15165_v29  ;;  %v5170_v16 = vsel %vm938_vm0, %v5126_v34, 0.0  ;;  %v15175_v47 = vld [vmem:[#allocation34_spill] sm:$0xff] }
0x15ba   : > { %v6558_v37 = vadd.f32 %v6536_v10, %v13217_v4  ;;  %v6592_v6 = vmul.f32 %v15163_v54, %v6576_v8  ;;  %8578 = vlog2.f32 %v13535_v48 }
0x15bc   : > { %v13562_v63 = vpop.xlane.xlu1 %5597  ;;  %v6630_v21 = vsel %vm938_vm0, %v6592_v6, 0.0  ;;  %v6574_v36 = vsub.f32 %v12907_v9, %v6558_v37  ;;  %v5173_v9 = vsel %vm938_vm0, %v5127_v58, 0.0 }
0x15bd   : > { %15164 = vst [vmem:[#allocation48_spill] sm:$0xff] %v13562_v63  ;;  %5171 = vadd.xlane.f32.xlu1 %v5170_v16  ;;  %6631 = vadd.xlane.f32.xlu0 %v6630_v21 }
0x15be   : > { %v6590_v4 = vmul.f32 %v15167_v2, %v6574_v36  ;;  %v15177_v2 = vld [vmem:[#allocation244_spill] sm:$0xff] }
0x15bf   : > { %v8569_v55 = vpop.eup %8568 }
0x15c0   : > { %v8571_v26 = vpop.eup %8570  ;;  %v6548_v23 = vmul.f32 0.6931472, %v8569_v55  ;;  %v13570_v30 = vpop.xlane.xlu1 %3684  ;;  %v6624_v51 = vsel %vm938_vm0, %v6590_v4, 0.0  ;;  %v15178_v55 = vld [vmem:[#allocation14_spill] sm:$0xff] }
0x15c1   : > { %v6542_v13 = vmul.f32 0.6931472, %v8571_v26  ;;  %v8573_v17 = vpop.eup %8572  ;;  %5174 = vadd.xlane.f32.xlu1 %v5173_v9  ;;  %6625 = vadd.xlane.f32.xlu0 %v6624_v51 }
0x15c2   : > { %v6564_v0 = vadd.f32 %v6548_v23, %v15168_v42  ;;  %v8575_v28 = vpop.eup %8574  ;;  %v1098_v38 = vmul.f32 0.6931472, %v8573_v17 }
0x15c3   : > { %v6561_v1 = vadd.f32 %v6542_v13, %v15169_v20  ;;  %v2679_v7 = vmul.f32 0.6931472, %v8575_v28  ;;  %v8577_v12 = vpop.eup %8576  ;;  %v15180_v13 = vld [vmem:[#allocation150_spill] sm:$0xff] }
0x15c4   : > { %v13576_v49 = vpop.xlane.xlu1 %2218  ;;  %v6580_v41 = vsub.f32 %v15170_v45, %v6564_v0  ;;  %v4146_v50 = vmul.f32 0.6931472, %v8577_v12  ;;  %v1122_v8 = vadd.f32 %v1098_v38, %v15175_v47  ;;  %v8579_v54 = vpop.eup %8578  ;;  %v15181_v0 = vld [vmem:[#allocation16_spill] sm:$0xff]  ;;  %v15184_v38 = vld [vmem:[#allocation246_spill] sm:$0xff] }
0x15c5   : > { %v6577_v39 = vsub.f32 %v15171_v18, %v6561_v1  ;;  %v2703_v10 = vadd.f32 %v2679_v7, %v15174_v52  ;;  %v6546_v59 = vmul.f32 0.6931472, %v8579_v54  ;;  %v15182_v45 = vld [vmem:[#allocation196_spill] sm:$0xff]  ;;  %v15183_v18 = vld [vmem:[#allocation251_spill] sm:$0xff] }
0x15c6   : > { %v6596_v40 = vmul.f32 %v15172_v46, %v6580_v41  ;;  %v1138_v34 = vsub.f32 %v15175_v47, %v1122_v8  ;;  %v4171_v11 = vadd.f32 %v4146_v50, %v15176_v43 }
0x15c7   : > { %v6593_v33 = vmul.f32 %v15173_v14, %v6577_v39  ;;  %v2719_v62 = vsub.f32 %v15174_v52, %v2703_v10  ;;  %v6563_v9 = vadd.f32 %v6546_v59, %v15180_v13 }
0x15c8   : > { %v13583_v19 = vpop.xlane.xlu1 %5153  ;;  %v6642_v15 = vsel %vm938_vm0, %v6596_v40, 0.0  ;;  %v4187_v16 = vsub.f32 %v15176_v43, %v4171_v11 }
0x15c9   : > { %6643 = vadd.xlane.f32.xlu1 %v6642_v15  ;;  %v6633_v32 = vsel %vm938_vm0, %v6593_v33, 0.0  ;;  %v3714_v6 = vsub.f32 %v2719_v62, %v3682_v53  ;;  %v15179_v53 = vld [vmem:[#allocation212_spill] sm:$0xff]  ;;  %v6579_v39 = vsub.f32 %v15183_v18, %v6563_v9  ;;  %v15186_v33 = vld [vmem:[#allocation234_spill] sm:$0xff]  ;;  %v15187_v62 = vld [vmem:[#allocation37_spill] sm:$0xff] }
0x15ca   : > { %6634 = vadd.xlane.f32.xlu0 %v6633_v32  ;;  %v15192_v18 = vld [vmem:[#allocation103_spill] sm:$0xff] }
0x15cb   : > { %v6510_v27 = vpop.xlane.xlu0 %6509  ;;  %v6595_v15 = vmul.f32 %v15186_v33, %v6579_v39 }
0x15cc   : > { %8580 = vlog2.f32 %v6510_v27  ;;  %v2222_v48 = vpop.xlane.xlu1 %2221 }
0x15cd   : > { %8582 = vlog2.f32 %v15177_v2 }
0x15ce   : > { %8584 = vlog2.f32 %v15178_v55 }
0x15cf   : > { %v2213_v37 = vpop.xlane.xlu0 %2212  ;;  %8586 = vlog2.f32 %v15179_v53 }
0x15d0   : > { %v2245_v21 = vsub.f32 %v1138_v34, %v2213_v37  ;;  %v13592_v36 = vpop.xlane.xlu1 %5156  ;;  %8588 = vlog2.f32 %v15184_v38  ;;  %v15188_v34 = vld [vmem:[#allocation101_spill] sm:$0xff] }
0x15d1   : > { %8590 = vlog2.f32 %v13334_v24  ;;  %v6639_v24 = vsel %vm938_vm0, %v6595_v15, 0.0 }
0x15d2   : > { %v13594_v29 = vadd.f32 %v3714_v6, %v2245_v21  ;;  %8592 = vlog2.f32 %v13373_v57  ;;  %v15190_v6 = vld [vmem:[#allocation165_spill] sm:$0xff] }
0x15d3   : > { %v5148_v58 = vpop.xlane.xlu0 %5147 }
0x15d4   : > { %v5182_v4 = vsub.f32 %v4187_v16, %v5148_v58  ;;  %v13599_v26 = vpop.xlane.xlu1 %2224 }
0x15d6   : > { %v8581_v23 = vpop.eup %8580  ;;  %v13602_v51 = vadd.f32 %v5182_v4, %v13501_v61  ;;  %v15185_v61 = vld [vmem:[#allocation71_spill] sm:$0xff] }
0x15d7   : > { %v6544_v17 = vmul.f32 0.6931472, %v8581_v23  ;;  %v13606_v42 = vpop.xlane.xlu0 %4131  ;;  %v8583_v46 = vpop.eup %8582 }
0x15d8   : > { %v5160_v20 = vpop.xlane.xlu1 %5159  ;;  %v8585_v40 = vpop.eup %8584  ;;  %v1104_v52 = vmul.f32 0.6931472, %v8583_v46 }
0x15d9   : > { %v6562_v28 = vadd.f32 %v6544_v17, %v15181_v0  ;;  %v8587_v32 = vpop.eup %8586  ;;  %v2685_v10 = vmul.f32 0.6931472, %v8585_v40 }
0x15da   : > { %v4154_v8 = vmul.f32 0.6931472, %v8587_v32  ;;  %v8589_v27 = vpop.eup %8588  ;;  %v1125_v57 = vadd.f32 %v1104_v52, %v15187_v62 }
0x15db   : > { %v13609_v1 = vpop.xlane.xlu0 %2215  ;;  %v6578_v41 = vsub.f32 %v15182_v45, %v6562_v28  ;;  %v2706_v43 = vadd.f32 %v2685_v10, %v15188_v34  ;;  %v8591_v11 = vpop.eup %8590  ;;  %v1108_v59 = vmul.f32 0.6931472, %v8589_v27  ;;  %v15191_v28 = vld [vmem:[#allocation39_spill] sm:$0xff]  ;;  %v15196_v27 = vld [vmem:[#allocation252_spill] sm:$0xff] }
0x15dc   : > { %v2228_v50 = vpop.xlane.xlu1 %2227  ;;  %v4175_v21 = vadd.f32 %v4154_v8, %v15190_v6  ;;  %v8593_v16 = vpop.eup %8592  ;;  %v2689_v58 = vmul.f32 0.6931472, %v8591_v11  ;;  %v1141_v2 = vsub.f32 %v15187_v62, %v1125_v57  ;;  %v15195_v8 = vld [vmem:[#allocation233_spill] sm:$0xff]  ;;  %v15197_v62 = vld [vmem:[#allocation211_spill] sm:$0xff]  ;;  %v15202_v11 = vld [vmem:[#allocation148_spill] sm:$0xff] }
0x15dd   : > { %v6594_v7 = vmul.f32 %v15185_v61, %v6578_v41  ;;  %v2722_v4 = vsub.f32 %v15188_v34, %v2706_v43  ;;  %v4158_v23 = vmul.f32 0.6931472, %v8593_v16  ;;  %v1127_v45 = vadd.f32 %v1108_v59, %v15191_v28  ;;  %v15193_v61 = vld [vmem:[#allocation167_spill] sm:$0xff]  ;;  %v15198_v57 = vld [vmem:[#allocation45_spill] sm:$0xff]  ;;  %v15199_v34 = vld [vmem:[#allocation274_spill] sm:$0xff] }
0x15de   : > { %v2248_v53 = vsub.f32 %v1141_v2, %v2222_v48  ;;  %v4191_v13 = vsub.f32 %v15190_v6, %v4175_v21  ;;  %v2708_v39 = vadd.f32 %v2689_v58, %v15192_v18  ;;  %8594 = vlog2.f32 %v15195_v8  ;;  %v15200_v43 = vld [vmem:[#allocation258_spill] sm:$0xff] }
0x15df   : > { %v13617_v12 = vpop.xlane.xlu0 %5150  ;;  %v6636_v14 = vsel %vm938_vm0, %v6594_v7, 0.0  ;;  %v4177_v7 = vadd.f32 %v4158_v23, %v15193_v61  ;;  %v1143_v40 = vsub.f32 %v15191_v28, %v1127_v45  ;;  %8596 = vlog2.f32 %v15196_v27  ;;  %v15212_v27 = vld [vmem:[#allocation156_spill] sm:$0xff] }
0x15e0   : > { %6637 = vadd.xlane.f32.xlu0 %v6636_v14  ;;  %v13626_v37 = vpop.xlane.xlu1 %5162  ;;  %v5186_v0 = vsub.f32 %v4191_v13, %v5160_v20  ;;  %v2724_v48 = vsub.f32 %v15192_v18, %v2708_v39  ;;  %8598 = vlog2.f32 %v15197_v62  ;;  %v15204_v18 = vld [vmem:[#allocation275_spill] sm:$0xff]  ;;  %vm6876_vm0 = vcmask 7168  }
0x15e1   : > { %15189 = vst [vmem:[#allocation175_spill] sm:$0xff] %v13626_v37  ;;  %v2250_v15 = vsub.f32 %v1143_v40, %v2228_v50  ;;  %v4193_v20 = vsub.f32 %v15193_v61, %v4177_v7  ;;  %8600 = vlog2.f32 %v15198_v57  ;;  %v15201_v50 = vld [vmem:[#allocation12_spill] sm:$0xff]  ;;  %v15205_v39 = vld [vmem:[#allocation243_spill] sm:$0xff]  ;;  %v15206_v61 = vld [vmem:[#allocation30_spill] sm:$0xff] }
0x15e2   : > { %8602 = vlog2.f32 %v15199_v34  ;;  %v15207_v40 = vld [vmem:[#allocation92_spill] sm:$0xff]  ;;  %v15214_v34 = vld [vmem:[#allocation193_spill] sm:$0xff] }
0x15e3   : > { %v13621_v47 = vpop.xlane.xlu0 %5600  ;;  %8604 = vlog2.f32 %v15200_v43  ;;  %v15215_v43 = vld [vmem:[#allocation220_spill] sm:$0xff] }
0x15e4   : > { %6640 = vadd.xlane.f32.xlu0 %v6639_v24  ;;  %v13634_v17 = vpop.xlane.xlu1 %2230  ;;  %8606 = vlog2.f32 %v15201_v50 }
0x15e5   : > { %8608 = vlog2.f32 %v15202_v11  ;;  %v15216_v11 = vld [vmem:[#allocation248_spill] sm:$0xff] }
0x15e7   : > { %v13628_v54 = vpop.xlane.xlu0 %3687 }
0x15e8   : > { %v5166_v14 = vpop.xlane.xlu1 %5165  ;;  %v8595_v6 = vpop.eup %8594 }
0x15e9   : > { %v5188_v52 = vsub.f32 %v4193_v20, %v5166_v14  ;;  %v8597_v21 = vpop.eup %8596  ;;  %v15208_v14 = vld [vmem:[#allocation245_spill] sm:$0xff] }
0x15ea   : > { %v8599_v16 = vpop.eup %8598 }
0x15eb   : > { %v3691_v55 = vpop.xlane.xlu0 %3690  ;;  %v8601_v59 = vpop.eup %8600  ;;  %v4134_v13 = vmul.f32 0.6931472, %v8599_v16 }
0x15ec   : > { %v3717_v9 = vsub.f32 %v2722_v4, %v3691_v55  ;;  %v8603_v58 = vpop.eup %8602  ;;  %v1086_v4 = vmul.f32 0.6931472, %v8595_v6  ;;  %v2667_v55 = vmul.f32 0.6931472, %v8597_v21  ;;  %v13675_v16 = vpop.xlane.xlu1 %2233 }
0x15ed   : > { %v8605_v2 = vpop.eup %8604  ;;  %v4136_v28 = vmul.f32 0.6931472, %v8603_v58  ;;  %15217 = vst [vmem:[#allocation277_spill] sm:$0xff] %v13675_v16 }
0x15ee   : > { %v3733_v41 = vadd.f32 %v3717_v9, %v2248_v53  ;;  %v15203_v53 = vld [vmem:[#allocation242_spill] sm:$0xff]  ;;  %v5607_v9 = vmul.f32 0.6931472, %v8601_v59  ;;  %v1116_v7 = vadd.f32 %v1086_v4, %v15206_v61  ;;  %v15218_v59 = vld [vmem:[#allocation249_spill] sm:$0xff] }
0x15ef   : > { %v13638_v38 = vpop.xlane.xlu0 %3693  ;;  %8610 = vlog2.f32 %v15203_v53  ;;  %v4166_v62 = vadd.f32 %v4136_v28, %v15212_v27  ;;  %v15219_v4 = vld [vmem:[#allocation217_spill] sm:$0xff]  ;;  %v15220_v53 = vld [vmem:[#allocation194_spill] sm:$0xff] }
0x15f0   : > { %v13641_v46 = vadd.f32 %v5186_v0, %v3733_v41  ;;  %v8607_v0 = vpop.eup %8606  ;;  %v5609_v41 = vmul.f32 0.6931472, %v8605_v2  ;;  %8612 = vlog2.f32 %v15204_v18  ;;  %v1132_v6 = vsub.f32 %v15206_v61, %v1116_v7  ;;  %v15224_v61 = vld [vmem:[#allocation151_spill] sm:$0xff] }
0x15f1   : > { %v8609_v45 = vpop.eup %8608  ;;  %8614 = vlog2.f32 %v15205_v39  ;;  %v15223_v39 = vld [vmem:[#allocation87_spill] sm:$0xff] }
0x15f2   : > { %8616 = vlog2.f32 %v15208_v14  ;;  %v5605_v8 = vmul.f32 0.6931472, %v8609_v45  ;;  %v5637_v50 = vadd.f32 %v5609_v41, %v15215_v43  ;;  %v15222_v45 = vld [vmem:[#allocation218_spill] sm:$0xff] }
0x15f3   : > { %v3697_v33 = vpop.xlane.xlu0 %3696  ;;  %v15225_v14 = vld [vmem:[#allocation278_spill] sm:$0xff] }
0x15f4   : > { %v3719_v32 = vsub.f32 %v2724_v48, %v3697_v33  ;;  %v2697_v48 = vadd.f32 %v2667_v55, %v15207_v40  ;;  %v5603_v33 = vmul.f32 0.6931472, %v8607_v0  ;;  %v4182_v0 = vsub.f32 %v15212_v27, %v4166_v62  ;;  %v15228_v62 = vld [vmem:[#allocation259_spill] sm:$0xff] }
0x15f5   : > { %v5635_v41 = vadd.f32 %v5605_v8, %v15222_v45  ;;  %v15229_v8 = vld [vmem:[#allocation88_spill] sm:$0xff] }
0x15f6   : > { %v3735_v10 = vadd.f32 %v3719_v32, %v2250_v15  ;;  %v15209_v15 = vld [vmem:[#allocation155_spill] sm:$0xff]  ;;  %v2713_v21 = vsub.f32 %v15207_v40, %v2697_v48  ;;  %v5634_v55 = vadd.f32 %v5603_v33, %v15219_v4  ;;  %v5653_v48 = vsub.f32 %v15215_v43, %v5637_v50  ;;  %v15226_v33 = vld [vmem:[#allocation210_spill] sm:$0xff] }
0x15f7   : > { %v13656_v23 = vpop.xlane.xlu0 %3699  ;;  %v4165_v20 = vadd.f32 %v4134_v13, %v15209_v15  ;;  %v15210_v32 = vld [vmem:[#allocation219_spill] sm:$0xff]  ;;  %v15221_v13 = vld [vmem:[#allocation253_spill] sm:$0xff] }
0x15f8   : > { %v13646_v24 = vadd.f32 %v5188_v52, %v3735_v10  ;;  %v5636_v52 = vadd.f32 %v5607_v9, %v15210_v32  ;;  %v15211_v10 = vld [vmem:[#allocation247_spill] sm:$0xff]  ;;  %v3708_v9 = vsub.f32 %v2713_v21, %v15221_v13  ;;  %v5650_v21 = vsub.f32 %v15219_v4, %v5634_v55  ;;  %v15231_v13 = vld [vmem:[#allocation172_spill] sm:$0xff] }
0x15f9   : > { %8618 = vlog2.f32 %v15211_v10  ;;  %v4181_v58 = vsub.f32 %v15209_v15, %v4165_v20  ;;  %v8611_v18 = vpop.eup %8610  ;;  %v2239_v15 = vsub.f32 %v1132_v6, %v15226_v33  ;;  %v15227_v20 = vld [vmem:[#allocation173_spill] sm:$0xff]  ;;  %v15230_v43 = vld [vmem:[#allocation123_spill] sm:$0xff]  ;;  %v5651_v6 = vsub.f32 %v15222_v45, %v5635_v41 }
0x15fa   : > { %15194 = vst [vmem:[#allocation112_spill] sm:$0xff] %v13646_v24  ;;  %8620 = vlog2.f32 %v15214_v34  ;;  %v5652_v2 = vsub.f32 %v15210_v32, %v5636_v52  ;;  %v5177_v32 = vsub.f32 %v4182_v0, %v15227_v20  ;;  %v13691_v52 = vld [vmem:[#allocation2] ss:$0 sm:$0xff]  ;;  %v8613_v27 = vpop.eup %8612  ;;  %v15233_v33 = vld [vmem:[#allocation109_spill] sm:$0xff] }
0x15fb   : > { %v13668_v57 = vpop.xlane.xlu0 %3702  ;;  %8622 = vlog2.f32 %v15216_v11  ;;  %v5176_v7 = vsub.f32 %v4181_v58, %v15224_v61  ;;  %v1100_v58 = vmul.f32 0.6931472, %v8611_v18  ;;  %v3724_v50 = vadd.f32 %v3708_v9, %v2239_v15  ;;  %v15234_v20 = vld [vmem:[#allocation141_spill] sm:$0xff] }
0x15fc   : > { %15213 = vst [vmem:[#allocation213_spill] sm:$0xff] %v13668_v57  ;;  %8624 = vlog2.f32 %v15218_v59  ;;  %v8615_v59 = vpop.eup %8614 }
0x15fd   : > { %8626 = vlog2.f32 %v15220_v53  ;;  %v8617_v53 = vpop.eup %8616  ;;  %v5192_v0 = vadd.f32 %v5176_v7, %v15231_v13  ;;  %v5193_v4 = vadd.f32 %v5177_v32, %v3724_v50  ;;  %v1102_v7 = vmul.f32 0.6931472, %v8615_v59  ;;  %v15238_v32 = vld [vmem:[#allocation203_spill] sm:$0xff] }
0x15fe   : > { %8628 = vlog2.f32 %v15223_v39  ;;  %v15232_v39 = vld [vmem:[#allocation47_spill] sm:$0xff] }
0x15ff   : > { %8630 = vlog2.f32 %v15225_v14 }
0x1600   : > { %8632 = vlog2.f32 %v15228_v62  ;;  %v1106_v62 = vmul.f32 0.6931472, %v8617_v53  ;;  %v15240_v53 = vld [vmem:[#allocation254_spill] sm:$0xff] }
0x1601   : > { %8634 = vlog2.f32 %v15230_v43 }
0x1602   : > { %8636 = vlog2.f32 %v15233_v33 }
0x161a   : > { %v6605_v28 = vpop.xlane.xlu0 %6604 }
0x161b   : > { %v6647_v40 = vsub.f32 %v5652_v2, %v6605_v28 }
0x161c   : > { %v6608_v10 = vpop.xlane.xlu1 %6607 }
0x161d   : > { %v6663_v34 = vadd.f32 %v6647_v40, %v15229_v8  ;;  %v6648_v11 = vsub.f32 %v5653_v48, %v6608_v10  ;;  %v8619_v40 = vpop.eup %8618  ;;  %v5615_v48 = vmul.f32 0.6931472, %v8613_v27  ;;  %v15235_v8 = vld [vmem:[#allocation276_spill] sm:$0xff] }
0x161e   : > { %v6599_v2 = vpop.xlane.xlu0 %6598  ;;  %v8621_v18 = vpop.eup %8620  ;;  %8638 = vlog2.f32 %v15235_v8  ;;  %v15246_v8 = vld [vmem:[#allocation38_spill] sm:$0xff] }
0x161f   : > { %v6830_v28 = vadd.f32 %v13691_v52, %v6663_v34  ;;  %v6664_v61 = vadd.f32 %v6648_v11, %v15232_v39  ;;  %v6645_v14 = vsub.f32 %v5650_v21, %v6599_v2  ;;  %v8623_v10 = vpop.eup %8622  ;;  %v15236_v34 = vld [vmem:[#allocation35_spill] sm:$0xff]  ;;  %v15237_v21 = vld [vmem:[#allocation46_spill] sm:$0xff]  ;;  %v15241_v39 = vld [vmem:[#allocation140_spill] sm:$0xff] }
0x1620   : > { %v6602_v55 = vpop.xlane.xlu1 %6601  ;;  %v13706_v11 = vadd.f32 %v1100_v58, %v15236_v34  ;;  %v8625_v27 = vpop.eup %8624  ;;  %8640 = vlog2.f32 %v15237_v21  ;;  %v13724_v21 = vadd.f32 %v1106_v62, %v15246_v8 }
0x1621   : > { %v6846_v9 = vsub.f32 %v6830_v28, %v15234_v20  ;;  %v6831_v15 = vadd.f32 %v13691_v52, %v6664_v61  ;;  %v6661_v45 = vadd.f32 %v6645_v14, %v5192_v0  ;;  %v6646_v41 = vsub.f32 %v5651_v6, %v6602_v55  ;;  %v8627_v13 = vpop.eup %8626  ;;  %v15239_v6 = vld [vmem:[#allocation89_spill] sm:$0xff]  ;;  %v15242_v14 = vld [vmem:[#allocation223_spill] sm:$0xff] }
0x1622   : > { %v1110_v28 = vmul.f32 0.6931472, %v8619_v40  ;;  %v5611_v0 = vmul.f32 0.6931472, %v8621_v18  ;;  %8642 = vlog2.f32 %v15239_v6  ;;  %v8629_v59 = vpop.eup %8628  ;;  %v5640_v33 = vadd.f32 %v5615_v48, %v15242_v14 }
0x1623   : > { %v6847_v43 = vsub.f32 %v6831_v15, %v15238_v32  ;;  %v6828_v50 = vadd.f32 %v13691_v52, %v6661_v45  ;;  %v6662_v2 = vadd.f32 %v6646_v41, %v5193_v4  ;;  %8644 = vlog2.f32 %v15240_v53  ;;  %v8631_v55 = vpop.eup %8630  ;;  %v15243_v15 = vld [vmem:[#allocation255_spill] sm:$0xff]  ;;  %v15244_v45 = vld [vmem:[#allocation36_spill] sm:$0xff] }
0x1624   : > { %v1112_v20 = vmul.f32 0.6931472, %v8623_v10  ;;  %8646 = vlog2.f32 %v15243_v15  ;;  %v13718_v4 = vadd.f32 %v1102_v7, %v15244_v45  ;;  %v8633_v18 = vpop.eup %8632  ;;  %v15245_v41 = vld [vmem:[#allocation111_spill] sm:$0xff]  ;;  %v1114_v6 = vmul.f32 0.6931472, %v8625_v27  ;;  %v15249_v53 = vld [vmem:[#allocation40_spill] sm:$0xff] }
0x1625   : > { %v6844_v61 = vsub.f32 %v6828_v50, %v15241_v39  ;;  %v6829_v58 = vadd.f32 %v13691_v52, %v6662_v2  ;;  %8648 = vlog2.f32 %v15245_v41  ;;  %v15247_v50 = vld [vmem:[#allocation142_spill] sm:$0xff]  ;;  %v8635_v48 = vpop.eup %8634  ;;  %v15248_v10 = vld [vmem:[#allocation15_spill] sm:$0xff]  ;;  %v13729_v39 = vadd.f32 %v1110_v28, %v15249_v53  ;;  %v15250_v7 = vld [vmem:[#allocation221_spill] sm:$0xff] }
0x1626   : > { %8650 = vlog2.f32 %v15248_v10  ;;  %v5638_v15 = vadd.f32 %v5611_v0, %v15250_v7  ;;  %v6862_v40 = vmul.f32 %v6846_v9, %v6846_v9  ;;  %v5656_v41 = vsub.f32 %v15242_v14, %v5640_v33  ;;  %v8637_v62 = vpop.eup %8636 }
0x1627   : > { %v6860_v32 = vmul.f32 %v6844_v61, %v6844_v61  ;;  %v6845_v2 = vsub.f32 %v6829_v58, %v15247_v50  ;;  %8652 = vlog2.f32 %v13405_v31  ;;  %v5613_v24 = vmul.f32 0.6931472, %v8627_v13  ;;  %v15251_v61 = vld [vmem:[#allocation41_spill] sm:$0xff] }
0x1628   : > { %8654 = vlog2.f32 %v13466_v35  ;;  %v13736_v58 = vadd.f32 %v1112_v20, %v15251_v61  ;;  %v6863_v50 = vmul.f32 %v6847_v43, %v6847_v43  ;;  %v8639_v31 = vpop.eup %8638  ;;  %v4148_v9 = vmul.f32 0.6931472, %v8629_v59 }
0x1629   : > { %v6861_v63 = vmul.f32 %v6845_v2, %v6845_v2  ;;  %v6877_v28 = vsel %vm6876_vm0, %v6860_v32, 0.0  ;;  %v2683_v2 = vmul.f32 0.6931472, %v8631_v55  ;;  %8656 = vlog2.f32 %v13488_v44 }
0x162a   : > { %15252 = vst [vmem:[#allocation153_spill] sm:$0xff] %v13736_v58  ;;  %v6617_v27 = vpop.xlane.xlu1 %6616  ;;  %v8641_v13 = vpop.eup %8640  ;;  %8658 = vlog2.f32 %v13497_v56  ;;  %v6880_v35 = vsel %vm6876_vm0, %v6862_v40, 0.0  ;;  %v5654_v43 = vsub.f32 %v15250_v7, %v5638_v15  ;;  %v5617_v32 = vmul.f32 0.6931472, %v8633_v18  ;;  %v15253_v56 = vld [vmem:[#allocation42_spill] sm:$0xff] }
0x162b   : > { %v6878_v0 = vsel %vm6876_vm0, %v6861_v63, 0.0  ;;  %v6651_v10 = vsub.f32 %v5656_v41, %v6617_v27  ;;  %v2681_v22 = vmul.f32 0.6931472, %v8635_v48  ;;  %8660 = vlog2.f32 %v13522_v3  ;;  %v15255_v7 = vld [vmem:[#allocation162_spill] sm:$0xff] }
0x162c   : > { %v6879_v14 = vadd.f32 %v6878_v0, %v6877_v28  ;;  %v8643_v20 = vpop.eup %8642  ;;  %v6882_v44 = vsel %vm6876_vm0, %v6863_v50, 0.0  ;;  %v13749_v28 = vadd.f32 %v1114_v6, %v15253_v56  ;;  %v4172_v18 = vadd.f32 %v4148_v9, %v15255_v7  ;;  %v15256_v15 = vld [vmem:[#allocation222_spill] sm:$0xff]  ;;  %v15268_v56 = vld [vmem:[#allocation104_spill] sm:$0xff] }
0x162d   : > { %v6667_v33 = vadd.f32 %v6651_v10, %v13602_v51  ;;  %v8645_v55 = vpop.eup %8644  ;;  %v13755_v3 = vadd.f32 %v5613_v24, %v15256_v15  ;;  %v15257_v10 = vld [vmem:[#allocation100_spill] sm:$0xff]  ;;  %v4152_v16 = vmul.f32 0.6931472, %v8639_v31  ;;  %8662 = vlog2.f32 %v13478_v25 }
0x162e   : > { %v6881_v63 = vadd.f32 %v6880_v35, %v6879_v14  ;;  %v6611_v59 = vpop.xlane.xlu0 %6610  ;;  %15254 = vst [vmem:[#allocation152_spill] sm:$0xff] %v13749_v28  ;;  %v8647_v40 = vpop.eup %8646  ;;  %v13760_v14 = vadd.f32 %v2683_v2, %v15257_v10  ;;  %v15258_v35 = vld [vmem:[#allocation81_spill] sm:$0xff]  ;;  %v4150_v2 = vmul.f32 0.6931472, %v8637_v62  ;;  %v4188_v37 = vsub.f32 %v15255_v7, %v4172_v18  ;;  %v15262_v31 = vld [vmem:[#allocation204_spill] sm:$0xff]  ;;  %v15263_v18 = vld [vmem:[#allocation163_spill] sm:$0xff] }
0x162f   : > { %v6834_v41 = vadd.f32 %v13691_v52, %v6667_v33  ;;  %v6649_v27 = vsub.f32 %v5654_v43, %v6611_v59  ;;  %v8649_v0 = vpop.eup %8648  ;;  %v15260_v59 = vld [vmem:[#allocation99_spill] sm:$0xff]  ;;  %v5655_v24 = vsub.f32 %v15256_v15, %v13755_v3  ;;  %v5623_v9 = vmul.f32 0.6931472, %v8647_v40  ;;  %v15265_v40 = vld [vmem:[#allocation102_spill] sm:$0xff] }
0x1630   : > { %v6883_v48 = vadd.f32 %v6882_v44, %v6881_v63  ;;  %v8651_v43 = vpop.eup %8650  ;;  %v13767_v51 = vadd.f32 %v2681_v22, %v15260_v59  ;;  %v15261_v63 = vld [vmem:[#allocation224_spill] sm:$0xff]  ;;  %v2687_v22 = vmul.f32 0.6931472, %v8643_v20  ;;  %v5183_v25 = vsub.f32 %v4188_v37, %v13617_v12 }
0x1631   : > { %v13763_v6 = vsub.f32 %v6834_v41, %v15258_v35  ;;  %v6665_v33 = vadd.f32 %v6649_v27, %v13410_v60  ;;  %v5641_v44 = vadd.f32 %v5617_v32, %v15261_v63  ;;  %v8653_v50 = vpop.eup %8652  ;;  %v5619_v35 = vmul.f32 0.6931472, %v8641_v13 }
0x1632   : > { %v8655_v27 = vpop.eup %8654  ;;  %v2691_v58 = vmul.f32 0.6931472, %v8651_v43  ;;  %v2720_v13 = vsub.f32 %v15260_v59, %v13767_v51  ;;  %v13788_v60 = vadd.f32 %v4150_v2, %v15263_v18  ;;  %8664 = vlog2.f32 %v13606_v42  ;;  %v15267_v2 = vld [vmem:[#allocation226_spill] sm:$0xff] }
0x1633   : > { %15259 = vst [vmem:[#allocation199_spill] sm:$0xff] %v13763_v6  ;;  %v6832_v41 = vadd.f32 %v13691_v52, %v6665_v33  ;;  %v5621_v6 = vmul.f32 0.6931472, %v8645_v55  ;;  %v8657_v33 = vpop.eup %8656  ;;  %v5657_v20 = vsub.f32 %v15261_v63, %v5641_v44  ;;  %v15264_v55 = vld [vmem:[#allocation164_spill] sm:$0xff]  ;;  %v2707_v43 = vadd.f32 %v2687_v22, %v15265_v40 }
0x1634   : > { %v8659_v7 = vpop.eup %8658  ;;  %v13791_v15 = vadd.f32 %v4152_v16, %v15264_v55  ;;  %v5625_v59 = vmul.f32 0.6931472, %v8653_v50  ;;  %v2693_v63 = vmul.f32 0.6931472, %v8655_v27  ;;  %v4160_v16 = vmul.f32 0.6931472, %v8657_v33 }
0x1635   : > { %v6848_v32 = vsub.f32 %v6832_v41, %v15262_v31  ;;  %v8661_v62 = vpop.eup %8660  ;;  %v4156_v41 = vmul.f32 0.6931472, %v8649_v0  ;;  %v15266_v31 = vld [vmem:[#allocation225_spill] sm:$0xff]  ;;  %v13801_v28 = vadd.f32 %v5621_v6, %v15267_v2  ;;  %v2709_v12 = vadd.f32 %v2691_v58, %v15268_v56  ;;  %v15270_v27 = vld [vmem:[#allocation166_spill] sm:$0xff] }
0x1636   : > { %v13797_v51 = vadd.f32 %v5619_v35, %v15266_v31  ;;  %v4162_v61 = vmul.f32 0.6931472, %v8659_v7  ;;  %v2695_v22 = vmul.f32 0.6931472, %v8661_v62  ;;  %v5199_v35 = vadd.f32 %v5183_v25, %v13594_v29  ;;  %v15272_v62 = vld [vmem:[#allocation228_spill] sm:$0xff] }
0x1637   : > { %v6864_v3 = vmul.f32 %v6848_v32, %v6848_v32  ;;  %v15269_v32 = vld [vmem:[#allocation227_spill] sm:$0xff]  ;;  %v4189_v50 = vsub.f32 %v15263_v18, %v13788_v60  ;;  %v4190_v6 = vsub.f32 %v15264_v55, %v13791_v15  ;;  %v4176_v33 = vadd.f32 %v4156_v41, %v15270_v27  ;;  %v15273_v60 = vld [vmem:[#allocation168_spill] sm:$0xff]  ;;  %v8663_v25 = vpop.eup %8662 }
0x1638   : > { %v5644_v42 = vadd.f32 %v5623_v9, %v15269_v32  ;;  %v5658_v58 = vsub.f32 %v15266_v31, %v13797_v51  ;;  %v2725_v29 = vsub.f32 %v15268_v56, %v2709_v12  ;;  %v4178_v18 = vadd.f32 %v4160_v16, %v15273_v60  ;;  %v15275_v31 = vld [vmem:[#allocation106_spill] sm:$0xff]  ;;  %v15276_v51 = vld [vmem:[#allocation169_spill] sm:$0xff] }
0x1639   : > { %v6884_v44 = vsel %vm6876_vm0, %v6864_v3, 0.0  ;;  %v15271_v3 = vld [vmem:[#allocation105_spill] sm:$0xff]  ;;  %v5659_v15 = vsub.f32 %v15267_v2, %v13801_v28  ;;  %v15274_v41 = vsub.f32 %v15236_v34, %v13706_v11  ;;  %v13833_v56 = vadd.f32 %v2695_v22, %v15275_v31 }
0x163a   : > { %v13804_v37 = vadd.f32 %v6884_v44, %v6883_v48  ;;  %v6620_v0 = vpop.xlane.xlu0 %6619  ;;  %v2723_v48 = vsub.f32 %v15265_v40, %v2707_v43  ;;  %v2710_v9 = vadd.f32 %v2693_v63, %v15271_v3  ;;  %v13818_v44 = vadd.f32 %v5625_v59, %v15272_v62 }
0x163b   : > { %v6652_v57 = vsub.f32 %v5657_v20, %v6620_v0  ;;  %v5660_v55 = vsub.f32 %v15269_v32, %v5644_v42  ;;  %v4179_v59 = vadd.f32 %v4162_v61, %v15276_v51  ;;  %v4192_v63 = vsub.f32 %v15270_v27, %v4176_v33 }
0x163c   : > { %8666 = vlog2.f32 %v13621_v47  ;;  %v3720_v16 = vsub.f32 %v2725_v29, %v13656_v23  ;;  %v3715_v0 = vsub.f32 %v2720_v13, %v13570_v30  ;;  %v2726_v34 = vsub.f32 %v15271_v3, %v2710_v9  ;;  %v8665_v42 = vpop.eup %8664 }
0x163d   : > { %v6668_v7 = vadd.f32 %v6652_v57, %v5199_v35  ;;  %v2246_v57 = vsub.f32 %v15274_v41, %v13609_v1  ;;  %v15277_v1 = vld [vmem:[#allocation145_spill] sm:$0xff]  ;;  %v5661_v32 = vsub.f32 %v15272_v62, %v13818_v44  ;;  %v13844_v22 = vmul.f32 0.6931472, %v8663_v25 }
0x163e   : > { %v13821_v20 = vpop.xlane.xlu0 %3705  ;;  %v6614_v43 = vpop.xlane.xlu1 %6613  ;;  %v15278_v61 = vsub.f32 %v15249_v53, %v13729_v39  ;;  %v3718_v13 = vsub.f32 %v2723_v48, %v13638_v38  ;;  %v2727_v35 = vsub.f32 %v15275_v31, %v13833_v56  ;;  %v4195_v3 = vsub.f32 %v15276_v51, %v4179_v59  ;;  %v15286_v56 = vld [vmem:[#allocation277_spill] sm:$0xff]  ;;  %v15290_v59 = vld [vmem:[#allocation170_spill] sm:$0xff] }
0x163f   : > { %v6835_v40 = vadd.f32 %v13691_v52, %v6668_v7  ;;  %v6650_v12 = vsub.f32 %v5655_v24, %v6614_v43  ;;  %v4194_v24 = vsub.f32 %v15273_v60, %v4178_v18  ;;  %v3731_v30 = vadd.f32 %v3715_v0, %v2246_v57  ;;  %v15282_v18 = vld [vmem:[#allocation77_spill] sm:$0xff] }
0x1640   : > { %v2251_v47 = vsub.f32 %v15278_v61, %v13634_v17  ;;  %v5184_v17 = vsub.f32 %v4189_v50, %v13583_v19  ;;  %v4164_v38 = vmul.f32 0.6931472, %v8665_v42  ;;  %v15280_v48 = vsub.f32 %v15257_v10, %v13760_v14  ;;  %v15288_v51 = vld [vmem:[#allocation153_spill] sm:$0xff] }
0x1641   : > { %v6851_v11 = vsub.f32 %v6835_v40, %v15277_v1  ;;  %v6666_v23 = vadd.f32 %v6650_v12, %v13509_v5  ;;  %v15279_v5 = vsub.f32 %v15246_v8, %v13724_v21  ;;  %v15281_v29 = vsub.f32 %v15244_v45, %v13718_v4  ;;  %v15283_v21 = vld [vmem:[#allocation213_spill] sm:$0xff]  ;;  %v15285_v4 = vld [vmem:[#allocation175_spill] sm:$0xff] }
0x1642   : > { %v5169_v27 = vpop.xlane.xlu1 %5168  ;;  %v6629_v33 = vpop.xlane.xlu0 %6628  ;;  %v3736_v9 = vadd.f32 %v3720_v16, %v2251_v47  ;;  %v3716_v44 = vsub.f32 %v15280_v48, %v13628_v54  ;;  %v5185_v8 = vsub.f32 %v4190_v6, %v13592_v36  ;;  %v3721_v50 = vsub.f32 %v2726_v34, %v15283_v21  ;;  %v15284_v54 = vld [vmem:[#allocation199_spill] sm:$0xff] }
0x1643   : > { %v6833_v7 = vadd.f32 %v13691_v52, %v6666_v23  ;;  %v5189_v62 = vsub.f32 %v4194_v24, %v5169_v27  ;;  %v6655_v53 = vsub.f32 %v5660_v55, %v6629_v33  ;;  %v2249_v39 = vsub.f32 %v15279_v5, %v13599_v26  ;;  %v15291_v1 = vld [vmem:[#allocation43_spill] sm:$0xff]  ;;  %v15292_v23 = vld [vmem:[#allocation42_spill] sm:$0xff] }
0x1644   : > { %v2247_v60 = vsub.f32 %v15281_v29, %v13576_v49  ;;  %v5200_v57 = vadd.f32 %v5184_v17, %v3731_v30  ;;  %v6866_v14 = vmul.f32 %v15284_v54, %v15284_v54  ;;  %v5187_v43 = vsub.f32 %v4192_v63, %v15285_v4  ;;  %v15293_v63 = vld [vmem:[#allocation152_spill] sm:$0xff] }
0x1645   : > { %v6849_v55 = vsub.f32 %v6833_v7, %v15282_v18  ;;  %v13871_v25 = vadd.f32 %v5189_v62, %v3736_v9  ;;  %v6671_v19 = vadd.f32 %v6655_v53, %v13641_v46  ;;  %v3734_v26 = vadd.f32 %v3718_v13, %v2249_v39  ;;  %v15287_v46 = vld [vmem:[#allocation41_spill] sm:$0xff]  ;;  %v15298_v54 = vld [vmem:[#allocation84_spill] sm:$0xff] }
0x1646   : > { %v2237_v41 = vpop.xlane.xlu1 %2236  ;;  %v6623_v10 = vpop.xlane.xlu0 %6622  ;;  %v3732_v31 = vadd.f32 %v3716_v44, %v2247_v60  ;;  %v15289_v36 = vsub.f32 %v15287_v46, %v15288_v51  ;;  %v4180_v16 = vadd.f32 %v4164_v38, %v15290_v59  ;;  %v6867_v0 = vmul.f32 %v6851_v11, %v6851_v11  ;;  %v15295_v38 = vld [vmem:[#allocation149_spill] sm:$0xff] }
0x1647   : > { %v6865_v40 = vmul.f32 %v6849_v55, %v6849_v55  ;;  %v6838_v49 = vadd.f32 %v13691_v52, %v6671_v19  ;;  %v6653_v45 = vsub.f32 %v5658_v58, %v6623_v10  ;;  %v8667_v12 = vpop.eup %8666  ;;  %v15294_v24 = vsub.f32 %v15292_v23, %v15293_v63  ;;  %v15303_v63 = vld [vmem:[#allocation108_spill] sm:$0xff] }
0x1648   : > { %v2252_v6 = vsub.f32 %v15289_v36, %v15286_v56  ;;  %v5203_v27 = vadd.f32 %v5187_v43, %v3734_v26  ;;  %v6888_v9 = vsel %vm6876_vm0, %v6866_v14, 0.0  ;;  %v5633_v53 = vmul.f32 0.6931472, %v8667_v12  ;;  %v15299_v43 = vld [vmem:[#allocation209_spill] sm:$0xff]  ;;  %v15301_v12 = vld [vmem:[#allocation112_spill] sm:$0xff] }
0x1649   : > { %v6886_v34 = vsel %vm6876_vm0, %v6865_v40, 0.0  ;;  %v6854_v42 = vsub.f32 %v6838_v49, %v15291_v1  ;;  %v6669_v61 = vadd.f32 %v6653_v45, %v5200_v57  ;;  %v2253_v30 = vsub.f32 %v15294_v24, %v2237_v41  ;;  %v15297_v41 = vld [vmem:[#allocation229_spill] sm:$0xff] }
0x164a   : > { %v3737_v47 = vadd.f32 %v3721_v50, %v2252_v6  ;;  %v6887_v58 = vadd.f32 %v6886_v34, %v13804_v37  ;;  %v5172_v13 = vpop.xlane.xlu1 %5171  ;;  %v6632_v33 = vpop.xlane.xlu0 %6631  ;;  %v3722_v5 = vsub.f32 %v2727_v35, %v13821_v20  ;;  %v4196_v39 = vsub.f32 %v15290_v59, %v4180_v16  ;;  %v15296_v35 = vld [vmem:[#allocation232_spill] sm:$0xff] }
0x164b   : > { %v6836_v7 = vadd.f32 %v13691_v52, %v6669_v61  ;;  %v5190_v11 = vsub.f32 %v4195_v3, %v5172_v13  ;;  %v6656_v62 = vsub.f32 %v5661_v32, %v6632_v33  ;;  %v6890_v37 = vsel %vm6876_vm0, %v6867_v0, 0.0  ;;  %v15302_v34 = vld [vmem:[#allocation48_spill] sm:$0xff] }
0x164c   : > { %v6889_v17 = vadd.f32 %v6888_v9, %v6887_v58  ;;  %v3738_v60 = vadd.f32 %v3722_v5, %v2253_v30  ;;  %v5201_v19 = vadd.f32 %v5185_v8, %v3732_v31  ;;  %v5649_v50 = vadd.f32 %v5633_v53, %v15296_v35  ;;  %v15304_v30 = vld [vmem:[#allocation86_spill] sm:$0xff] }
0x164d   : > { %v6852_v48 = vsub.f32 %v6836_v7, %v15295_v38  ;;  %v5206_v44 = vadd.f32 %v5190_v11, %v3737_v47  ;;  %v6672_v29 = vadd.f32 %v6656_v62, %v5203_v27  ;;  %v5646_v57 = vadd.f32 %v13844_v22, %v15297_v41  ;;  %v15305_v5 = vld [vmem:[#allocation230_spill] sm:$0xff]  ;;  %v15306_v38 = vld [vmem:[#allocation231_spill] sm:$0xff] }
0x164e   : > { %v6891_v18 = vadd.f32 %v6890_v37, %v6889_v17  ;;  %v5175_v55 = vpop.xlane.xlu1 %5174  ;;  %v6626_v26 = vpop.xlane.xlu0 %6625  ;;  %v5665_v4 = vsub.f32 %v15296_v35, %v5649_v50  ;;  %v6870_v46 = vmul.f32 %v6854_v42, %v6854_v42 }
0x164f   : > { %v6868_v21 = vmul.f32 %v6852_v48, %v6852_v48  ;;  %v6839_v32 = vadd.f32 %v13691_v52, %v6672_v29  ;;  %v5191_v3 = vsub.f32 %v4196_v39, %v5175_v55  ;;  %v6654_v20 = vsub.f32 %v5659_v15, %v6626_v26  ;;  %v15300_v15 = vld [vmem:[#allocation174_spill] sm:$0xff] }
0x1650   : > { %v5662_v2 = vsub.f32 %v15297_v41, %v5646_v57  ;;  %8668 = vlog2.f32 %v15300_v15  ;;  %v6896_v47 = vsel %vm6876_vm0, %v6870_v46, 0.0  ;;  %v15308_v41 = vld [vmem:[#allocation124_spill] sm:$0xff]  ;;  %v15309_v15 = vlaneseq }
0x1651   : > { %v6892_v10 = vsel %vm6876_vm0, %v6868_v21, 0.0  ;;  %v6855_v14 = vsub.f32 %v6839_v32, %v15298_v54  ;;  %v5207_v40 = vadd.f32 %v5191_v3, %v3738_v60  ;;  %v6670_v8 = vadd.f32 %v6654_v20, %v5201_v19  ;;  %v15307_v32 = vld [vmem:[#allocation107_spill] sm:$0xff] }
0x1652   : > { %v6893_v49 = vadd.f32 %v6892_v10, %v6891_v18  ;;  %8670 = vlog2.f32 %v15302_v34 }
0x1653   : > { %v6837_v45 = vadd.f32 %v13691_v52, %v6670_v8  ;;  %v6871_v59 = vmul.f32 %v6855_v14, %v6855_v14 }
0x1655   : > { %v6853_v31 = vsub.f32 %v6837_v45, %v15299_v43  ;;  %v6898_v24 = vsel %vm6876_vm0, %v6871_v59, 0.0 }
0x1656   : > { %v6644_v28 = vpop.xlane.xlu1 %6643 }
0x1657   : > { %v6660_v56 = vsub.f32 %v5665_v4, %v6644_v28  ;;  %v6635_v22 = vpop.xlane.xlu0 %6634  ;;  %v6869_v51 = vmul.f32 %v6853_v31, %v6853_v31 }
0x1658   : > { %v6657_v36 = vsub.f32 %v5662_v2, %v6635_v22  ;;  %v15310_v22 = vld [vmem:[#allocation26_spill] sm:$0xff] }
0x1659   : > { %v6676_v6 = vadd.f32 %v6660_v56, %v5207_v40  ;;  %v6894_v16 = vsel %vm6876_vm0, %v6869_v51, 0.0  ;;  %v6918_v56 = vshrl.u32 %v15309_v15, 7  ;;  %vm6920_vm7 = vcmp.eq.s32.totalorder %v15310_v22, 0 }
0x165a   : > { %v6673_v0 = vadd.f32 %v6657_v36, %v15301_v12  ;;  %v6895_v1 = vadd.f32 %v6894_v16, %v6893_v49  ;;  %v8669_v9 = vpop.eup %8668 }
0x165b   : > { %v6843_v61 = vadd.f32 %v13691_v52, %v6676_v6  ;;  %v5629_v62 = vmul.f32 0.6931472, %v8669_v9  ;;  %vm6919_vm6 = vcmp.eq.s32.totalorder %v6918_v56, 0 }
0x165c   : > { %v6840_v58 = vadd.f32 %v13691_v52, %v6673_v0  ;;  %v6897_v23 = vadd.f32 %v6896_v47, %v6895_v1  ;;  %v8671_v53 = vpop.eup %8670  ;;  %vm6921_vm8 = vmand %vm6919_vm6, %vm6920_vm7 }
0x165d   : > { %v6859_v42 = vsub.f32 %v6843_v61, %v15303_v63  ;;  %v5631_v17 = vmul.f32 0.6931472, %v8671_v53  ;;  %v5647_v39 = vadd.f32 %v5629_v62, %v15305_v5 }
0x165e   : > { %v6856_v13 = vsub.f32 %v6840_v58, %v15304_v30  ;;  %v6899_v27 = vadd.f32 %v6898_v24, %v6897_v23 }
0x165f   : > { %v5663_v37 = vsub.f32 %v15305_v5, %v5647_v39  ;;  %v5648_v48 = vadd.f32 %v5631_v17, %v15306_v38 }
0x1660   : > { %v6872_v33 = vmul.f32 %v6856_v13, %v6856_v13 }
0x1661   : > { %v5664_v55 = vsub.f32 %v15306_v38, %v5648_v48 }
0x1662   : > { %v6900_v7 = vsel %vm6876_vm0, %v6872_v33, 0.0 }
0x1663   : > { %v6901_v11 = vadd.f32 %v6900_v7, %v6899_v27 }
0x166d   : > { %v6638_v29 = vpop.xlane.xlu0 %6637 }
0x166e   : > { %v6658_v60 = vsub.f32 %v5663_v37, %v6638_v29 }
0x1670   : > { %v6674_v18 = vadd.f32 %v6658_v60, %v13871_v25  ;;  %v6875_v25 = vmul.f32 %v6859_v42, %v6859_v42 }
0x1671   : > { %v6641_v19 = vpop.xlane.xlu0 %6640 }
0x1672   : > { %v6841_v26 = vadd.f32 %v13691_v52, %v6674_v18  ;;  %v6659_v21 = vsub.f32 %v5664_v55, %v6641_v19  ;;  %v6906_v49 = vsel %vm6876_vm0, %v6875_v25, 0.0 }
0x1674   : > { %v6857_v3 = vsub.f32 %v6841_v26, %v15307_v32  ;;  %v6675_v20 = vadd.f32 %v6659_v21, %v5206_v44 }
0x1676   : > { %v6873_v35 = vmul.f32 %v6857_v3, %v6857_v3  ;;  %v6842_v50 = vadd.f32 %v13691_v52, %v6675_v20 }
0x1678   : > { %v6858_v57 = vsub.f32 %v6842_v50, %v15308_v41  ;;  %v6902_v10 = vsel %vm6876_vm0, %v6873_v35, 0.0 }
0x1679   : > { %v6903_v54 = vadd.f32 %v6902_v10, %v6901_v11 }
0x167a   : > { %v6874_v14 = vmul.f32 %v6858_v57, %v6858_v57 }
0x167c   : > { %v6904_v40 = vsel %vm6876_vm0, %v6874_v14, 0.0 }
0x167d   : > { %v6905_v8 = vadd.f32 %v6904_v40, %v6903_v54 }
0x167f   : > { %v6907_v45 = vadd.f32 %v6906_v49, %v6905_v8 }
0x1681   : > { %6908 = vadd.xlane.f32.xlu0 %v6907_v45 }
0x170e   : > { %v6909_v44 = vpop.xlane.xlu0 %6908 }
0x170f   : > { %v6910_v4 = vrot.slane %v6909_v44, 4 }
0x1711   : > { %v6911_v43 = vadd.f32 %v6910_v4, %v6909_v44 }
0x1713   : > { %v6912_v52 = vrot.slane %v6911_v43, 2 }
0x1715   : > { %v6913_v31 = vadd.f32 %v6912_v52, %v6911_v43 }
0x1717   : > { %v6914_v28 = vrot.slane %v6913_v31, 1 }
0x1719   : > { %v6915_v2 = vadd.f32 %v6914_v28, %v6913_v31 }
0x171b   : > { %7924 = vpush %v6915_v2 }
0x174c   : > { %s7925_s29 = spop %7924 }
0x174d   : > { %v6922_v46 = vstv %s7925_s29 }
0x174e   : > { %v6923_v51 = vsel %vm6921_vm8, %v6922_v46, 0.0 }
0x174f   : > { %6924 = vst [vmem:[%s433_s25] sm:$0xff] %v6923_v51 }
0x1750   : > { %8846 = shalt.err (!%p8843_p1)
}
0x1751   : > { %s8847_s27 = scalar_lea.hbm %s13940_s21, 128  ;;  %s8851_s29 = scalar_lea.hbm %s13995_s12, 512 }
0x1752   : > { %p8848_p3 = scmp.ne.s32.totalorder %s13940_s21, %s8847_s27  ;;  %p8852_p0 = scmp.lt.u32.totalorder %s13940_s21, %s13995_s12 }
0x1753   : > { %p8853_p2 = scmp.lt.u32.totalorder %s8851_s29, %s8847_s27  ;;  %p8855_p6 = scmp.lt.u32.totalorder %s8847_s27, %s13940_s21 }
0x1754   : > { %p8849_p4 = pnand %p8848_p3, %p15311_p10 }
0x1755   : > { %p8854_p7 = por %p8853_p2, %p8852_p0 }
0x1756   : > { %p8850_p5 = pneg %p8849_p4 }
0x1757   : > { %p8856_p11 = por %p8855_p6, %p8854_p7 }
0x1759   : > { %p8857_p12 = pnand %p8856_p11, %p8850_p5 }
0x175b   : > { %8860 = shalt.err (!%p8857_p12)
}
0x175c   : > { %7928 = dma.vmem_to_hbm [thread:$0]  (%p15311_p10), %s13942_s13, 128, %s13940_s21, %s6926_s14  }
0x175d PF: > { %p7939_p8 = scmp.ge.s32.totalorder %s8899_s26, 2  ;;  %s6951_s20 = sand.u32 1, %s8887_s23  }
0x175e   : > { %p15312_p9 = scmp.ne.s32.totalorder %s14364_s17, 0  ;;  %s6952_s11 = scalar_lea.sflag [#allocation5], %s6951_s20 }
0x1760   : > { %p7935_p13 = pnand %p7939_p8, %p15312_p9 }
0x1762   : > { %8882 = dma.done.wait (!%p7935_p13), %s6952_s11, 128  }
0x1763   : > { %8884 = vsyncadd (!%p7935_p13), %s6952_s11, 4294967168  ;;  %s15313_s15 = sld [smem:[#allocation9_spill]]  ;;  %s15314_s25 = sld [smem:[#allocation10_spill]] }
0x1764   : > { %p27_p1 = scmp.ge.s32.totalorder %s9000_s28, 6   ;;  %s15315_s23 = smov %s8891_s24 }
0x1765   : > { %s15317_s26 = smov %s9000_s28 }
0x1766   :  { %29 = sbr.rel (!%p27_p1) target bundleno = 8 (0x8), region = 113 }
0x1769   : > { %s15316_s24 = smov %s15313_s15 }
0x176d   :  { %6957 = vsyncpa [#allocation4], 1 }
0x176e   :  { %6959 = vsyncpa [#allocation4 + $0x1], 1 }
0x176f   :  { %6960 = vsyncpa [#allocation5], 1 }
0x1770   :  { %6962 = vsyncpa [#allocation5 + $0x1], 1 }

</bundles_post_ra>
